<compile_context>
chip_gen: v7x
topology: tpu7x:2x2x1
jax: 0.10.0
libtpu: 0.0.40
codegen_flags: <defaults>
</compile_context>

<pallas_src>
import math
import functools

import jax
import jax.numpy as jnp
from jax.experimental import pallas as pl
from jax.experimental.pallas import tpu as pltpu


def _make_mlp_sine_kernel(num_layers, d_in, d_out):
    """Builds the per-tile kernel for a `num_layers`-deep sine MLP.

    Feature-major ("channels-first") layout: the big N axis sits on the
    128-lane dimension so sin/bias are lane-dense and the d_out-row store is a
    full-width vst.
      x_ref            : [d_in,  tile_n]
      layer 0          : W [hidden, d_in]   (w0 folded), b [hidden, 1]
      layers 1..L-2    : W [hidden, hidden] (w0 folded), b [hidden, 1]
      layer L-1        : W^T [hidden, d_out],            b [d_out, 1]
      o_ref            : [d_out, tile_n]
    """

    def kernel(*refs):
        x_ref = refs[0]
        o_ref = refs[-1]
        layer_refs = refs[1:-1]

        # ---- layer 0: K = d_in is tiny -> broadcast VPU FMAs, no MXU pass.
        w_ref, b_ref = layer_refs[0], layer_refs[1]
        h = b_ref[...]                                        # [hidden, 1]
        for j in range(d_in):
            h = h + w_ref[:, j:j + 1] * x_ref[j:j + 1, :]     # -> [hidden, tile_n]
        h = jnp.sin(h)                                        # lane-dense EUP work

        # ---- hidden layers: MXU matmul, result stays feature-major so the
        # sin/bias vregs stay lane-dense.  See module docstring for why the
        # weight is intentionally left as the streamed (LHS) operand here.
        for li in range(1, num_layers - 1):
            w_ref, b_ref = layer_refs[2 * li], layer_refs[2 * li + 1]
            h = jnp.sin(
                jnp.dot(w_ref[...], h, preferred_element_type=jnp.float32)
                + b_ref[...])

        # ---- final linear: M = d_out is tiny -> VPU multiply + XLU sublane
        # reduce instead of a 1-row MXU pass.  W is pre-transposed [hidden, d_out].
        wt_ref = layer_refs[2 * (num_layers - 1)]
        bl_ref = layer_refs[2 * (num_layers - 1) + 1]
        rows = [jnp.sum(wt_ref[:, j:j + 1] * h, axis=0, keepdims=True)
                for j in range(d_out)]
        out = rows[0] if d_out == 1 else jnp.concatenate(rows, axis=0)
        o_ref[...] = (out + bl_ref[...]).astype(o_ref.dtype)  # [d_out, tile_n]

    return kernel


def prepare_coordinate_net_params(params, w0):
    """One-time transform of torch-layout params for the kernel.

    - Folds w0 into every activated layer: sin(w0*(W h + b)) == sin((w0 W) h + (w0 b)).
    - Biases become column vectors [fan_out, 1].
    - The final (outermost linear) weight is pre-transposed to [hidden, d_out]
      and left unscaled.
    """
    n_layers = len(params)
    w0_f32 = jnp.float32(w0)
    prepared = []
    for li, (W, b) in enumerate(params):
        W = jnp.asarray(W, jnp.float32)
        b = jnp.asarray(b, jnp.float32)
        if li < n_layers - 1:
            prepared.append((W * w0_f32, (b * w0_f32).reshape(-1, 1)))
        else:
            prepared.append((W.T, b.reshape(-1, 1)))
    return tuple(prepared)


def _choose_tile_n(n):
    """Largest tile (amortizes ~0.35us/step + weight latches) that still leaves
    >= 4 'parallel' grid steps so both v7x TensorCores get work.  Per-tile
    working set stays ~2 MiB even at 8192, far below VMEM on v5e/v6e/v7x."""
    for cand in (8192, 4096, 2048, 1024, 512, 256):
        if pl.cdiv(n, cand) >= 4:
            return cand
    return 256


@functools.partial(jax.jit, static_argnames=("tile_n",))
def coordinate_net_forward(coords, prepared_params, *, tile_n=None):
    """coords: [N, d_in] float32.
    prepared_params: output of prepare_coordinate_net_params (w0 already folded)."""
    n, d_in = coords.shape
    num_layers = len(prepared_params)
    d_out = prepared_params[-1][0].shape[1]

    if tile_n is None:
        tile_n = _choose_tile_n(n)
    n_blocks = pl.cdiv(n, tile_n)
    n_pad = n_blocks * tile_n

    # Feature-major layout + pad N up to a multiple of tile_n (all fused under jit).
    x_t = coords.T                                   # [d_in, n]
    if n_pad != n:
        x_t = jnp.pad(x_t, ((0, 0), (0, n_pad - n)))

    flat_params = []
    in_specs = [pl.BlockSpec((d_in, tile_n), lambda i: (0, i))]
    for (W, b) in prepared_params:
        flat_params.extend([W, b])
        # Constant block index -> fetched once, stays resident in VMEM.
        in_specs.append(pl.BlockSpec(W.shape, lambda i: (0, 0)))
        in_specs.append(pl.BlockSpec(b.shape, lambda i: (0, 0)))

    kernel = _make_mlp_sine_kernel(num_layers, d_in, d_out)

    out_t = pl.pallas_call(
        kernel,
        out_shape=jax.ShapeDtypeStruct((d_out, n_pad), jnp.float32),
        grid_spec=pltpu.PrefetchScalarGridSpec(
            num_scalar_prefetch=0,
            grid=(n_blocks,),
            in_specs=in_specs,
            out_specs=pl.BlockSpec((d_out, tile_n), lambda i: (0, i)),
        ),
        compiler_params=pltpu.CompilerParams(
            dimension_semantics=("parallel",)),
    )(x_t, *flat_params)

    # Back to the module's [N, d_out] layout (tiny transpose, fused under jit).
    return out_t[:, :n].T


def init_coordinate_net_params(key, in_features, hidden_features,
                               num_hidden_layers, out_features, w0):
    """Deterministic init mirroring FCBlock's sine init.

    Weights are stored in the torch nn.Linear layout [fan_out, fan_in]."""
    dims = [in_features] + [hidden_features] * (num_hidden_layers + 1) + [out_features]
    params = []
    for li in range(len(dims) - 1):
        fan_in, fan_out = dims[li], dims[li + 1]
        key, kw, kb = jax.random.split(key, 3)
        if li == 0:
            # first_layer_sine_init: U(-1/fan_in, 1/fan_in)
            bound = 1.0 / fan_in
        else:
            # sine_init: U(-sqrt(6/fan_in)/w0, sqrt(6/fan_in)/w0)
            bound = math.sqrt(6.0 / fan_in) / w0
        W = jax.random.uniform(kw, (fan_out, fan_in), jnp.float32, -bound, bound)
        # torch.nn.Linear default bias init: U(-1/sqrt(fan_in), 1/sqrt(fan_in))
        b_bound = 1.0 / math.sqrt(fan_in)
        b = jax.random.uniform(kb, (fan_out,), jnp.float32, -b_bound, b_bound)
        params.append((W, b))
    return params


def coordinate_net_reference(coords, params, w0):
    """Pure-JAX reference of the same forward pass (unfolded w0)."""
    h = coords
    for li, (W, b) in enumerate(params):
        h = h @ W.T + b
        if li < len(params) - 1:
            h = jnp.sin(w0 * h)
    return h


if __name__ == "__main__":
    # Small CoordinateNet: in_features=2, hidden=32, num_hidden_layers=3, out_features=1.
    IN_FEATURES = 2
    HIDDEN = 32
    NUM_HIDDEN_LAYERS = 3
    OUT_FEATURES = 1
    W0 = 30.0
    N = 2000       # number of coordinate samples (NOT a multiple of tile_n)

    key = jax.random.PRNGKey(0)
    k_coords, k_params = jax.random.split(key)
    coords = jax.random.uniform(k_coords, (N, IN_FEATURES), jnp.float32, -1.0, 1.0)

    params = init_coordinate_net_params(
        k_params, IN_FEATURES, HIDDEN, NUM_HIDDEN_LAYERS, OUT_FEATURES, W0)
    prepared = prepare_coordinate_net_params(params, W0)   # one-time w0 fold / layout

    # model_input = {'coords': coords}; output dict mirrors the torch module.
    out = coordinate_net_forward(coords, prepared)          # tile_n auto -> 512, grid=(4,)
    out = jax.block_until_ready(out)
    model_output = {"model_in": {"coords": coords}, "model_out": {"output": out}}

    # Sanity-check against a pure-JAX reference (w0 folding + FMA/reduce layers
    # shift fp rounding slightly, so allow a modest tolerance).
    ref = coordinate_net_reference(coords, params, W0)
    assert out.shape == (N, OUT_FEATURES)
    assert jnp.allclose(out, ref, atol=2e-4, rtol=2e-4), \
        f"max abs err = {jnp.max(jnp.abs(out - ref))}"

    print("KERNEL_OK")
</pallas_src>

<mosaic_0001>
module attributes {stable_mosaic.version = 11 : i64} {
  func.func @kernel(%arg0: i32, %arg1: memref<2x512xf32, #tpu.memory_space<vmem>>, %arg2: memref<32x2xf32, #tpu.memory_space<vmem>>, %arg3: memref<32x1xf32, #tpu.memory_space<vmem>>, %arg4: memref<32x32xf32, #tpu.memory_space<vmem>>, %arg5: memref<32x1xf32, #tpu.memory_space<vmem>>, %arg6: memref<32x32xf32, #tpu.memory_space<vmem>>, %arg7: memref<32x1xf32, #tpu.memory_space<vmem>>, %arg8: memref<32x32xf32, #tpu.memory_space<vmem>>, %arg9: memref<32x1xf32, #tpu.memory_space<vmem>>, %arg10: memref<32x1xf32, #tpu.memory_space<vmem>>, %arg11: memref<1x1xf32, #tpu.memory_space<vmem>>, %arg12: memref<1x512xf32, #tpu.memory_space<vmem>>) attributes {dimension_semantics = [#tpu.dimension_semantics<parallel>], iteration_bounds = array<i64: 4>, scalar_prefetch = 0 : i64, scratch_operands = 0 : i64, tpu.core_type = #tpu.core_type<tc>, window_params = [{transform_indices = @transform_0, window_bounds = array<i64: 2, 512>}, {pipeline_mode = #tpu.pipeline_mode<synchronous>, transform_indices = @transform_1, window_bounds = array<i64: 32, 2>}, {pipeline_mode = #tpu.pipeline_mode<synchronous>, transform_indices = @transform_2, window_bounds = array<i64: 32, 1>}, {pipeline_mode = #tpu.pipeline_mode<synchronous>, transform_indices = @transform_3, window_bounds = array<i64: 32, 32>}, {pipeline_mode = #tpu.pipeline_mode<synchronous>, transform_indices = @transform_4, window_bounds = array<i64: 32, 1>}, {pipeline_mode = #tpu.pipeline_mode<synchronous>, transform_indices = @transform_5, window_bounds = array<i64: 32, 32>}, {pipeline_mode = #tpu.pipeline_mode<synchronous>, transform_indices = @transform_6, window_bounds = array<i64: 32, 1>}, {pipeline_mode = #tpu.pipeline_mode<synchronous>, transform_indices = @transform_7, window_bounds = array<i64: 32, 32>}, {pipeline_mode = #tpu.pipeline_mode<synchronous>, transform_indices = @transform_8, window_bounds = array<i64: 32, 1>}, {pipeline_mode = #tpu.pipeline_mode<synchronous>, transform_indices = @transform_9, window_bounds = array<i64: 32, 1>}, {pipeline_mode = #tpu.pipeline_mode<synchronous>, transform_indices = @transform_10, window_bounds = array<i64: 1, 1>}, {transform_indices = @transform_11, window_bounds = array<i64: 1, 512>}]} {
    %c0 = arith.constant 0 : index
    %c0_0 = arith.constant 0 : index
    %0 = vector.load %arg3[%c0, %c0_0] : memref<32x1xf32, #tpu.memory_space<vmem>>, vector<32x1xf32>
    %c0_1 = arith.constant 0 : index
    %c0_2 = arith.constant 0 : index
    %1 = vector.load %arg2[%c0_1, %c0_2] : memref<32x2xf32, #tpu.memory_space<vmem>>, vector<32x1xf32>
    %c0_3 = arith.constant 0 : index
    %c0_4 = arith.constant 0 : index
    %2 = vector.load %arg1[%c0_3, %c0_4] : memref<2x512xf32, #tpu.memory_space<vmem>>, vector<1x512xf32>
    %3 = vector.broadcast %1 : vector<32x1xf32> to vector<32x512xf32>
    %4 = vector.broadcast %2 : vector<1x512xf32> to vector<32x512xf32>
    %5 = arith.mulf %3, %4 : vector<32x512xf32>
    %6 = vector.broadcast %0 : vector<32x1xf32> to vector<32x512xf32>
    %7 = arith.addf %6, %5 : vector<32x512xf32>
    %c0_5 = arith.constant 0 : index
    %c1 = arith.constant 1 : index
    %8 = vector.load %arg2[%c0_5, %c1] : memref<32x2xf32, #tpu.memory_space<vmem>>, vector<32x1xf32>
    %c1_6 = arith.constant 1 : index
    %c0_7 = arith.constant 0 : index
    %9 = vector.load %arg1[%c1_6, %c0_7] : memref<2x512xf32, #tpu.memory_space<vmem>>, vector<1x512xf32>
    %10 = vector.broadcast %8 : vector<32x1xf32> to vector<32x512xf32>
    %11 = vector.broadcast %9 : vector<1x512xf32> to vector<32x512xf32>
    %12 = arith.mulf %10, %11 : vector<32x512xf32>
    %13 = arith.addf %7, %12 : vector<32x512xf32>
    %14 = math.sin %13 : vector<32x512xf32>
    %c0_8 = arith.constant 0 : index
    %c0_9 = arith.constant 0 : index
    %15 = vector.load %arg4[%c0_8, %c0_9] : memref<32x32xf32, #tpu.memory_space<vmem>>, vector<32x32xf32>
    %cst = arith.constant dense<0.000000e+00> : vector<32x512xf32>
    %16 = tpu.matmul %15, %14, %cst {dimension_numbers = #tpu.dot_dimension_numbers<[1], [0], [0], [1], [0, 0, 1, 1], [], []>} : vector<32x32xf32>, vector<32x512xf32>, vector<32x512xf32> -> vector<32x512xf32>
    %c0_10 = arith.constant 0 : index
    %c0_11 = arith.constant 0 : index
    %17 = vector.load %arg5[%c0_10, %c0_11] : memref<32x1xf32, #tpu.memory_space<vmem>>, vector<32x1xf32>
    %18 = vector.broadcast %17 : vector<32x1xf32> to vector<32x512xf32>
    %19 = arith.addf %16, %18 : vector<32x512xf32>
    %20 = math.sin %19 : vector<32x512xf32>
    %c0_12 = arith.constant 0 : index
    %c0_13 = arith.constant 0 : index
    %21 = vector.load %arg6[%c0_12, %c0_13] : memref<32x32xf32, #tpu.memory_space<vmem>>, vector<32x32xf32>
    %cst_14 = arith.constant dense<0.000000e+00> : vector<32x512xf32>
    %22 = tpu.matmul %21, %20, %cst_14 {dimension_numbers = #tpu.dot_dimension_numbers<[1], [0], [0], [1], [0, 0, 1, 1], [], []>} : vector<32x32xf32>, vector<32x512xf32>, vector<32x512xf32> -> vector<32x512xf32>
    %c0_15 = arith.constant 0 : index
    %c0_16 = arith.constant 0 : index
    %23 = vector.load %arg7[%c0_15, %c0_16] : memref<32x1xf32, #tpu.memory_space<vmem>>, vector<32x1xf32>
    %24 = vector.broadcast %23 : vector<32x1xf32> to vector<32x512xf32>
    %25 = arith.addf %22, %24 : vector<32x512xf32>
    %26 = math.sin %25 : vector<32x512xf32>
    %c0_17 = arith.constant 0 : index
    %c0_18 = arith.constant 0 : index
    %27 = vector.load %arg8[%c0_17, %c0_18] : memref<32x32xf32, #tpu.memory_space<vmem>>, vector<32x32xf32>
    %cst_19 = arith.constant dense<0.000000e+00> : vector<32x512xf32>
    %28 = tpu.matmul %27, %26, %cst_19 {dimension_numbers = #tpu.dot_dimension_numbers<[1], [0], [0], [1], [0, 0, 1, 1], [], []>} : vector<32x32xf32>, vector<32x512xf32>, vector<32x512xf32> -> vector<32x512xf32>
    %c0_20 = arith.constant 0 : index
    %c0_21 = arith.constant 0 : index
    %29 = vector.load %arg9[%c0_20, %c0_21] : memref<32x1xf32, #tpu.memory_space<vmem>>, vector<32x1xf32>
    %30 = vector.broadcast %29 : vector<32x1xf32> to vector<32x512xf32>
    %31 = arith.addf %28, %30 : vector<32x512xf32>
    %32 = math.sin %31 : vector<32x512xf32>
    %c0_22 = arith.constant 0 : index
    %c0_23 = arith.constant 0 : index
    %33 = vector.load %arg10[%c0_22, %c0_23] : memref<32x1xf32, #tpu.memory_space<vmem>>, vector<32x1xf32>
    %34 = vector.broadcast %33 : vector<32x1xf32> to vector<32x512xf32>
    %35 = arith.mulf %34, %32 : vector<32x512xf32>
    %cst_24 = arith.constant dense<0.000000e+00> : vector<512xf32>
    %36 = vector.multi_reduction <add>, %35, %cst_24 [0] : vector<32x512xf32> to vector<512xf32>
    %37 = vector.shape_cast %36 : vector<512xf32> to vector<1x512xf32>
    %c0_25 = arith.constant 0 : index
    %c0_26 = arith.constant 0 : index
    %38 = vector.load %arg11[%c0_25, %c0_26] : memref<1x1xf32, #tpu.memory_space<vmem>>, vector<1x1xf32>
    %39 = vector.broadcast %38 : vector<1x1xf32> to vector<1x512xf32>
    %40 = arith.addf %37, %39 : vector<1x512xf32>
    %c0_27 = arith.constant 0 : index
    %c0_28 = arith.constant 0 : index
    %41 = vector.load %arg12[%c0_27, %c0_28] : memref<1x512xf32, #tpu.memory_space<vmem>>, vector<1x512xf32>
    tpu.vector_store %arg12[%c0_27, %c0_28], %40 {strides = array<i32>} : memref<1x512xf32, #tpu.memory_space<vmem>>, vector<1x512xf32>,
    return
  }
  func.func @transform_0(%arg0: i32) -> (i32, i32) {
    %c0_i32 = arith.constant 0 : i32
    %c0_i32_0 = arith.constant 0 : i32
    return %c0_i32, %arg0 : i32, i32
  }
  func.func @transform_1(%arg0: i32) -> (i32, i32) {
    %c0_i32 = arith.constant 0 : i32
    %c0_i32_0 = arith.constant 0 : i32
    %c0_i32_1 = arith.constant 0 : i32
    return %c0_i32, %c0_i32_0 : i32, i32
  }
  func.func @transform_2(%arg0: i32) -> (i32, i32) {
    %c0_i32 = arith.constant 0 : i32
    %c0_i32_0 = arith.constant 0 : i32
    %c0_i32_1 = arith.constant 0 : i32
    return %c0_i32, %c0_i32_0 : i32, i32
  }
  func.func @transform_3(%arg0: i32) -> (i32, i32) {
    %c0_i32 = arith.constant 0 : i32
    %c0_i32_0 = arith.constant 0 : i32
    %c0_i32_1 = arith.constant 0 : i32
    return %c0_i32, %c0_i32_0 : i32, i32
  }
  func.func @transform_4(%arg0: i32) -> (i32, i32) {
    %c0_i32 = arith.constant 0 : i32
    %c0_i32_0 = arith.constant 0 : i32
    %c0_i32_1 = arith.constant 0 : i32
    return %c0_i32, %c0_i32_0 : i32, i32
  }
  func.func @transform_5(%arg0: i32) -> (i32, i32) {
    %c0_i32 = arith.constant 0 : i32
    %c0_i32_0 = arith.constant 0 : i32
    %c0_i32_1 = arith.constant 0 : i32
    return %c0_i32, %c0_i32_0 : i32, i32
  }
  func.func @transform_6(%arg0: i32) -> (i32, i32) {
    %c0_i32 = arith.constant 0 : i32
    %c0_i32_0 = arith.constant 0 : i32
    %c0_i32_1 = arith.constant 0 : i32
    return %c0_i32, %c0_i32_0 : i32, i32
  }
  func.func @transform_7(%arg0: i32) -> (i32, i32) {
    %c0_i32 = arith.constant 0 : i32
    %c0_i32_0 = arith.constant 0 : i32
    %c0_i32_1 = arith.constant 0 : i32
    return %c0_i32, %c0_i32_0 : i32, i32
  }
  func.func @transform_8(%arg0: i32) -> (i32, i32) {
    %c0_i32 = arith.constant 0 : i32
    %c0_i32_0 = arith.constant 0 : i32
    %c0_i32_1 = arith.constant 0 : i32
    return %c0_i32, %c0_i32_0 : i32, i32
  }
  func.func @transform_9(%arg0: i32) -> (i32, i32) {
    %c0_i32 = arith.constant 0 : i32
    %c0_i32_0 = arith.constant 0 : i32
    %c0_i32_1 = arith.constant 0 : i32
    return %c0_i32, %c0_i32_0 : i32, i32
  }
  func.func @transform_10(%arg0: i32) -> (i32, i32) {
    %c0_i32 = arith.constant 0 : i32
    %c0_i32_0 = arith.constant 0 : i32
    %c0_i32_1 = arith.constant 0 : i32
    return %c0_i32, %c0_i32_0 : i32, i32
  }
  func.func @transform_11(%arg0: i32) -> (i32, i32) {
    %c0_i32 = arith.constant 0 : i32
    %c0_i32_0 = arith.constant 0 : i32
    return %c0_i32, %arg0 : i32, i32
  }
}

</mosaic_0001>

<bundles_post_ra>
// kernel: coordinate_net_forward.1
= control target key start
LH: loop header
LB: loop body
LE: loop exit
PB: predicated region body
PF: predicated region fallthrough
CT: control target
= control target key end

     0   :  { %s9006_s19 = smov 0   ;;  %s15908_s0 = inlined_call_operand.vmem [shape: f32[2,2048], index: 0, kind: input, shape index: {}]   ;;  %s15909_s1 = inlined_call_operand.vmem [shape: f32[32,2], index: 1, kind: input, shape index: {}]   ;;  %s15910_s2 = inlined_call_operand.vmem [shape: f32[32,1], index: 2, kind: input, shape index: {}]   ;;  %s15911_s3 = inlined_call_operand.vmem [shape: f32[32,32], index: 3, kind: input, shape index: {}]   ;;  %s15912_s4 = inlined_call_operand.vmem [shape: f32[32,1], index: 4, kind: input, shape index: {}]   ;;  %s15913_s5 = inlined_call_operand.vmem [shape: f32[32,32], index: 5, kind: input, shape index: {}]   ;;  %s15914_s6 = inlined_call_operand.vmem [shape: f32[32,1], index: 6, kind: input, shape index: {}]   ;;  %s15915_s7 = inlined_call_operand.vmem [shape: f32[32,32], index: 7, kind: input, shape index: {}]   ;;  %s15916_s8 = inlined_call_operand.vmem [shape: f32[32,1], index: 8, kind: input, shape index: {}]   ;;  %s15917_s9 = inlined_call_operand.vmem [shape: f32[32,1], index: 9, kind: input, shape index: {}]   ;;  %s15918_s10 = inlined_call_operand.<no memory space> [shape: f32[1,1], index: 10, kind: input, shape index: {}]   ;;  %s15919_s11 = inlined_call_operand.vmem [shape: f32[1,2048], index: 11, kind: output, shape index: {}]  }
   0x1   :  { %v16_v0 = vstv %s15918_s10 }
   0x2   :  { %17 = vst [vmem:[#allocation2] sm:$0x1] %v16_v0 }
   0x3 LB: > { %s8048_s20 = sadd.s32 4294967295, %s8931_s19   ;;  %p8052_p0 = scmp.ge.s32.totalorder %s8931_s19, 1  ;;  %s8931_s19 = sphi %s9006_s19, %s23_s19  }
   0x4   : > { %p340_p1 = scmp.lt.s32.totalorder %s8931_s19, 5 }
   0x6   : > { %p341_p2 = pnand %p8052_p0, %p340_p1 }
   0x8   : > { %344 = sbr.rel (%p341_p2) target bundleno = 2465 (0x9a1), region = 64 }
   0xf   : > { %v394_v1 = vld [vmem:[%s15909_s1] sm:$0xff]  ;;  %v8933_v3 = vmov 0   ;;  %v395_v4 = vld [vmem:[%s15909_s1 + $0x8] sm:$0xff]  ;;  %v397_v6 = vld [vmem:[%s15909_s1 + $0x18] sm:$0xff]  ;;  %v8934_v7 = vmov 1   ;;  %s8053_s17 = sshll.u32 %s8048_s20, 2  ;;  %v15920_v11 = vlaneseq }
  0x10   : > { %v390_v2 = vld [vmem:[%s15910_s2] sm:$0xff]  ;;  %8662 = vset.pattern.permute.xlu1 %v8933_v3  ;;  %8661 = vset.pattern.permute.xlu0 %v8933_v3  ;;  %v391_v5 = vld [vmem:[%s15910_s2 + $0x8] sm:$0xff]  ;;  %v396_v8 = vld [vmem:[%s15909_s1 + $0x10] sm:$0xff]  ;;  %p380_p3 = scmp.lt.s32.totalorder %s8053_s17, 15 }
  0x11   : > { %401 = vperm.xlu0 %8661, %v394_v1   ;;  %458 = vperm.xlu1 %8662, %v390_v2   ;;  %v392_v9 = vld [vmem:[%s15910_s2 + $0x10] sm:$0xff]  ;;  %v393_v10 = vld [vmem:[%s15910_s2 + $0x18] sm:$0xff]  ;;  %v9044_v12 = vshrl.u32 %v15920_v11, 7 }
  0x12   : > { %s16603_s17 = smov (!%p380_p3, %s8053_s17), 15 }
  0x13   : > { %s8054_s18 = sshll.u32 %s16603_s17, 1  ;;  %16115 = vst [vmem:[#allocation3_spill] sm:$0xff] %v9044_v12  ;;  %v9050_v13 = vsub.s32 0, %v9044_v12  ;;  %v430_v14 = vsub.s32 2, %v9044_v12  ;;  %v426_v22 = vsub.s32 1, %v9044_v12  ;;  %v434_v23 = vsub.s32 3, %v9044_v12  ;;  %s388_s26 = scalar_lea.vmem %s15919_s11, %s16603_s17 }
  0x14   : > { %s383_s10 = scalar_lea.vmem %s15908_s0, %s8054_s18 }
  0x15   : > { %406 = vperm.xlu0 %8661, %v395_v4   ;;  %463 = vperm.xlu1 %8662, %v391_v5   ;;  %16116 = vst [vmem:[#allocation4_spill] sm:$0xff] %v9050_v13  ;;  %v398_v15 = vld [vmem:[%s383_s10] ss:$2 sm:$0xf] }
  0x16   : > { %v423_v16 = vrot.slane %v398_v15, %v9050_v13  ;;  %v431_v17 = vrot.slane %v398_v15, %v430_v14  ;;  %v8056_v26 = vld [vmem:[%s383_s10 + $0x1] ss:$2 sm:$0xf]  ;;  %v427_v33 = vrot.slane %v398_v15, %v426_v22  ;;  %v435_v34 = vrot.slane %v398_v15, %v434_v23 }
  0x17   : > { %v9057_v31 = vrot.slane %v8056_v26, %v9050_v13  ;;  %v9059_v32 = vrot.slane %v8056_v26, %v430_v14  ;;  %v9071_v45 = vrot.slane %v8056_v26, %v426_v22  ;;  %v9077_v50 = vrot.slane %v8056_v26, %v434_v23 }
  0x19   : > { %416 = vperm.xlu0 %8661, %v397_v6   ;;  %8663 = vset.pattern.permute.xlu1 %v8934_v7 }
  0x1a   : > { %499 = vperm.xlu1 %8663, %v395_v4  }
  0x1d   : > { %8665 = vset.pattern.permute.xlu0 %v8934_v7 }
  0x1e   : > { %495 = vperm.xlu0 %8665, %v394_v1   ;;  %8664 = vset.pattern.permute.xlu1 %v8933_v3 }
  0x1f   : > { %411 = vperm.xlu1 %8664, %v396_v8  }
  0x22   : > { %503 = vperm.xlu0 %8665, %v396_v8  }
  0x23   : > { %468 = vperm.xlu1 %8664, %v392_v9  }
  0x26   : > { %8668 = vset.pattern.permute.xlu0 %v8933_v3 }
  0x27   : > { %473 = vperm.xlu1 %8664, %v393_v10  }
  0x2b   : > { %8666 = vset.pattern.permute.xlu1 %v8934_v7 }
  0x2c   : > { %507 = vperm.xlu1 %8666, %v397_v6  }
  0x30   : > { %8667 = vset.pattern.permute.xlu1 %v8933_v3 }
  0x90   : > { %v402_v18 = vpop.permute.xlu0 %401  ;;  %v459_v19 = vpop.permute.xlu1 %458 }
  0x91   : > { %v440_v20 = vmul.f32 %v423_v16, %v402_v18  ;;  %v442_v21 = vmul.f32 %v431_v17, %v402_v18  ;;  %v441_v57 = vmul.f32 %v427_v33, %v402_v18  ;;  %v443_v6 = vmul.f32 %v435_v34, %v402_v18 }
  0x93   : > { %v476_v24 = vadd.f32 %v459_v19, %v440_v20  ;;  %v478_v25 = vadd.f32 %v459_v19, %v442_v21  ;;  %v477_v0 = vadd.f32 %v459_v19, %v441_v57  ;;  %v479_v22 = vadd.f32 %v459_v19, %v443_v6 }
  0x94   : > { %v407_v27 = vpop.permute.xlu0 %406  ;;  %v464_v28 = vpop.permute.xlu1 %463 }
  0x95   : > { %v444_v29 = vmul.f32 %v423_v16, %v407_v27  ;;  %v446_v30 = vmul.f32 %v431_v17, %v407_v27  ;;  %v445_v49 = vmul.f32 %v427_v33, %v407_v27  ;;  %v447_v54 = vmul.f32 %v435_v34, %v407_v27 }
  0x97   : > { %v480_v35 = vadd.f32 %v464_v28, %v444_v29  ;;  %v482_v36 = vadd.f32 %v464_v28, %v446_v30  ;;  %v481_v58 = vadd.f32 %v464_v28, %v445_v49  ;;  %v483_v63 = vadd.f32 %v464_v28, %v447_v54 }
  0x98   : > { %v417_v37 = vpop.permute.xlu0 %416 }
  0x99   : > { %v9061_v38 = vmul.f32 %v423_v16, %v417_v37  ;;  %v9063_v39 = vmul.f32 %v427_v33, %v417_v37  ;;  %v9065_v40 = vmul.f32 %v431_v17, %v417_v37  ;;  %v9067_v41 = vmul.f32 %v435_v34, %v417_v37  ;;  %v500_v42 = vpop.permute.xlu1 %499 }
  0x9a   : > { %v535_v43 = vmul.f32 %v9057_v31, %v500_v42  ;;  %v537_v44 = vmul.f32 %v9059_v32, %v500_v42  ;;  %v536_v53 = vmul.f32 %v9071_v45, %v500_v42  ;;  %v538_v60 = vmul.f32 %v9077_v50, %v500_v42 }
  0x9c   : > { %v9073_v46 = vadd.f32 %v535_v43, %v480_v35  ;;  %v9075_v47 = vadd.f32 %v537_v44, %v482_v36  ;;  %v9087_v61 = vadd.f32 %v536_v53, %v481_v58  ;;  %v9090_v1 = vadd.f32 %v538_v60, %v483_v63 }
  0x9d   : > { %v496_v48 = vpop.permute.xlu0 %495 }
  0x9e   : > { %16117 = vst [vmem:[#allocation5_spill] sm:$0xff] %v9075_v47  ;;  %v531_v51 = vmul.f32 %v9057_v31, %v496_v48  ;;  %v533_v52 = vmul.f32 %v9059_v32, %v496_v48  ;;  %v412_v59 = vpop.permute.xlu1 %411  ;;  %v532_v62 = vmul.f32 %v9071_v45, %v496_v48  ;;  %v982_v2 = vand.u32 2139095040, %v9073_v46 }
  0x9f   : > { %v1086_v3 = vand.u32 2139095040, %v9087_v61  ;;  %v1190_v7 = vand.u32 2139095040, %v9075_v47  ;;  %v1294_v8 = vand.u32 2139095040, %v9090_v1  ;;  %v534_v9 = vmul.f32 %v9077_v50, %v496_v48 }
  0xa0   : > { %v9082_v55 = vadd.f32 %v531_v51, %v476_v24  ;;  %v9084_v56 = vadd.f32 %v533_v52, %v478_v25  ;;  %v9094_v4 = vadd.f32 %v532_v62, %v477_v0  ;;  %v983_v10 = vshrl.u32 %v982_v2, 23 }
  0xa1   : > { %v1087_v14 = vshrl.u32 %v1086_v3, 23  ;;  %v448_v20 = vmul.f32 %v423_v16, %v412_v59  ;;  %v450_v21 = vmul.f32 %v431_v17, %v412_v59  ;;  %v1191_v23 = vshrl.u32 %v1190_v7, 23  ;;  %v504_v24 = vpop.permute.xlu0 %503 }
  0xa2   : > { %16118 = vst [vmem:[#allocation6_spill] sm:$0xff] %v9084_v56  ;;  %v469_v5 = vpop.permute.xlu1 %468  ;;  %v670_v15 = vand.u32 2139095040, %v9094_v4  ;;  %v1295_v26 = vshrl.u32 %v1294_v8, 23  ;;  %v8073_v27 = vadd.s32 4294967169, %v983_v10  ;;  %v9100_v18 = vadd.f32 %v534_v9, %v479_v22 }
  0xa3   : > { %v8077_v28 = vadd.s32 4294967169, %v1087_v14  ;;  %v566_v30 = vand.u32 2139095040, %v9082_v55  ;;  %v449_v35 = vmul.f32 %v427_v33, %v412_v59  ;;  %v539_v36 = vmul.f32 %v9057_v31, %v504_v24 }
  0xa4   : > { %v671_v29 = vshrl.u32 %v670_v15, 23  ;;  %v540_v37 = vmul.f32 %v9071_v45, %v504_v24  ;;  %v8081_v42 = vadd.s32 4294967169, %v1191_v23  ;;  %v451_v16 = vmul.f32 %v435_v34, %v412_v59 }
  0xa5   : > { %v541_v17 = vmul.f32 %v9059_v32, %v504_v24  ;;  %v542_v19 = vmul.f32 %v9077_v50, %v504_v24  ;;  %v8085_v43 = vadd.s32 4294967169, %v1295_v26  ;;  %v774_v44 = vand.u32 2139095040, %v9084_v56 }
  0xa6   : > { %v474_v25 = vpop.permute.xlu1 %473  ;;  %v484_v48 = vadd.f32 %v469_v5, %v448_v20  ;;  %v485_v49 = vadd.f32 %v469_v5, %v449_v35  ;;  %v8061_v51 = vadd.s32 4294967169, %v671_v29  ;;  %v486_v52 = vadd.f32 %v469_v5, %v450_v21 }
  0xa7   : > { %v487_v53 = vadd.f32 %v469_v5, %v451_v16  ;;  %v488_v33 = vadd.f32 %v474_v25, %v9061_v38  ;;  %v567_v57 = vshrl.u32 %v566_v30, 23  ;;  %v878_v58 = vand.u32 2139095040, %v9100_v18 }
  0xa8   : > { %v9110_v60 = vadd.f32 %v539_v36, %v484_v48  ;;  %v9112_v34 = vadd.f32 %v540_v37, %v485_v49  ;;  %v989_v59 = vadd.s32 1, %v8073_v27  ;;  %v9114_v62 = vadd.f32 %v541_v17, %v486_v52 }
  0xa9   : > { %v9116_v63 = vadd.f32 %v542_v19, %v487_v53  ;;  %v490_v0 = vadd.f32 %v474_v25, %v9065_v40  ;;  %v1093_v2 = vadd.s32 1, %v8077_v28  ;;  %v489_v3 = vadd.f32 %v474_v25, %v9063_v39 }
  0xaa   : > { %16119 = vst [vmem:[#allocation7_spill] sm:$0xff] %v9110_v60  ;;  %16120 = vst [vmem:[#allocation8_spill] sm:$0xff] %v9112_v34  ;;  %v677_v6 = vadd.s32 1, %v8061_v51  ;;  %v491_v7 = vadd.f32 %v474_v25, %v9067_v41  ;;  %v1197_v10 = vadd.s32 1, %v8081_v42  ;;  %v8057_v14 = vadd.s32 4294967169, %v567_v57 }
  0xab   : > { %v508_v54 = vpop.permute.xlu1 %507  ;;  %16121 = vst [vmem:[#allocation9_spill] sm:$0xff] %v9114_v62  ;;  %16122 = vst [vmem:[#allocation10_spill] sm:$0xff] %v9116_v63  ;;  %v775_v40 = vshrl.u32 %v774_v44, 23  ;;  %v879_v21 = vshrl.u32 %v878_v58, 23  ;;  %vm990_vm1 = vcmp.gt.s32.totalorder %v989_v59, 0  ;;  %vm1094_vm2 = vcmp.gt.s32.totalorder %v1093_v2, 0 }
  0xac   : > { %v543_v38 = vmul.f32 %v9057_v31, %v508_v54  ;;  %v544_v5 = vmul.f32 %v9071_v45, %v508_v54  ;;  %v545_v8 = vmul.f32 %v9059_v32, %v508_v54  ;;  %v546_v9 = vmul.f32 %v9077_v50, %v508_v54 }
  0xad   : > { %v1301_v45 = vadd.s32 1, %v8085_v43  ;;  %vm678_vm0 = vcmp.gt.s32.totalorder %v677_v6, 0  ;;  %v573_v41 = vadd.s32 1, %v8057_v14  ;;  %vm1198_vm3 = vcmp.gt.s32.totalorder %v1197_v10, 0 }
  0xae   : > { %v9125_v15 = vadd.f32 %v543_v38, %v488_v33  ;;  %v9127_v20 = vadd.f32 %v544_v5, %v489_v3  ;;  %v9129_v39 = vadd.f32 %v545_v8, %v490_v0  ;;  %v9131_v31 = vadd.f32 %v546_v9, %v491_v7 }
  0xaf   : > { %v8065_v32 = vadd.s32 4294967169, %v775_v40  ;;  %v8069_v50 = vadd.s32 4294967169, %v879_v21  ;;  %vm1302_vm4 = vcmp.gt.s32.totalorder %v1301_v45, 0  ;;  %v679_v22 = vsel %vm678_vm0, %v677_v6, 0 }
  0xb0   : > { %v991_v23 = vsel %vm990_vm1, %v989_v59, 0  ;;  %v1095_v24 = vsel %vm1094_vm2, %v1093_v2, 0  ;;  %v1199_v25 = vsel %vm1198_vm3, %v1197_v10, 0  ;;  %vm574_vm5 = vcmp.gt.s32.totalorder %v573_v41, 0 }
  0xb1   : > { %v1303_v26 = vsel %vm1302_vm4, %v1301_v45, 0  ;;  %v681_v27 = vand.u32 31, %v679_v22  ;;  %v781_v28 = vadd.s32 1, %v8065_v32  ;;  %v885_v29 = vadd.s32 1, %v8069_v50 }
  0xb2   : > { %v9133_v30 = vand.u32 31, %v991_v23  ;;  %v9135_v35 = vand.u32 31, %v1095_v24  ;;  %v575_v36 = vsel %vm574_vm5, %v573_v41, 0  ;;  %v9137_v37 = vand.u32 31, %v1199_v25 }
  0xb3   : > { %v9139_v42 = vand.u32 31, %v1303_v26  ;;  %v682_v16 = vsub.s32 32, %v681_v27  ;;  %vm782_vm6 = vcmp.gt.s32.totalorder %v781_v28, 0  ;;  %vm886_vm7 = vcmp.gt.s32.totalorder %v885_v29, 0 }
  0xb4   : > { %16123 = vst [vmem:[#allocation11_spill] sm:$0xff] %v9133_v30  ;;  %16124 = vst [vmem:[#allocation12_spill] sm:$0xff] %v9137_v37  ;;  %v9141_v17 = vshrl.u32 %v991_v23, 5  ;;  %v9143_v19 = vshrl.u32 %v1095_v24, 5  ;;  %v9145_v43 = vand.u32 31, %v575_v36  ;;  %v9149_v48 = vsub.s32 32, %v9133_v30 }
  0xb5   : > { %v15921_v44 = vand.u32 2147483647, %v9094_v4  ;;  %v9152_v49 = vsub.s32 32, %v9135_v35  ;;  %v9154_v51 = vshrl.u32 %v1199_v25, 5  ;;  %v9156_v52 = vshrl.u32 %v1303_v26, 5 }
  0xb6   : > { %16125 = vst [vmem:[#allocation13_spill] sm:$0xff] %v9141_v17  ;;  %v9159_v53 = vsub.s32 32, %v9137_v37  ;;  %v9162_v33 = vsub.s32 32, %v9139_v42  ;;  %v783_v54 = vsel %vm782_vm6, %v781_v28, 0  ;;  %v9164_v57 = vsel %vm886_vm7, %v885_v29, 0 }
  0xb7   : > { %16126 = vst [vmem:[#allocation14_spill] sm:$0xff] %v9154_v51  ;;  %v9166_v58 = vshrl.u32 %v575_v36, 5  ;;  %v680_v59 = vshrl.u32 %v679_v22, 5  ;;  %v674_v0 = vand.u32 8388607, %v15921_v44  ;;  %v9172_v38 = vsub.s32 32, %v9145_v43 }
  0xb8   : > { %16127 = vst [vmem:[#allocation15_spill] sm:$0xff] %v9159_v53  ;;  %v15926_v2 = vmov 2475754826   ;;  %v15928_v5 = vmov 683565275   ;;  %v9177_v10 = vshrl.u32 %v783_v54, 5 }
  0xb9   : > { %v685_v3 = vshrl.u32 %v15926_v2, %v682_v16  ;;  %v684_v6 = vshll.u32 %v15928_v5, %v681_v27  ;;  %v687_v7 = vshll.u32 %v15926_v2, %v681_v27  ;;  %v15924_v8 = vmov 2131351028  }
  0xba   : > { %v688_v9 = vshrl.u32 %v15924_v8, %v682_v16  ;;  %16128 = vst [vmem:[#allocation16_spill] sm:$0xff] %v9177_v10  ;;  %v9179_v14 = vand.u32 31, %v783_v54  ;;  %v9182_v40 = vand.u32 31, %v9164_v57  ;;  %v1398_v21 = vand.u32 2139095040, %v9110_v60 }
  0xbb   : > { %v1502_v45 = vand.u32 2139095040, %v9112_v34  ;;  %v675_v41 = vor.u32 8388608, %v674_v0  ;;  %v686_v32 = vor.u32 %v685_v3, %v684_v6  ;;  %v690_v22 = vshll.u32 %v15924_v8, %v681_v27 }
  0xbc   : > { %16129 = vst [vmem:[#allocation17_spill] sm:$0xff] %v9179_v14  ;;  %v689_v50 = vor.u32 %v688_v9, %v687_v7  ;;  %v15922_v23 = vmov 2102212464   ;;  %v15930_v26 = vmov 920167782   ;;  %v683_v29 = vshrl.u32 %v15928_v5, %v682_v16 }
  0xbd   : > { %v691_v24 = vshrl.u32 %v15922_v23, %v682_v16  ;;  %v693_v25 = vshll.u32 %v15922_v23, %v681_v27  ;;  %v694_v28 = vshrl.u32 %v15930_v26, %v682_v16  ;;  %v696_v36 = vshll.u32 %v15930_v26, %v681_v27 }
  0xbe   : > { %v15933_v54 = vmov 1326507024   ;;  %vm699_vm8 = vcmp.lt.s32.totalorder %v680_v59, 1  ;;  %vm700_vm9 = vcmp.lt.s32.totalorder %v680_v59, 2  ;;  %vm701_vm10 = vcmp.lt.s32.totalorder %v680_v59, 3 }
  0xbf   : > { %v697_v11 = vshrl.u32 %v15933_v54, %v682_v16  ;;  %v692_v0 = vor.u32 %v691_v24, %v690_v22  ;;  %v695_v3 = vor.u32 %v694_v28, %v693_v25  ;;  %vm702_vm11 = vcmp.lt.s32.totalorder %v680_v59, 4 }
  0xc0   : > { %v703_v7 = vsel %vm699_vm8, %v683_v29, %v686_v32  ;;  %v707_v9 = vsel %vm699_vm8, %v686_v32, %v689_v50  ;;  %v715_v2 = vshll.u32 %v675_v41, 8  ;;  %v15932_v16 = vand.u32 2147483647, %v9087_v61 }
  0xc1   : > { %v698_v6 = vor.u32 %v697_v11, %v696_v36  ;;  %v704_v44 = vsel %vm702_vm11, %v692_v0, 2102212464  ;;  %v708_v23 = vsel %vm702_vm11, %v695_v3, 920167782  ;;  %v711_v8 = vsel %vm699_vm8, %v689_v50, %v692_v0 }
  0xc2   : > { %v705_v5 = vsel %vm701_vm10, %v689_v50, %v704_v44  ;;  %v709_v27 = vsel %vm701_vm10, %v692_v0, %v708_v23  ;;  %v1606_v22 = vand.u32 2139095040, %v9114_v62  ;;  %v1710_v32 = vand.u32 2139095040, %v9116_v63 }
  0xc3   : > { %v712_v26 = vsel %vm702_vm11, %v698_v6, 1326507024  ;;  %v706_v24 = vsel %vm700_vm9, %v703_v7, %v705_v5  ;;  %v710_v11 = vsel %vm700_vm9, %v707_v9, %v709_v27  ;;  %v1399_v44 = vshrl.u32 %v1398_v21, 23 }
  0xc4   : > { %v713_v25 = vsel %vm701_vm10, %v695_v3, %v712_v26  ;;  %v9202_v41 = vmul.u32.u64.low %v715_v2, %v710_v11  ;;  %v9203_v29 = vmul.u32.u64.high %v715_v2, %v710_v11, %v9202_v41  ;;  %v1090_v36 = vand.u32 8388607, %v15932_v16 }
  0xc5   : > { %v714_v28 = vsel %vm700_vm9, %v711_v8, %v713_v25  ;;  %v1503_v5 = vshrl.u32 %v1502_v45, 23  ;;  %v722_v0 = vmul.u32 %v715_v2, %v706_v24  ;;  %v16130_v6 = vmov 683565275  }
  0xc6   : > { %v9206_v50 = vmul.u32.u64.low %v715_v2, %v714_v28  ;;  %v9207_v23 = vmul.u32.u64.high %v715_v2, %v714_v28, %v9206_v50  ;;  %v1100_v26 = vshll.u32 %v16130_v6, %v9135_v35  ;;  %v16131_v3 = vmov 2475754826  }
  0xc7   : > { %v1101_v59 = vshrl.u32 %v16131_v3, %v9152_v49  ;;  %v1103_v8 = vshll.u32 %v16131_v3, %v9135_v35  ;;  %v16132_v7 = vmov 2131351028   ;;  %v16133_v27 = vmov 2102212464  }
  0xc8   : > { %v1104_v21 = vshrl.u32 %v16132_v7, %v9152_v49  ;;  %v1106_v9 = vshll.u32 %v16132_v7, %v9135_v35  ;;  %v1107_v11 = vshrl.u32 %v16133_v27, %v9152_v49  ;;  %v725_v2 = vadd.s32 1, %v9203_v29 }
  0xc9   : > { %v1102_v45 = vor.u32 %v1101_v59, %v1100_v26  ;;  %v1109_v24 = vshll.u32 %v16133_v27, %v9135_v35  ;;  %v16134_v25 = vmov 920167782   ;;  %vm724_vm12 = vc.u32 %v9207_v23, %v9202_v41 }
  0xca   : > { %v1110_v28 = vshrl.u32 %v16134_v25, %v9152_v49  ;;  %v1091_v50 = vor.u32 8388608, %v1090_v36  ;;  %v1105_v16 = vor.u32 %v1104_v21, %v1103_v8  ;;  %v1108_v54 = vor.u32 %v1107_v11, %v1106_v9 }
  0xcb   : > { %v726_v12 = vsel %vm724_vm12, %v725_v2, %v9203_v29  ;;  %v1112_v62 = vshll.u32 %v16134_v25, %v9135_v35  ;;  %v16135_v26 = vmov 1326507024   ;;  %v1099_v63 = vshrl.u32 %v16130_v6, %v9152_v49 }
  0xcc   : > { %v1111_v13 = vor.u32 %v1110_v28, %v1109_v24  ;;  %v1113_v59 = vshrl.u32 %v16135_v26, %v9152_v49  ;;  %v727_v60 = vadd.s32 %v726_v12, %v722_v0  ;;  %vm1115_vm13 = vcmp.lt.s32.totalorder %v9143_v19, 1 }
  0xcd   : > { %vm1116_vm14 = vcmp.lt.s32.totalorder %v9143_v19, 2  ;;  %vm1117_vm15 = vcmp.lt.s32.totalorder %v9143_v19, 3  ;;  %vm1118_vm0 = vcmp.lt.s32.totalorder %v9143_v19, 4  ;;  %v1123_v29 = vsel %vm1115_vm13, %v1102_v45, %v1105_v16 }
  0xce   : > { %v1114_v36 = vor.u32 %v1113_v59, %v1112_v62  ;;  %v728_v8 = vadd.s32 536870912, %v727_v60  ;;  %v1120_v21 = vsel %vm1118_vm0, %v1108_v54, 2102212464  ;;  %v1124_v35 = vsel %vm1118_vm0, %v1111_v13, 920167782 }
  0xcf   : > { %v1127_v9 = vsel %vm1115_vm13, %v1105_v16, %v1108_v54  ;;  %v1119_v11 = vsel %vm1115_vm13, %v1099_v63, %v1102_v45  ;;  %v1125_v2 = vsel %vm1117_vm15, %v1108_v54, %v1124_v35  ;;  %v1131_v0 = vshll.u32 %v1091_v50, 8 }
  0xd0   : > { %v1128_v12 = vsel %vm1118_vm0, %v1114_v36, 1326507024  ;;  %v729_v24 = vshrl.u32 %v728_v8, 30  ;;  %v1121_v49 = vsel %vm1117_vm15, %v1105_v16, %v1120_v21  ;;  %v1126_v28 = vsel %vm1116_vm14, %v1123_v29, %v1125_v2 }
  0xd1   : > { %v1129_v34 = vsel %vm1117_vm15, %v1111_v13, %v1128_v12  ;;  %v9244_v62 = vshrl.u32 %v9164_v57, 5  ;;  %v9248_v51 = vmul.u32.u64.low %v1131_v0, %v1126_v28  ;;  %v9249_v37 = vmul.u32.u64.high %v1131_v0, %v1126_v28, %v9248_v51 }
  0xd2   : > { %v1130_v59 = vsel %vm1116_vm14, %v1127_v9, %v1129_v34  ;;  %v1607_v63 = vshrl.u32 %v1606_v22, 23  ;;  %v730_v54 = vshll.u32 %v729_v24, 30  ;;  %v9256_v16 = vsub.s32 32, %v9179_v14 }
  0xd3   : > { %v9252_v45 = vmul.u32.u64.low %v1131_v0, %v1130_v59  ;;  %v9253_v50 = vmul.u32.u64.high %v1131_v0, %v1130_v59, %v9252_v45  ;;  %v890_v13 = vsub.s32 32, %v9182_v40  ;;  %v1711_v36 = vshrl.u32 %v1710_v32, 23 }
  0xd4   : > { %16136 = vst [vmem:[#allocation18_spill] sm:$0xff] %v9256_v16  ;;  %v1122_v57 = vsel %vm1116_vm14, %v1119_v11, %v1121_v49  ;;  %v9261_v29 = vadd.s32 4294967169, %v1399_v44  ;;  %v9263_v34 = vadd.s32 4294967169, %v1503_v5  ;;  %v9266_v22 = vsub.s32 %v727_v60, %v730_v54 }
  0xd5   : > { %v753_v35 = vsub.s32 4, %v729_v24  ;;  %v1141_v9 = vadd.s32 1, %v9249_v37  ;;  %v15948_v2 = vand.u32 2147483647, %v9100_v18  ;;  %v9271_v12 = vadd.s32 4294967169, %v1607_v63 }
  0xd6   : > { %v733_v19 = vsub.s32 0, %v9266_v22  ;;  %v1138_v32 = vmul.u32 %v1131_v0, %v1122_v57  ;;  %vm1140_vm1 = vc.u32 %v9253_v50, %v9248_v51  ;;  %v9276_v44 = vadd.s32 4294967169, %v1711_v36 }
  0xd7   : > { %v1142_v11 = vsel %vm1140_vm1, %v1141_v9, %v9249_v37  ;;  %v16137_v49 = vand.u32 2147483647, %v9094_v4  ;;  %vm669_vm3 = vcmp.lt.s32.totalorder %v9094_v4, 0  ;;  %v723_v63 = vadd.s32 %v9202_v41, %v9207_v23 }
  0xd8   : > { %v8062_v0 = vmin.u32 %v733_v19, %v9266_v22  ;;  %v1143_v59 = vadd.s32 %v1142_v11, %v1138_v32  ;;  %v754_v54 = vsel %vm669_vm3, %v753_v35, %v729_v24  ;;  %vm1085_vm4 = vcmp.lt.s32.totalorder %v9087_v61, 0 }
  0xd9   : > { %vm9283_vm2 = vcmp.le.f32.partialorder %v16137_v49, 0.7853982  ;;  %v882_v37 = vand.u32 8388607, %v15948_v2  ;;  %v902_v45 = vshrl.u32 %v16134_v25, %v890_v13  ;;  %v891_v57 = vshrl.u32 %v16130_v6, %v890_v13 }
  0xda   : > { %v735_v36 = vclz %v8062_v0  ;;  %v893_v9 = vshrl.u32 %v16131_v3, %v890_v13  ;;  %v896_v19 = vshrl.u32 %v16132_v7, %v890_v13  ;;  %v1144_v32 = vadd.s32 536870912, %v1143_v59 }
  0xdb   : > { %v892_v41 = vshll.u32 %v16130_v6, %v9182_v40  ;;  %v899_v23 = vshrl.u32 %v16133_v27, %v890_v13  ;;  %v901_v24 = vshll.u32 %v16133_v27, %v9182_v40  ;;  %v756_v11 = vsel %vm9283_vm2, 0, %v754_v54 }
  0xdc   : > { %v8063_v35 = vadd.s32 4294967294, %v735_v36  ;;  %v16140_v49 = vand.u32 2147483647, %v9087_v61  ;;  %v895_v5 = vshll.u32 %v16131_v3, %v9182_v40  ;;  %v905_v60 = vshrl.u32 %v16135_v26, %v890_v13 }
  0xdd   : > { %v1145_v21 = vshrl.u32 %v1144_v32, 30  ;;  %v883_v2 = vor.u32 8388608, %v882_v37  ;;  %v898_v8 = vshll.u32 %v16132_v7, %v9182_v40  ;;  %v903_v36 = vor.u32 %v902_v45, %v901_v24 }
  0xde   : > { %vm9309_vm5 = vcmp.le.f32.partialorder %v16140_v49, 0.7853982  ;;  %vm8064_vm6 = vcmp.lt.s32.totalorder %v8063_v35, 0  ;;  %v894_v53 = vor.u32 %v893_v9, %v892_v41  ;;  %v897_v54 = vor.u32 %v896_v19, %v895_v5 }
  0xdf   : > { %v904_v49 = vshll.u32 %v16134_v25, %v9182_v40  ;;  %v738_v47 = vsel %vm8064_vm6, 0, %v8063_v35  ;;  %v1146_v10 = vshll.u32 %v1145_v21, 30  ;;  %v1169_v14 = vsub.s32 4, %v1145_v21 }
  0xe0   : > { %v900_v16 = vor.u32 %v899_v23, %v898_v8  ;;  %v739_v56 = vsub.s32 32, %v738_v47  ;;  %v743_v17 = vsub.s32 4294967266, %v738_v47  ;;  %vm910_vm7 = vcmp.lt.s32.totalorder %v9244_v62, 4 }
  0xe1   : > { %v906_v30 = vor.u32 %v905_v60, %v904_v49  ;;  %v9321_v13 = vsub.s32 %v1143_v59, %v1146_v10  ;;  %vm907_vm8 = vcmp.lt.s32.totalorder %v9244_v62, 1  ;;  %vm909_vm9 = vcmp.lt.s32.totalorder %v9244_v62, 3 }
  0xe2   : > { %v916_v5 = vsel %vm910_vm7, %v903_v36, 920167782  ;;  %v740_v40 = vshll.u32 %v9266_v22, %v738_v47  ;;  %v741_v37 = vshrl.u32 %v723_v63, %v739_v56  ;;  %v744_v45 = vadd.s32 127, %v743_v17 }
  0xe3   : > { %v1170_v8 = vsel %vm1085_vm4, %v1169_v14, %v1145_v21  ;;  %v1149_v60 = vsub.s32 0, %v9321_v13  ;;  %v915_v10 = vsel %vm907_vm8, %v894_v53, %v897_v54  ;;  %v917_v59 = vsel %vm909_vm9, %v900_v16, %v916_v5 }
  0xe4   : > { %v919_v9 = vsel %vm907_vm8, %v897_v54, %v900_v16  ;;  %v742_v19 = vor.u32 %v741_v37, %v740_v40  ;;  %v745_v32 = vshll.u32 %v744_v45, 23  ;;  %v912_v47 = vsel %vm910_vm7, %v900_v16, 2102212464 }
  0xe5   : > { %v920_v56 = vsel %vm910_vm7, %v906_v30, 1326507024  ;;  %v8078_v17 = vmin.u32 %v1149_v60, %v9321_v13  ;;  %v1172_v14 = vsel %vm9309_vm5, 0, %v1170_v8  ;;  %vm908_vm10 = vcmp.lt.s32.totalorder %v9244_v62, 2 }
  0xe6   : > { %v921_v22 = vsel %vm909_vm9, %v903_v36, %v920_v56  ;;  %v746_v21 = vor.u32 4788187, %v745_v32  ;;  %v918_v63 = vsel %vm908_vm10, %v915_v10, %v917_v59  ;;  %v923_v41 = vshll.u32 %v883_v2, 8 }
  0xe7   : > { %v922_v16 = vsel %vm908_vm10, %v919_v9, %v921_v22  ;;  %v760_v23 = vadd.s32 3, %v756_v11  ;;  %v1151_v30 = vclz %v8078_v17  ;;  %v911_v24 = vsel %vm907_vm8, %v891_v57, %v894_v53 }
  0xe8   : > { %v913_v35 = vsel %vm909_vm9, %v897_v54, %v912_v47  ;;  %v747_v49 = vand.u32 2147483647, %v746_v21  ;;  %v749_v5 = vcvt.s32.f32 %v742_v19  ;;  %v1176_v45 = vadd.s32 3, %v1172_v14 }
  0xe9   : > { %v9355_v40 = vmul.u32.u64.low %v923_v41, %v922_v16  ;;  %v9356_v36 = vmul.u32.u64.high %v923_v41, %v922_v16, %v9355_v40  ;;  %v8079_v37 = vadd.s32 4294967294, %v1151_v30  ;;  %v9363_v2 = vadd.s32 1, %v9261_v29 }
  0xea   : > { %v9358_v8 = vmul.u32.u64.low %v923_v41, %v918_v63  ;;  %v9359_v60 = vmul.u32.u64.high %v923_v41, %v918_v63, %v9358_v8  ;;  %v9366_v11 = vadd.s32 1, %v9263_v34  ;;  %v750_v53 = vmul.f32 %v749_v5, %v747_v49 }
  0xeb   : > { %v1291_v57 = vand.u32 2147483647, %v9090_v1  ;;  %v16143_v54 = vand.u32 2139095040, %v9125_v15  ;;  %v1139_v59 = vadd.s32 %v9248_v51, %v9253_v50  ;;  %vm8080_vm11 = vcmp.lt.s32.totalorder %v8079_v37, 0 }
  0xec   : > { %v914_v9 = vsel %vm908_vm10, %v911_v24, %v913_v35  ;;  %v751_v19 = vxor.u32 2147483648, %v750_v53  ;;  %v9377_v29 = vand.u32 3, %v760_v23  ;;  %v1154_v32 = vsel %vm8080_vm11, 0, %v8079_v37 }
  0xed   : > { %v9371_v10 = vshrl.u32 %v16143_v54, 23  ;;  %vm932_vm12 = vc.u32 %v9356_v36, %v9358_v8  ;;  %v1155_v34 = vsub.s32 32, %v1154_v32  ;;  %v1159_v47 = vsub.s32 4294967266, %v1154_v32 }
  0xee   : > { %v9381_v56 = vand.u32 3, %v1176_v45  ;;  %v933_v17 = vadd.s32 1, %v9359_v60  ;;  %v752_v51 = vsel %vm669_vm3, %v751_v19, %v750_v53  ;;  %v1156_v50 = vshll.u32 %v9321_v13, %v1154_v32 }
  0xef   : > { %v930_v62 = vmul.u32 %v923_v41, %v914_v9  ;;  %v9389_v14 = vand.u32 8388607, %v1291_v57  ;;  %v755_v22 = vsel %vm9283_vm2, %v9094_v4, %v752_v51  ;;  %v1157_v21 = vshrl.u32 %v1139_v59, %v1155_v34 }
  0xf0   : > { %v1160_v63 = vadd.s32 127, %v1159_v47  ;;  %v934_v16 = vsel %vm932_vm12, %v933_v17, %v9359_v60  ;;  %8669 = vcosq.f32 %v755_v22  ;;  %v1309_v30 = vshrl.u32 %v16131_v3, %v9162_v33 }
  0xf1   : > { %v935_v23 = vadd.s32 %v934_v16, %v930_v62  ;;  %v1312_v13 = vshrl.u32 %v16132_v7, %v9162_v33  ;;  %8671 = vsinq.f32 %v755_v22  ;;  %v1158_v41 = vor.u32 %v1157_v21, %v1156_v50 }
  0xf2   : > { %v1161_v24 = vshll.u32 %v1160_v63, 23  ;;  %v1315_v35 = vshrl.u32 %v16133_v27, %v9162_v33  ;;  %v1314_v49 = vshll.u32 %v16132_v7, %v9139_v42  ;;  %v1317_v5 = vshll.u32 %v16133_v27, %v9139_v42 }
  0xf3   : > { %v936_v28 = vadd.s32 536870912, %v935_v23  ;;  %v1318_v40 = vshrl.u32 %v16134_v25, %v9162_v33  ;;  %vm877_vm13 = vcmp.lt.s32.totalorder %v9100_v18, 0  ;;  %v1308_v45 = vshll.u32 %v16130_v6, %v9139_v42 }
  0xf4   : > { %v1162_v37 = vor.u32 4788187, %v1161_v24  ;;  %v1311_v60 = vshll.u32 %v16131_v3, %v9139_v42  ;;  %v1321_v53 = vshrl.u32 %v16135_v26, %v9162_v33  ;;  %vm766_vm14 = vcmp.eq.s32.totalorder %v9377_v29, 2 }
  0xf5   : > { %v937_v54 = vshrl.u32 %v936_v28, 30  ;;  %v1316_v59 = vor.u32 %v1315_v35, %v1314_v49  ;;  %v1319_v9 = vor.u32 %v1318_v40, %v1317_v5  ;;  %v1320_v19 = vshll.u32 %v16134_v25, %v9139_v42 }
  0xf6   : > { %vm763_vm15 = vcmp.eq.s32.totalorder %v9377_v29, 0  ;;  %v1163_v32 = vand.u32 2147483647, %v1162_v37  ;;  %v1165_v34 = vcvt.s32.f32 %v1158_v41  ;;  %v1310_v47 = vor.u32 %v1309_v30, %v1308_v45 }
  0xf7   : > { %v1313_v17 = vor.u32 %v1312_v13, %v1311_v60  ;;  %vm762_vm0 = vcmp.lt.s32.totalorder %v9377_v29, 2  ;;  %v16144_v51 = vand.u32 2147483647, %v9100_v18  ;;  %v938_v62 = vshll.u32 %v937_v54, 30 }
  0xf8   : > { %v1307_v22 = vshrl.u32 %v16130_v6, %v9162_v33  ;;  %v1322_v21 = vor.u32 %v1321_v53, %v1320_v19  ;;  %vm1326_vm2 = vcmp.lt.s32.totalorder %v9156_v52, 4  ;;  %v1166_v42 = vmul.f32 %v1165_v34, %v1163_v32 }
  0xf9   : > { %vm9421_vm1 = vcmp.le.f32.partialorder %v16144_v51, 0.7853982  ;;  %v1299_v63 = vor.u32 8388608, %v9389_v14  ;;  %vm1323_vm3 = vcmp.lt.s32.totalorder %v9156_v52, 1  ;;  %v1332_v16 = vsel %vm1326_vm2, %v1319_v9, 920167782 }
  0xfa   : > { %v9432_v30 = vsub.s32 %v935_v23, %v938_v62  ;;  %v961_v13 = vsub.s32 4, %v937_v54  ;;  %vm1324_vm6 = vcmp.lt.s32.totalorder %v9156_v52, 2  ;;  %v1328_v41 = vsel %vm1326_vm2, %v1316_v59, 2102212464  ;;  %v8670_v28 = vpop.eup %8669 }
  0xfb   : > { %v1167_v33 = vxor.u32 2147483648, %v1166_v42  ;;  %vm1325_vm7 = vcmp.lt.s32.totalorder %v9156_v52, 3  ;;  %v1327_v24 = vsel %vm1323_vm3, %v1307_v22, %v1310_v47  ;;  %v1331_v35 = vsel %vm1323_vm3, %v1310_v47, %v1313_v17  ;;  %v8672_v40 = vpop.eup %8671 }
  0xfc   : > { %v941_v14 = vsub.s32 0, %v9432_v30  ;;  %v1333_v49 = vsel %vm1325_vm7, %v1316_v59, %v1332_v16  ;;  %v1335_v5 = vsel %vm1323_vm3, %v1313_v17, %v1316_v59  ;;  %v1336_v23 = vsel %vm1326_vm2, %v1322_v21, 1326507024 }
  0xfd   : > { %v767_v37 = vxor.u32 2147483648, %v8670_v28  ;;  %v1168_v45 = vsel %vm1085_vm4, %v1167_v33, %v1166_v42  ;;  %v1329_v60 = vsel %vm1325_vm7, %v1313_v17, %v1328_v41  ;;  %v1337_v53 = vsel %vm1325_vm7, %v1319_v9, %v1336_v23 }
  0xfe   : > { %v764_v19 = vxor.u32 2147483648, %v8672_v40  ;;  %v1171_v32 = vsel %vm9309_vm5, %v9087_v61, %v1168_v45  ;;  %v8070_v34 = vmin.u32 %v941_v14, %v9432_v30  ;;  %v962_v59 = vsel %vm877_vm13, %v961_v13, %v937_v54 }
  0xff   : > { %v768_v47 = vsel %vm766_vm14, %v767_v37, %v8672_v40  ;;  %8673 = vcosq.f32 %v1171_v32  ;;  %v1334_v51 = vsel %vm1324_vm6, %v1331_v35, %v1333_v49  ;;  %v1338_v9 = vsel %vm1324_vm6, %v1335_v5, %v1337_v53 }
 0x100   : > { %v765_v17 = vsel %vm763_vm15, %v8670_v28, %v764_v19  ;;  %8675 = vsinq.f32 %v1171_v32  ;;  %v943_v0 = vclz %v8070_v34  ;;  %v1339_v62 = vshll.u32 %v1299_v63, 8 }
 0x101   : > { %v16147_v22 = vand.u32 2139095040, %v9127_v20  ;;  %v769_v54 = vsel %vm762_vm0, %v765_v17, %v768_v47  ;;  %v964_v42 = vsel %vm9421_vm1, 0, %v962_v59  ;;  %v1330_v16 = vsel %vm1324_vm6, %v1327_v24, %v1329_v60 }
 0x102   : > { %v8071_v13 = vadd.s32 4294967294, %v943_v0  ;;  %v9467_v41 = vmul.u32.u64.low %v1339_v62, %v1338_v9  ;;  %v9468_v33 = vmul.u32.u64.high %v1339_v62, %v1338_v9, %v9467_v41  ;;  %v563_v35 = vand.u32 2147483647, %v9082_v55 }
 0x103   : > { %v9459_v21 = vshrl.u32 %v16147_v22, 23  ;;  %v9472_v63 = vadd.s32 1, %v9271_v12  ;;  %vm759_vm4 = vweird.f32 %v9094_v4  ;;  %vm1179_vm5 = vcmp.eq.s32.totalorder %v9381_v56, 0 }
 0x104   : > { %v9475_v28 = vmul.u32.u64.low %v1339_v62, %v1334_v51  ;;  %v9476_v29 = vmul.u32.u64.high %v1339_v62, %v1334_v51, %v9475_v28  ;;  %vm1182_vm8 = vcmp.eq.s32.totalorder %v9381_v56, 2  ;;  %v931_v52 = vadd.s32 %v9358_v8, %v9356_v36 }
 0x105   : > { %vm8072_vm9 = vcmp.lt.s32.totalorder %v8071_v13, 0  ;;  %v770_v24 = vsel %vm759_vm4, nan, %v769_v54  ;;  %vm1178_vm10 = vcmp.lt.s32.totalorder %v9381_v56, 2  ;;  %v9484_v12 = vadd.s32 3, %v964_v42 }
 0x106   : > { %v946_v14 = vsel %vm8072_vm9, 0, %v8071_v13  ;;  %v1346_v49 = vmul.u32 %v1339_v62, %v1330_v16  ;;  %vm1175_vm11 = vweird.f32 %v9087_v61  ;;  %v9489_v23 = vand.u32 8388607, %v563_v35 }
 0x107   : > { %v947_v4 = vsub.s32 32, %v946_v14  ;;  %v951_v5 = vsub.s32 4294967266, %v946_v14  ;;  %v579_v40 = vshrl.u32 %v16130_v6, %v9172_v38  ;;  %vm1348_vm12 = vc.u32 %v9468_v33, %v9475_v28 }
 0x108   : > { %v1349_v36 = vadd.s32 1, %v9476_v29  ;;  %v580_v8 = vshll.u32 %v16130_v6, %v9145_v43  ;;  %v581_v37 = vshrl.u32 %v16131_v3, %v9172_v38  ;;  %v948_v45 = vshll.u32 %v9432_v30, %v946_v14 }
 0x109   : > { %v949_v60 = vshrl.u32 %v931_v52, %v947_v4  ;;  %v952_v53 = vadd.s32 127, %v951_v5  ;;  %v583_v19 = vshll.u32 %v16131_v3, %v9145_v43  ;;  %v8674_v32 = vpop.eup %8673  ;;  %v586_v59 = vshll.u32 %v16132_v7, %v9145_v43 }
 0x10a   : > { %v1350_v34 = vsel %vm1348_vm12, %v1349_v36, %v9476_v29  ;;  %v587_v47 = vshrl.u32 %v16133_v27, %v9172_v38  ;;  %v590_v51 = vshrl.u32 %v16134_v25, %v9172_v38  ;;  %v8676_v9 = vpop.eup %8675  ;;  %v1183_v17 = vxor.u32 2147483648, %v8674_v32 }
 0x10b   : > { %v950_v30 = vor.u32 %v949_v60, %v948_v45  ;;  %v953_v0 = vshll.u32 %v952_v53, 23  ;;  %v1351_v62 = vadd.s32 %v1350_v34, %v1346_v49  ;;  %v1180_v22 = vxor.u32 2147483648, %v8676_v9 }
 0x10c   : > { %vm1293_vm14 = vcmp.lt.s32.totalorder %v9090_v1, 0  ;;  %v582_v54 = vor.u32 %v581_v37, %v580_v8  ;;  %v584_v42 = vshrl.u32 %v16132_v7, %v9172_v38  ;;  %v589_v16 = vshll.u32 %v16133_v27, %v9145_v43 }
 0x10d   : > { %v1184_v13 = vsel %vm1182_vm8, %v1183_v17, %v8676_v9  ;;  %v954_v41 = vor.u32 4788187, %v953_v0  ;;  %v1352_v29 = vadd.s32 536870912, %v1351_v62  ;;  %v588_v52 = vor.u32 %v587_v47, %v586_v59 }
 0x10e   : > { %v1181_v14 = vsel %vm1179_vm5, %v8674_v32, %v1180_v22  ;;  %v591_v49 = vor.u32 %v590_v51, %v589_v16  ;;  %v592_v4 = vshll.u32 %v16134_v25, %v9145_v43  ;;  %v593_v5 = vshrl.u32 %v16135_v26, %v9172_v38 }
 0x10f   : > { %v1185_v36 = vsel %vm1178_vm10, %v1181_v14, %v1184_v13  ;;  %v955_v8 = vand.u32 2147483647, %v954_v41  ;;  %v957_v37 = vcvt.s32.f32 %v950_v30  ;;  %v1353_v45 = vshrl.u32 %v1352_v29, 30 }
 0x110   : > { %v1186_v60 = vsel %vm1175_vm11, nan, %v1185_v36  ;;  %v585_v53 = vor.u32 %v584_v42, %v583_v19  ;;  %v594_v34 = vor.u32 %v593_v5, %v592_v4  ;;  %vm598_vm15 = vcmp.lt.s32.totalorder %v9166_v58, 4 }
 0x111   : > { %v8339_v32 = vpack.c.bf16 %v1186_v60, %v770_v24  ;;  %v958_v59 = vmul.f32 %v957_v37, %v955_v8  ;;  %v1354_v47 = vshll.u32 %v1353_v45, 30  ;;  %v1377_v43 = vsub.s32 4, %v1353_v45 }
 0x112   : > { %v571_v51 = vor.u32 8388608, %v9489_v23  ;;  %vm595_vm0 = vcmp.lt.s32.totalorder %v9166_v58, 1  ;;  %vm596_vm2 = vcmp.lt.s32.totalorder %v9166_v58, 2  ;;  %v604_v38 = vsel %vm598_vm15, %v591_v49, 920167782 }
 0x113   : > { %8340 = vmatprep.subr.bf16.mxu0 %v8339_v32  ;;  %v959_v61 = vxor.u32 2147483648, %v958_v59  ;;  %v9533_v56 = vsub.s32 %v1351_v62, %v1354_v47  ;;  %vm597_vm3 = vcmp.lt.s32.totalorder %v9166_v58, 3  ;;  %v600_v24 = vsel %vm598_vm15, %v588_v52, 2102212464 }
 0x114   : > { %v603_v19 = vsel %vm595_vm0, %v582_v54, %v585_v53  ;;  %v605_v9 = vsel %vm597_vm3, %v588_v52, %v604_v38  ;;  %v607_v17 = vsel %vm595_vm0, %v585_v53, %v588_v52  ;;  %v608_v23 = vsel %vm598_vm15, %v594_v34, 1326507024 }
 0x115   : > { %v960_v30 = vsel %vm877_vm13, %v959_v61, %v958_v59  ;;  %v1357_v0 = vsub.s32 0, %v9533_v56  ;;  %v1378_v62 = vsel %vm1293_vm14, %v1377_v43, %v1353_v45  ;;  %v599_v22 = vsel %vm595_vm0, %v579_v40, %v582_v54 }
 0x116   : > { %v963_v42 = vsel %vm9421_vm1, %v9100_v18, %v960_v30  ;;  %v601_v16 = vsel %vm597_vm3, %v585_v53, %v600_v24  ;;  %v609_v13 = vsel %vm597_vm3, %v591_v49, %v608_v23  ;;  %v611_v41 = vshll.u32 %v571_v51, 8 }
 0x117   : > { %8677 = vcosq.f32 %v963_v42  ;;  %v8086_v29 = vmin.u32 %v1357_v0, %v9533_v56  ;;  %v606_v52 = vsel %vm596_vm2, %v603_v19, %v605_v9  ;;  %v610_v14 = vsel %vm596_vm2, %v607_v17, %v609_v13 }
 0x118   : > { %vm1406_vm13 = vcmp.gt.s32.totalorder %v9363_v2, 0  ;;  %v9555_v40 = vadd.s32 1, %v9276_v44  ;;  %v9557_v54 = vmul.u32.u64.low %v611_v41, %v610_v14  ;;  %v9558_v50 = vmul.u32.u64.high %v611_v41, %v610_v14, %v9557_v54 }
 0x119   : > { %8679 = vsinq.f32 %v963_v42  ;;  %v9561_v49 = vand.u32 3, %v9484_v12  ;;  %vm9565_vm1 = vcmp.le.f32.partialorder %v1291_v57, 0.7853982  ;;  %v1359_v5 = vclz %v8086_v29 }
 0x11a   : > { %v1380_v36 = vsel %vm9565_vm1, 0, %v1378_v62  ;;  %v602_v44 = vsel %vm596_vm2, %v599_v22, %v601_v16  ;;  %v9573_v8 = vmul.u32.u64.low %v611_v41, %v606_v52  ;;  %v9574_v37 = vmul.u32.u64.high %v611_v41, %v606_v52, %v9573_v8 }
 0x11b   : > { %v16150_v12 = vand.u32 2139095040, %v9129_v39  ;;  %v16151_v57 = vand.u32 2139095040, %v9131_v31  ;;  %v8087_v53 = vadd.s32 4294967294, %v1359_v5  ;;  %v979_v34 = vand.u32 2147483647, %v9073_v46 }
 0x11c   : > { %v9587_v32 = vsel %vm1406_vm13, %v9363_v2, 0  ;;  %v9590_v58 = vadd.s32 4294967169, %v9371_v10  ;;  %v9593_v59 = vadd.s32 4294967169, %v9459_v21  ;;  %v1347_v47 = vadd.s32 %v9475_v28, %v9468_v33  ;;  %v16152_v21 = vld [vmem:[#allocation11_spill] sm:$0xff] }
 0x11d   : > { %v9579_v45 = vshrl.u32 %v16150_v12, 23  ;;  %v9583_v60 = vshrl.u32 %v16151_v57, 23  ;;  %vm974_vm6 = vcmp.eq.s32.totalorder %v9561_v49, 2  ;;  %vm8088_vm7 = vcmp.lt.s32.totalorder %v8087_v53, 0 }
 0x11e   : > { %v9598_v43 = vadd.s32 3, %v1380_v36  ;;  %v618_v51 = vmul.u32 %v611_v41, %v602_v44  ;;  %vm620_vm4 = vc.u32 %v9558_v50, %v9573_v8  ;;  %v1362_v2 = vsel %vm8088_vm7, 0, %v8087_v53 }
 0x11f   : > { %v621_v38 = vadd.s32 1, %v9574_v37  ;;  %v995_v10 = vshrl.u32 %v16130_v6, %v9149_v48  ;;  %v996_v61 = vshll.u32 %v16130_v6, %v16152_v21  ;;  %v1363_v24 = vsub.s32 32, %v1362_v2 }
 0x120   : > { %v1367_v33 = vsub.s32 4294967266, %v1362_v2  ;;  %v986_v28 = vand.u32 8388607, %v979_v34  ;;  %v997_v19 = vshrl.u32 %v16131_v3, %v9149_v48  ;;  %v1364_v9 = vshll.u32 %v9533_v56, %v1362_v2 }
 0x121   : > { %v622_v17 = vsel %vm620_vm4, %v621_v38, %v9574_v37  ;;  %v1000_v23 = vshrl.u32 %v16132_v7, %v9149_v48  ;;  %v1006_v30 = vshrl.u32 %v16134_v25, %v9149_v48  ;;  %v8678_v0 = vpop.eup %8677  ;;  %vm971_vm5 = vcmp.eq.s32.totalorder %v9561_v49, 0 }
 0x122   : > { %v1365_v62 = vshrl.u32 %v1347_v47, %v1363_v24  ;;  %v1368_v22 = vadd.s32 127, %v1367_v33  ;;  %v623_v42 = vadd.s32 %v622_v17, %v618_v51  ;;  %v1003_v16 = vshrl.u32 %v16133_v27, %v9149_v48 }
 0x123   : > { %v975_v13 = vxor.u32 2147483648, %v8678_v0  ;;  %vm565_vm8 = vcmp.lt.s32.totalorder %v9082_v55, 0  ;;  %v999_v56 = vshll.u32 %v16131_v3, %v16152_v21  ;;  %v1005_v41 = vshll.u32 %v16133_v27, %v16152_v21  ;;  %v8680_v52 = vpop.eup %8679 }
 0x124   : > { %v1009_v29 = vshrl.u32 %v16135_v26, %v9149_v48  ;;  %v1366_v14 = vor.u32 %v1365_v62, %v1364_v9  ;;  %v1369_v54 = vshll.u32 %v1368_v22, 23  ;;  %v624_v5 = vadd.s32 536870912, %v623_v42  ;;  %v16155_v9 = vld [vmem:[#allocation13_spill] sm:$0xff] }
 0x125   : > { %v1002_v36 = vshll.u32 %v16132_v7, %v16152_v21  ;;  %v987_v44 = vor.u32 8388608, %v986_v28  ;;  %v998_v37 = vor.u32 %v997_v19, %v996_v61  ;;  %v1007_v12 = vor.u32 %v1006_v30, %v1005_v41 }
 0x126   : > { %v1008_v57 = vshll.u32 %v16134_v25, %v16152_v21  ;;  %v1370_v53 = vor.u32 4788187, %v1369_v54  ;;  %v625_v47 = vshrl.u32 %v624_v5, 30  ;;  %v1001_v51 = vor.u32 %v1000_v23, %v999_v56 }
 0x127   : > { %v1004_v2 = vor.u32 %v1003_v16, %v1002_v36  ;;  %vm1510_vm9 = vcmp.gt.s32.totalorder %v9366_v11, 0  ;;  %vm970_vm10 = vcmp.lt.s32.totalorder %v9561_v49, 2  ;;  %v972_v48 = vxor.u32 2147483648, %v8680_v52 }
 0x128   : > { %v976_v38 = vsel %vm974_vm6, %v975_v13, %v8680_v52  ;;  %v1373_v24 = vcvt.s32.f32 %v1366_v14  ;;  %vm9637_vm11 = vcmp.le.f32.partialorder %v563_v35, 0.7853982  ;;  %v1010_v21 = vor.u32 %v1009_v29, %v1008_v57 }
 0x129   : > { %v1371_v33 = vand.u32 2147483647, %v1370_v53  ;;  %v626_v28 = vshll.u32 %v625_v47, 30  ;;  %v649_v19 = vsub.s32 4, %v625_v47  ;;  %vm1014_vm12 = vcmp.lt.s32.totalorder %v16155_v9, 4 }
 0x12a   : > { %vm1011_vm15 = vcmp.lt.s32.totalorder %v16155_v9, 1  ;;  %vm1012_vm0 = vcmp.lt.s32.totalorder %v16155_v9, 2  ;;  %vm1013_vm2 = vcmp.lt.s32.totalorder %v16155_v9, 3  ;;  %v1020_v17 = vsel %vm1014_vm12, %v1007_v12, 920167782 }
 0x12b   : > { %v1374_v23 = vmul.f32 %v1373_v24, %v1371_v33  ;;  %v9645_v30 = vsub.s32 %v623_v42, %v626_v28  ;;  %v1016_v35 = vsel %vm1014_vm12, %v1004_v2, 2102212464  ;;  %v1019_v62 = vsel %vm1011_vm15, %v998_v37, %v1001_v51 }
 0x12c   : > { %v973_v22 = vsel %vm971_vm5, %v8678_v0, %v972_v48  ;;  %v1021_v16 = vsel %vm1013_vm2, %v1004_v2, %v1020_v17  ;;  %v1023_v13 = vsel %vm1011_vm15, %v1001_v51, %v1004_v2  ;;  %v1024_v56 = vsel %vm1014_vm12, %v1010_v21, 1326507024 }
 0x12d   : > { %v1375_v41 = vxor.u32 2147483648, %v1374_v23  ;;  %v629_v29 = vsub.s32 0, %v9645_v30  ;;  %v650_v52 = vsel %vm565_vm8, %v649_v19, %v625_v47  ;;  %v1015_v14 = vsel %vm1011_vm15, %v995_v10, %v998_v37  ;;  %v16156_v47 = vld [vmem:[#allocation6_spill] sm:$0xff] }
 0x12e   : > { %v1017_v42 = vsel %vm1013_vm2, %v1001_v51, %v1016_v35  ;;  %v1022_v54 = vsel %vm1012_vm0, %v1019_v62, %v1021_v16  ;;  %v1025_v0 = vsel %vm1013_vm2, %v1007_v12, %v1024_v56  ;;  %v1027_v5 = vshll.u32 %v987_v44, 8  ;;  %v16157_v35 = vld [vmem:[#allocation18_spill] sm:$0xff] }
 0x12f   : > { %v1376_v36 = vsel %vm1293_vm14, %v1375_v41, %v1374_v23  ;;  %v8058_v57 = vmin.u32 %v629_v29, %v9645_v30  ;;  %v1026_v53 = vsel %vm1012_vm0, %v1023_v13, %v1025_v0  ;;  %v771_v10 = vand.u32 2147483647, %v16156_v47 }
 0x130   : > { %v1379_v37 = vsel %vm9565_vm1, %v9090_v1, %v1376_v36  ;;  %v9670_v51 = vand.u32 3, %v9598_v43  ;;  %v9672_v2 = vmul.u32.u64.low %v1027_v5, %v1026_v53  ;;  %v9673_v12 = vmul.u32.u64.high %v1027_v5, %v1026_v53, %v9672_v2 }
 0x131   : > { %v977_v44 = vsel %vm970_vm10, %v973_v22, %v976_v38  ;;  %8681 = vcosq.f32 %v1379_v37  ;;  %v631_v48 = vclz %v8058_v57  ;;  %v652_v24 = vsel %vm9637_vm11, 0, %v650_v52  ;;  %v16158_v22 = vld [vmem:[#allocation17_spill] sm:$0xff] }
 0x132   : > { %8683 = vsinq.f32 %v1379_v37  ;;  %v1018_v21 = vsel %vm1012_vm0, %v1015_v14, %v1017_v42  ;;  %v9681_v4 = vmul.u32.u64.low %v1027_v5, %v1022_v54  ;;  %v9682_v33 = vmul.u32.u64.high %v1027_v5, %v1022_v54, %v9681_v4 }
 0x133   : > { %v9688_v43 = vsel %vm1510_vm9, %v9366_v11, 0  ;;  %vm967_vm14 = vweird.f32 %v9100_v18  ;;  %v8059_v49 = vadd.s32 4294967294, %v631_v48  ;;  %v9693_v38 = vand.u32 8388607, %v771_v10 }
 0x134   : > { %v9696_v28 = vshrl.u32 %v9587_v32, 5  ;;  %v9699_v19 = vadd.s32 1, %v9593_v59  ;;  %v9701_v9 = vsel %vm967_vm14, nan, %v977_v44  ;;  %v619_v17 = vadd.s32 %v9573_v8, %v9558_v50 }
 0x135   : > { %vm1390_vm3 = vcmp.eq.s32.totalorder %v9670_v51, 2  ;;  %vm8060_vm13 = vcmp.lt.s32.totalorder %v8059_v49, 0  ;;  %v9706_v18 = vadd.s32 3, %v652_v24  ;;  %v1034_v11 = vmul.u32 %v1027_v5, %v1018_v21 }
 0x136   : > { %vm1036_vm1 = vc.u32 %v9673_v12, %v9681_v4  ;;  %vm1387_vm6 = vcmp.eq.s32.totalorder %v9670_v51, 0  ;;  %v634_v23 = vsel %vm8060_vm13, 0, %v8059_v49  ;;  %v1037_v59 = vadd.s32 1, %v9682_v33 }
 0x137   : > { %v787_v62 = vshrl.u32 %v16130_v6, %v16157_v35  ;;  %v788_v50 = vshll.u32 %v16130_v6, %v16158_v22  ;;  %vm1386_vm7 = vcmp.lt.s32.totalorder %v9670_v51, 2  ;;  %v635_v8 = vsub.s32 32, %v634_v23 }
 0x138   : > { %v639_v16 = vsub.s32 4294967266, %v634_v23  ;;  %v779_v13 = vor.u32 8388608, %v9693_v38  ;;  %v789_v56 = vshrl.u32 %v16131_v3, %v16157_v35  ;;  %vm1383_vm4 = vweird.f32 %v9090_v1 }
 0x139   : > { %v636_v41 = vshll.u32 %v9645_v30, %v634_v23  ;;  %v1038_v29 = vsel %vm1036_vm1, %v1037_v59, %v9682_v33  ;;  %v792_v52 = vshrl.u32 %v16132_v7, %v16157_v35  ;;  %v795_v14 = vshrl.u32 %v16133_v27, %v16157_v35 }
 0x13a   : > { %v637_v42 = vshrl.u32 %v619_v17, %v635_v8  ;;  %v640_v54 = vadd.s32 127, %v639_v16  ;;  %v1039_v0 = vadd.s32 %v1038_v29, %v1034_v11  ;;  %v798_v5 = vshrl.u32 %v16134_v25, %v16157_v35 }
 0x13b   : > { %v791_v36 = vshll.u32 %v16131_v3, %v16158_v22  ;;  %v794_v30 = vshll.u32 %v16132_v7, %v16158_v22  ;;  %v797_v57 = vshll.u32 %v16133_v27, %v16158_v22  ;;  %v801_v53 = vshrl.u32 %v16135_v26, %v16157_v35  ;;  %v8682_v37 = vpop.eup %8681 }
 0x13c   : > { %v638_v2 = vor.u32 %v637_v42, %v636_v41  ;;  %v641_v44 = vshll.u32 %v640_v54, 23  ;;  %vm981_vm5 = vcmp.lt.s32.totalorder %v9073_v46, 0  ;;  %v1040_v48 = vadd.s32 536870912, %v1039_v0  ;;  %v8684_v21 = vpop.eup %8683  ;;  %v16161_v41 = vld [vmem:[#allocation16_spill] sm:$0xff] }
 0x13d   : > { %v790_v24 = vor.u32 %v789_v56, %v788_v50  ;;  %v1391_v33 = vxor.u32 2147483648, %v8682_v37  ;;  %v793_v49 = vor.u32 %v792_v52, %v791_v36  ;;  %v799_v38 = vor.u32 %v798_v5, %v797_v57 }
 0x13e   : > { %v800_v17 = vshll.u32 %v16134_v25, %v16158_v22  ;;  %vm1718_vm9 = vcmp.gt.s32.totalorder %v9555_v40, 0  ;;  %v1388_v11 = vxor.u32 2147483648, %v8684_v21  ;;  %v642_v23 = vor.u32 4788187, %v641_v44 }
 0x13f   : > { %v1041_v59 = vshrl.u32 %v1040_v48, 30  ;;  %v796_v35 = vor.u32 %v795_v14, %v794_v30  ;;  %v1392_v8 = vsel %vm1390_vm3, %v1391_v33, %v8684_v21  ;;  %v645_v16 = vcvt.s32.f32 %v638_v2 }
 0x140   : > { %vm9745_vm10 = vcmp.le.f32.partialorder %v979_v34, 0.7853982  ;;  %v802_v56 = vor.u32 %v801_v53, %v800_v17  ;;  %vm803_vm12 = vcmp.lt.s32.totalorder %v16161_v41, 1  ;;  %v1389_v22 = vsel %vm1387_vm6, %v8682_v37, %v1388_v11 }
 0x141   : > { %v643_v29 = vand.u32 2147483647, %v642_v23  ;;  %v1042_v52 = vshll.u32 %v1041_v59, 30  ;;  %vm806_vm15 = vcmp.lt.s32.totalorder %v16161_v41, 4  ;;  %v1393_v14 = vsel %vm1386_vm7, %v1389_v22, %v1392_v8 }
 0x142   : > { %v1065_v42 = vsub.s32 4, %v1041_v59  ;;  %vm805_vm0 = vcmp.lt.s32.totalorder %v16161_v41, 3  ;;  %v812_v34 = vsel %vm806_vm15, %v799_v38, 920167782  ;;  %v1394_v54 = vsel %vm1383_vm4, nan, %v1393_v14 }
 0x143   : > { %v646_v5 = vmul.f32 %v645_v16, %v643_v29  ;;  %v9760_v36 = vsub.s32 %v1039_v0, %v1042_v52  ;;  %v811_v30 = vsel %vm803_vm12, %v790_v24, %v793_v49  ;;  %v8347_v57 = vpack.c.bf16 %v1394_v54, %v9701_v9 }
 0x144   : > { %vm804_vm2 = vcmp.lt.s32.totalorder %v16161_v41, 2  ;;  %v808_v51 = vsel %vm806_vm15, %v796_v35, 2102212464  ;;  %v813_v53 = vsel %vm805_vm0, %v796_v35, %v812_v34  ;;  %v807_v0 = vsel %vm803_vm12, %v787_v62, %v790_v24 }
 0x145   : > { %v647_v37 = vxor.u32 2147483648, %v646_v5  ;;  %v1045_v1 = vsub.s32 0, %v9760_v36  ;;  %v815_v2 = vsel %vm803_vm12, %v793_v49, %v796_v35  ;;  %8348 = vmatprep.subr.bf16.mxu1 %v8347_v57  ;;  %v1066_v9 = vsel %vm981_vm5, %v1065_v42, %v1041_v59 }
 0x146   : > { %v814_v44 = vsel %vm804_vm2, %v811_v30, %v813_v53  ;;  %v816_v48 = vsel %vm806_vm15, %v802_v56, 1326507024  ;;  %v819_v21 = vshll.u32 %v779_v13, 8  ;;  %v809_v62 = vsel %vm805_vm0, %v793_v49, %v808_v51 }
 0x147   : > { %v648_v33 = vsel %vm565_vm8, %v647_v37, %v646_v5  ;;  %v8074_v17 = vmin.u32 %v1045_v1, %v9760_v36  ;;  %v817_v24 = vsel %vm805_vm0, %v799_v38, %v816_v48  ;;  %v9798_v35 = vand.u32 31, %v9688_v43  ;;  %v16162_v37 = vld [vmem:[#allocation5_spill] sm:$0xff] }
 0x148   : > { %v651_v11 = vsel %vm9637_vm11, %v9082_v55, %v648_v33  ;;  %v818_v23 = vsel %vm804_vm2, %v815_v2, %v817_v24  ;;  %v9793_v59 = vmul.u32.u64.low %v819_v21, %v814_v44  ;;  %v9794_v13 = vmul.u32.u64.high %v819_v21, %v814_v44, %v9793_v59 }
 0x149   : > { %8685 = vcosq.f32 %v651_v11  ;;  %v1047_v8 = vclz %v8074_v17  ;;  %v1068_v49 = vsel %vm9745_vm10, 0, %v1066_v9  ;;  %v9805_v61 = vsel %vm1718_vm9, %v9555_v40, 0  ;;  %v16163_v9 = vld [vmem:[#allocation15_spill] sm:$0xff] }
 0x14a   : > { %vm1926_vm8 = vcmp.gt.s32.totalorder %v9699_v19, 0  ;;  %v9808_v38 = vmul.u32.u64.low %v819_v21, %v818_v23  ;;  %v9809_v16 = vmul.u32.u64.high %v819_v21, %v818_v23, %v9808_v38  ;;  %v9812_v56 = vand.u32 31, %v9587_v32 }
 0x14b   : > { %v9815_v22 = vshrl.u32 %v9688_v43, 5  ;;  %v8075_v29 = vadd.s32 4294967294, %v1047_v8  ;;  %v810_v52 = vsel %vm804_vm2, %v807_v0, %v809_v62  ;;  %8687 = vsinq.f32 %v651_v11 }
 0x14c   : > { %v9820_v14 = vand.u32 3, %v9706_v18  ;;  %v1072_v40 = vadd.s32 3, %v1068_v49  ;;  %v829_v42 = vadd.s32 1, %v9794_v13  ;;  %v9824_v34 = vsub.s32 32, %v9798_v35 }
 0x14d   : > { %v9827_v32 = vand.u32 31, %v9805_v61  ;;  %v9830_v43 = vsel %vm1926_vm8, %v9699_v19, 0  ;;  %vm8076_vm11 = vcmp.lt.s32.totalorder %v8075_v29, 0  ;;  %v9833_v41 = vadd.s32 4294967169, %v9583_v60 }
 0x14e   : > { %v1050_v54 = vsel %vm8076_vm11, 0, %v8075_v29  ;;  %v826_v5 = vmul.u32 %v819_v21, %v810_v52  ;;  %vm828_vm14 = vc.u32 %v9809_v16, %v9793_v59  ;;  %v1035_v18 = vadd.s32 %v9681_v4, %v9673_v12  ;;  %v16164_v12 = vld [vmem:[#allocation12_spill] sm:$0xff] }
 0x14f   : > { %v1051_v30 = vsub.s32 32, %v1050_v54  ;;  %v1055_v57 = vsub.s32 4294967266, %v1050_v54  ;;  %v830_v51 = vsel %vm828_vm14, %v829_v42, %v9794_v13  ;;  %vm662_vm3 = vcmp.eq.s32.totalorder %v9820_v14, 2 }
 0x150   : > { %v9841_v19 = vand.u32 3, %v1072_v40  ;;  %v831_v53 = vadd.s32 %v830_v51, %v826_v5  ;;  %v15961_v60 = vand.u32 2147483647, %v16162_v37  ;;  %v1052_v1 = vshll.u32 %v9760_v36, %v1050_v54 }
 0x151   : > { %v1053_v0 = vshrl.u32 %v1035_v18, %v1051_v30  ;;  %v1056_v2 = vadd.s32 127, %v1055_v57  ;;  %v1203_v44 = vshrl.u32 %v16130_v6, %v16163_v9  ;;  %v1204_v4 = vshll.u32 %v16130_v6, %v16164_v12 }
 0x152   : > { %v832_v48 = vadd.s32 536870912, %v831_v53  ;;  %v1205_v21 = vshrl.u32 %v16131_v3, %v16163_v9  ;;  %v1208_v33 = vshrl.u32 %v16132_v7, %v16163_v9  ;;  %v1211_v36 = vshrl.u32 %v16133_v27, %v16163_v9 }
 0x153   : > { %v8686_v17 = vpop.eup %8685  ;;  %v1054_v62 = vor.u32 %v1053_v0, %v1052_v1  ;;  %v1057_v24 = vshll.u32 %v1056_v2, 23  ;;  %v1214_v11 = vshrl.u32 %v16134_v25, %v16163_v9  ;;  %vm659_vm13 = vcmp.eq.s32.totalorder %v9820_v14, 0 }
 0x154   : > { %vm773_vm1 = vcmp.lt.s32.totalorder %v16156_v47, 0  ;;  %v833_v23 = vshrl.u32 %v832_v48, 30  ;;  %v1194_v13 = vand.u32 8388607, %v15961_v60  ;;  %v1207_v8 = vshll.u32 %v16131_v3, %v16164_v12 }
 0x155   : > { %v1217_v49 = vshrl.u32 %v16135_v26, %v16163_v9  ;;  %v663_v38 = vxor.u32 2147483648, %v8686_v17  ;;  %v1058_v29 = vor.u32 4788187, %v1057_v24  ;;  %v1210_v52 = vshll.u32 %v16132_v7, %v16164_v12  ;;  %v8688_v42 = vpop.eup %8687  ;;  %v16165_v24 = vld [vmem:[#allocation14_spill] sm:$0xff] }
 0x156   : > { %v1213_v40 = vshll.u32 %v16133_v27, %v16164_v12  ;;  %v834_v54 = vshll.u32 %v833_v23, 30  ;;  %v1206_v5 = vor.u32 %v1205_v21, %v1204_v4  ;;  %v1209_v18 = vor.u32 %v1208_v33, %v1207_v8 }
 0x157   : > { %v1216_v30 = vshll.u32 %v16134_v25, %v16164_v12  ;;  %v1059_v57 = vand.u32 2147483647, %v1058_v29  ;;  %v1061_v51 = vcvt.s32.f32 %v1054_v62  ;;  %v1212_v1 = vor.u32 %v1211_v36, %v1210_v52 }
 0x158   : > { %v1215_v0 = vor.u32 %v1214_v11, %v1213_v40  ;;  %vm658_vm6 = vcmp.lt.s32.totalorder %v9820_v14, 2  ;;  %v9872_v2 = vsub.s32 %v831_v53, %v834_v54  ;;  %v1195_v9 = vor.u32 8388608, %v1194_v13 }
 0x159   : > { %v1218_v48 = vor.u32 %v1217_v49, %v1216_v30  ;;  %vm1219_vm7 = vcmp.lt.s32.totalorder %v16165_v24, 1  ;;  %v660_v60 = vxor.u32 2147483648, %v8688_v42  ;;  %v664_v4 = vsel %vm662_vm3, %v663_v38, %v8688_v42 }
 0x15a   : > { %v1062_v21 = vmul.f32 %v1061_v51, %v1059_v57  ;;  %v857_v33 = vsub.s32 4, %v833_v23  ;;  %v837_v12 = vsub.s32 0, %v9872_v2  ;;  %vm1220_vm4 = vcmp.lt.s32.totalorder %v16165_v24, 2 }
 0x15b   : > { %vm1221_vm9 = vcmp.lt.s32.totalorder %v16165_v24, 3  ;;  %vm1222_vm12 = vcmp.lt.s32.totalorder %v16165_v24, 4  ;;  %v1227_v36 = vsel %vm1219_vm7, %v1206_v5, %v1209_v18  ;;  %v1231_v49 = vsel %vm1219_vm7, %v1209_v18, %v1212_v1 }
 0x15c   : > { %v1063_v53 = vxor.u32 2147483648, %v1062_v21  ;;  %v1224_v62 = vsel %vm1222_vm12, %v1212_v1, 2102212464  ;;  %v1228_v11 = vsel %vm1222_vm12, %v1215_v0, 920167782  ;;  %v8066_v13 = vmin.u32 %v837_v12, %v9872_v2 }
 0x15d   : > { %v1229_v8 = vsel %vm1221_vm9, %v1212_v1, %v1228_v11  ;;  %v1232_v38 = vsel %vm1222_vm12, %v1218_v48, 1326507024  ;;  %v661_v29 = vsel %vm659_vm13, %v8686_v17, %v660_v60  ;;  %v858_v40 = vsel %vm773_vm1, %v857_v33, %v833_v23 }
 0x15e   : > { %v1064_v52 = vsel %vm981_vm5, %v1063_v53, %v1062_v21  ;;  %v1233_v42 = vsel %vm1221_vm9, %v1215_v0, %v1232_v38  ;;  %v839_v30 = vclz %v8066_v13  ;;  %v1230_v57 = vsel %vm1220_vm4, %v1227_v36, %v1229_v8  ;;  %v16168_v21 = vld [vmem:[#allocation8_spill] sm:$0xff] }
 0x15f   : > { %v1067_v54 = vsel %vm9745_vm10, %v9073_v46, %v1064_v52  ;;  %v1235_v51 = vshll.u32 %v1195_v9, 8  ;;  %v1223_v60 = vsel %vm1219_vm7, %v1203_v44, %v1206_v5  ;;  %v1225_v17 = vsel %vm1221_vm9, %v1209_v18, %v1224_v62 }
 0x160   : > { %8689 = vcosq.f32 %v1067_v54  ;;  %v1234_v23 = vsel %vm1220_vm4, %v1231_v49, %v1233_v42  ;;  %v8067_v1 = vadd.s32 4294967294, %v839_v30  ;;  %v665_v48 = vsel %vm658_vm6, %v661_v29, %v664_v4 }
 0x161   : > { %8691 = vsinq.f32 %v1067_v54  ;;  %v9907_v0 = vmul.u32.u64.low %v1235_v51, %v1234_v23  ;;  %v9908_v50 = vmul.u32.u64.high %v1235_v51, %v1234_v23, %v9907_v0  ;;  %vm9914_vm5 = vcmp.le.f32.partialorder %v771_v10, 0.7853982 }
 0x162   : > { %v9918_v44 = vmul.u32.u64.low %v1235_v51, %v1230_v57  ;;  %v9919_v5 = vmul.u32.u64.high %v1235_v51, %v1230_v57, %v9918_v44  ;;  %v9923_v18 = vadd.s32 1, %v9833_v41  ;;  %vm655_vm10 = vweird.f32 %v9082_v55 }
 0x163   : > { %vm8068_vm15 = vcmp.lt.s32.totalorder %v8067_v1, 0  ;;  %v860_v14 = vsel %vm9914_vm5, 0, %v858_v40  ;;  %vm1078_vm0 = vcmp.eq.s32.totalorder %v9841_v19, 2  ;;  %v1226_v10 = vsel %vm1220_vm4, %v1223_v60, %v1225_v17 }
 0x164   : > { %v842_v4 = vsel %vm8068_vm15, 0, %v8067_v1  ;;  %v1499_v33 = vand.u32 2147483647, %v16168_v21  ;;  %v1517_v12 = vshrl.u32 %v16131_v3, %v9824_v34  ;;  %v666_v53 = vsel %vm655_vm10, nan, %v665_v48 }
 0x165   : > { %vm1075_vm2 = vcmp.eq.s32.totalorder %v9841_v19, 0  ;;  %v827_v55 = vadd.s32 %v9793_v59, %v9809_v16  ;;  %v843_v41 = vsub.s32 32, %v842_v4  ;;  %v847_v62 = vsub.s32 4294967266, %v842_v4 }
 0x166   : > { %vm1074_vm8 = vcmp.lt.s32.totalorder %v9841_v19, 2  ;;  %v9938_v36 = vadd.s32 3, %v860_v14  ;;  %vm1244_vm11 = vc.u32 %v9908_v50, %v9918_v44  ;;  %v1245_v24 = vadd.s32 1, %v9919_v5 }
 0x167   : > { %v1516_v11 = vshll.u32 %v16130_v6, %v9798_v35  ;;  %vm1071_vm14 = vweird.f32 %v9073_v46  ;;  %v844_v13 = vshll.u32 %v9872_v2, %v842_v4  ;;  %v845_v8 = vshrl.u32 %v827_v55, %v843_v41 }
 0x168   : > { %v848_v59 = vadd.s32 127, %v847_v62  ;;  %v1242_v16 = vmul.u32 %v1235_v51, %v1226_v10  ;;  %v1246_v49 = vsel %vm1244_vm11, %v1245_v24, %v9919_v5  ;;  %v1506_v38 = vand.u32 8388607, %v1499_v33 }
 0x169   : > { %v1518_v29 = vor.u32 %v1517_v12, %v1516_v11  ;;  %v1520_v52 = vshrl.u32 %v16132_v7, %v9824_v34  ;;  %v846_v40 = vor.u32 %v845_v8, %v844_v13  ;;  %v1519_v30 = vshll.u32 %v16131_v3, %v9798_v35 }
 0x16a   : > { %v849_v42 = vshll.u32 %v848_v59, 23  ;;  %v1247_v54 = vadd.s32 %v1246_v49, %v1242_v16  ;;  %v8690_v57 = vpop.eup %8689  ;;  %v1523_v2 = vshrl.u32 %v16133_v27, %v9824_v34  ;;  %v1525_v51 = vshll.u32 %v16133_v27, %v9798_v35 }
 0x16b   : > { %v1526_v60 = vshrl.u32 %v16134_v25, %v9824_v34  ;;  %v1529_v17 = vshrl.u32 %v16135_v26, %v9824_v34  ;;  %v8692_v23 = vpop.eup %8691  ;;  %v1079_v1 = vxor.u32 2147483648, %v8690_v57  ;;  %v1522_v5 = vshll.u32 %v16132_v7, %v9798_v35 }
 0x16c   : > { %v850_v0 = vor.u32 4788187, %v849_v42  ;;  %v1248_v48 = vadd.s32 536870912, %v1247_v54  ;;  %v1076_v14 = vxor.u32 2147483648, %v8692_v23  ;;  %v1521_v4 = vor.u32 %v1520_v52, %v1519_v30 }
 0x16d   : > { %v1527_v10 = vor.u32 %v1526_v60, %v1525_v51  ;;  %v1528_v12 = vshll.u32 %v16134_v25, %v9798_v35  ;;  %v1080_v55 = vsel %vm1078_vm0, %v1079_v1, %v8692_v23  ;;  %v853_v62 = vcvt.s32.f32 %v846_v40 }
 0x16e   : > { %v851_v41 = vand.u32 2147483647, %v850_v0  ;;  %v1249_v24 = vshrl.u32 %v1248_v48, 30  ;;  %v1077_v11 = vsel %vm1075_vm2, %v8690_v57, %v1076_v14  ;;  %v1507_v13 = vor.u32 8388608, %v1506_v38 }
 0x16f   : > { %v1524_v8 = vor.u32 %v1523_v2, %v1522_v5  ;;  %v1530_v59 = vor.u32 %v1529_v17, %v1528_v12  ;;  %v1081_v16 = vsel %vm1074_vm8, %v1077_v11, %v1080_v55  ;;  %vm1534_vm3 = vcmp.lt.s32.totalorder %v9815_v22, 4 }
 0x170   : > { %v854_v49 = vmul.f32 %v853_v62, %v851_v41  ;;  %v1250_v52 = vshll.u32 %v1249_v24, 30  ;;  %v1082_v35 = vsel %vm1071_vm14, nan, %v1081_v16  ;;  %vm1531_vm13 = vcmp.lt.s32.totalorder %v9815_v22, 1 }
 0x171   : > { %vm1533_vm6 = vcmp.lt.s32.totalorder %v9815_v22, 3  ;;  %v1540_v40 = vsel %vm1534_vm3, %v1527_v10, 920167782  ;;  %v8341_v38 = vpack.c.bf16 %v1082_v35, %v666_v53  ;;  %v1539_v19 = vsel %vm1531_vm13, %v1518_v29, %v1521_v4 }
 0x172   : > { %v855_v42 = vxor.u32 2147483648, %v854_v49  ;;  %v9979_v30 = vsub.s32 %v1247_v54, %v1250_v52  ;;  %v1515_v57 = vshrl.u32 %v16130_v6, %v9824_v34  ;;  %vm1532_vm7 = vcmp.lt.s32.totalorder %v9815_v22, 2 }
 0x173   : > { %v1536_v46 = vsel %vm1534_vm3, %v1524_v8, 2102212464  ;;  %v1541_v2 = vsel %vm1533_vm6, %v1524_v8, %v1540_v40  ;;  %8342 = vmatpush1.bf16.msra.mxu0 %v8341_v38  ;;  %v1273_v51 = vsub.s32 4, %v1249_v24  ;;  %v1543_v60 = vsel %vm1531_vm13, %v1521_v4, %v1524_v8 }
 0x174   : > { %v856_v53 = vsel %vm773_vm1, %v855_v42, %v854_v49  ;;  %v1253_v54 = vsub.s32 0, %v9979_v30  ;;  %v1542_v17 = vsel %vm1532_vm7, %v1539_v19, %v1541_v2  ;;  %v1544_v23 = vsel %vm1534_vm3, %v1530_v59, 1326507024 }
 0x175   : > { %v859_v34 = vsel %vm9914_vm5, %v16156_v47, %v856_v53  ;;  %v1547_v1 = vshll.u32 %v1507_v13, 8  ;;  %v1535_v48 = vsel %vm1531_vm13, %v1515_v57, %v1518_v29  ;;  %v1537_v5 = vsel %vm1533_vm6, %v1521_v4, %v1536_v46 }
 0x176   : > { %v8082_v0 = vmin.u32 %v1253_v54, %v9979_v30  ;;  %v1545_v14 = vsel %vm1533_vm6, %v1527_v10, %v1544_v23  ;;  %8693 = vcosq.f32 %v859_v34  ;;  %v10016_v41 = vadd.s32 1, %v9590_v58 }
 0x177   : > { %v1546_v9 = vsel %vm1532_vm7, %v1543_v60, %v1545_v14  ;;  %v10011_v12 = vmul.u32.u64.low %v1547_v1, %v1542_v17  ;;  %v10012_v55 = vmul.u32.u64.high %v1547_v1, %v1542_v17, %v10011_v12  ;;  %v1929_v62 = vand.u32 31, %v9830_v43 }
 0x178   : > { %vm1189_vm1 = vcmp.lt.s32.totalorder %v16162_v37, 0  ;;  %v1255_v29 = vclz %v8082_v0  ;;  %8695 = vsinq.f32 %v859_v34  ;;  %v10026_v13 = vshrl.u32 %v9805_v61, 5 }
 0x179   : > { %v1274_v4 = vsel %vm1189_vm1, %v1273_v51, %v1249_v24  ;;  %v10022_v10 = vmul.u32.u64.low %v1547_v1, %v1546_v9  ;;  %v10023_v11 = vmul.u32.u64.high %v1547_v1, %v1546_v9, %v10022_v10  ;;  %vm2134_vm4 = vcmp.gt.s32.totalorder %v9923_v18, 0 }
 0x17a   : > { %v8083_v8 = vadd.s32 4294967294, %v1255_v29  ;;  %v1538_v58 = vsel %vm1532_vm7, %v1535_v48, %v1537_v5  ;;  %v10032_v59 = vsub.s32 32, %v9827_v32  ;;  %v10035_v16 = vand.u32 3, %v9938_v36 }
 0x17b   : > { %v16169_v24 = vand.u32 2147483647, %v16162_v37  ;;  %v1557_v61 = vadd.s32 1, %v10012_v55  ;;  %v10045_v52 = vshrl.u32 %v9830_v43, 5  ;;  %v1930_v35 = vsub.s32 32, %v1929_v62 }
 0x17c   : > { %vm8084_vm12 = vcmp.lt.s32.totalorder %v8083_v8, 0  ;;  %v10050_v40 = vsel %vm2134_vm4, %v9923_v18, 0  ;;  %v1554_v38 = vmul.u32 %v1547_v1, %v1538_v58  ;;  %vm1556_vm5 = vc.u32 %v10023_v11, %v10011_v12 }
 0x17d   : > { %vm10039_vm9 = vcmp.le.f32.partialorder %v16169_v24, 0.7853982  ;;  %v1258_v36 = vsel %vm8084_vm12, 0, %v8083_v8  ;;  %v1243_v42 = vadd.s32 %v9918_v44, %v9908_v50  ;;  %v1558_v43 = vsel %vm1556_vm5, %v1557_v61, %v10012_v55 }
 0x17e   : > { %v1276_v22 = vsel %vm10039_vm9, 0, %v1274_v4  ;;  %v1259_v19 = vsub.s32 32, %v1258_v36  ;;  %v1263_v57 = vsub.s32 4294967266, %v1258_v36  ;;  %vm870_vm10 = vcmp.eq.s32.totalorder %v10035_v16, 2 }
 0x17f   : > { %v1280_v46 = vadd.s32 3, %v1276_v22  ;;  %v1559_v2 = vadd.s32 %v1558_v43, %v1554_v38  ;;  %v1915_v53 = vand.u32 2147483647, %v9127_v20  ;;  %v1260_v18 = vshll.u32 %v9979_v30, %v1258_v36 }
 0x180   : > { %v1261_v54 = vshrl.u32 %v1243_v42, %v1259_v19  ;;  %v1264_v51 = vadd.s32 127, %v1263_v57  ;;  %v1933_v60 = vshrl.u32 %v16131_v3, %v1930_v35  ;;  %v8694_v34 = vpop.eup %8693  ;;  %vm867_vm15 = vcmp.eq.s32.totalorder %v10035_v16, 0 }
 0x181   : > { %v1560_v50 = vadd.s32 536870912, %v1559_v2  ;;  %v1932_v44 = vshll.u32 %v16130_v6, %v1929_v62  ;;  %v1936_v17 = vshrl.u32 %v16132_v7, %v1930_v35  ;;  %v1942_v23 = vshrl.u32 %v16134_v25, %v1930_v35 }
 0x182   : > { %v1262_v1 = vor.u32 %v1261_v54, %v1260_v18  ;;  %v1265_v0 = vshll.u32 %v1264_v51, 23  ;;  %v1935_v48 = vshll.u32 %v16131_v3, %v1929_v62  ;;  %v1939_v30 = vshrl.u32 %v16133_v27, %v1930_v35  ;;  %v8696_v5 = vpop.eup %8695 }
 0x183   : > { %v10067_v14 = vshrl.u32 %v1560_v50, 30  ;;  %v1922_v9 = vand.u32 8388607, %v1915_v53  ;;  %v1941_v55 = vshll.u32 %v16133_v27, %v1929_v62  ;;  %v1945_v29 = vshrl.u32 %v16135_v26, %v1930_v35 }
 0x184   : > { %v871_v4 = vxor.u32 2147483648, %v8694_v34  ;;  %v1266_v10 = vor.u32 4788187, %v1265_v0  ;;  %v1934_v8 = vor.u32 %v1933_v60, %v1932_v44  ;;  %v1938_v58 = vshll.u32 %v16132_v7, %v1929_v62 }
 0x185   : > { %v1562_v24 = vshll.u32 %v10067_v14, 30  ;;  %v1937_v61 = vor.u32 %v1936_v17, %v1935_v48  ;;  %v1943_v22 = vor.u32 %v1942_v23, %v1941_v55  ;;  %v1944_v36 = vshll.u32 %v16134_v25, %v1929_v62 }
 0x186   : > { %v868_v38 = vxor.u32 2147483648, %v8696_v5  ;;  %v1267_v42 = vand.u32 2147483647, %v1266_v10  ;;  %v1269_v19 = vcvt.s32.f32 %v1262_v1  ;;  %v1940_v57 = vor.u32 %v1939_v30, %v1938_v58 }
 0x187   : > { %vm866_vm0 = vcmp.lt.s32.totalorder %v10035_v16, 2  ;;  %v10077_v43 = vand.u32 3, %v1280_v46  ;;  %v10079_v18 = vsub.s32 %v1559_v2, %v1562_v24  ;;  %v1931_v54 = vshrl.u32 %v16130_v6, %v1930_v35  ;;  %v16172_v16 = vld [vmem:[#allocation10_spill] sm:$0xff] }
 0x188   : > { %v1946_v51 = vor.u32 %v1945_v29, %v1944_v36  ;;  %v872_v60 = vsel %vm870_vm10, %v871_v4, %v8696_v5  ;;  %v1270_v50 = vmul.f32 %v1269_v19, %v1267_v42  ;;  %v1923_v44 = vor.u32 8388608, %v1922_v9 }
 0x189   : > { %vm1950_vm2 = vcmp.lt.s32.totalorder %v10045_v52, 4  ;;  %v1565_v62 = vsub.s32 0, %v10079_v18  ;;  %vm1947_vm8 = vcmp.lt.s32.totalorder %v10045_v52, 1  ;;  %vm1949_vm11 = vcmp.lt.s32.totalorder %v10045_v52, 3 }
 0x18a   : > { %v1956_v46 = vsel %vm1950_vm2, %v1943_v22, 920167782  ;;  %v869_v2 = vsel %vm867_vm15, %v8694_v34, %v868_v38  ;;  %v1271_v17 = vxor.u32 2147483648, %v1270_v50  ;;  %v1955_v35 = vsel %vm1947_vm8, %v1934_v8, %v1937_v61 }
 0x18b   : > { %v1957_v23 = vsel %vm1949_vm11, %v1940_v57, %v1956_v46  ;;  %v8094_v1 = vmin.u32 %v1565_v62, %v10079_v18  ;;  %v1952_v0 = vsel %vm1950_vm2, %v1940_v57, 2102212464  ;;  %v1959_v48 = vsel %vm1947_vm8, %v1937_v61, %v1940_v57 }
 0x18c   : > { %v1960_v30 = vsel %vm1950_vm2, %v1946_v51, 1326507024  ;;  %v1272_v5 = vsel %vm1189_vm1, %v1271_v17, %v1270_v50  ;;  %v1585_v9 = vsub.s32 4, %v10067_v14  ;;  %vm1948_vm14 = vcmp.lt.s32.totalorder %v10045_v52, 2 }
 0x18d   : > { %v1961_v34 = vsel %vm1949_vm11, %v1943_v22, %v1960_v30  ;;  %v1275_v55 = vsel %vm10039_vm9, %v16162_v37, %v1272_v5  ;;  %v1567_v29 = vclz %v8094_v1  ;;  %v1958_v4 = vsel %vm1948_vm14, %v1955_v35, %v1957_v23 }
 0x18e   : > { %v1963_v10 = vshll.u32 %v1923_v44, 8  ;;  %8697 = vcosq.f32 %v1275_v55  ;;  %v1951_v58 = vsel %vm1947_vm8, %v1931_v54, %v1934_v8  ;;  %v1953_v24 = vsel %vm1949_vm11, %v1937_v61, %v1952_v0 }
 0x18f   : > { %v1962_v36 = vsel %vm1948_vm14, %v1959_v48, %v1961_v34  ;;  %8699 = vsinq.f32 %v1275_v55  ;;  %v8095_v22 = vadd.s32 4294967294, %v1567_v29  ;;  %v10118_v42 = vand.u32 31, %v10050_v40 }
 0x190   : > { %v10114_v38 = vmul.u32.u64.low %v1963_v10, %v1962_v36  ;;  %v10115_v49 = vmul.u32.u64.high %v1963_v10, %v1962_v36, %v10114_v38  ;;  %v873_v19 = vsel %vm866_vm0, %v869_v2, %v872_v60  ;;  %vm863_vm3 = vweird.f32 %v16156_v47 }
 0x191   : > { %v10122_v57 = vmul.u32.u64.low %v1963_v10, %v1958_v4  ;;  %v10123_v51 = vmul.u32.u64.high %v1963_v10, %v1958_v4, %v10122_v57  ;;  %vm1501_vm13 = vcmp.lt.s32.totalorder %v16168_v21, 0  ;;  %vm8096_vm6 = vcmp.lt.s32.totalorder %v8095_v22, 0 }
 0x192   : > { %v1954_v8 = vsel %vm1948_vm14, %v1951_v58, %v1953_v24  ;;  %vm1286_vm7 = vcmp.eq.s32.totalorder %v10077_v43, 2  ;;  %v1555_v61 = vadd.s32 %v10011_v12, %v10023_v11  ;;  %v1570_v54 = vsel %vm8096_vm6, 0, %v8095_v22 }
 0x193   : > { %v1707_v60 = vand.u32 2147483647, %v16172_v16  ;;  %v10134_v50 = vsel %vm863_vm3, nan, %v873_v19  ;;  %vm1283_vm1 = vcmp.eq.s32.totalorder %v10077_v43, 0  ;;  %v1571_v44 = vsub.s32 32, %v1570_v54 }
 0x194   : > { %v1575_v47 = vsub.s32 4294967266, %v1570_v54  ;;  %v10140_v62 = vsel %vm1501_vm13, %v1585_v9, %v10067_v14  ;;  %vm1282_vm4 = vcmp.lt.s32.totalorder %v10077_v43, 2  ;;  %v1970_v52 = vmul.u32 %v1963_v10, %v1954_v8 }
 0x195   : > { %vm1972_vm9 = vc.u32 %v10115_v49, %v10122_v57  ;;  %v1973_v12 = vadd.s32 1, %v10123_v51  ;;  %v1725_v11 = vshrl.u32 %v16131_v3, %v10032_v59  ;;  %vm1279_vm12 = vweird.f32 %v16162_v37 }
 0x196   : > { %v1572_v46 = vshll.u32 %v10079_v18, %v1570_v54  ;;  %v1573_v2 = vshrl.u32 %v1555_v61, %v1571_v44  ;;  %v1576_v17 = vadd.s32 127, %v1575_v47  ;;  %v1724_v14 = vshll.u32 %v16130_v6, %v9827_v32 }
 0x197   : > { %v1974_v35 = vsel %vm1972_vm9, %v1973_v12, %v10123_v51  ;;  %v1714_v23 = vand.u32 8388607, %v1707_v60  ;;  %v1728_v1 = vshrl.u32 %v16132_v7, %v10032_v59  ;;  %v1734_v0 = vshrl.u32 %v16134_v25, %v10032_v59 }
 0x198   : > { %v1574_v48 = vor.u32 %v1573_v2, %v1572_v46  ;;  %v1577_v30 = vshll.u32 %v1576_v17, 23  ;;  %v1975_v5 = vadd.s32 %v1974_v35, %v1970_v52  ;;  %v1727_v18 = vshll.u32 %v16131_v3, %v9827_v32  ;;  %v8698_v9 = vpop.eup %8697 }
 0x199   : > { %vm10163_vm5 = vcmp.le.f32.partialorder %v1499_v33, 0.7853982  ;;  %v1726_v55 = vor.u32 %v1725_v11, %v1724_v14  ;;  %v1731_v29 = vshrl.u32 %v16133_v27, %v10032_v59  ;;  %v1733_v4 = vshll.u32 %v16133_v27, %v9827_v32  ;;  %v8700_v58 = vpop.eup %8699 }
 0x19a   : > { %v1737_v10 = vshrl.u32 %v16135_v26, %v10032_v59  ;;  %v1287_v24 = vxor.u32 2147483648, %v8698_v9  ;;  %v1578_v36 = vor.u32 4788187, %v1577_v30  ;;  %v1976_v22 = vadd.s32 536870912, %v1975_v5 }
 0x19b   : > { %v1730_v33 = vshll.u32 %v16132_v7, %v9827_v32  ;;  %v1284_v38 = vxor.u32 2147483648, %v8700_v58  ;;  %v1729_v19 = vor.u32 %v1728_v1, %v1727_v18  ;;  %v1735_v51 = vor.u32 %v1734_v0, %v1733_v4 }
 0x19c   : > { %v1736_v8 = vshll.u32 %v16134_v25, %v9827_v32  ;;  %vm1614_vm10 = vcmp.gt.s32.totalorder %v9472_v63, 0  ;;  %v1288_v61 = vsel %vm1286_vm7, %v1287_v24, %v8700_v58  ;;  %v1579_v54 = vand.u32 2147483647, %v1578_v36 }
 0x19d   : > { %v1581_v44 = vcvt.s32.f32 %v1574_v48  ;;  %v1977_v47 = vshrl.u32 %v1976_v22, 30  ;;  %v1285_v52 = vsel %vm1283_vm1, %v8698_v9, %v1284_v38  ;;  %v1715_v12 = vor.u32 8388608, %v1714_v23 }
 0x19e   : > { %v1732_v11 = vor.u32 %v1731_v29, %v1730_v33  ;;  %v1738_v46 = vor.u32 %v1737_v10, %v1736_v8  ;;  %v1289_v2 = vsel %vm1282_vm4, %v1285_v52, %v1288_v61  ;;  %vm1742_vm15 = vcmp.lt.s32.totalorder %v10026_v13, 4 }
 0x19f   : > { %v1582_v17 = vmul.f32 %v1581_v44, %v1579_v54  ;;  %v1978_v14 = vshll.u32 %v1977_v47, 30  ;;  %v1290_v32 = vsel %vm1279_vm12, nan, %v1289_v2  ;;  %vm1739_vm0 = vcmp.lt.s32.totalorder %v10026_v13, 1 }
 0x1a0   : > { %vm1741_vm2 = vcmp.lt.s32.totalorder %v10026_v13, 3  ;;  %v1748_v35 = vsel %vm1742_vm15, %v1735_v51, 920167782  ;;  %v8349_v23 = vpack.c.bf16 %v1290_v32, %v10134_v50  ;;  %v1747_v43 = vsel %vm1739_vm0, %v1726_v55, %v1729_v19 }
 0x1a1   : > { %v1583_v1 = vxor.u32 2147483648, %v1582_v17  ;;  %v10192_v0 = vsub.s32 %v1975_v5, %v1978_v14  ;;  %v2001_v48 = vsub.s32 4, %v1977_v47  ;;  %v1749_v37 = vsel %vm1741_vm2, %v1732_v11, %v1748_v35 }
 0x1a2   : > { %v1751_v30 = vsel %vm1739_vm0, %v1729_v19, %v1732_v11  ;;  %v1752_v18 = vsel %vm1742_vm15, %v1738_v46, 1326507024  ;;  %8350 = vmatpush1.bf16.msra.mxu1 %v8349_v23  ;;  %v1588_v50 = vsel %vm10163_vm5, 0, %v10140_v62  ;;  %vm1917_vm8 = vcmp.lt.s32.totalorder %v9127_v20, 0 }
 0x1a3   : > { %v1981_v5 = vsub.s32 0, %v10192_v0  ;;  %vm1740_vm11 = vcmp.lt.s32.totalorder %v10026_v13, 2  ;;  %v1584_v9 = vsel %vm1501_vm13, %v1583_v1, %v1582_v17  ;;  %v1744_v29 = vsel %vm1742_vm15, %v1732_v11, 2102212464 }
 0x1a4   : > { %v1753_v4 = vsel %vm1741_vm2, %v1735_v51, %v1752_v18  ;;  %v1755_v10 = vshll.u32 %v1715_v12, 8  ;;  %v1723_v62 = vshrl.u32 %v16130_v6, %v10032_v59  ;;  %v1750_v24 = vsel %vm1740_vm11, %v1747_v43, %v1749_v37 }
 0x1a5   : > { %v8110_v58 = vmin.u32 %v1981_v5, %v10192_v0  ;;  %v1754_v36 = vsel %vm1740_vm11, %v1751_v30, %v1753_v4  ;;  %v1592_v22 = vadd.s32 3, %v1588_v50  ;;  %v2002_v33 = vsel %vm1917_vm8, %v2001_v48, %v1977_v47 }
 0x1a6   : > { %v10223_v38 = vmul.u32.u64.low %v1755_v10, %v1754_v36  ;;  %v10224_v8 = vmul.u32.u64.high %v1755_v10, %v1754_v36, %v10223_v38  ;;  %v1587_v51 = vsel %vm10163_vm5, %v16168_v21, %v1584_v9  ;;  %v1743_v59 = vsel %vm1739_vm0, %v1723_v62, %v1726_v55 }
 0x1a7   : > { %v1983_v61 = vclz %v8110_v58  ;;  %v1745_v54 = vsel %vm1741_vm2, %v1729_v19, %v1744_v29  ;;  %v10236_v44 = vsel %vm1614_vm10, %v9472_v63, 0  ;;  %vm10240_vm14 = vcmp.le.f32.partialorder %v1915_v53, 0.7853982 }
 0x1a8   : > { %v10244_v34 = vmul.u32.u64.low %v1755_v10, %v1750_v24  ;;  %v10245_v52 = vmul.u32.u64.high %v1755_v10, %v1750_v24, %v10244_v34  ;;  %vm1822_vm3 = vcmp.gt.s32.totalorder %v10016_v41, 0  ;;  %v10250_v55 = vshrl.u32 %v10050_v40, 5 }
 0x1a9   : > { %v8111_v19 = vadd.s32 4294967294, %v1983_v61  ;;  %v2004_v63 = vsel %vm10240_vm14, 0, %v2002_v33  ;;  %v2138_v12 = vsub.s32 32, %v10118_v42  ;;  %8701 = vcosq.f32 %v1587_v51 }
 0x1aa   : > { %v10255_v53 = vand.u32 3, %v1592_v22  ;;  %v1746_v11 = vsel %vm1740_vm11, %v1743_v59, %v1745_v54  ;;  %8703 = vsinq.f32 %v1587_v51  ;;  %v1971_v46 = vadd.s32 %v10122_v57, %v10115_v49 }
 0x1ab   : > { %vm8112_vm13 = vcmp.lt.s32.totalorder %v8111_v19, 0  ;;  %vm1764_vm6 = vc.u32 %v10224_v8, %v10244_v34  ;;  %v2008_v2 = vadd.s32 3, %v2004_v63  ;;  %v1765_v17 = vadd.s32 1, %v10245_v52 }
 0x1ac   : > { %v1986_v40 = vsel %vm8112_vm13, 0, %v8111_v19  ;;  %v2123_v14 = vand.u32 2147483647, %v9131_v31  ;;  %v1762_v23 = vmul.u32 %v1755_v10, %v1746_v11  ;;  %v2140_v13 = vshll.u32 %v16130_v6, %v10118_v42 }
 0x1ad   : > { %v1987_v32 = vsub.s32 32, %v1986_v40  ;;  %v1991_v35 = vsub.s32 4294967266, %v1986_v40  ;;  %v1988_v1 = vshll.u32 %v10192_v0, %v1986_v40  ;;  %v1766_v49 = vsel %vm1764_vm6, %v1765_v17, %v10245_v52 }
 0x1ae   : > { %v2141_v57 = vshrl.u32 %v16131_v3, %v2138_v12  ;;  %v2144_v43 = vshrl.u32 %v16132_v7, %v2138_v12  ;;  %v1767_v30 = vadd.s32 %v1766_v49, %v1762_v23  ;;  %v2150_v18 = vshrl.u32 %v16134_v25, %v2138_v12 }
 0x1af   : > { %v1989_v48 = vshrl.u32 %v1971_v46, %v1987_v32  ;;  %v1992_v37 = vadd.s32 127, %v1991_v35  ;;  %v2130_v50 = vand.u32 8388607, %v2123_v14  ;;  %v2143_v5 = vshll.u32 %v16131_v3, %v10118_v42 }
 0x1b0   : > { %v2147_v9 = vshrl.u32 %v16133_v27, %v2138_v12  ;;  %v2149_v0 = vshll.u32 %v16133_v27, %v10118_v42  ;;  %v1768_v10 = vadd.s32 536870912, %v1767_v30  ;;  %v2146_v58 = vshll.u32 %v16132_v7, %v10118_v42 }
 0x1b1   : > { %v1990_v29 = vor.u32 %v1989_v48, %v1988_v1  ;;  %v1993_v4 = vshll.u32 %v1992_v37, 23  ;;  %v2142_v62 = vor.u32 %v2141_v57, %v2140_v13  ;;  %v2145_v24 = vor.u32 %v2144_v43, %v2143_v5 }
 0x1b2   : > { %v2151_v36 = vor.u32 %v2150_v18, %v2149_v0  ;;  %v2153_v22 = vshrl.u32 %v16135_v26, %v2138_v12  ;;  %v10285_v33 = vsel %vm1822_vm3, %v10016_v41, 0  ;;  %v10287_v51 = vand.u32 3, %v2008_v2 }
 0x1b3   : > { %v1994_v38 = vor.u32 4788187, %v1993_v4  ;;  %v1769_v61 = vshrl.u32 %v1768_v10, 30  ;;  %v8702_v59 = vpop.eup %8701  ;;  %vm1595_vm7 = vcmp.eq.s32.totalorder %v10255_v53, 0  ;;  %vm1598_vm1 = vcmp.eq.s32.totalorder %v10255_v53, 2 }
 0x1b4   : > { %v2139_v54 = vshrl.u32 %v16130_v6, %v2138_v12  ;;  %v2148_v52 = vor.u32 %v2147_v9, %v2146_v58  ;;  %v2152_v19 = vshll.u32 %v16134_v25, %v10118_v42  ;;  %vm2155_vm4 = vcmp.lt.s32.totalorder %v10250_v55, 1  ;;  %v8704_v63 = vpop.eup %8703 }
 0x1b5   : > { %v1995_v41 = vand.u32 2147483647, %v1994_v38  ;;  %v1997_v11 = vcvt.s32.f32 %v1990_v29  ;;  %vm1709_vm9 = vcmp.lt.s32.totalorder %v16172_v16, 0  ;;  %v1770_v46 = vshll.u32 %v1769_v61, 30 }
 0x1b6   : > { %vm2158_vm12 = vcmp.lt.s32.totalorder %v10250_v55, 4  ;;  %v2131_v40 = vor.u32 8388608, %v2130_v50  ;;  %v2154_v2 = vor.u32 %v2153_v22, %v2152_v19  ;;  %v2163_v17 = vsel %vm2155_vm4, %v2142_v62, %v2145_v24 }
 0x1b7   : > { %v2164_v12 = vsel %vm2158_vm12, %v2151_v36, 920167782  ;;  %v1599_v32 = vxor.u32 2147483648, %v8702_v59  ;;  %v1998_v42 = vmul.f32 %v1997_v11, %v1995_v41  ;;  %v10301_v35 = vsub.s32 %v1767_v30, %v1770_v46 }
 0x1b8   : > { %vm2157_vm5 = vcmp.lt.s32.totalorder %v10250_v55, 3  ;;  %v1596_v23 = vxor.u32 2147483648, %v8704_v63  ;;  %vm2156_vm10 = vcmp.lt.s32.totalorder %v10250_v55, 2  ;;  %v2160_v13 = vsel %vm2158_vm12, %v2148_v52, 2102212464 }
 0x1b9   : > { %v2165_v1 = vsel %vm2157_vm5, %v2148_v52, %v2164_v12  ;;  %v1999_v49 = vxor.u32 2147483648, %v1998_v42  ;;  %v1773_v57 = vsub.s32 0, %v10301_v35  ;;  %v2167_v48 = vsel %vm2155_vm4, %v2145_v24, %v2148_v52 }
 0x1ba   : > { %v2166_v43 = vsel %vm2156_vm10, %v2163_v17, %v2165_v1  ;;  %v1793_v37 = vsub.s32 4, %v1769_v61  ;;  %v2159_v30 = vsel %vm2155_vm4, %v2139_v54, %v2142_v62  ;;  %v2168_v18 = vsel %vm2158_vm12, %v2154_v2, 1326507024 }
 0x1bb   : > { %v2171_v50 = vshll.u32 %v2131_v40, 8  ;;  %v2000_v5 = vsel %vm1917_vm8, %v1999_v49, %v1998_v42  ;;  %v8102_v9 = vmin.u32 %v1773_v57, %v10301_v35  ;;  %v2161_v0 = vsel %vm2157_vm5, %v2145_v24, %v2160_v13 }
 0x1bc   : > { %v2169_v29 = vsel %vm2157_vm5, %v2151_v36, %v2168_v18  ;;  %v2003_v4 = vsel %vm10240_vm14, %v9127_v20, %v2000_v5  ;;  %v1597_v22 = vsel %vm1595_vm7, %v8702_v59, %v1596_v23  ;;  %v1600_v24 = vsel %vm1598_vm1, %v1599_v32, %v8704_v63 }
 0x1bd   : > { %v2170_v10 = vsel %vm2156_vm10, %v2167_v48, %v2169_v29  ;;  %v10330_v58 = vmul.u32.u64.low %v2171_v50, %v2166_v43  ;;  %v10331_v62 = vmul.u32.u64.high %v2171_v50, %v2166_v43, %v10330_v58  ;;  %8705 = vcosq.f32 %v2003_v4 }
 0x1be   : > { %v1775_v38 = vclz %v8102_v9  ;;  %8707 = vsinq.f32 %v2003_v4  ;;  %v1794_v47 = vsel %vm1709_vm9, %v1793_v37, %v1769_v61  ;;  %v1410_v52 = vsub.s32 32, %v9812_v56 }
 0x1bf   : > { %v10340_v36 = vmul.u32.u64.low %v2171_v50, %v2170_v10  ;;  %v10341_v54 = vmul.u32.u64.high %v2171_v50, %v2170_v10, %v10340_v36  ;;  %v10345_v19 = vand.u32 31, %v10285_v33  ;;  %v2162_v59 = vsel %vm2156_vm10, %v2159_v30, %v2161_v0 }
 0x1c0   : > { %v8103_v41 = vadd.s32 4294967294, %v1775_v38  ;;  %vm1591_vm15 = vweird.f32 %v16168_v21  ;;  %vm1594_vm0 = vcmp.lt.s32.totalorder %v10255_v53, 2  ;;  %vm10353_vm2 = vcmp.le.f32.partialorder %v1707_v60, 0.7853982  ;;  %v16179_v60 = vld [vmem:[#allocation7_spill] sm:$0xff] }
 0x1c1   : > { %v2181_v63 = vadd.s32 1, %v10331_v62  ;;  %v1601_v11 = vsel %vm1594_vm0, %v1597_v22, %v1600_v24  ;;  %vm2014_vm8 = vcmp.eq.s32.totalorder %v10287_v51, 2  ;;  %v1763_v46 = vadd.s32 %v10244_v34, %v10224_v8 }
 0x1c2   : > { %vm8104_vm11 = vcmp.lt.s32.totalorder %v8103_v41, 0  ;;  %v1796_v55 = vsel %vm10353_vm2, 0, %v1794_v47  ;;  %vm2011_vm14 = vcmp.eq.s32.totalorder %v10287_v51, 0  ;;  %v2178_v40 = vmul.u32 %v2171_v50, %v2162_v59 }
 0x1c3   : > { %v1778_v53 = vsel %vm8104_vm11, 0, %v8103_v41  ;;  %vm2180_vm3 = vc.u32 %v10341_v54, %v10330_v58  ;;  %v1395_v2 = vand.u32 2147483647, %v16179_v60  ;;  %vm2010_vm13 = vcmp.lt.s32.totalorder %v10287_v51, 2 }
 0x1c4   : > { %v1779_v17 = vsub.s32 32, %v1778_v53  ;;  %v1783_v12 = vsub.s32 4294967266, %v1778_v53  ;;  %v2182_v32 = vsel %vm2180_vm3, %v2181_v63, %v10331_v62  ;;  %v1413_v8 = vshrl.u32 %v16131_v3, %v1410_v52 }
 0x1c5   : > { %v1602_v34 = vsel %vm1591_vm15, nan, %v1601_v11  ;;  %vm2007_vm6 = vweird.f32 %v9127_v20  ;;  %v10373_v42 = vadd.s32 3, %v1796_v55  ;;  %v2183_v23 = vadd.s32 %v2182_v32, %v2178_v40 }
 0x1c6   : > { %v1412_v13 = vshll.u32 %v16130_v6, %v9812_v56  ;;  %v1780_v1 = vshll.u32 %v10301_v35, %v1778_v53  ;;  %v1781_v49 = vshrl.u32 %v1763_v46, %v1779_v17  ;;  %v1784_v57 = vadd.s32 127, %v1783_v12 }
 0x1c7   : > { %v1416_v43 = vshrl.u32 %v16132_v7, %v1410_v52  ;;  %v2184_v48 = vadd.s32 536870912, %v2183_v23  ;;  %v1402_v37 = vand.u32 8388607, %v1395_v2  ;;  %v1415_v21 = vshll.u32 %v16131_v3, %v9812_v56  ;;  %v8706_v18 = vpop.eup %8705 }
 0x1c8   : > { %v1419_v30 = vshrl.u32 %v16133_v27, %v1410_v52  ;;  %v1782_v50 = vor.u32 %v1781_v49, %v1780_v1  ;;  %v1785_v5 = vshll.u32 %v1784_v57, 23  ;;  %v1414_v9 = vor.u32 %v1413_v8, %v1412_v13  ;;  %v8708_v35 = vpop.eup %8707 }
 0x1c9   : > { %v1422_v0 = vshrl.u32 %v16134_v25, %v1410_v52  ;;  %v2015_v29 = vxor.u32 2147483648, %v8706_v18  ;;  %v2185_v4 = vshrl.u32 %v2184_v48, 30  ;;  %v1418_v10 = vshll.u32 %v16132_v7, %v9812_v56 }
 0x1ca   : > { %v1425_v62 = vshrl.u32 %v16135_v26, %v1410_v52  ;;  %v2012_v22 = vxor.u32 2147483648, %v8708_v35  ;;  %v1786_v24 = vor.u32 4788187, %v1785_v5  ;;  %v1417_v38 = vor.u32 %v1416_v43, %v1415_v21 }
 0x1cb   : > { %v1421_v47 = vshll.u32 %v16133_v27, %v9812_v56  ;;  %v2016_v36 = vsel %vm2014_vm8, %v2015_v29, %v8708_v35  ;;  %v2186_v41 = vshll.u32 %v2185_v4, 30  ;;  %v1420_v59 = vor.u32 %v1419_v30, %v1418_v10 }
 0x1cc   : > { %v1424_v63 = vshll.u32 %v16134_v25, %v9812_v56  ;;  %v2013_v11 = vsel %vm2011_vm14, %v8706_v18, %v2012_v22  ;;  %v1787_v46 = vand.u32 2147483647, %v1786_v24  ;;  %v1789_v55 = vcvt.s32.f32 %v1782_v50 }
 0x1cd   : > { %v1423_v53 = vor.u32 %v1422_v0, %v1421_v47  ;;  %v2017_v40 = vsel %vm2010_vm13, %v2013_v11, %v2016_v36  ;;  %vm2125_vm7 = vcmp.lt.s32.totalorder %v9131_v31, 0  ;;  %v10399_v17 = vsub.s32 %v2183_v23, %v2186_v41 }
 0x1ce   : > { %v1411_v12 = vshrl.u32 %v16130_v6, %v1410_v52  ;;  %v1426_v32 = vor.u32 %v1425_v62, %v1424_v63  ;;  %v2018_v8 = vsel %vm2007_vm6, nan, %v2017_v40  ;;  %v1790_v56 = vmul.f32 %v1789_v55, %v1787_v46 }
 0x1cf   : > { %v1403_v13 = vor.u32 8388608, %v1402_v37  ;;  %vm1427_vm1 = vcmp.lt.s32.totalorder %v9696_v28, 1  ;;  %v8343_v1 = vpack.c.bf16 %v2018_v8, %v1602_v34  ;;  %v2189_v49 = vsub.s32 0, %v10399_v17 }
 0x1d0   : > { %vm1429_vm4 = vcmp.lt.s32.totalorder %v9696_v28, 3  ;;  %vm1430_vm12 = vcmp.lt.s32.totalorder %v9696_v28, 4  ;;  %v1791_v51 = vxor.u32 2147483648, %v1790_v56  ;;  %v1435_v52 = vsel %vm1427_vm1, %v1414_v9, %v1417_v38 }
 0x1d1   : > { %v1432_v23 = vsel %vm1430_vm12, %v1420_v59, 2102212464  ;;  %v1436_v57 = vsel %vm1430_vm12, %v1423_v53, 920167782  ;;  %8344 = vmatprep.subr.bf16.mxu0 %v8343_v1  ;;  %v8118_v20 = vmin.u32 %v2189_v49, %v10399_v17  ;;  %v1439_v34 = vsel %vm1427_vm1, %v1417_v38, %v1420_v59 }
 0x1d2   : > { %v1437_v43 = vsel %vm1429_vm4, %v1420_v59, %v1436_v57  ;;  %v1440_v48 = vsel %vm1430_vm12, %v1426_v32, 1326507024  ;;  %v1792_v37 = vsel %vm1709_vm9, %v1791_v51, %v1790_v56  ;;  %v2209_v21 = vsub.s32 4, %v2185_v4 }
 0x1d3   : > { %vm1428_vm5 = vcmp.lt.s32.totalorder %v9696_v28, 2  ;;  %v1441_v30 = vsel %vm1429_vm4, %v1423_v53, %v1440_v48  ;;  %v1795_v18 = vsel %vm10353_vm2, %v16172_v16, %v1792_v37  ;;  %v2191_v50 = vclz %v8118_v20 }
 0x1d4   : > { %v1438_v5 = vsel %vm1428_vm5, %v1435_v52, %v1437_v43  ;;  %v1443_v0 = vshll.u32 %v1403_v13, 8  ;;  %8709 = vcosq.f32 %v1795_v18  ;;  %v1431_v35 = vsel %vm1427_vm1, %v1411_v12, %v1414_v9 }
 0x1d5   : > { %v1433_v29 = vsel %vm1429_vm4, %v1417_v38, %v1432_v23  ;;  %v1442_v10 = vsel %vm1428_vm5, %v1439_v34, %v1441_v30  ;;  %8711 = vsinq.f32 %v1795_v18  ;;  %v8119_v62 = vadd.s32 4294967294, %v2191_v50 }
 0x1d6   : > { %v10431_v22 = vmul.u32.u64.low %v1443_v0, %v1442_v10  ;;  %v10432_v61 = vmul.u32.u64.high %v1443_v0, %v1442_v10, %v10431_v22  ;;  %v10435_v24 = vand.u32 31, %v10236_v44  ;;  %v2210_v47 = vsel %vm2125_vm7, %v2209_v21, %v2185_v4 }
 0x1d7   : > { %v10439_v36 = vmul.u32.u64.low %v1443_v0, %v1438_v5  ;;  %v10440_v41 = vmul.u32.u64.high %v1443_v0, %v1438_v5, %v10439_v36  ;;  %v1826_v9 = vsub.s32 32, %v10345_v19  ;;  %v10445_v38 = vadd.s32 4294967169, %v9579_v45 }
 0x1d8   : > { %vm8120_vm9 = vcmp.lt.s32.totalorder %v8119_v62, 0  ;;  %v1434_v59 = vsel %vm1428_vm5, %v1431_v35, %v1433_v29  ;;  %v10450_v63 = vshrl.u32 %v10285_v33, 5  ;;  %v10453_v11 = vand.u32 3, %v10373_v42 }
 0x1d9   : > { %vm10457_vm10 = vcmp.le.f32.partialorder %v2123_v14, 0.7853982  ;;  %v2194_v46 = vsel %vm8120_vm9, 0, %v8119_v62  ;;  %v2179_v45 = vadd.s32 %v10330_v58, %v10341_v54  ;;  %v1450_v33 = vmul.u32 %v1443_v0, %v1434_v59 }
 0x1da   : > { %v2195_v55 = vsub.s32 32, %v2194_v46  ;;  %v2199_v53 = vsub.s32 4294967266, %v2194_v46  ;;  %v2212_v28 = vsel %vm10457_vm10, 0, %v2210_v47  ;;  %vm1452_vm15 = vc.u32 %v10432_v61, %v10439_v36 }
 0x1db   : > { %v1453_v42 = vadd.s32 1, %v10440_v41  ;;  %v1811_v14 = vand.u32 2147483647, %v9125_v15  ;;  %v2196_v40 = vshll.u32 %v10399_v17, %v2194_v46  ;;  %v1829_v8 = vshrl.u32 %v16131_v3, %v1826_v9 }
 0x1dc   : > { %v2197_v12 = vshrl.u32 %v2179_v45, %v2195_v55  ;;  %v2200_v32 = vadd.s32 127, %v2199_v53  ;;  %vm1806_vm0 = vcmp.eq.s32.totalorder %v10453_v11, 2  ;;  %v10472_v58 = vadd.s32 3, %v2212_v28 }
 0x1dd   : > { %v1454_v54 = vsel %vm1452_vm15, %v1453_v42, %v10440_v41  ;;  %v1832_v56 = vshrl.u32 %v16132_v7, %v1826_v9  ;;  %vm1803_vm2 = vcmp.eq.s32.totalorder %v10453_v11, 0  ;;  %v1828_v17 = vshll.u32 %v16130_v6, %v10345_v19 }
 0x1de   : > { %v2198_v13 = vor.u32 %v2197_v12, %v2196_v40  ;;  %v2201_v1 = vshll.u32 %v2200_v32, 23  ;;  %v1455_v49 = vadd.s32 %v1454_v54, %v1450_v33  ;;  %v8710_v51 = vpop.eup %8709  ;;  %v1831_v23 = vshll.u32 %v16131_v3, %v10345_v19  ;;  %v2231_v32 = vld [vmem:[%s15912_s4] sm:$0xff] }
 0x1df   : > { %v1835_v52 = vshrl.u32 %v16133_v27, %v1826_v9  ;;  %v1837_v57 = vshll.u32 %v16133_v27, %v10345_v19  ;;  %v1838_v20 = vshrl.u32 %v16134_v25, %v1826_v9  ;;  %v8712_v43 = vpop.eup %8711  ;;  %v1818_v37 = vand.u32 8388607, %v1811_v14  ;;  %2237 = vperm.xlu1 %8667, %v2231_v32  }
 0x1e0   : > { %v2202_v34 = vor.u32 4788187, %v2201_v1  ;;  %v1456_v48 = vadd.s32 536870912, %v1455_v49  ;;  %v1830_v21 = vor.u32 %v1829_v8, %v1828_v17  ;;  %v1833_v30 = vor.u32 %v1832_v56, %v1831_v23  ;;  %v2232_v8 = vld [vmem:[%s15912_s4 + $0x8] sm:$0xff] }
 0x1e1   : > { %v1834_v18 = vshll.u32 %v16132_v7, %v10345_v19  ;;  %v1839_v50 = vor.u32 %v1838_v20, %v1837_v57  ;;  %v1841_v5 = vshrl.u32 %v16135_v26, %v1826_v9  ;;  %v1807_v0 = vxor.u32 2147483648, %v8710_v51  ;;  %2242 = vperm.xlu0 %8668, %v2232_v8   ;;  %v4114_v57 = vld [vmem:[%s15914_s6] sm:$0xff] }
 0x1e2   : > { %v2203_v35 = vand.u32 2147483647, %v2202_v34  ;;  %v2205_v29 = vcvt.s32.f32 %v2198_v13  ;;  %v10490_v10 = vshrl.u32 %v1456_v48, 30  ;;  %v1804_v62 = vxor.u32 2147483648, %v8712_v43 }
 0x1e3   : > { %v1827_v22 = vshrl.u32 %v16130_v6, %v1826_v9  ;;  %v1836_v47 = vor.u32 %v1835_v52, %v1834_v18  ;;  %v1840_v41 = vshll.u32 %v16134_v25, %v10345_v19  ;;  %vm1843_vm8 = vcmp.lt.s32.totalorder %v10450_v63, 1  ;;  %v2233_v52 = vld [vmem:[%s15912_s4 + $0x10] sm:$0xff] }
 0x1e4   : > { %v2206_v59 = vmul.f32 %v2205_v29, %v2203_v35  ;;  %v1458_v46 = vshll.u32 %v10490_v10, 30  ;;  %vm1846_vm11 = vcmp.lt.s32.totalorder %v10450_v63, 4  ;;  %v1819_v45 = vor.u32 8388608, %v1818_v37  ;;  %2247 = vperm.xlu1 %8667, %v2233_v52  }
 0x1e5   : > { %v1842_v55 = vor.u32 %v1841_v5, %v1840_v41  ;;  %v1851_v53 = vsel %vm1843_vm8, %v1830_v21, %v1833_v30  ;;  %v1852_v28 = vsel %vm1846_vm11, %v1839_v50, 920167782  ;;  %v1808_v9 = vsel %vm1806_vm0, %v1807_v0, %v8712_v43  ;;  %4120 = vperm.xlu0 %8668, %v4114_v57   ;;  %v2234_v0 = vld [vmem:[%s15912_s4 + $0x18] sm:$0xff] }
 0x1e6   : > { %v2207_v33 = vxor.u32 2147483648, %v2206_v59  ;;  %v10504_v19 = vsub.s32 %v1455_v49, %v1458_v46  ;;  %vm1845_vm14 = vcmp.lt.s32.totalorder %v10450_v63, 3  ;;  %v1805_v42 = vsel %vm1803_vm2, %v8710_v51, %v1804_v62  ;;  %v4115_v46 = vld [vmem:[%s15914_s6 + $0x8] sm:$0xff] }
 0x1e7   : > { %vm1844_vm3 = vcmp.lt.s32.totalorder %v10450_v63, 2  ;;  %v1848_v40 = vsel %vm1846_vm11, %v1836_v47, 2102212464  ;;  %v1853_v12 = vsel %vm1845_vm14, %v1836_v47, %v1852_v28  ;;  %v1855_v1 = vsel %vm1843_vm8, %v1833_v30, %v1836_v47  ;;  %v16182_v47 = vld [vmem:[#allocation9_spill] sm:$0xff] }
 0x1e8   : > { %v2208_v54 = vsel %vm2125_vm7, %v2207_v33, %v2206_v59  ;;  %v1461_v56 = vsub.s32 0, %v10504_v19  ;;  %v1854_v13 = vsel %vm1844_vm3, %v1851_v53, %v1853_v12  ;;  %v1847_v17 = vsel %vm1843_vm8, %v1827_v22, %v1830_v21  ;;  %2252 = vperm.xlu1 %8667, %v2234_v0  }
 0x1e9   : > { %v2211_v49 = vsel %vm10457_vm10, %v9131_v31, %v2208_v54  ;;  %v1856_v51 = vsel %vm1846_vm11, %v1842_v55, 1326507024  ;;  %v1859_v23 = vshll.u32 %v1819_v45, 8  ;;  %v1849_v4 = vsel %vm1845_vm14, %v1833_v30, %v1848_v40 }
 0x1ea   : > { %8713 = vcosq.f32 %v2211_v49  ;;  %v8090_v20 = vmin.u32 %v1461_v56, %v10504_v19  ;;  %v1857_v43 = vsel %vm1845_vm14, %v1839_v50, %v1856_v51  ;;  %v10552_v21 = vadd.s32 1, %v10445_v38  ;;  %v4116_v38 = vld [vmem:[%s15914_s6 + $0x10] sm:$0xff] }
 0x1eb   : > { %8715 = vsinq.f32 %v2211_v49  ;;  %v1858_v34 = vsel %vm1844_vm3, %v1855_v1, %v1857_v43  ;;  %v10547_v48 = vmul.u32.u64.low %v1859_v23, %v1854_v13  ;;  %v10548_v37 = vmul.u32.u64.high %v1859_v23, %v1854_v13, %v10547_v48  ;;  %4130 = vperm.xlu0 %8668, %v4116_v38   ;;  %v5998_v51 = vld [vmem:[%s15916_s8 + $0x10] sm:$0xff] }
 0x1ec   : > { %v10555_v18 = vand.u32 3, %v10472_v58  ;;  %v1463_v5 = vclz %v8090_v20  ;;  %vm1802_vm13 = vcmp.lt.s32.totalorder %v10453_v11, 2  ;;  %v10568_v35 = vshrl.u32 %v10236_v44, 5  ;;  %4125 = vperm.xlu1 %8667, %v4115_v46  }
 0x1ed   : > { %v10558_v30 = vmul.u32.u64.low %v1859_v23, %v1858_v34  ;;  %v10559_v50 = vmul.u32.u64.high %v1859_v23, %v1858_v34, %v10558_v30  ;;  %v1809_v58 = vsel %vm1802_vm13, %v1805_v42, %v1808_v9  ;;  %v1850_v62 = vsel %vm1844_vm3, %v1847_v17, %v1849_v4 }
 0x1ee   : > { %v8091_v29 = vadd.s32 4294967294, %v1463_v5  ;;  %v10573_v11 = vsub.s32 32, %v10435_v24  ;;  %vm1799_vm6 = vweird.f32 %v16172_v16  ;;  %v1869_v22 = vadd.s32 1, %v10548_v37 }
 0x1ef   : > { %v1603_v41 = vand.u32 2147483647, %v16182_v47  ;;  %vm2030_vm7 = vcmp.gt.s32.totalorder %v10552_v21, 0  ;;  %vm2218_vm1 = vcmp.lt.s32.totalorder %v10555_v18, 2  ;;  %vm2219_vm4 = vcmp.eq.s32.totalorder %v10555_v18, 0 }
 0x1f0   : > { %vm2222_vm12 = vcmp.eq.s32.totalorder %v10555_v18, 2  ;;  %v1451_v44 = vadd.s32 %v10439_v36, %v10432_v61  ;;  %vm8092_vm5 = vcmp.lt.s32.totalorder %v8091_v29, 0  ;;  %v10584_v63 = vsel %vm1799_vm6, nan, %v1809_v58  ;;  %v5996_v61 = vld [vmem:[%s15916_s8] sm:$0xff] }
 0x1f1   : > { %vm2215_vm9 = vweird.f32 %v9131_v31  ;;  %v1466_v16 = vsel %vm8092_vm5, 0, %v8091_v29  ;;  %v1866_v59 = vmul.u32 %v1859_v23, %v1850_v62  ;;  %vm1868_vm10 = vc.u32 %v10559_v50, %v10547_v48  ;;  %6002 = vperm.xlu0 %8668, %v5996_v61   ;;  %v5999_v31 = vld [vmem:[%s15916_s8 + $0x18] sm:$0xff] }
 0x1f2   : > { %v1467_v36 = vsub.s32 32, %v1466_v16  ;;  %v1471_v45 = vsub.s32 4294967266, %v1466_v16  ;;  %v1870_v55 = vsel %vm1868_vm10, %v1869_v22, %v10548_v37  ;;  %v1620_v53 = vshll.u32 %v16130_v6, %v10435_v24 }
 0x1f3   : > { %v1871_v28 = vadd.s32 %v1870_v55, %v1866_v59  ;;  %v10600_v9 = vand.u32 8388607, %v1603_v41  ;;  %v1621_v33 = vshrl.u32 %v16131_v3, %v10573_v11  ;;  %v1623_v42 = vshll.u32 %v16131_v3, %v10435_v24 }
 0x1f4   : > { %v8714_v40 = vpop.eup %8713  ;;  %v1468_v12 = vshll.u32 %v10504_v19, %v1466_v16  ;;  %v1469_v32 = vshrl.u32 %v1451_v44, %v1467_v36  ;;  %v1472_v8 = vadd.s32 127, %v1471_v45  ;;  %v1624_v54 = vshrl.u32 %v16132_v7, %v10573_v11  ;;  %v4117_v19 = vld [vmem:[%s15914_s6 + $0x18] sm:$0xff]  ;;  %v5997_v44 = vld [vmem:[%s15916_s8 + $0x8] sm:$0xff]  ;;  %v7874_v16 = vld [vmem:[%s15917_s9] sm:$0xff] }
 0x1f5   : > { %v8716_v56 = vpop.eup %8715  ;;  %v2223_v13 = vxor.u32 2147483648, %v8714_v40  ;;  %v1872_v1 = vadd.s32 536870912, %v1871_v28  ;;  %v1626_v49 = vshll.u32 %v16132_v7, %v10435_v24  ;;  %v1630_v17 = vshrl.u32 %v16134_v25, %v10573_v11  ;;  %4135 = vperm.xlu1 %8667, %v4117_v19   ;;  %6012 = vperm.xlu0 %8668, %v5998_v51  }
 0x1f6   : > { %v2220_v23 = vxor.u32 2147483648, %v8716_v56  ;;  %v1470_v52 = vor.u32 %v1469_v32, %v1468_v12  ;;  %v1473_v57 = vshll.u32 %v1472_v8, 23  ;;  %v1627_v20 = vshrl.u32 %v16133_v27, %v10573_v11 }
 0x1f7   : > { %v2224_v4 = vsel %vm2222_vm12, %v2223_v13, %v8716_v56  ;;  %v10623_v43 = vshrl.u32 %v1872_v1, 30  ;;  %v1629_v34 = vshll.u32 %v16133_v27, %v10435_v24  ;;  %v1633_v37 = vshrl.u32 %v16135_v26, %v10573_v11 }
 0x1f8   : > { %v2221_v5 = vsel %vm2219_vm4, %v8714_v40, %v2220_v23  ;;  %v1474_v30 = vor.u32 4788187, %v1473_v57  ;;  %v1622_v0 = vor.u32 %v1621_v33, %v1620_v53  ;;  %v1625_v38 = vor.u32 %v1624_v54, %v1623_v42  ;;  %v7875_v23 = vld [vmem:[%s15917_s9 + $0x8] sm:$0xff] }
 0x1f9   : > { %v2225_v58 = vsel %vm2218_vm1, %v2221_v5, %v2224_v4  ;;  %v1874_v29 = vshll.u32 %v10623_v43, 30  ;;  %v1631_v62 = vor.u32 %v1630_v17, %v1629_v34  ;;  %v1632_v22 = vshll.u32 %v16134_v25, %v10435_v24  ;;  %6007 = vperm.xlu1 %8667, %v5997_v44   ;;  %7880 = vperm.xlu0 %8668, %v7874_v16  }
 0x1fa   : > { %v2226_v59 = vsel %vm2215_vm9, nan, %v2225_v58  ;;  %v1475_v46 = vand.u32 2147483647, %v1474_v30  ;;  %v1477_v18 = vcvt.s32.f32 %v1470_v52  ;;  %v1628_v61 = vor.u32 %v1627_v20, %v1626_v49  ;;  %v7950_v52 = vld [vmem:[#allocation2] sm:$0x1] }
 0x1fb   : > { %v2031_v36 = vsel %vm2030_vm7, %v10552_v21, 0  ;;  %v8351_v24 = vpack.c.bf16 %v2226_v59, %v10584_v63  ;;  %v10648_v45 = vsub.s32 %v1871_v28, %v1874_v29  ;;  %v1634_v55 = vor.u32 %v1633_v37, %v1632_v22  ;;  %v7876_v63 = vld [vmem:[%s15917_s9 + $0x10] sm:$0xff]  ;;  %v7877_v22 = vld [vmem:[%s15917_s9 + $0x18] sm:$0xff] }
 0x1fc   : > { %v1478_v53 = vmul.f32 %v1477_v18, %v1475_v46  ;;  %v1611_v33 = vor.u32 8388608, %v10600_v9  ;;  %vm1638_vm15 = vcmp.lt.s32.totalorder %v10568_v35, 4  ;;  %vm1635_vm0 = vcmp.lt.s32.totalorder %v10568_v35, 1 }
 0x1fd   : > { %8352 = vmatprep.subr.bf16.mxu1 %v8351_v24  ;;  %v1877_v42 = vsub.s32 0, %v10648_v45  ;;  %vm1637_vm2 = vcmp.lt.s32.totalorder %v10568_v35, 3  ;;  %v1644_v21 = vsel %vm1638_vm15, %v1631_v62, 920167782  ;;  %v10663_v28 = vand.u32 31, %v2031_v36  ;;  %6017 = vperm.xlu1 %8667, %v5999_v31  }
 0x1fe   : > { %v1643_v9 = vsel %vm1635_vm0, %v1622_v0, %v1625_v38  ;;  %v1645_v40 = vsel %vm1637_vm2, %v1628_v61, %v1644_v21  ;;  %v1640_v32 = vsel %vm1638_vm15, %v1628_v61, 2102212464  ;;  %v1647_v8 = vsel %vm1635_vm0, %v1625_v38, %v1628_v61  ;;  %7890 = vperm.xlu0 %8668, %v7876_v63  }
 0x1ff   : > { %v8106_v12 = vmin.u32 %v1877_v42, %v10648_v45  ;;  %v1648_v54 = vsel %vm1638_vm15, %v1634_v55, 1326507024  ;;  %v1479_v56 = vxor.u32 2147483648, %v1478_v53  ;;  %v1619_v13 = vshrl.u32 %v16130_v6, %v10573_v11 }
 0x200   : > { %vm1636_vm8 = vcmp.lt.s32.totalorder %v10568_v35, 2  ;;  %v1649_v1 = vsel %vm1637_vm2, %v1631_v62, %v1648_v54  ;;  %v1481_v49 = vsub.s32 4, %v10490_v10  ;;  %v1651_v51 = vshll.u32 %v1611_v33, 8 }
 0x201   : > { %v1879_v17 = vclz %v8106_v12  ;;  %v1646_v19 = vsel %vm1636_vm8, %v1643_v9, %v1645_v40  ;;  %v1639_v11 = vsel %vm1635_vm0, %v1619_v13, %v1622_v0  ;;  %v1641_v57 = vsel %vm1637_vm2, %v1625_v38, %v1640_v32  ;;  %7885 = vperm.xlu1 %8667, %v7875_v23  }
 0x202   : > { %v1650_v20 = vsel %vm1636_vm8, %v1647_v8, %v1649_v1  ;;  %vm1397_vm11 = vcmp.lt.s32.totalorder %v16179_v60, 0  ;;  %v10697_v5 = vshrl.u32 %v2031_v36, 5  ;;  %7953 = vperm.xlu0 %8668, %v7950_v52   ;;  %v10704_v0 = vsub.s32 32, %v10663_v28 }
 0x203   : > { %v8107_v4 = vadd.s32 4294967294, %v1879_v17  ;;  %v10694_v34 = vmul.u32.u64.low %v1651_v51, %v1650_v20  ;;  %v10695_v37 = vmul.u32.u64.high %v1651_v51, %v1650_v20, %v10694_v34  ;;  %v1480_v30 = vsel %vm1397_vm11, %v1479_v56, %v1478_v53 }
 0x204   : > { %v10699_v58 = vmul.u32.u64.low %v1651_v51, %v1646_v19  ;;  %v10700_v29 = vmul.u32.u64.high %v1651_v51, %v1646_v19, %v10699_v58  ;;  %v1482_v38 = vsel %vm1397_vm11, %v1481_v49, %v10490_v10  ;;  %v1642_v62 = vsel %vm1636_vm8, %v1639_v11, %v1641_v57 }
 0x205   : > { %vm8108_vm14 = vcmp.lt.s32.totalorder %v8107_v4, 0  ;;  %vm10714_vm3 = vcmp.le.f32.partialorder %v1395_v2, 0.7853982  ;;  %vm1813_vm13 = vcmp.lt.s32.totalorder %v9125_v15, 0  ;;  %v1897_v59 = vsub.s32 4, %v10623_v43  ;;  %7895 = vperm.xlu1 %8667, %v7877_v22  }
 0x206   : > { %v1882_v16 = vsel %vm8108_vm14, 0, %v8107_v4  ;;  %v1483_v10 = vsel %vm10714_vm3, %v16179_v60, %v1480_v30  ;;  %v1867_v35 = vadd.s32 %v10547_v48, %v10559_v50  ;;  %v1484_v2 = vsel %vm10714_vm3, 0, %v1482_v38 }
 0x207   : > { %v1883_v46 = vsub.s32 32, %v1882_v16  ;;  %v1887_v18 = vsub.s32 4294967266, %v1882_v16  ;;  %v1658_v61 = vmul.u32 %v1651_v51, %v1642_v62  ;;  %vm1660_vm6 = vc.u32 %v10695_v37, %v10699_v58 }
 0x208   : > { %v1661_v36 = vadd.s32 1, %v10700_v29  ;;  %v1884_v24 = vshll.u32 %v10648_v45, %v1882_v16  ;;  %v2019_v33 = vand.u32 2147483647, %v9129_v39  ;;  %8717 = vcosq.f32 %v1483_v10 }
 0x209   : > { %v1885_v55 = vshrl.u32 %v1867_v35, %v1883_v46  ;;  %v1888_v53 = vadd.s32 127, %v1887_v18  ;;  %v10735_v48 = vsel %vm1813_vm13, %v1897_v59, %v10623_v43  ;;  %v2046_v31 = vshrl.u32 %v16134_v25, %v10704_v0 }
 0x20a   : > { %v1662_v50 = vsel %vm1660_vm6, %v1661_v36, %v10700_v29  ;;  %v2037_v45 = vshrl.u32 %v16131_v3, %v10704_v0  ;;  %v2040_v9 = vshrl.u32 %v16132_v7, %v10704_v0  ;;  %v2043_v40 = vshrl.u32 %v16133_v27, %v10704_v0 }
 0x20b   : > { %v1886_v42 = vor.u32 %v1885_v55, %v1884_v24  ;;  %v1889_v21 = vshll.u32 %v1888_v53, 23  ;;  %v1663_v63 = vadd.s32 %v1662_v50, %v1658_v61  ;;  %v2045_v43 = vshll.u32 %v16133_v27, %v10663_v28 }
 0x20c   : > { %v2049_v12 = vshrl.u32 %v16135_v26, %v10704_v0  ;;  %v2026_v54 = vand.u32 8388607, %v2019_v33  ;;  %v2036_v56 = vshll.u32 %v16130_v6, %v10663_v28  ;;  %v2039_v13 = vshll.u32 %v16131_v3, %v10663_v28 }
 0x20d   : > { %v1890_v32 = vor.u32 4788187, %v1889_v21  ;;  %v1664_v8 = vadd.s32 536870912, %v1663_v63  ;;  %v2042_v1 = vshll.u32 %v16132_v7, %v10663_v28  ;;  %v2047_v49 = vor.u32 %v2046_v31, %v2045_v43 }
 0x20e   : > { %v2048_v17 = vshll.u32 %v16134_v25, %v10663_v28  ;;  %8719 = vsinq.f32 %v1483_v10  ;;  %v1893_v51 = vcvt.s32.f32 %v1886_v42  ;;  %v2038_v52 = vor.u32 %v2037_v45, %v2036_v56 }
 0x20f   : > { %v1891_v19 = vand.u32 2147483647, %v1890_v32  ;;  %v10760_v23 = vshrl.u32 %v1664_v8, 30  ;;  %v2041_v11 = vor.u32 %v2040_v9, %v2039_v13  ;;  %v2044_v57 = vor.u32 %v2043_v40, %v2042_v1 }
 0x210   : > { %v2050_v20 = vor.u32 %v2049_v12, %v2048_v17  ;;  %vm10764_vm7 = vcmp.le.f32.partialorder %v1811_v14, 0.7853982  ;;  %vm2054_vm1 = vcmp.lt.s32.totalorder %v10697_v5, 4  ;;  %v1488_v28 = vadd.s32 3, %v1484_v2 }
 0x211   : > { %v1894_v34 = vmul.f32 %v1893_v51, %v1891_v19  ;;  %v1666_v30 = vshll.u32 %v10760_v23, 30  ;;  %v1900_v29 = vsel %vm10764_vm7, 0, %v10735_v48  ;;  %v2027_v38 = vor.u32 8388608, %v2026_v54 }
 0x212   : > { %v2060_v62 = vsel %vm2054_vm1, %v2047_v49, 920167782  ;;  %vm2051_vm4 = vcmp.lt.s32.totalorder %v10697_v5, 1  ;;  %vm2053_vm12 = vcmp.lt.s32.totalorder %v10697_v5, 3  ;;  %v8718_v14 = vpop.eup %8717  ;;  %v2064_v35 = vsel %vm2054_vm1, %v2050_v20, 1326507024 }
 0x213   : > { %v1895_v22 = vxor.u32 2147483648, %v1894_v34  ;;  %v10775_v44 = vsub.s32 %v1663_v63, %v1666_v30  ;;  %v2059_v16 = vsel %vm2051_vm4, %v2038_v52, %v2041_v11  ;;  %v2061_v59 = vsel %vm2053_vm12, %v2044_v57, %v2060_v62 }
 0x214   : > { %v2063_v10 = vsel %vm2051_vm4, %v2041_v11, %v2044_v57  ;;  %v2035_v2 = vshrl.u32 %v16130_v6, %v10704_v0  ;;  %vm2052_vm5 = vcmp.lt.s32.totalorder %v10697_v5, 2  ;;  %v2056_v36 = vsel %vm2054_vm1, %v2044_v57, 2102212464 }
 0x215   : > { %v1896_v46 = vsel %vm1813_vm13, %v1895_v22, %v1894_v34  ;;  %v1669_v18 = vsub.s32 0, %v10775_v44  ;;  %v2065_v24 = vsel %vm2053_vm12, %v2047_v49, %v2064_v35  ;;  %v2067_v55 = vshll.u32 %v2027_v38, 8 }
 0x216   : > { %v1899_v61 = vsel %vm10764_vm7, %v9125_v15, %v1896_v46  ;;  %v2062_v48 = vsel %vm2052_vm5, %v2059_v16, %v2061_v59  ;;  %v2066_v0 = vsel %vm2052_vm5, %v2063_v10, %v2065_v24  ;;  %v2055_v63 = vsel %vm2051_vm4, %v2035_v2, %v2038_v52 }
 0x217   : > { %8721 = vcosq.f32 %v1899_v61  ;;  %v8098_v53 = vmin.u32 %v1669_v18, %v10775_v44  ;;  %v10805_v50 = vmul.u32.u64.low %v2067_v55, %v2066_v0  ;;  %v10806_v31 = vmul.u32.u64.high %v2067_v55, %v2066_v0, %v10805_v50 }
 0x218   : > { %8723 = vsinq.f32 %v1899_v61  ;;  %v8720_v42 = vpop.eup %8719  ;;  %v2057_v45 = vsel %vm2053_vm12, %v2041_v11, %v2056_v36  ;;  %v1904_v9 = vadd.s32 3, %v1900_v29  ;;  %v1489_v12 = vand.u32 3, %v1488_v28 }
 0x219   : > { %v1671_v21 = vclz %v8098_v53  ;;  %v10812_v40 = vmul.u32.u64.low %v2067_v55, %v2062_v48  ;;  %v10813_v43 = vmul.u32.u64.high %v2067_v55, %v2062_v48, %v10812_v40  ;;  %v15962_v8 = vmov 0.0  }
 0x21a   : > { %2332 = vmatprep.mubr.f32.mxu0 %v15962_v8  ;;  %2421 = vmatprep.mubr.f32.mxu1 %v15962_v8  ;;  %v1492_v54 = vxor.u32 2147483648, %v8720_v42  ;;  %v1495_v56 = vxor.u32 2147483648, %v8718_v14  ;;  %v2058_v13 = vsel %vm2052_vm5, %v2055_v63, %v2057_v45  ;;  %v1905_v1 = vand.u32 3, %v1904_v9  ;;  %v10848_v63 = vld [vmem:[%s15911_s3 + $0x10] sm:$0xff] }
 0x21b   : > { %v8099_v32 = vadd.s32 4294967294, %v1671_v21  ;;  %vm2076_vm10 = vc.u32 %v10806_v31, %v10812_v40  ;;  %v2077_v17 = vadd.s32 1, %v10813_v43  ;;  %vm1491_vm15 = vcmp.eq.s32.totalorder %v1489_v12, 0 }
 0x21c   : > { %vm1494_vm0 = vcmp.eq.s32.totalorder %v1489_v12, 2  ;;  %v2074_v51 = vmul.u32 %v2067_v55, %v2058_v13  ;;  %v1493_v52 = vsel %vm1491_vm15, %v8718_v14, %v1492_v54  ;;  %vm1490_vm2 = vcmp.lt.s32.totalorder %v1489_v12, 2  ;;  %v10859_v54 = vld [vmem:[%s15911_s3 + $0x18] sm:$0xff] }
 0x21d   : > { %vm8100_vm9 = vcmp.lt.s32.totalorder %v8099_v32, 0  ;;  %v1496_v11 = vsel %vm1494_vm0, %v1495_v56, %v8720_v42  ;;  %v2078_v57 = vsel %vm2076_vm10, %v2077_v17, %v10813_v43  ;;  %vm1910_vm8 = vcmp.eq.s32.totalorder %v1905_v1, 2 }
 0x21e   : > { %v1674_v49 = vsel %vm8100_vm9, 0, %v8099_v32  ;;  %v2079_v34 = vadd.s32 %v2078_v57, %v2074_v51  ;;  %v1659_v29 = vadd.s32 %v10699_v58, %v10695_v37  ;;  %v1497_v38 = vsel %vm1490_vm2, %v1493_v52, %v1496_v11 }
 0x21f   : > { %v1679_v19 = vsub.s32 4294967266, %v1674_v49  ;;  %v1675_v4 = vsub.s32 32, %v1674_v49  ;;  %vm1487_vm11 = vweird.f32 %v16179_v60  ;;  %vm1907_vm14 = vcmp.eq.s32.totalorder %v1905_v1, 0  ;;  %v10832_v60 = vld [vmem:[%s15911_s3] sm:$0xff] }
 0x220   : > { %v2080_v16 = vadd.s32 536870912, %v2079_v34  ;;  %vm1906_vm3 = vcmp.lt.s32.totalorder %v1905_v1, 2  ;;  %v1498_v46 = vsel %vm1487_vm11, nan, %v1497_v38  ;;  %vm1903_vm13 = vweird.f32 %v9125_v15 }
 0x221   : > { %v8722_v20 = vpop.eup %8721  ;;  %v1680_v5 = vadd.s32 127, %v1679_v19  ;;  %v1677_v10 = vshrl.u32 %v1659_v29, %v1675_v4  ;;  %v1676_v61 = vshll.u32 %v10775_v44, %v1674_v49  ;;  %vm16002_vm6 = vcmask 261120   ;;  %v10840_v44 = vld [vmem:[%s15911_s3 + $0x8] sm:$0xff] }
 0x222   : > { %v8724_v30 = vpop.eup %8723  ;;  %v1911_v28 = vxor.u32 2147483648, %v8722_v20  ;;  %v2081_v35 = vshrl.u32 %v2080_v16, 30  ;;  %v2075_v43 = vadd.s32 %v10812_v40, %v10806_v31  ;;  %vm1605_vm1 = vcmp.lt.s32.totalorder %v16182_v47, 0 }
 0x223   : > { %v1908_v62 = vxor.u32 2147483648, %v8724_v30  ;;  %v1681_v22 = vshll.u32 %v1680_v5, 23  ;;  %v1678_v24 = vor.u32 %v1677_v10, %v1676_v61  ;;  %vm10865_vm4 = vcmp.le.f32.partialorder %v1603_v41, 0.7853982 }
 0x224   : > { %v1912_v14 = vsel %vm1910_vm8, %v1911_v28, %v8724_v30  ;;  %v2082_v58 = vshll.u32 %v2081_v35, 30  ;;  %v1689_v52 = vsub.s32 4, %v10760_v23  ;;  %vm2021_vm12 = vcmp.lt.s32.totalorder %v9129_v39, 0 }
 0x225   : > { %v1909_v59 = vsel %vm1907_vm14, %v8722_v20, %v1908_v62  ;;  %v1682_v37 = vor.u32 4788187, %v1681_v22  ;;  %v1685_v0 = vcvt.s32.f32 %v1678_v24  ;;  %v2105_v20 = vsub.s32 4, %v2081_v35 }
 0x226   : > { %v1913_v18 = vsel %vm1906_vm3, %v1909_v59, %v1912_v14  ;;  %v2083_v55 = vsub.s32 %v2079_v34, %v2082_v58  ;;  %v1690_v4 = vsel %vm1605_vm1, %v1689_v52, %v10760_v23  ;;  %vm2020_vm5 = vcmp.le.f32.partialorder %v2019_v33, 0.7853982 }
 0x227   : > { %v1914_v2 = vsel %vm1903_vm13, nan, %v1913_v18  ;;  %v1683_v53 = vand.u32 2147483647, %v1682_v37  ;;  %v1692_v34 = vsel %vm10865_vm4, 0, %v1690_v4  ;;  %v2106_v28 = vsel %vm2021_vm12, %v2105_v20, %v2081_v35 }
 0x228   : > { %v8345_v36 = vpack.c.bf16 %v1914_v2, %v1498_v46  ;;  %v2085_v48 = vsub.s32 0, %v2083_v55  ;;  %v1696_v38 = vadd.s32 3, %v1692_v34  ;;  %v2108_v62 = vsel %vm2020_vm5, 0, %v2106_v28 }
 0x229   : > { %v1686_v50 = vmul.f32 %v1685_v0, %v1683_v53  ;;  %v2112_v23 = vadd.s32 3, %v2108_v62  ;;  %vm1695_vm11 = vweird.f32 %v16182_v47  ;;  %vm2111_vm14 = vweird.f32 %v9129_v39 }
 0x22a   : > { %8346 = vmatpush1.bf16.msra.mxu0 %v8345_v36  ;;  %v8114_v15 = vmin.u32 %v2085_v48, %v2083_v55  ;;  %v1697_v14 = vand.u32 3, %v1696_v38 }
 0x22b   : > { %v1687_v45 = vxor.u32 2147483648, %v1686_v50  ;;  %v2113_v46 = vand.u32 3, %v2112_v23 }
 0x22c   : > { %v2087_v42 = vclz %v8114_v15  ;;  %vm1699_vm9 = vcmp.eq.s32.totalorder %v1697_v14, 0  ;;  %vm1702_vm10 = vcmp.eq.s32.totalorder %v1697_v14, 2  ;;  %vm1698_vm15 = vcmp.lt.s32.totalorder %v1697_v14, 2 }
 0x22d   : > { %8121 = vmatmul.mubr.msk.f32.vlgmr.msra.gmra.mrb[0].mxu0 %vm16002_vm6, %v10832_v60  ;;  %v1688_v56 = vsel %vm1605_vm1, %v1687_v45, %v1686_v50  ;;  %vm2118_vm0 = vcmp.eq.s32.totalorder %v2113_v46, 2  ;;  %vm2115_vm2 = vcmp.eq.s32.totalorder %v2113_v46, 0  ;;  %vm2114_vm8 = vcmp.lt.s32.totalorder %v2113_v46, 2 }
 0x22e   : > { %2338 = vmatprep.mubr.f32.mxu0 %v15962_v8  ;;  %v8115_v21 = vadd.s32 4294967294, %v2087_v42  ;;  %v1691_v19 = vsel %vm10865_vm4, %v16182_v47, %v1688_v56 }
 0x22f   : > { %8725 = vcosq.f32 %v1691_v19 }
 0x230   : > { %vm8116_vm7 = vcmp.lt.s32.totalorder %v8115_v21, 0  ;;  %8727 = vsinq.f32 %v1691_v19 }
 0x231   : > { %8122 = vmatmul.mubr.msk.f32.gmra.mrb[2].mxu0 %vm16002_vm6, %v10840_v44  ;;  %v2090_v9 = vsel %vm8116_vm7, 0, %v8115_v21 }
 0x232   : > { %2344 = vmatprep.mubr.f32.mxu0 %v15962_v8  ;;  %v2091_v12 = vsub.s32 32, %v2090_v9  ;;  %v2095_v32 = vsub.s32 4294967266, %v2090_v9  ;;  %v2092_v13 = vshll.u32 %v2083_v55, %v2090_v9 }
 0x234   : > { %v2093_v1 = vshrl.u32 %v2075_v43, %v2091_v12  ;;  %v2096_v31 = vadd.s32 127, %v2095_v32 }
 0x235   : > { %8123 = vmatmul.mubr.msk.f32.gmra.mrb[4].mxu0 %vm16002_vm6, %v10848_v63 }
 0x236   : > { %2350 = vmatprep.mubr.f32.mxu0 %v15962_v8  ;;  %v2094_v49 = vor.u32 %v2093_v1, %v2092_v13  ;;  %v2097_v17 = vshll.u32 %v2096_v31, 23 }
 0x238   : > { %v2098_v51 = vor.u32 4788187, %v2097_v17  ;;  %v2101_v41 = vcvt.s32.f32 %v2094_v49 }
 0x239   : > { %8124 = vmatmul.mubr.msk.f32.gmra.mrb[6].mxu0 %vm16002_vm6, %v10859_v54  ;;  %v8726_v22 = vpop.eup %8725 }
 0x23a   : > { %4214 = vmatprep.mubr.f32.mxu0 %v15962_v8  ;;  %v2099_v11 = vand.u32 2147483647, %v2098_v51  ;;  %v8728_v16 = vpop.eup %8727  ;;  %v1703_v10 = vxor.u32 2147483648, %v8726_v22 }
 0x23b   : > { %v1700_v59 = vxor.u32 2147483648, %v8728_v16 }
 0x23c   : > { %v2102_v57 = vmul.f32 %v2101_v41, %v2099_v11  ;;  %v1704_v33 = vsel %vm1702_vm10, %v1703_v10, %v8728_v16 }
 0x23d   : > { %v1701_v2 = vsel %vm1699_vm9, %v8726_v22, %v1700_v59 }
 0x23e   : > { %v2103_v5 = vxor.u32 2147483648, %v2102_v57  ;;  %v1705_v58 = vsel %vm1698_vm15, %v1701_v2, %v1704_v33 }
 0x23f   : > { %v1706_v53 = vsel %vm1695_vm11, nan, %v1705_v58 }
 0x240   : > { %v2104_v30 = vsel %vm2021_vm12, %v2103_v5, %v2102_v57 }
 0x241   : > { %v2107_v29 = vsel %vm2020_vm5, %v9129_v39, %v2104_v30 }
 0x242   : > { %8729 = vcosq.f32 %v2107_v29 }
 0x243   : > { %8731 = vsinq.f32 %v2107_v29 }
 0x24c   : > { %v8730_v18 = vpop.eup %8729 }
 0x24d   : > { %v8732_v61 = vpop.eup %8731  ;;  %v2119_v35 = vxor.u32 2147483648, %v8730_v18 }
 0x24e   : > { %v2116_v37 = vxor.u32 2147483648, %v8732_v61 }
 0x24f   : > { %v2120_v36 = vsel %vm2118_vm0, %v2119_v35, %v8732_v61 }
 0x250   : > { %v2117_v24 = vsel %vm2115_vm2, %v8730_v18, %v2116_v37 }
 0x251   : > { %v2121_v55 = vsel %vm2114_vm8, %v2117_v24, %v2120_v36 }
 0x252   : > { %v2122_v48 = vsel %vm2111_vm14, nan, %v2121_v55 }
 0x253   : > { %v8353_v0 = vpack.c.bf16 %v2122_v48, %v1706_v53 }
 0x255   : > { %8354 = vmatpush1.bf16.msra.mxu1 %v8353_v0 }
 0x258   : > { %8125 = vmatmul.mubr.msk.f32.vlgmr.msra.gmra.mrb[0].mxu1 %vm16002_vm6, %v10832_v60 }
 0x259   : > { %2427 = vmatprep.mubr.f32.mxu1 %v15962_v8 }
 0x25c   : > { %8126 = vmatmul.mubr.msk.f32.gmra.mrb[2].mxu1 %vm16002_vm6, %v10840_v44 }
 0x25d   : > { %2433 = vmatprep.mubr.f32.mxu1 %v15962_v8 }
 0x25e   : > { %v10899_v39 = vpop.permute.xlu1 %2237 }
 0x260   : > { %8127 = vmatmul.mubr.msk.f32.gmra.mrb[4].mxu1 %vm16002_vm6, %v10848_v63  ;;  %v10909_v21 = vpop.permute.xlu0 %2242 }
 0x261   : > { %2439 = vmatprep.mubr.f32.mxu1 %v15962_v8 }
 0x264   : > { %8128 = vmatmul.mubr.msk.f32.gmra.mrb[6].mxu1 %vm16002_vm6, %v10859_v54 }
 0x265   : > { %4303 = vmatprep.mubr.f32.mxu1 %v15962_v8 }
 0x300   : > { %v2334_v47 = vpop.f32.mrb[0].mxu0 }
 0x301   : > { %v10902_v60 = vadd.f32 %v2334_v47, %v10899_v39  ;;  %v2336_v15 = vpop.f32.mrb[1].mxu0 }
 0x302   : > { %v10905_v44 = vadd.f32 %v2336_v15, %v10899_v39 }
 0x303   : > { %16189 = vst [vmem:[#allocation11_spill] sm:$0xff] %v10902_v60  ;;  %v15968_v50 = vand.u32 2147483647, %v10902_v60  ;;  %v2449_v42 = vand.u32 2139095040, %v10902_v60 }
 0x304   : > { %v15967_v63 = vand.u32 2147483647, %v10905_v44  ;;  %v2553_v45 = vand.u32 2139095040, %v10905_v44  ;;  %v2340_v9 = vpop.f32.mrb[2].mxu0 }
 0x305   : > { %v2450_v43 = vshrl.u32 %v2449_v42, 23  ;;  %v10914_v12 = vadd.f32 %v2340_v9, %v10909_v21  ;;  %v10916_v32 = vpop.f32.mrb[3].mxu0  ;;  %v2453_v54 = vand.u32 8388607, %v15968_v50 }
 0x306   : > { %v2554_v56 = vshrl.u32 %v2553_v45, 23  ;;  %v2557_v13 = vand.u32 8388607, %v15967_v63 }
 0x307   : > { %16190 = vst [vmem:[#allocation13_spill] sm:$0xff] %v10914_v12  ;;  %v8129_v1 = vadd.s32 4294967169, %v2450_v43  ;;  %v2865_v40 = vand.u32 2139095040, %v10914_v12  ;;  %v2454_v17 = vor.u32 8388608, %v2453_v54 }
 0x308   : > { %v8133_v31 = vadd.s32 4294967169, %v2554_v56  ;;  %v2558_v19 = vor.u32 8388608, %v2557_v13  ;;  %v10944_v45 = vpop.f32.mrb[4].mxu0 }
 0x309   : > { %v2456_v49 = vadd.s32 1, %v8129_v1  ;;  %v2866_v52 = vshrl.u32 %v2865_v40, 23  ;;  %v10923_v4 = vshll.u32 %v2454_v17, 8 }
 0x30a   : > { %v2560_v51 = vadd.s32 1, %v8133_v31  ;;  %v10925_v5 = vshll.u32 %v2558_v19, 8 }
 0x30b   : > { %vm2457_vm3 = vcmp.gt.s32.totalorder %v2456_v49, 0  ;;  %v8145_v34 = vadd.s32 4294967169, %v2866_v52 }
 0x30c   : > { %v2458_v11 = vsel %vm2457_vm3, %v2456_v49, 0  ;;  %vm2561_vm13 = vcmp.gt.s32.totalorder %v2560_v51, 0 }
 0x30d   : > { %v2459_v41 = vshrl.u32 %v2458_v11, 5  ;;  %v2460_v57 = vand.u32 31, %v2458_v11  ;;  %v2562_v20 = vsel %vm2561_vm13, %v2560_v51, 0 }
 0x30e   : > { %v10928_v29 = vshrl.u32 %v2562_v20, 5  ;;  %v2564_v38 = vand.u32 31, %v2562_v20 }
 0x30f   : > { %v2461_v30 = vsub.s32 32, %v2460_v57  ;;  %v2463_v28 = vshll.u32 %v16130_v6, %v2460_v57  ;;  %v2466_v62 = vshll.u32 %v16131_v3, %v2460_v57  ;;  %v2469_v22 = vshll.u32 %v16132_v7, %v2460_v57 }
 0x310   : > { %v2472_v16 = vshll.u32 %v16133_v27, %v2460_v57  ;;  %v2475_v23 = vshll.u32 %v16134_v25, %v2460_v57  ;;  %vm2478_vm7 = vcmp.lt.s32.totalorder %v2459_v41, 1  ;;  %vm2479_vm1 = vcmp.lt.s32.totalorder %v2459_v41, 2 }
 0x311   : > { %v2464_v14 = vshrl.u32 %v16131_v3, %v2461_v30  ;;  %v2467_v59 = vshrl.u32 %v16132_v7, %v2461_v30  ;;  %v2470_v10 = vshrl.u32 %v16133_v27, %v2461_v30  ;;  %v2462_v46 = vshrl.u32 %v16130_v6, %v2461_v30 }
 0x312   : > { %v2473_v18 = vshrl.u32 %v16134_v25, %v2461_v30  ;;  %v2476_v2 = vshrl.u32 %v16135_v26, %v2461_v30  ;;  %v2565_v37 = vsub.s32 32, %v2564_v38  ;;  %vm2480_vm4 = vcmp.lt.s32.totalorder %v2459_v41, 3 }
 0x313   : > { %v2465_v33 = vor.u32 %v2464_v14, %v2463_v28  ;;  %v2468_v61 = vor.u32 %v2467_v59, %v2466_v62  ;;  %v2471_v35 = vor.u32 %v2470_v10, %v2469_v22  ;;  %vm2481_vm12 = vcmp.lt.s32.totalorder %v2459_v41, 4 }
 0x314   : > { %v2474_v58 = vor.u32 %v2473_v18, %v2472_v16  ;;  %v2477_v36 = vor.u32 %v2476_v2, %v2475_v23  ;;  %v2567_v42 = vshll.u32 %v16130_v6, %v2564_v38  ;;  %v2568_v54 = vshrl.u32 %v16131_v3, %v2565_v37 }
 0x315   : > { %v2482_v24 = vsel %vm2478_vm7, %v2462_v46, %v2465_v33  ;;  %v2483_v55 = vsel %vm2481_vm12, %v2471_v35, 2102212464  ;;  %v2486_v53 = vsel %vm2478_vm7, %v2465_v33, %v2468_v61  ;;  %v2490_v48 = vsel %vm2478_vm7, %v2468_v61, %v2471_v35 }
 0x316   : > { %v2484_v0 = vsel %vm2480_vm4, %v2468_v61, %v2483_v55  ;;  %v2487_v47 = vsel %vm2481_vm12, %v2474_v58, 920167782  ;;  %v2491_v15 = vsel %vm2481_vm12, %v2477_v36, 1326507024  ;;  %v2570_v56 = vshll.u32 %v16131_v3, %v2564_v38 }
 0x317   : > { %v2488_v9 = vsel %vm2480_vm4, %v2471_v35, %v2487_v47  ;;  %v2492_v43 = vsel %vm2480_vm4, %v2474_v58, %v2491_v15  ;;  %v2485_v13 = vsel %vm2479_vm1, %v2482_v24, %v2484_v0  ;;  %v2571_v40 = vshrl.u32 %v16132_v7, %v2565_v37 }
 0x318   : > { %v2489_v1 = vsel %vm2479_vm1, %v2486_v53, %v2488_v9  ;;  %v2493_v31 = vsel %vm2479_vm1, %v2490_v48, %v2492_v43  ;;  %v2569_v52 = vor.u32 %v2568_v54, %v2567_v42  ;;  %v2573_v57 = vshll.u32 %v16132_v7, %v2564_v38 }
 0x319   : > { %v10953_v49 = vmul.u32.u64.low %v10923_v4, %v2493_v31  ;;  %v10954_v17 = vmul.u32.u64.high %v10923_v4, %v2493_v31, %v10953_v49  ;;  %v10957_v19 = vmul.u32.u64.low %v10923_v4, %v2489_v1  ;;  %v10958_v51 = vmul.u32.u64.high %v10923_v4, %v2489_v1, %v10957_v19 }
 0x31a   : > { %v2572_v11 = vor.u32 %v2571_v40, %v2570_v56  ;;  %v2574_v20 = vshrl.u32 %v16133_v27, %v2565_v37  ;;  %v2576_v41 = vshll.u32 %v16133_v27, %v2564_v38  ;;  %v2577_v30 = vshrl.u32 %v16134_v25, %v2565_v37 }
 0x31b   : > { %v2580_v28 = vshrl.u32 %v16135_v26, %v2565_v37  ;;  %v2872_v62 = vadd.s32 1, %v8145_v34  ;;  %v2501_v22 = vmul.u32 %v10923_v4, %v2485_v13  ;;  %v2566_v16 = vshrl.u32 %v16130_v6, %v2565_v37 }
 0x31c   : > { %v2575_v23 = vor.u32 %v2574_v20, %v2573_v57  ;;  %v2579_v14 = vshll.u32 %v16134_v25, %v2564_v38  ;;  %vm2503_vm5 = vc.u32 %v10954_v17, %v10957_v19  ;;  %v2504_v59 = vadd.s32 1, %v10958_v51 }
 0x31d   : > { %v2578_v10 = vor.u32 %v2577_v30, %v2576_v41  ;;  %vm2582_vm9 = vcmp.lt.s32.totalorder %v10928_v29, 1  ;;  %vm2584_vm10 = vcmp.lt.s32.totalorder %v10928_v29, 3  ;;  %vm2585_vm15 = vcmp.lt.s32.totalorder %v10928_v29, 4 }
 0x31e   : > { %v2581_v46 = vor.u32 %v2580_v28, %v2579_v14  ;;  %v2590_v34 = vsel %vm2582_vm9, %v2569_v52, %v2572_v11  ;;  %v2505_v4 = vsel %vm2503_vm5, %v2504_v59, %v10958_v51  ;;  %v2587_v18 = vsel %vm2585_vm15, %v2575_v23, 2102212464 }
 0x31f   : > { %v2591_v2 = vsel %vm2585_vm15, %v2578_v10, 920167782  ;;  %v2594_v33 = vsel %vm2582_vm9, %v2572_v11, %v2575_v23  ;;  %v2506_v38 = vadd.s32 %v2505_v4, %v2501_v22  ;;  %vm2583_vm0 = vcmp.lt.s32.totalorder %v10928_v29, 2 }
 0x320   : > { %v2592_v61 = vsel %vm2584_vm10, %v2575_v23, %v2591_v2  ;;  %v2595_v35 = vsel %vm2585_vm15, %v2581_v46, 1326507024  ;;  %v2586_v37 = vsel %vm2582_vm9, %v2566_v16, %v2569_v52  ;;  %v2588_v58 = vsel %vm2584_vm10, %v2572_v11, %v2587_v18 }
 0x321   : > { %v2593_v36 = vsel %vm2583_vm0, %v2590_v34, %v2592_v61  ;;  %v2596_v24 = vsel %vm2584_vm10, %v2578_v10, %v2595_v35  ;;  %v2507_v55 = vadd.s32 536870912, %v2506_v38  ;;  %v2589_v9 = vsel %vm2583_vm0, %v2586_v37, %v2588_v58 }
 0x322   : > { %v2597_v53 = vsel %vm2583_vm0, %v2594_v33, %v2596_v24  ;;  %v10978_v48 = vmul.u32.u64.low %v10925_v5, %v2593_v36  ;;  %v10979_v0 = vmul.u32.u64.high %v10925_v5, %v2593_v36, %v10978_v48  ;;  %vm2873_vm2 = vcmp.gt.s32.totalorder %v2872_v62, 0 }
 0x323   : > { %v10982_v47 = vmul.u32.u64.low %v10925_v5, %v2597_v53  ;;  %v10983_v15 = vmul.u32.u64.high %v10925_v5, %v2597_v53, %v10982_v47  ;;  %v10985_v42 = vshrl.u32 %v2507_v55, 30  ;;  %v15964_v29 = vand.u32 2147483647, %v10914_v12 }
 0x324   : > { %v2608_v54 = vadd.s32 1, %v10979_v0  ;;  %v2605_v56 = vmul.u32 %v10925_v5, %v2589_v9  ;;  %v2874_v13 = vsel %vm2873_vm2, %v2872_v62, 0  ;;  %v10994_v1 = vadd.f32 %v10916_v32, %v10909_v21 }
 0x325   : > { %v2509_v43 = vshll.u32 %v10985_v42, 30  ;;  %vm2607_vm8 = vc.u32 %v10983_v15, %v10978_v48  ;;  %v2869_v51 = vand.u32 8388607, %v15964_v29  ;;  %v2876_v11 = vand.u32 31, %v2874_v13 }
 0x326   : > { %v2609_v40 = vsel %vm2607_vm8, %v2608_v54, %v10979_v0  ;;  %v2969_v5 = vand.u32 2139095040, %v10994_v1  ;;  %v2502_v34 = vadd.s32 %v10957_v19, %v10954_v17  ;;  %v11017_v18 = vshrl.u32 %v2874_v13, 5 }
 0x327   : > { %v10996_v31 = vsub.s32 %v2506_v38, %v2509_v43  ;;  %v2610_v49 = vadd.s32 %v2609_v40, %v2605_v56  ;;  %v2870_v32 = vor.u32 8388608, %v2869_v51  ;;  %v2877_v62 = vsub.s32 32, %v2876_v11 }
 0x328   : > { %v2970_v14 = vshrl.u32 %v2969_v5, 23  ;;  %v11033_v36 = vadd.s32 %v10978_v48, %v10983_v15  ;;  %v2879_v24 = vshll.u32 %v16130_v6, %v2876_v11  ;;  %v2882_v43 = vshll.u32 %v16131_v3, %v2876_v11 }
 0x329   : > { %v2512_v52 = vsub.s32 0, %v10996_v31  ;;  %v2611_v57 = vadd.s32 536870912, %v2610_v49  ;;  %v11019_v2 = vshll.u32 %v2870_v32, 8  ;;  %v2880_v61 = vshrl.u32 %v16131_v3, %v2877_v62 }
 0x32a   : > { %v2883_v17 = vshrl.u32 %v16132_v7, %v2877_v62  ;;  %v11029_v19 = vadd.s32 4294967169, %v2970_v14  ;;  %v2886_v55 = vshrl.u32 %v16133_v27, %v2877_v62  ;;  %v2878_v56 = vshrl.u32 %v16130_v6, %v2877_v62 }
 0x32b   : > { %v8130_v20 = vmin.u32 %v2512_v52, %v10996_v31  ;;  %v11004_v41 = vshrl.u32 %v2611_v57, 30  ;;  %v2423_v28 = vpop.f32.mrb[0].mxu1  ;;  %v11044_v13 = vor.u32 %v2880_v61, %v2879_v24  ;;  %v2885_v48 = vshll.u32 %v16132_v7, %v2876_v11 }
 0x32c   : > { %v11007_v22 = vadd.f32 %v2423_v28, %v10899_v39  ;;  %v2425_v23 = vpop.f32.mrb[1].mxu1  ;;  %v2888_v51 = vshll.u32 %v16133_v27, %v2876_v11  ;;  %v2889_v52 = vshrl.u32 %v16134_v25, %v2877_v62  ;;  %v11059_v32 = vshll.u32 %v16134_v25, %v2876_v11 }
 0x32d   : > { %16191 = vst [vmem:[#allocation6_spill] sm:$0xff] %v11004_v41  ;;  %v2514_v30 = vclz %v8130_v20  ;;  %v2613_v16 = vshll.u32 %v11004_v41, 30  ;;  %v11011_v10 = vadd.f32 %v2425_v23, %v10899_v39  ;;  %v11056_v20 = vor.u32 %v2886_v55, %v2885_v48 }
 0x32e   : > { %16192 = vst [vmem:[#allocation18_spill] sm:$0xff] %v11007_v22  ;;  %v2657_v4 = vand.u32 2139095040, %v11007_v22  ;;  %v15966_v58 = vand.u32 2147483647, %v11007_v22  ;;  %vm2894_vm3 = vcmp.lt.s32.totalorder %v11017_v18, 1  ;;  %vm2897_vm13 = vcmp.lt.s32.totalorder %v11017_v18, 4 }
 0x32f   : > { %v8131_v59 = vadd.s32 4294967294, %v2514_v30  ;;  %v11021_v33 = vsub.s32 %v2610_v49, %v2613_v16  ;;  %v2761_v38 = vand.u32 2139095040, %v11011_v10  ;;  %v11025_v39 = vpop.f32.mrb[2].mxu1  ;;  %v11049_v49 = vor.u32 %v2883_v17, %v2882_v43 }
 0x330   : > { %v2658_v37 = vshrl.u32 %v2657_v4, 23  ;;  %v11037_v53 = vpop.f32.mrb[3].mxu1  ;;  %v2661_v5 = vand.u32 8388607, %v15966_v58  ;;  %v15965_v28 = vand.u32 2147483647, %v11011_v10  ;;  %v11074_v11 = vsel %vm2894_vm3, %v2878_v56, %v11044_v13 }
 0x331   : > { %vm8132_vm11 = vcmp.lt.s32.totalorder %v8131_v59, 0  ;;  %v2762_v9 = vshrl.u32 %v2761_v38, 23  ;;  %v2616_v54 = vsub.s32 0, %v11021_v33  ;;  %v11068_v38 = vor.u32 %v2889_v52, %v2888_v51 }
 0x332   : > { %v11039_v0 = vsel %vm8132_vm11, 0, %v8131_v59  ;;  %v8137_v47 = vadd.s32 4294967169, %v2658_v37  ;;  %v11065_v59 = vshrl.u32 %v16135_v26, %v2877_v62  ;;  %v2662_v17 = vor.u32 8388608, %v2661_v5 }
 0x333   : > { %v11047_v15 = vpop.f32.mrb[4].mxu1  ;;  %v2518_v57 = vsub.s32 32, %v11039_v0  ;;  %v2522_v30 = vsub.s32 4294967266, %v11039_v0  ;;  %v8141_v16 = vadd.s32 4294967169, %v2762_v9  ;;  %v8134_v14 = vmin.u32 %v2616_v54, %v11021_v33 }
 0x334   : > { %v2664_v40 = vadd.s32 1, %v8137_v47  ;;  %v2519_v61 = vshll.u32 %v10996_v31, %v11039_v0  ;;  %v2899_v62 = vsel %vm2897_vm13, %v11056_v20, 2102212464  ;;  %v11085_v47 = vand.u32 8388607, %v15965_v28 }
 0x335   : > { %v2520_v37 = vshrl.u32 %v2502_v34, %v2518_v57  ;;  %v11081_v24 = vadd.s32 127, %v2522_v30  ;;  %v2768_v9 = vadd.s32 1, %v8141_v16  ;;  %v2618_v31 = vclz %v8134_v14  ;;  %v11089_v34 = vpop.f32.mrb[5].mxu0 }
 0x336   : > { %vm2665_vm14 = vcmp.gt.s32.totalorder %v2664_v40, 0  ;;  %16193 = vst [vmem:[#allocation17_spill] sm:$0xff] %v11089_v34  ;;  %vm2896_vm7 = vcmp.lt.s32.totalorder %v11017_v18, 3  ;;  %v2702_v63 = vshll.u32 %v2662_v17, 8  ;;  %vm2895_vm15 = vcmp.lt.s32.totalorder %v11017_v18, 2 }
 0x337   : > { %v2666_v23 = vsel %vm2665_vm14, %v2664_v40, 0  ;;  %vm2769_vm1 = vcmp.gt.s32.totalorder %v2768_v9, 0  ;;  %v8135_v35 = vadd.s32 4294967294, %v2618_v31  ;;  %v2524_v17 = vshll.u32 %v11081_v24, 23 }
 0x338   : > { %v2668_v4 = vand.u32 31, %v2666_v23  ;;  %v2667_v43 = vshrl.u32 %v2666_v23, 5 }
 0x339   : > { %vm8136_vm10 = vcmp.lt.s32.totalorder %v8135_v35, 0 }
 0x33a   : > { %v2669_v55 = vsub.s32 32, %v2668_v4  ;;  %v2671_v54 = vshll.u32 %v16130_v6, %v2668_v4  ;;  %v2674_v56 = vshll.u32 %v16131_v3, %v2668_v4  ;;  %v2677_v40 = vshll.u32 %v16132_v7, %v2668_v4 }
 0x33b   : > { %v2680_v52 = vshll.u32 %v16133_v27, %v2668_v4  ;;  %v2683_v5 = vshll.u32 %v16134_v25, %v2668_v4  ;;  %vm2686_vm4 = vcmp.lt.s32.totalorder %v2667_v43, 1  ;;  %vm2689_vm12 = vcmp.lt.s32.totalorder %v2667_v43, 4 }
 0x33c   : > { %v2672_v0 = vshrl.u32 %v16131_v3, %v2669_v55  ;;  %v2675_v48 = vshrl.u32 %v16132_v7, %v2669_v55  ;;  %v2678_v51 = vshrl.u32 %v16133_v27, %v2669_v55  ;;  %v2681_v57 = vshrl.u32 %v16134_v25, %v2669_v55 }
 0x33d   : > { %v2684_v30 = vshrl.u32 %v16135_v26, %v2669_v55  ;;  %v2670_v46 = vshrl.u32 %v16130_v6, %v2669_v55  ;;  %vm2688_vm5 = vcmp.lt.s32.totalorder %v2667_v43, 3  ;;  %vm2687_vm9 = vcmp.lt.s32.totalorder %v2667_v43, 2 }
 0x33e   : > { %v2673_v16 = vor.u32 %v2672_v0, %v2671_v54  ;;  %v2676_v23 = vor.u32 %v2675_v48, %v2674_v56  ;;  %v2679_v14 = vor.u32 %v2678_v51, %v2677_v40  ;;  %v2682_v8 = vor.u32 %v2681_v57, %v2680_v52 }
 0x33f   : > { %v2685_v29 = vor.u32 %v2684_v30, %v2683_v5  ;;  %v2770_v54 = vsel %vm2769_vm1, %v2768_v9, 0  ;;  %v2766_v9 = vor.u32 8388608, %v11085_v47  ;;  %vm2448_vm1 = vcmp.lt.s32.totalorder %v10902_v60, 0 }
 0x340   : > { %v2691_v28 = vsel %vm2689_vm12, %v2679_v14, 2102212464  ;;  %v2694_v58 = vsel %vm2686_vm4, %v2673_v16, %v2676_v23  ;;  %v2695_v50 = vsel %vm2689_vm12, %v2682_v8, 920167782  ;;  %v2698_v41 = vsel %vm2686_vm4, %v2676_v23, %v2679_v14 }
 0x341   : > { %v2696_v4 = vsel %vm2688_vm5, %v2679_v14, %v2695_v50  ;;  %v2699_v34 = vsel %vm2689_vm12, %v2685_v29, 1326507024  ;;  %v2690_v56 = vsel %vm2686_vm4, %v2670_v46, %v2673_v16  ;;  %v2692_v0 = vsel %vm2688_vm5, %v2676_v23, %v2691_v28  ;;  %v11147_v16 = vpop.f32.mrb[5].mxu1 }
 0x342   : > { %v2697_v48 = vsel %vm2687_vm9, %v2694_v58, %v2696_v4  ;;  %v2700_v40 = vsel %vm2688_vm5, %v2682_v8, %v2699_v34  ;;  %v2900_v50 = vsel %vm2896_vm7, %v11049_v49, %v2899_v62  ;;  %v2693_v29 = vsel %vm2687_vm9, %v2690_v56, %v2692_v0 }
 0x343   : > { %v2701_v51 = vsel %vm2687_vm9, %v2698_v41, %v2700_v40  ;;  %v11102_v52 = vmul.u32.u64.low %v2702_v63, %v2697_v48  ;;  %v11103_v57 = vmul.u32.u64.high %v2702_v63, %v2697_v48, %v11102_v52  ;;  %v2772_v46 = vand.u32 31, %v2770_v54 }
 0x344   : > { %v11107_v55 = vmul.u32.u64.low %v2702_v63, %v2701_v51  ;;  %v11108_v31 = vmul.u32.u64.high %v2702_v63, %v2701_v51, %v11107_v55  ;;  %v2903_v8 = vsel %vm2897_vm13, %v11068_v38, 920167782  ;;  %v11117_v41 = vor.u32 %v2520_v37, %v2519_v61 }
 0x345   : > { %v11119_v58 = vsel %vm8136_vm10, 0, %v8135_v35  ;;  %v2893_v28 = vor.u32 %v11065_v59, %v11059_v32  ;;  %v2902_v62 = vsel %vm2894_vm3, %v11044_v13, %v11049_v49  ;;  %v2712_v24 = vadd.s32 1, %v11103_v57 }
 0x346   : > { %v2773_v43 = vsub.s32 32, %v2772_v46  ;;  %v11132_v61 = vsel %vm2895_vm15, %v11074_v11, %v2900_v50  ;;  %v11134_v35 = vor.u32 4788187, %v2524_v17  ;;  %v2709_v37 = vmul.u32 %v2702_v63, %v2693_v29 }
 0x347   : > { %vm2711_vm0 = vc.u32 %v11108_v31, %v11102_v52  ;;  %v2904_v13 = vsel %vm2896_vm7, %v11056_v20, %v2903_v8  ;;  %v2622_v59 = vsub.s32 32, %v11119_v58  ;;  %v2771_v47 = vshrl.u32 %v2770_v54, 5 }
 0x348   : > { %v2713_v32 = vsel %vm2711_vm0, %v2712_v24, %v11103_v57  ;;  %v2776_v34 = vshrl.u32 %v16131_v3, %v2773_v43  ;;  %v2775_v11 = vshll.u32 %v16130_v6, %v2772_v46  ;;  %v2778_v30 = vshll.u32 %v16131_v3, %v2772_v46 }
 0x349   : > { %v2714_v5 = vadd.s32 %v2713_v32, %v2709_v37  ;;  %v2779_v63 = vshrl.u32 %v16132_v7, %v2773_v43  ;;  %v2781_v23 = vshll.u32 %v16132_v7, %v2772_v46  ;;  %v2782_v14 = vshrl.u32 %v16133_v27, %v2773_v43 }
 0x34a   : > { %v2784_v4 = vshll.u32 %v16133_v27, %v2772_v46  ;;  %v2785_v56 = vshrl.u32 %v16134_v25, %v2773_v43  ;;  %v2626_v0 = vsub.s32 4294967266, %v11119_v58  ;;  %v2777_v48 = vor.u32 %v2776_v34, %v2775_v11 }
 0x34b   : > { %v2715_v54 = vadd.s32 536870912, %v2714_v5  ;;  %v2780_v40 = vor.u32 %v2779_v63, %v2778_v30  ;;  %v2783_v51 = vor.u32 %v2782_v14, %v2781_v23  ;;  %v2787_v17 = vshll.u32 %v16134_v25, %v2772_v46 }
 0x34c   : > { %v2786_v57 = vor.u32 %v2785_v56, %v2784_v4  ;;  %v2788_v55 = vshrl.u32 %v16135_v26, %v2773_v43  ;;  %v2526_v50 = vand.u32 2147483647, %v11134_v35  ;;  %v2528_v29 = vcvt.s32.f32 %v11117_v41 }
 0x34d   : > { %v11158_v8 = vshrl.u32 %v2715_v54, 30  ;;  %v2806_v24 = vshll.u32 %v2766_v9, 8  ;;  %v2624_v37 = vshrl.u32 %v11033_v36, %v2622_v59  ;;  %vm2793_vm2 = vcmp.lt.s32.totalorder %v2771_v47, 4 }
 0x34e   : > { %v2789_v32 = vor.u32 %v2788_v55, %v2787_v17  ;;  %v2905_v34 = vsel %vm2895_vm15, %v2902_v62, %v2904_v13  ;;  %v2627_v30 = vadd.s32 127, %v2626_v0  ;;  %vm2790_vm8 = vcmp.lt.s32.totalorder %v2771_v47, 1 }
 0x34f   : > { %v2717_v11 = vshll.u32 %v11158_v8, 30  ;;  %v2795_v46 = vsel %vm2793_vm2, %v2783_v51, 2102212464  ;;  %v2774_v63 = vshrl.u32 %v16130_v6, %v2773_v43  ;;  %v2798_v35 = vsel %vm2790_vm8, %v2777_v48, %v2780_v40 }
 0x350   : > { %v2799_v23 = vsel %vm2793_vm2, %v2786_v57, 920167782  ;;  %v2803_v41 = vsel %vm2793_vm2, %v2789_v32, 1326507024  ;;  %vm2791_vm11 = vcmp.lt.s32.totalorder %v2771_v47, 2  ;;  %vm2792_vm14 = vcmp.lt.s32.totalorder %v2771_v47, 3 }
 0x351   : > { %v11165_v14 = vsub.s32 %v2714_v5, %v2717_v11  ;;  %v2802_v36 = vsel %vm2790_vm8, %v2780_v40, %v2783_v51  ;;  %v2794_v9 = vsel %vm2790_vm8, %v2774_v63, %v2777_v48  ;;  %v2796_v59 = vsel %vm2792_vm14, %v2780_v40, %v2795_v46 }
 0x352   : > { %v2800_v4 = vsel %vm2792_vm14, %v2783_v51, %v2799_v23  ;;  %v2804_v56 = vsel %vm2792_vm14, %v2786_v57, %v2803_v41  ;;  %v2906_v43 = vsel %vm2894_vm3, %v11049_v49, %v11056_v20  ;;  %v2907_v5 = vsel %vm2897_vm13, %v2893_v28, 1326507024 }
 0x353   : > { %v2720_v62 = vsub.s32 0, %v11165_v14  ;;  %v2801_v13 = vsel %vm2791_vm11, %v2798_v35, %v2800_v4  ;;  %v2628_v54 = vshll.u32 %v2627_v30, 23  ;;  %v2805_v0 = vsel %vm2791_vm11, %v2802_v36, %v2804_v56 }
 0x354   : > { %v11177_v48 = vmul.u32.u64.low %v2806_v24, %v2801_v13  ;;  %v11178_v40 = vmul.u32.u64.high %v2806_v24, %v2801_v13, %v11177_v48  ;;  %v2797_v57 = vsel %vm2791_vm11, %v2794_v9, %v2796_v59  ;;  %v2908_v49 = vsel %vm2896_vm7, %v11068_v38, %v2907_v5 }
 0x355   : > { %v8138_v51 = vmin.u32 %v2720_v62, %v11165_v14  ;;  %v11183_v17 = vmul.u32.u64.low %v2806_v24, %v2805_v0  ;;  %v11184_v55 = vmul.u32.u64.high %v2806_v24, %v2805_v0, %v11183_v17  ;;  %v11196_v32 = vadd.f32 %v11025_v39, %v10909_v21 }
 0x356   : > { %v11190_v20 = vmul.u32.u64.low %v11019_v2, %v2905_v34  ;;  %v11191_v28 = vmul.u32.u64.high %v11019_v2, %v2905_v34, %v11190_v20  ;;  %v2529_v11 = vmul.f32 %v2528_v29, %v2526_v50  ;;  %v2623_v47 = vshll.u32 %v11021_v33, %v11119_v58 }
 0x357   : > { %16194 = vst [vmem:[#allocation16_spill] sm:$0xff] %v11196_v32  ;;  %v2722_v30 = vclz %v8138_v51  ;;  %v2909_v46 = vsel %vm2895_vm15, %v2906_v43, %v2908_v49  ;;  %v16195_v63 = vand.u32 2147483647, %v10902_v60  ;;  %v2629_v34 = vor.u32 4788187, %v2628_v54 }
 0x358   : > { %v2816_v35 = vadd.s32 1, %v11178_v40  ;;  %v11210_v39 = vmul.u32.u64.low %v11019_v2, %v2909_v46  ;;  %v11211_v23 = vmul.u32.u64.high %v11019_v2, %v2909_v46, %v11210_v39  ;;  %v2625_v29 = vor.u32 %v2624_v37, %v2623_v47 }
 0x359   : > { %vm11204_vm3 = vcmp.le.f32.partialorder %v16195_v63, 0.7853982  ;;  %v8139_v50 = vadd.s32 4294967294, %v2722_v30  ;;  %v2813_v41 = vmul.u32 %v2806_v24, %v2797_v57  ;;  %vm2815_vm13 = vc.u32 %v11184_v55, %v11177_v48 }
 0x35a   : > { %v2817_v18 = vsel %vm2815_vm13, %v2816_v35, %v11178_v40  ;;  %v2920_v33 = vadd.s32 1, %v11191_v28  ;;  %v3073_v58 = vand.u32 2139095040, %v11196_v32  ;;  %v2976_v36 = vadd.s32 1, %v11029_v19  ;;  %v11240_v35 = vpop.permute.xlu1 %2247 }
 0x35b   : > { %v2530_v9 = vxor.u32 2147483648, %v2529_v11  ;;  %vm8140_vm7 = vcmp.lt.s32.totalorder %v8139_v50, 0  ;;  %v2818_v59 = vadd.s32 %v2817_v18, %v2813_v41  ;;  %v16198_v4 = vand.u32 2147483647, %v10994_v1 }
 0x35c   : > { %v2725_v62 = vsel %vm8140_vm7, 0, %v8139_v50  ;;  %v2630_v37 = vand.u32 2147483647, %v2629_v34  ;;  %vm2919_vm4 = vc.u32 %v11211_v23, %v11190_v20  ;;  %v3074_v24 = vshrl.u32 %v3073_v58, 23 }
 0x35d   : > { %v2973_v56 = vand.u32 8388607, %v16198_v4  ;;  %v16199_v13 = vsub.s32 4, %v10985_v42  ;;  %v2632_v5 = vcvt.s32.f32 %v2625_v29  ;;  %v2819_v19 = vadd.s32 536870912, %v2818_v59 }
 0x35e   : > { %v2917_v54 = vmul.u32 %v11019_v2, %v11132_v61  ;;  %v2921_v0 = vsel %vm2919_vm4, %v2920_v33, %v11191_v28  ;;  %v15971_v40 = vand.u32 2147483647, %v11196_v32  ;;  %v8153_v51 = vadd.s32 4294967169, %v3074_v24 }
 0x35f   : > { %v2533_v43 = vsel %vm2448_vm1, %v16199_v13, %v10985_v42  ;;  %vm2977_vm12 = vcmp.gt.s32.totalorder %v2976_v36, 0  ;;  %v2531_v57 = vsel %vm2448_vm1, %v2530_v9, %v2529_v11  ;;  %v2730_v17 = vsub.s32 4294967266, %v2725_v62 }
 0x360   : > { %vm2552_vm5 = vcmp.lt.s32.totalorder %v10905_v44, 0  ;;  %v11235_v49 = vshrl.u32 %v2819_v19, 30  ;;  %v2922_v42 = vadd.s32 %v2921_v0, %v2917_v54  ;;  %v2726_v30 = vsub.s32 32, %v2725_v62 }
 0x361   : > { %v2633_v47 = vmul.f32 %v2632_v5, %v2630_v37  ;;  %v3080_v46 = vadd.s32 1, %v8153_v51  ;;  %v2974_v63 = vor.u32 8388608, %v2973_v56  ;;  %v2535_v2 = vsel %vm11204_vm3, 0, %v2533_v43  ;;  %v11268_v5 = vpop.f32.mrb[6].mxu0 }
 0x362   : > { %16200 = vst [vmem:[#allocation5_spill] sm:$0xff] %v11235_v49  ;;  %v2821_v61 = vshll.u32 %v11235_v49, 30  ;;  %v2923_v28 = vadd.s32 536870912, %v2922_v42  ;;  %v2978_v34 = vsel %vm2977_vm12, %v2976_v36, 0  ;;  %v2534_v11 = vsel %vm11204_vm3, %v10902_v60, %v2531_v57 }
 0x363   : > { %v2710_v39 = vadd.s32 %v11102_v52, %v11108_v31  ;;  %v3077_v50 = vand.u32 8388607, %v15971_v40  ;;  %vm3081_vm9 = vcmp.gt.s32.totalorder %v3080_v46, 0  ;;  %v2731_v29 = vadd.s32 127, %v2730_v17 }
 0x364   : > { %v11249_v41 = vsub.s32 %v2818_v59, %v2821_v61  ;;  %v11251_v18 = vshrl.u32 %v2923_v28, 30  ;;  %v11255_v33 = vadd.f32 %v10944_v45, %v11240_v35  ;;  %v2634_v36 = vxor.u32 2147483648, %v2633_v47 }
 0x365   : > { %v2728_v58 = vshrl.u32 %v2710_v39, %v2726_v30  ;;  %v3082_v38 = vsel %vm3081_vm9, %v3080_v46, 0  ;;  %v11257_v9 = vand.u32 31, %v2978_v34  ;;  %8733 = vcosq.f32 %v2534_v11 }
 0x366   : > { %16201 = vst [vmem:[#allocation15_spill] sm:$0xff] %v11255_v33  ;;  %v11259_v52 = vadd.s32 3, %v2535_v2  ;;  %v2824_v31 = vsub.s32 0, %v11249_v41  ;;  %v2925_v4 = vshll.u32 %v11251_v18, 30  ;;  %8735 = vsinq.f32 %v2534_v11 }
 0x367   : > { %v2727_v59 = vshll.u32 %v11165_v14, %v2725_v62  ;;  %v3078_v56 = vor.u32 8388608, %v3077_v50  ;;  %v3084_v37 = vand.u32 31, %v3082_v38  ;;  %v2732_v24 = vshll.u32 %v2731_v29, 23 }
 0x368   : > { %16202 = vst [vmem:[#allocation12_spill] sm:$0xff] %v11259_v52  ;;  %v8142_v13 = vmin.u32 %v2824_v31, %v11249_v41  ;;  %v11266_v43 = vsub.s32 %v2922_v42, %v2925_v4  ;;  %v11274_v54 = vsel %vm2552_vm5, %v2634_v36, %v2633_v47  ;;  %v11277_v14 = vsub.s32 32, %v11257_v9 }
 0x369   : > { %v11270_v19 = vor.u32 %v2728_v58, %v2727_v59  ;;  %v3085_v0 = vsub.s32 32, %v3084_v37  ;;  %v2814_v62 = vadd.s32 %v11177_v48, %v11184_v55  ;;  %v11282_v17 = vshll.u32 %v2974_v63, 8 }
 0x36a   : > { %v2826_v51 = vclz %v8142_v13  ;;  %v2928_v57 = vsub.s32 0, %v11266_v43  ;;  %v11286_v42 = vadd.s32 %v11190_v20, %v11211_v23  ;;  %v11288_v30 = vshll.u32 %v3078_v56, 8 }
 0x36b   : > { %v11290_v47 = vshrl.u32 %v2978_v34, 5  ;;  %v11294_v46 = vshll.u32 %v16130_v6, %v11257_v9  ;;  %v11296_v2 = vor.u32 4788187, %v2732_v24  ;;  %v11301_v63 = vshll.u32 %v16131_v3, %v11257_v9 }
 0x36c   : > { %v8143_v48 = vadd.s32 4294967294, %v2826_v51  ;;  %v8146_v55 = vmin.u32 %v2928_v57, %v11266_v43  ;;  %v2736_v20 = vcvt.s32.f32 %v11270_v19  ;;  %v3088_v23 = vshrl.u32 %v16131_v3, %v3085_v0 }
 0x36d   : > { %v3091_v61 = vshrl.u32 %v16132_v7, %v3085_v0  ;;  %v11308_v28 = vshrl.u32 %v16130_v6, %v11277_v14  ;;  %v3087_v11 = vshll.u32 %v16130_v6, %v3084_v37  ;;  %v3094_v39 = vshrl.u32 %v16133_v27, %v3085_v0 }
 0x36e   : > { %vm8144_vm10 = vcmp.lt.s32.totalorder %v8143_v48, 0  ;;  %v2930_v34 = vclz %v8146_v55  ;;  %v3090_v29 = vshll.u32 %v16131_v3, %v3084_v37  ;;  %v3096_v58 = vshll.u32 %v16133_v27, %v3084_v37 }
 0x36f   : > { %v2829_v50 = vsel %vm8144_vm10, 0, %v8143_v48  ;;  %v3097_v36 = vshrl.u32 %v16134_v25, %v3085_v0  ;;  %v11315_v31 = vpop.eup %8733  ;;  %v3083_v56 = vshrl.u32 %v3082_v38, 5  ;;  %v3093_v24 = vshll.u32 %v16132_v7, %v3084_v37 }
 0x370   : > { %16203 = vst [vmem:[#allocation14_spill] sm:$0xff] %v11315_v31  ;;  %v2834_v4 = vsub.s32 4294967266, %v2829_v50  ;;  %v8147_v59 = vadd.s32 4294967294, %v2930_v34  ;;  %v11318_v13 = vpop.eup %8735  ;;  %v3089_v19 = vor.u32 %v3088_v23, %v3087_v11  ;;  %v3092_v51 = vor.u32 %v3091_v61, %v3090_v29  ;;  %v11329_v11 = vpop.f32.mrb[6].mxu1 }
 0x371   : > { %16204 = vst [vmem:[#allocation8_spill] sm:$0xff] %v11318_v13  ;;  %v3098_v57 = vor.u32 %v3097_v36, %v3096_v58  ;;  %v3100_v48 = vshrl.u32 %v16135_v26, %v3085_v0  ;;  %v3095_v40 = vor.u32 %v3094_v39, %v3093_v24  ;;  %v3099_v45 = vshll.u32 %v16134_v25, %v3084_v37 }
 0x372   : > { %v2835_v55 = vadd.s32 127, %v2834_v4  ;;  %vm8148_vm15 = vcmp.lt.s32.totalorder %v8147_v59, 0  ;;  %v2830_v60 = vsub.s32 32, %v2829_v50  ;;  %v2984_v38 = vshrl.u32 %v16131_v3, %v11277_v14  ;;  %16205 = vst [vmem:[#allocation10_spill] sm:$0xff] %v11329_v11 }
 0x373   : > { %v11322_v52 = vsel %vm8148_vm15, 0, %v8147_v59  ;;  %v2987_v34 = vshrl.u32 %v16132_v7, %v11277_v14  ;;  %v2734_v23 = vand.u32 2147483647, %v11296_v2  ;;  %v3101_v61 = vor.u32 %v3100_v48, %v3099_v45 }
 0x374   : > { %vm3102_vm0 = vcmp.lt.s32.totalorder %v3083_v56, 1  ;;  %vm3105_vm2 = vcmp.lt.s32.totalorder %v3083_v56, 4  ;;  %v2938_v39 = vsub.s32 4294967266, %v11322_v52  ;;  %v3086_v37 = vshrl.u32 %v16130_v6, %v3085_v0 }
 0x375   : > { %v3110_v29 = vsel %vm3102_vm0, %v3089_v19, %v3092_v51  ;;  %v3111_v58 = vsel %vm3105_vm2, %v3098_v57, 920167782  ;;  %v2831_v36 = vshll.u32 %v11249_v41, %v2829_v50  ;;  %v2836_v4 = vshll.u32 %v2835_v55, 23 }
 0x376   : > { %vm3104_vm8 = vcmp.lt.s32.totalorder %v3083_v56, 3  ;;  %v3107_v59 = vsel %vm3105_vm2, %v3095_v40, 2102212464  ;;  %v2832_v2 = vshrl.u32 %v2814_v62, %v2830_v60  ;;  %vm3103_vm11 = vcmp.lt.s32.totalorder %v3083_v56, 2 }
 0x377   : > { %v3112_v45 = vsel %vm3104_vm8, %v3095_v40, %v3111_v58  ;;  %v3114_v24 = vsel %vm3102_vm0, %v3092_v51, %v3095_v40  ;;  %v2939_v48 = vadd.s32 127, %v2938_v39  ;;  %v3106_v31 = vsel %vm3102_vm0, %v3086_v37, %v3089_v19 }
 0x378   : > { %v3113_v0 = vsel %vm3103_vm11, %v3110_v29, %v3112_v45  ;;  %v3115_v13 = vsel %vm3105_vm2, %v3101_v61, 1326507024  ;;  %v3108_v49 = vsel %vm3104_vm8, %v3092_v51, %v3107_v59  ;;  %v2837_v55 = vor.u32 4788187, %v2836_v4 }
 0x379   : > { %v3116_v11 = vsel %vm3104_vm8, %v3098_v57, %v3115_v13  ;;  %v11342_v41 = vmul.u32.u64.low %v11288_v30, %v3113_v0  ;;  %v11343_v50 = vmul.u32.u64.high %v11288_v30, %v3113_v0, %v11342_v41  ;;  %v2934_v60 = vsub.s32 32, %v11322_v52 }
 0x37a   : > { %v3117_v62 = vsel %vm3103_vm11, %v3114_v24, %v3116_v11  ;;  %v2985_v40 = vor.u32 %v2984_v38, %v11294_v46  ;;  %v2737_v39 = vmul.f32 %v2736_v20, %v2734_v23  ;;  %v2833_v19 = vor.u32 %v2832_v2, %v2831_v36 }
 0x37b   : > { %v11350_v37 = vmul.u32.u64.low %v11288_v30, %v3117_v62  ;;  %v11351_v29 = vmul.u32.u64.high %v11288_v30, %v3117_v62, %v11350_v37  ;;  %v2940_v51 = vshll.u32 %v2939_v48, 23  ;;  %v3109_v13 = vsel %vm3103_vm11, %v3106_v31, %v3108_v49 }
 0x37c   : > { %v2990_v57 = vshrl.u32 %v16133_v27, %v11277_v14  ;;  %v2993_v61 = vshrl.u32 %v16134_v25, %v11277_v14  ;;  %v3128_v58 = vadd.s32 1, %v11343_v50  ;;  %v2989_v46 = vshll.u32 %v16132_v7, %v11257_v9 }
 0x37d   : > { %v2992_v20 = vshll.u32 %v16133_v27, %v11257_v9  ;;  %v2996_v38 = vshrl.u32 %v16135_v26, %v11277_v14  ;;  %vm2656_vm14 = vcmp.lt.s32.totalorder %v11007_v22, 0  ;;  %v16206_v49 = vand.u32 2147483647, %v10905_v44 }
 0x37e   : > { %v2838_v56 = vand.u32 2147483647, %v2837_v55  ;;  %v2936_v23 = vshrl.u32 %v11286_v42, %v2934_v60  ;;  %v2988_v11 = vor.u32 %v2987_v34, %v11301_v63  ;;  %v2995_v36 = vshll.u32 %v16134_v25, %v11257_v9 }
 0x37f   : > { %vm11368_vm1 = vcmp.le.f32.partialorder %v16206_v49, 0.7853982  ;;  %v3125_v4 = vmul.u32 %v11288_v30, %v3109_v13  ;;  %vm3127_vm3 = vc.u32 %v11351_v29, %v11342_v41  ;;  %v2991_v14 = vor.u32 %v2990_v57, %v2989_v46 }
 0x380   : > { %v2994_v59 = vor.u32 %v2993_v61, %v2992_v20  ;;  %v2840_v2 = vcvt.s32.f32 %v2833_v19  ;;  %v2935_v45 = vshll.u32 %v11266_v43, %v11322_v52  ;;  %v3129_v24 = vsel %vm3127_vm3, %v3128_v58, %v11343_v50 }
 0x381   : > { %v2997_v48 = vor.u32 %v2996_v38, %v2995_v36  ;;  %v2738_v42 = vxor.u32 2147483648, %v2737_v39  ;;  %v2941_v0 = vor.u32 4788187, %v2940_v51  ;;  %v3130_v63 = vadd.s32 %v3129_v24, %v3125_v4 }
 0x382   : > { %vm2998_vm13 = vcmp.lt.s32.totalorder %v11290_v47, 1  ;;  %v16209_v9 = vand.u32 2147483647, %v11007_v22  ;;  %v2841_v34 = vmul.f32 %v2840_v2, %v2838_v56  ;;  %v2937_v55 = vor.u32 %v2936_v23, %v2935_v45 }
 0x383   : > { %vm3001_vm4 = vcmp.lt.s32.totalorder %v11290_v47, 4  ;;  %v3006_v52 = vsel %vm2998_vm13, %v2985_v40, %v2988_v11  ;;  %v3131_v43 = vadd.s32 536870912, %v3130_v63  ;;  %vm3000_vm12 = vcmp.lt.s32.totalorder %v11290_v47, 3 }
 0x384   : > { %vm11385_vm7 = vcmp.le.f32.partialorder %v16209_v9, 0.7853982  ;;  %v3003_v50 = vsel %vm3001_vm4, %v2991_v14, 2102212464  ;;  %v3007_v60 = vsel %vm3001_vm4, %v2994_v59, 920167782  ;;  %v3010_v19 = vsel %vm2998_vm13, %v2988_v11, %v2991_v14 }
 0x385   : > { %vm2999_vm9 = vcmp.lt.s32.totalorder %v11290_v47, 2  ;;  %v3008_v62 = vsel %vm3000_vm12, %v2991_v14, %v3007_v60  ;;  %v3011_v37 = vsel %vm3001_vm4, %v2997_v48, 1326507024  ;;  %vm16013_vm10 = vcmp.lt.s32.totalorder %v11011_v10, 0 }
 0x386   : > { %v2942_v51 = vand.u32 2147483647, %v2941_v0  ;;  %v11397_v13 = vshrl.u32 %v3131_v43, 30  ;;  %v3002_v57 = vsel %vm2998_vm13, %v11308_v28, %v2985_v40  ;;  %v3009_v61 = vsel %vm2999_vm9, %v3006_v52, %v3008_v62 }
 0x387   : > { %v3004_v58 = vsel %vm3000_vm12, %v2988_v11, %v3003_v50  ;;  %v3012_v46 = vsel %vm3000_vm12, %v2994_v59, %v3011_v37  ;;  %v11405_v20 = vmul.u32.u64.low %v11282_v17, %v3009_v61  ;;  %v11406_v38 = vmul.u32.u64.high %v11282_v17, %v3009_v61, %v11405_v20 }
 0x388   : > { %v2739_v49 = vsel %vm2656_vm14, %v2738_v42, %v2737_v39  ;;  %v2638_v56 = vsel %vm11368_vm1, %v10905_v44, %v11274_v54  ;;  %vm2864_vm15 = vcmp.lt.s32.totalorder %v10914_v12, 0  ;;  %v3133_v28 = vshll.u32 %v11397_v13, 30 }
 0x389   : > { %v3013_v40 = vsel %vm2999_vm9, %v3010_v19, %v3012_v46  ;;  %v16212_v23 = vand.u32 2147483647, %v11011_v10  ;;  %v2944_v36 = vcvt.s32.f32 %v2937_v55  ;;  %v11431_v54 = vadd.f32 %v11037_v53, %v10909_v21  ;;  %v11468_v46 = vpop.f32.mrb[7].mxu0 }
 0x38a   : > { %v11426_v39 = vmul.u32.u64.low %v11282_v17, %v3013_v40  ;;  %v11427_v4 = vmul.u32.u64.high %v11282_v17, %v3013_v40, %v11426_v39  ;;  %v16216_v14 = vsub.s32 4, %v11158_v8  ;;  %v11440_v2 = vsub.s32 %v3130_v63, %v3133_v28 }
 0x38b   : > { %vm11421_vm0 = vcmp.le.f32.partialorder %v16212_v23, 0.7853982  ;;  %16215 = vst [vmem:[#allocation7_spill] sm:$0xff] %v11431_v54  ;;  %v3005_v45 = vsel %vm2999_vm9, %v3002_v57, %v3004_v58  ;;  %v3281_v24 = vand.u32 2139095040, %v11255_v33  ;;  %8737 = vcosq.f32 %v2638_v56 }
 0x38c   : > { %v11438_v59 = vsel %vm2656_vm14, %v16216_v14, %v11158_v8  ;;  %v2842_v48 = vxor.u32 2147483648, %v2841_v34  ;;  %v2945_v42 = vmul.f32 %v2944_v36, %v2942_v51  ;;  %v3024_v21 = vadd.s32 1, %v11406_v38 }
 0x38d   : > { %v2742_v53 = vsel %vm11385_vm7, %v11007_v22, %v2739_v49  ;;  %v3136_v0 = vsub.s32 0, %v11440_v2  ;;  %v15979_v8 = vand.u32 2147483647, %v11431_v54  ;;  %v3177_v63 = vand.u32 2139095040, %v11431_v54 }
 0x38e   : > { %8739 = vsinq.f32 %v2638_v56  ;;  %v2948_v47 = vsub.s32 4, %v11251_v18  ;;  %v3021_v9 = vmul.u32 %v11282_v17, %v3005_v45  ;;  %vm3023_vm2 = vc.u32 %v11427_v4, %v11405_v20 }
 0x38f   : > { %v16217_v55 = vand.u32 2147483647, %v10914_v12  ;;  %v8154_v43 = vmin.u32 %v3136_v0, %v11440_v2  ;;  %v3025_v50 = vsel %vm3023_vm2, %v3024_v21, %v11406_v38  ;;  %v3178_v60 = vshrl.u32 %v3177_v63, 23 }
 0x390   : > { %v3282_v62 = vshrl.u32 %v3281_v24, 23  ;;  %8741 = vcosq.f32 %v2742_v53  ;;  %v2843_v19 = vsel %vm16013_vm10, %v2842_v48, %v2841_v34  ;;  %v2946_v17 = vxor.u32 2147483648, %v2945_v42 }
 0x391   : > { %vm11458_vm8 = vcmp.le.f32.partialorder %v16217_v55, 0.7853982  ;;  %v3026_v37 = vadd.s32 %v3025_v50, %v3021_v9  ;;  %v3138_v51 = vclz %v8154_v43  ;;  %v8157_v57 = vadd.s32 4294967169, %v3178_v60 }
 0x392   : > { %v3181_v61 = vand.u32 8388607, %v15979_v8  ;;  %v8161_v58 = vadd.s32 4294967169, %v3282_v62  ;;  %8743 = vsinq.f32 %v2742_v53  ;;  %v11476_v49 = vsel %vm2864_vm15, %v2948_v47, %v11251_v18 }
 0x393   : > { %v3027_v34 = vadd.s32 536870912, %v3026_v37  ;;  %v11481_v56 = vsel %vm11421_vm0, %v11011_v10, %v2843_v19  ;;  %v8155_v28 = vadd.s32 4294967294, %v3138_v51  ;;  %v3184_v40 = vadd.s32 1, %v8157_v57 }
 0x394   : > { %v3288_v23 = vadd.s32 1, %v8161_v58  ;;  %v2947_v36 = vsel %vm2864_vm15, %v2946_v17, %v2945_v42  ;;  %v3126_v39 = vadd.s32 %v11342_v41, %v11351_v29  ;;  %v15978_v18 = vand.u32 2147483647, %v11255_v33 }
 0x395   : > { %v11487_v14 = vshrl.u32 %v3027_v34, 30  ;;  %vm8156_vm11 = vcmp.lt.s32.totalorder %v8155_v28, 0  ;;  %v3182_v45 = vor.u32 8388608, %v3181_v61  ;;  %vm3185_vm14 = vcmp.gt.s32.totalorder %v3184_v40, 0  ;;  %v11490_v24 = vpop.eup %8737 }
 0x396   : > { %vm3289_vm3 = vcmp.gt.s32.totalorder %v3288_v23, 0  ;;  %8745 = vcosq.f32 %v11481_v56  ;;  %v3141_v48 = vsel %vm8156_vm11, 0, %v8155_v28  ;;  %v3186_v53 = vsel %vm3185_vm14, %v3184_v40, 0 }
 0x397   : > { %v3029_v21 = vshll.u32 %v11487_v14, 30  ;;  %v3142_v42 = vsub.s32 32, %v3141_v48  ;;  %v3146_v0 = vsub.s32 4294967266, %v3141_v48  ;;  %v11494_v63 = vshrl.u32 %v3186_v53, 5 }
 0x398   : > { %v11496_v41 = vsel %vm3289_vm3, %v3288_v23, 0  ;;  %v11498_v29 = vpop.eup %8739  ;;  %v11503_v47 = vsel %vm11458_vm8, %v10914_v12, %v2947_v36  ;;  %v3188_v43 = vand.u32 31, %v3186_v53  ;;  %v3022_v60 = vadd.s32 %v11405_v20, %v11427_v4 }
 0x399   : > { %v11506_v55 = vsub.s32 %v3026_v37, %v3029_v21  ;;  %v3147_v50 = vadd.s32 127, %v3146_v0  ;;  %v11510_v62 = vshll.u32 %v3182_v45, 8  ;;  %v11514_v19 = vand.u32 8388607, %v15978_v18 }
 0x39a   : > { %v11516_v17 = vpop.eup %8741  ;;  %v3143_v51 = vshll.u32 %v11440_v2, %v3141_v48  ;;  %v3189_v61 = vsub.s32 32, %v3188_v43  ;;  %v11521_v37 = vand.u32 31, %v11496_v41  ;;  %v3144_v58 = vshrl.u32 %v3126_v39, %v3142_v42 }
 0x39b   : > { %16220 = vst [vmem:[#allocation9_spill] sm:$0xff] %v11516_v17  ;;  %v3032_v57 = vsub.s32 0, %v11506_v55  ;;  %v3148_v34 = vshll.u32 %v3147_v50, 23  ;;  %v3191_v20 = vshll.u32 %v16130_v6, %v3188_v43  ;;  %vm3206_vm13 = vcmp.lt.s32.totalorder %v11494_v63, 1 }
 0x39c   : > { %v11525_v4 = vpop.eup %8743  ;;  %v3192_v40 = vshrl.u32 %v16131_v3, %v3189_v61  ;;  %v3194_v2 = vshll.u32 %v16131_v3, %v3188_v43  ;;  %v3195_v23 = vshrl.u32 %v16132_v7, %v3189_v61  ;;  %v3197_v36 = vshll.u32 %v16132_v7, %v3188_v43 }
 0x39d   : > { %16221 = vst [vmem:[#allocation19_spill] sm:$0xff] %v11525_v4  ;;  %v8150_v28 = vmin.u32 %v3032_v57, %v11506_v55  ;;  %v3198_v45 = vshrl.u32 %v16133_v27, %v3189_v61  ;;  %v3200_v39 = vshll.u32 %v16133_v27, %v3188_v43  ;;  %v3201_v48 = vshrl.u32 %v16134_v25, %v3189_v61 }
 0x39e   : > { %v3149_v21 = vor.u32 4788187, %v3148_v34  ;;  %v3193_v42 = vor.u32 %v3192_v40, %v3191_v20  ;;  %v3196_v0 = vor.u32 %v3195_v23, %v3194_v2  ;;  %v3203_v18 = vshll.u32 %v16134_v25, %v3188_v43  ;;  %v11547_v20 = vpop.f32.mrb[7].mxu1 }
 0x39f   : > { %v3034_v53 = vclz %v8150_v28  ;;  %v3199_v50 = vor.u32 %v3198_v45, %v3197_v36  ;;  %v3202_v57 = vor.u32 %v3201_v48, %v3200_v39  ;;  %v3204_v8 = vshrl.u32 %v16135_v26, %v3189_v61 }
 0x3a0   : > { %v11537_v38 = vpop.eup %8745  ;;  %v3190_v22 = vshrl.u32 %v16130_v6, %v3189_v61  ;;  %vm3207_vm4 = vcmp.lt.s32.totalorder %v11494_v63, 2  ;;  %vm3209_vm12 = vcmp.lt.s32.totalorder %v11494_v63, 4  ;;  %vm3208_vm9 = vcmp.lt.s32.totalorder %v11494_v63, 3 }
 0x3a1   : > { %16222 = vst [vmem:[#allocation20_spill] sm:$0xff] %v11537_v38  ;;  %v8151_v9 = vadd.s32 4294967294, %v3034_v53  ;;  %v3205_v17 = vor.u32 %v3204_v8, %v3203_v18  ;;  %v3211_v34 = vsel %vm3209_vm12, %v3199_v50, 2102212464  ;;  %v3214_v43 = vsel %vm3206_vm13, %v3193_v42, %v3196_v0 }
 0x3a2   : > { %v3210_v28 = vsel %vm3206_vm13, %v3190_v22, %v3193_v42  ;;  %v3212_v61 = vsel %vm3208_vm9, %v3196_v0, %v3211_v34  ;;  %v3215_v8 = vsel %vm3209_vm12, %v3202_v57, 920167782  ;;  %v3145_v18 = vor.u32 %v3144_v58, %v3143_v51 }
 0x3a3   : > { %vm8152_vm15 = vcmp.lt.s32.totalorder %v8151_v9, 0  ;;  %v3150_v40 = vand.u32 2147483647, %v3149_v21  ;;  %v3216_v23 = vsel %vm3208_vm9, %v3199_v50, %v3215_v8  ;;  %v3218_v22 = vsel %vm3206_vm13, %v3196_v0, %v3199_v50 }
 0x3a4   : > { %v3037_v2 = vsel %vm8152_vm15, 0, %v8151_v9  ;;  %v3217_v39 = vsel %vm3207_vm4, %v3214_v43, %v3216_v23  ;;  %v3213_v48 = vsel %vm3207_vm4, %v3210_v28, %v3212_v61  ;;  %v3219_v53 = vsel %vm3209_vm12, %v3205_v17, 1326507024 }
 0x3a5   : > { %v3038_v36 = vsub.s32 32, %v3037_v2  ;;  %v3042_v45 = vsub.s32 4294967266, %v3037_v2  ;;  %v11566_v51 = vmul.u32.u64.low %v11510_v62, %v3217_v39  ;;  %v11567_v9 = vmul.u32.u64.high %v11510_v62, %v3217_v39, %v11566_v51 }
 0x3a6   : > { %v3039_v58 = vshll.u32 %v11506_v55, %v3037_v2  ;;  %v3220_v34 = vsel %vm3208_vm9, %v3202_v57, %v3219_v53  ;;  %v3152_v43 = vcvt.s32.f32 %v3145_v18  ;;  %v3293_v50 = vsub.s32 32, %v11521_v37 }
 0x3a7   : > { %v3040_v21 = vshrl.u32 %v3022_v60, %v3038_v36  ;;  %v3043_v42 = vadd.s32 127, %v3042_v45  ;;  %v3221_v0 = vsel %vm3207_vm4, %v3218_v22, %v3220_v34  ;;  %v11578_v17 = vadd.f32 %v11047_v15, %v11240_v35 }
 0x3a8   : > { %v3286_v8 = vor.u32 8388608, %v11514_v19  ;;  %v11582_v55 = vshrl.u32 %v11496_v41, 5  ;;  %v11584_v60 = vmul.f32 %v3152_v43, %v3150_v40  ;;  %v3229_v63 = vmul.u32 %v11510_v62, %v3213_v48 }
 0x3a9   : > { %16223 = vst [vmem:[#allocation21_spill] sm:$0xff] %v11578_v17  ;;  %v3041_v28 = vor.u32 %v3040_v21, %v3039_v58  ;;  %v3044_v61 = vshll.u32 %v3043_v42, 23  ;;  %v11587_v57 = vmul.u32.u64.low %v11510_v62, %v3221_v0  ;;  %v11588_v18 = vmul.u32.u64.high %v11510_v62, %v3221_v0, %v11587_v57 }
 0x3aa   : > { %v3232_v23 = vadd.s32 1, %v11567_v9  ;;  %v3295_v15 = vshll.u32 %v16130_v6, %v11521_v37  ;;  %v3296_v36 = vshrl.u32 %v16131_v3, %v3293_v50  ;;  %v3298_v41 = vshll.u32 %v16131_v3, %v11521_v37 }
 0x3ab   : > { %v3045_v2 = vor.u32 4788187, %v3044_v61  ;;  %v3048_v19 = vcvt.s32.f32 %v3041_v28  ;;  %v3299_v40 = vshrl.u32 %v16132_v7, %v3293_v50  ;;  %v3302_v45 = vshrl.u32 %v16133_v27, %v3293_v50 }
 0x3ac   : > { %v3301_v62 = vshll.u32 %v16132_v7, %v11521_v37  ;;  %v3304_v22 = vshll.u32 %v16133_v27, %v11521_v37  ;;  %v3305_v48 = vshrl.u32 %v16134_v25, %v3293_v50  ;;  %vm3231_vm2 = vc.u32 %v11588_v18, %v11566_v51 }
 0x3ad   : > { %v3046_v39 = vand.u32 2147483647, %v3045_v2  ;;  %v3297_v53 = vor.u32 %v3296_v36, %v3295_v15  ;;  %v3300_v58 = vor.u32 %v3299_v40, %v3298_v41  ;;  %v3307_v21 = vshll.u32 %v16134_v25, %v11521_v37 }
 0x3ae   : > { %v3233_v42 = vsel %vm3231_vm2, %v3232_v23, %v11567_v9  ;;  %v3303_v34 = vor.u32 %v3302_v45, %v3301_v62  ;;  %v3306_v43 = vor.u32 %v3305_v48, %v3304_v22  ;;  %v3308_v0 = vshrl.u32 %v16135_v26, %v3293_v50 }
 0x3af   : > { %vm3072_vm11 = vcmp.lt.s32.totalorder %v11196_v32, 0  ;;  %v3234_v28 = vadd.s32 %v3233_v42, %v3229_v63  ;;  %v3326_v61 = vshll.u32 %v3286_v8, 8  ;;  %v3489_v2 = vand.u32 2139095040, %v11578_v17 }
 0x3b0   : > { %vm2968_vm14 = vcmp.lt.s32.totalorder %v10994_v1, 0  ;;  %v3049_v15 = vmul.f32 %v3048_v19, %v3046_v39  ;;  %v3309_v36 = vor.u32 %v3308_v0, %v3307_v21  ;;  %vm3310_vm3 = vcmp.lt.s32.totalorder %v11582_v55, 1 }
 0x3b1   : > { %vm3313_vm13 = vcmp.lt.s32.totalorder %v11582_v55, 4  ;;  %v3235_v37 = vadd.s32 536870912, %v3234_v28  ;;  %vm3312_vm4 = vcmp.lt.s32.totalorder %v11582_v55, 3  ;;  %v3318_v9 = vsel %vm3310_vm3, %v3297_v53, %v3300_v58 }
 0x3b2   : > { %v3319_v8 = vsel %vm3313_vm13, %v3306_v43, 920167782  ;;  %v16224_v63 = vand.u32 2147483647, %v11196_v32  ;;  %v3154_v19 = vxor.u32 2147483648, %v11584_v60  ;;  %vm3311_vm9 = vcmp.lt.s32.totalorder %v11582_v55, 2 }
 0x3b3   : > { %v3315_v41 = vsel %vm3313_vm13, %v3303_v34, 2102212464  ;;  %v3320_v40 = vsel %vm3312_vm4, %v3303_v34, %v3319_v8  ;;  %v16227_v45 = vand.u32 2147483647, %v10994_v1  ;;  %v11639_v62 = vshrl.u32 %v3235_v37, 30 }
 0x3b4   : > { %vm11623_vm12 = vcmp.le.f32.partialorder %v16224_v63, 0.7853982  ;;  %v3294_v22 = vshrl.u32 %v16130_v6, %v3293_v50  ;;  %v3321_v48 = vsel %vm3311_vm9, %v3318_v9, %v3320_v40  ;;  %v3322_v21 = vsel %vm3310_vm3, %v3300_v58, %v3303_v34  ;;  %v16231_v40 = vld [vmem:[#allocation17_spill] sm:$0xff] }
 0x3b5   : > { %vm11635_vm15 = vcmp.le.f32.partialorder %v16227_v45, 0.7853982  ;;  %16230 = vst [vmem:[#allocation22_spill] sm:$0xff] %v11639_v62  ;;  %v3050_v42 = vxor.u32 2147483648, %v3049_v15  ;;  %v3323_v0 = vsel %vm3313_vm13, %v3309_v36, 1326507024  ;;  %v3316_v50 = vsel %vm3312_vm4, %v3300_v58, %v3315_v41 }
 0x3b6   : > { %v11648_v8 = vmul.u32.u64.low %v3326_v61, %v3321_v48  ;;  %v11649_v63 = vmul.u32.u64.high %v3326_v61, %v3321_v48, %v11648_v8  ;;  %v3237_v45 = vshll.u32 %v11639_v62, 30  ;;  %v3314_v37 = vsel %vm3310_vm3, %v3294_v22, %v3297_v53 }
 0x3b7   : > { %v3324_v9 = vsel %vm3312_vm4, %v3306_v43, %v3323_v0  ;;  %8747 = vsinq.f32 %v11481_v56  ;;  %v3490_v36 = vshrl.u32 %v3489_v2, 23  ;;  %v11664_v48 = vadd.f32 %v16231_v40, %v11240_v35 }
 0x3b8   : > { %v3325_v34 = vsel %vm3311_vm9, %v3322_v21, %v3324_v9  ;;  %8749 = vcosq.f32 %v11503_v47  ;;  %v11667_v57 = vsub.s32 %v3234_v28, %v3237_v45  ;;  %v3155_v58 = vsel %vm3072_vm11, %v3154_v19, %v11584_v60 }
 0x3b9   : > { %v11669_v53 = vmul.u32.u64.low %v3326_v61, %v3325_v34  ;;  %v11670_v22 = vmul.u32.u64.high %v3326_v61, %v3325_v34, %v11669_v53  ;;  %v3317_v56 = vsel %vm3311_vm9, %v3314_v37, %v3316_v50  ;;  %v3336_v43 = vadd.s32 1, %v11649_v63 }
 0x3ba   : > { %v8169_v2 = vadd.s32 4294967169, %v3490_v36  ;;  %v16232_v41 = vsub.s32 4, %v11397_v13  ;;  %v3051_v21 = vsel %vm2968_vm14, %v3050_v42, %v3049_v15  ;;  %v3240_v0 = vsub.s32 0, %v11667_v57 }
 0x3bb   : > { %v16233_v45 = vand.u32 2147483647, %v11578_v17  ;;  %v2951_v55 = vsel %vm11458_vm8, 0, %v11476_v49  ;;  %8751 = vsinq.f32 %v11503_v47  ;;  %v3385_v37 = vand.u32 2139095040, %v11664_v48 }
 0x3bc   : > { %v3157_v28 = vsel %vm3072_vm11, %v16232_v41, %v11397_v13  ;;  %v3496_v19 = vadd.s32 1, %v8169_v2  ;;  %v3158_v13 = vsel %vm11623_vm12, %v11196_v32, %v3155_v58  ;;  %v8158_v15 = vmin.u32 %v3240_v0, %v11667_v57 }
 0x3bd   : > { %v3493_v60 = vand.u32 8388607, %v16233_v45  ;;  %v3333_v42 = vmul.u32 %v3326_v61, %v3317_v56  ;;  %vm3335_vm2 = vc.u32 %v11670_v22, %v11648_v8  ;;  %v3159_v50 = vsel %vm11623_vm12, 0, %v3157_v28 }
 0x3be   : > { %v11704_v52 = vsel %vm11635_vm15, %v10994_v1, %v3051_v21  ;;  %v3337_v49 = vsel %vm3335_vm2, %v3336_v43, %v11649_v63  ;;  %vm3497_vm8 = vcmp.gt.s32.totalorder %v3496_v19, 0  ;;  %v3242_v47 = vclz %v8158_v15 }
 0x3bf   : > { %v3338_v9 = vadd.s32 %v3337_v49, %v3333_v42  ;;  %v3494_v34 = vor.u32 8388608, %v3493_v60  ;;  %v3498_v36 = vsel %vm3497_vm8, %v3496_v19, 0  ;;  %v16234_v61 = vsel %vm11385_vm7, 0, %v11438_v59 }
 0x3c0   : > { %v11711_v40 = vadd.s32 3, %v16234_v61  ;;  %8753 = vcosq.f32 %v3158_v13  ;;  %v3500_v23 = vand.u32 31, %v3498_v36  ;;  %v3386_v53 = vshrl.u32 %v3385_v37, 23 }
 0x3c1   : > { %v11713_v58 = vadd.s32 3, %v2951_v55  ;;  %8755 = vsinq.f32 %v3158_v13  ;;  %v8159_v56 = vadd.s32 4294967294, %v3242_v47  ;;  %v3339_v2 = vadd.s32 536870912, %v3338_v9  ;;  %v11715_v63 = vpop.eup %8747 }
 0x3c2   : > { %16235 = vst [vmem:[#allocation17_spill] sm:$0xff] %v11711_v40  ;;  %16237 = vst [vmem:[#allocation24_spill] sm:$0xff] %v11715_v63  ;;  %v11717_v43 = vadd.s32 3, %v3159_v50  ;;  %8757 = vcosq.f32 %v11704_v52  ;;  %v3230_v30 = vadd.s32 %v11566_v51, %v11588_v18  ;;  %v3501_v59 = vsub.s32 32, %v3500_v23  ;;  %v11722_v41 = vpop.eup %8749 }
 0x3c3   : > { %16236 = vst [vmem:[#allocation23_spill] sm:$0xff] %v11713_v58  ;;  %16239 = vst [vmem:[#allocation26_spill] sm:$0xff] %v11722_v41  ;;  %vm8160_vm7 = vcmp.lt.s32.totalorder %v8159_v56, 0  ;;  %v11724_v28 = vshrl.u32 %v3339_v2, 30  ;;  %v11726_v21 = vshll.u32 %v3494_v34, 8  ;;  %v8165_v19 = vadd.s32 4294967169, %v3386_v53 }
 0x3c4   : > { %16238 = vst [vmem:[#allocation25_spill] sm:$0xff] %v11717_v43  ;;  %v3245_v45 = vsel %vm8160_vm7, 0, %v8159_v56  ;;  %v3504_v60 = vshrl.u32 %v16131_v3, %v3501_v59  ;;  %v3507_v55 = vshrl.u32 %v16132_v7, %v3501_v59  ;;  %v3499_v51 = vshrl.u32 %v3498_v36, 5 }
 0x3c5   : > { %v3250_v37 = vsub.s32 4294967266, %v3245_v45  ;;  %v3341_v13 = vshll.u32 %v11724_v28, 30  ;;  %v3503_v18 = vshll.u32 %v16130_v6, %v3500_v23  ;;  %v11733_v15 = vpop.eup %8751  ;;  %v3506_v42 = vshll.u32 %v16131_v3, %v3500_v23 }
 0x3c6   : > { %16240 = vst [vmem:[#allocation27_spill] sm:$0xff] %v11733_v15  ;;  %v3509_v50 = vshll.u32 %v16132_v7, %v3500_v23  ;;  %v3510_v49 = vshrl.u32 %v16133_v27, %v3501_v59  ;;  %v3512_v47 = vshll.u32 %v16133_v27, %v3500_v23  ;;  %v3513_v53 = vshrl.u32 %v16134_v25, %v3501_v59 }
 0x3c7   : > { %v3251_v34 = vadd.s32 127, %v3250_v37  ;;  %v11739_v61 = vsub.s32 %v3338_v9, %v3341_v13  ;;  %v3515_v56 = vshll.u32 %v16134_v25, %v3500_v23  ;;  %v3246_v36 = vsub.s32 32, %v3245_v45 }
 0x3c8   : > { %v3505_v2 = vor.u32 %v3504_v60, %v3503_v18  ;;  %v3508_v0 = vor.u32 %v3507_v55, %v3506_v42  ;;  %v3516_v32 = vshrl.u32 %v16135_v26, %v3501_v59  ;;  %v3511_v4 = vor.u32 %v3510_v49, %v3509_v50 }
 0x3c9   : > { %v3344_v43 = vsub.s32 0, %v11739_v61  ;;  %v16241_v40 = vand.u32 2147483647, %v11664_v48  ;;  %v11749_v37 = vadd.f32 %v11147_v16, %v11240_v35  ;;  %v3502_v13 = vshrl.u32 %v16130_v6, %v3501_v59 }
 0x3ca   : > { %v11751_v9 = vpop.eup %8753  ;;  %v3514_v23 = vor.u32 %v3513_v53, %v3512_v47  ;;  %v3517_v12 = vor.u32 %v3516_v32, %v3515_v56  ;;  %v3392_v60 = vadd.s32 1, %v8165_v19  ;;  %v3247_v18 = vshll.u32 %v11667_v57, %v3245_v45 }
 0x3cb   : > { %v3389_v41 = vand.u32 8388607, %v16241_v40  ;;  %16242 = vst [vmem:[#allocation28_spill] sm:$0xff] %v11751_v9  ;;  %v11754_v55 = vpop.eup %8755  ;;  %v3252_v42 = vshll.u32 %v3251_v34, 23  ;;  %v8162_v50 = vmin.u32 %v3344_v43, %v11739_v61  ;;  %vm3518_vm11 = vcmp.lt.s32.totalorder %v3499_v51, 1 }
 0x3cc   : > { %16243 = vst [vmem:[#allocation29_spill] sm:$0xff] %v11754_v55  ;;  %v11758_v40 = vpop.eup %8757  ;;  %v3248_v49 = vshrl.u32 %v3230_v30, %v3246_v36  ;;  %vm3519_vm3 = vcmp.lt.s32.totalorder %v3499_v51, 2  ;;  %vm3521_vm13 = vcmp.lt.s32.totalorder %v3499_v51, 4  ;;  %v3526_v16 = vsel %vm3518_vm11, %v3505_v2, %v3508_v0 }
 0x3cd   : > { %v3346_v35 = vclz %v8162_v50  ;;  %vm3520_vm4 = vcmp.lt.s32.totalorder %v3499_v51, 3  ;;  %v3523_v59 = vsel %vm3521_vm13, %v3511_v4, 2102212464  ;;  %v3527_v32 = vsel %vm3521_vm13, %v3514_v23, 920167782 }
 0x3ce   : > { %v3528_v19 = vsel %vm3520_vm4, %v3511_v4, %v3527_v32  ;;  %v3530_v47 = vsel %vm3518_vm11, %v3508_v0, %v3511_v4  ;;  %v3531_v53 = vsel %vm3521_vm13, %v3517_v12, 1326507024  ;;  %vm3393_vm12 = vcmp.gt.s32.totalorder %v3392_v60, 0 }
 0x3cf   : > { %v3253_v57 = vor.u32 4788187, %v3252_v42  ;;  %v8163_v45 = vadd.s32 4294967294, %v3346_v35  ;;  %v3522_v43 = vsel %vm3518_vm11, %v3502_v13, %v3505_v2  ;;  %v3529_v34 = vsel %vm3519_vm3, %v3526_v16, %v3528_v19  ;;  %v11775_v13 = vpop.permute.xlu1 %2252 }
 0x3d0   : > { %v3524_v30 = vsel %vm3520_vm4, %v3508_v0, %v3523_v59  ;;  %v3532_v56 = vsel %vm3520_vm4, %v3514_v23, %v3531_v53  ;;  %v11765_v36 = vmul.u32.u64.low %v11726_v21, %v3529_v34  ;;  %v11766_v9 = vmul.u32.u64.high %v11726_v21, %v3529_v34, %v11765_v36 }
 0x3d1   : > { %v3249_v50 = vor.u32 %v3248_v49, %v3247_v18  ;;  %vm8164_vm9 = vcmp.lt.s32.totalorder %v8163_v45, 0  ;;  %v3533_v32 = vsel %vm3519_vm3, %v3530_v47, %v3532_v56  ;;  %v3394_v4 = vsel %vm3393_vm12, %v3392_v60, 0 }
 0x3d2   : > { %8759 = vsinq.f32 %v11704_v52  ;;  %v3349_v12 = vsel %vm8164_vm9, 0, %v8163_v45  ;;  %v11772_v42 = vmul.u32.u64.low %v11726_v21, %v3533_v32  ;;  %v11773_v2 = vmul.u32.u64.high %v11726_v21, %v3533_v32, %v11772_v42  ;;  %v16245_v52 = vld [vmem:[#allocation10_spill] sm:$0xff] }
 0x3d3   : > { %v3254_v0 = vand.u32 2147483647, %v3253_v57  ;;  %v3354_v23 = vsub.s32 4294967266, %v3349_v12  ;;  %v3525_v16 = vsel %vm3519_vm3, %v3522_v43, %v3524_v30  ;;  %v3390_v35 = vor.u32 8388608, %v3389_v41 }
 0x3d4   : > { %v3544_v18 = vadd.s32 1, %v11766_v9  ;;  %v3396_v49 = vand.u32 31, %v3394_v4  ;;  %v11781_v60 = vadd.f32 %v11268_v5, %v11775_v13  ;;  %v11785_v59 = vadd.f32 %v16245_v52, %v11775_v13 }
 0x3d5   : > { %v3256_v19 = vcvt.s32.f32 %v3249_v50  ;;  %v3334_v47 = vadd.s32 %v11648_v8, %v11670_v22  ;;  %v3355_v53 = vadd.s32 127, %v3354_v23  ;;  %v3350_v57 = vsub.s32 32, %v3349_v12 }
 0x3d6   : > { %16244 = vst [vmem:[#allocation30_spill] sm:$0xff] %v11781_v60  ;;  %v3541_v41 = vmul.u32 %v11726_v21, %v3525_v16  ;;  %vm3543_vm2 = vc.u32 %v11773_v2, %v11765_v36  ;;  %v3397_v45 = vsub.s32 32, %v3396_v49  ;;  %v11795_v30 = vshll.u32 %v3390_v35, 8 }
 0x3d7   : > { %v3257_v5 = vmul.f32 %v3256_v19, %v3254_v0  ;;  %v3545_v34 = vsel %vm3543_vm2, %v3544_v18, %v11766_v9  ;;  %vm16012_vm8 = vcmp.lt.s32.totalorder %v11431_v54, 0  ;;  %v3351_v8 = vshll.u32 %v11739_v61, %v3349_v12 }
 0x3d8   : > { %v3546_v22 = vadd.s32 %v3545_v34, %v3541_v41  ;;  %v3395_v56 = vshrl.u32 %v3394_v4, 5  ;;  %v3400_v50 = vshrl.u32 %v16131_v3, %v3397_v45  ;;  %v3356_v21 = vshll.u32 %v3355_v53, 23 }
 0x3d9   : > { %v3399_v32 = vshll.u32 %v16130_v6, %v3396_v49  ;;  %v3402_v42 = vshll.u32 %v16131_v3, %v3396_v49  ;;  %v3403_v0 = vshrl.u32 %v16132_v7, %v3397_v45  ;;  %v3352_v23 = vshrl.u32 %v3334_v47, %v3350_v57 }
 0x3da   : > { %v3547_v16 = vadd.s32 536870912, %v3546_v22  ;;  %v3405_v9 = vshll.u32 %v16132_v7, %v3396_v49  ;;  %v3406_v35 = vshrl.u32 %v16133_v27, %v3397_v45  ;;  %v16246_v18 = vand.u32 2147483647, %v11431_v54 }
 0x3db   : > { %v16247_v61 = vmov 0  ;;  %v3401_v4 = vor.u32 %v3400_v50, %v3399_v32  ;;  %v3404_v12 = vor.u32 %v3403_v0, %v3402_v42  ;;  %v3408_v52 = vshll.u32 %v16133_v27, %v3396_v49 }
 0x3dc   : > { %vm11807_vm7 = vcmp.le.f32.partialorder %v16246_v18, 0.7853982  ;;  %v3409_v19 = vshrl.u32 %v16134_v25, %v3397_v45  ;;  %v11813_v53 = vpop.eup %8759  ;;  %v11815_v47 = vshrl.u32 %v3547_v16, 30  ;;  %v3407_v57 = vor.u32 %v3406_v35, %v3405_v9 }
 0x3dd   : > { %v16248_v61 = vsel %vm11807_vm7, 4294967295, %v16247_v61  ;;  %v3411_v41 = vshll.u32 %v16134_v25, %v3396_v49  ;;  %v3412_v34 = vshrl.u32 %v16135_v26, %v3397_v45  ;;  %v3258_v51 = vxor.u32 2147483648, %v3257_v5 }
 0x3de   : > { %16249 = vst [vmem:[#allocation10_spill] sm:$0xff] %v16248_v61  ;;  %vm3280_vm11 = vcmp.lt.s32.totalorder %v11255_v33, 0  ;;  %v3357_v18 = vor.u32 4788187, %v3356_v21  ;;  %v3410_v43 = vor.u32 %v3409_v19, %v3408_v52  ;;  %vm3414_vm3 = vcmp.lt.s32.totalorder %v3395_v56, 1 }
 0x3df   : > { %v3353_v50 = vor.u32 %v3352_v23, %v3351_v8  ;;  %v3549_v32 = vshll.u32 %v11815_v47, 30  ;;  %v3413_v42 = vor.u32 %v3412_v34, %v3411_v41  ;;  %vm3417_vm13 = vcmp.lt.s32.totalorder %v3395_v56, 4 }
 0x3e0   : > { %vm3415_vm4 = vcmp.lt.s32.totalorder %v3395_v56, 2  ;;  %vm3416_vm12 = vcmp.lt.s32.totalorder %v3395_v56, 3  ;;  %v3422_v0 = vsel %vm3414_vm3, %v3401_v4, %v3404_v12  ;;  %v3423_v16 = vsel %vm3417_vm13, %v3410_v43, 920167782 }
 0x3e1   : > { %v11823_v49 = vsub.s32 %v3546_v22, %v3549_v32  ;;  %v3398_v9 = vshrl.u32 %v16130_v6, %v3397_v45  ;;  %v3419_v35 = vsel %vm3417_vm13, %v3407_v57, 2102212464  ;;  %v3424_v21 = vsel %vm3416_vm12, %v3407_v57, %v3423_v16 }
 0x3e2   : > { %v3259_v8 = vsel %vm16012_vm8, %v3258_v51, %v3257_v5  ;;  %v3358_v23 = vand.u32 2147483647, %v3357_v18  ;;  %v3425_v52 = vsel %vm3415_vm4, %v3422_v0, %v3424_v21  ;;  %v3426_v19 = vsel %vm3414_vm3, %v3404_v12, %v3407_v57 }
 0x3e3   : > { %v3360_v41 = vcvt.s32.f32 %v3353_v50  ;;  %v3552_v34 = vsub.s32 0, %v11823_v49  ;;  %v3418_v22 = vsel %vm3414_vm3, %v3398_v9, %v3401_v4  ;;  %v3427_v32 = vsel %vm3417_vm13, %v3413_v42, 1326507024 }
 0x3e4   : > { %v3420_v45 = vsel %vm3416_vm12, %v3404_v12, %v3419_v35  ;;  %v3428_v55 = vsel %vm3416_vm12, %v3410_v43, %v3427_v32  ;;  %v11838_v16 = vmul.u32.u64.low %v11795_v30, %v3425_v52  ;;  %v11839_v15 = vmul.u32.u64.high %v11795_v30, %v3425_v52, %v11838_v16 }
 0x3e5   : > { %v11845_v51 = vsel %vm11807_vm7, %v11431_v54, %v3259_v8  ;;  %vm3488_vm9 = vcmp.lt.s32.totalorder %v11578_v17, 0  ;;  %v8170_v5 = vmin.u32 %v3552_v34, %v11823_v49  ;;  %v3429_v4 = vsel %vm3415_vm4, %v3426_v19, %v3428_v55 }
 0x3e6   : > { %v11852_v12 = vadd.f32 %v11468_v46, %v11775_v13  ;;  %v3361_v43 = vmul.f32 %v3360_v41, %v3358_v23  ;;  %v11855_v57 = vmul.u32.u64.low %v11795_v30, %v3429_v4  ;;  %v11856_v18 = vmul.u32.u64.high %v11795_v30, %v3429_v4, %v11855_v57 }
 0x3e7   : > { %v3593_v50 = vand.u32 2139095040, %v11749_v37  ;;  %v16250_v42 = vsub.s32 4, %v11724_v28  ;;  %v3554_v9 = vclz %v8170_v5  ;;  %v3421_v55 = vsel %vm3415_vm4, %v3418_v22, %v3420_v45 }
 0x3e8   : > { %v3697_v46 = vand.u32 2139095040, %v11781_v60  ;;  %8761 = vcosq.f32 %v11845_v51  ;;  %v3440_v35 = vadd.s32 1, %v11839_v15  ;;  %v16251_v8 = vand.u32 2147483647, %v11749_v37 }
 0x3e9   : > { %v11864_v0 = vsel %vm3280_vm11, %v16250_v42, %v11724_v28  ;;  %v3594_v21 = vshrl.u32 %v3593_v50, 23  ;;  %v8171_v52 = vadd.s32 4294967294, %v3554_v9  ;;  %v3572_v19 = vsub.s32 4, %v11815_v47 }
 0x3ea   : > { %v3597_v23 = vand.u32 8388607, %v16251_v8  ;;  %v15991_v41 = vand.u32 2147483647, %v11781_v60  ;;  %v3698_v28 = vshrl.u32 %v3697_v46, 23  ;;  %v3362_v34 = vxor.u32 2147483648, %v3361_v43 }
 0x3eb   : > { %v3437_v56 = vmul.u32 %v11795_v30, %v3421_v55  ;;  %vm3439_vm2 = vc.u32 %v11856_v18, %v11838_v16  ;;  %v8173_v22 = vadd.s32 4294967169, %v3594_v21  ;;  %v3542_v32 = vadd.s32 %v11765_v36, %v11773_v2 }
 0x3ec   : > { %vm8172_vm3 = vcmp.lt.s32.totalorder %v8171_v52, 0  ;;  %v3441_v45 = vsel %vm3439_vm2, %v3440_v35, %v11839_v15  ;;  %v8177_v5 = vadd.s32 4294967169, %v3698_v28  ;;  %v3598_v50 = vor.u32 8388608, %v3597_v23 }
 0x3ed   : > { %v3557_v4 = vsel %vm8172_vm3, 0, %v8171_v52  ;;  %v3442_v57 = vadd.s32 %v3441_v45, %v3437_v56  ;;  %v3600_v42 = vadd.s32 1, %v8173_v22  ;;  %v11882_v30 = vand.u32 8388607, %v15991_v41 }
 0x3ee   : > { %v3558_v9 = vsub.s32 32, %v3557_v4  ;;  %v3562_v46 = vsub.s32 4294967266, %v3557_v4  ;;  %v3704_v55 = vadd.s32 1, %v8177_v5  ;;  %v11886_v21 = vsel %vm3280_vm11, %v3362_v34, %v3361_v43 }
 0x3ef   : > { %v11891_v15 = vsel %vm3488_vm9, %v3572_v19, %v11815_v47  ;;  %v3443_v36 = vadd.s32 536870912, %v3442_v57  ;;  %vm3601_vm13 = vcmp.gt.s32.totalorder %v3600_v42, 0  ;;  %v3559_v23 = vshll.u32 %v11823_v49, %v3557_v4 }
 0x3f0   : > { %v3560_v2 = vshrl.u32 %v3542_v32, %v3558_v9  ;;  %v3563_v35 = vadd.s32 127, %v3562_v46  ;;  %v3602_v8 = vsel %vm3601_vm13, %v3600_v42, 0  ;;  %vm3705_vm4 = vcmp.gt.s32.totalorder %v3704_v55, 0 }
 0x3f1   : > { %v11894_v52 = vshrl.u32 %v3443_v36, 30  ;;  %v3604_v28 = vand.u32 31, %v3602_v8  ;;  %v3706_v56 = vsel %vm3705_vm4, %v3704_v55, 0  ;;  %v11896_v43 = vshll.u32 %v3598_v50, 8 }
 0x3f2   : > { %v3564_v22 = vshll.u32 %v3563_v35, 23  ;;  %v3702_v34 = vor.u32 8388608, %v11882_v30  ;;  %v11900_v19 = vpop.eup %8761  ;;  %v3561_v45 = vor.u32 %v3560_v2, %v3559_v23  ;;  %v3603_v5 = vshrl.u32 %v3602_v8, 5 }
 0x3f3   : > { %16252 = vst [vmem:[#allocation31_spill] sm:$0xff] %v11894_v52  ;;  %16253 = vst [vmem:[#allocation32_spill] sm:$0xff] %v11900_v19  ;;  %v3445_v32 = vshll.u32 %v11894_v52, 30  ;;  %v3605_v42 = vsub.s32 32, %v3604_v28  ;;  %v3607_v49 = vshll.u32 %v16130_v6, %v3604_v28  ;;  %v3610_v4 = vshll.u32 %v16131_v3, %v3604_v28 }
 0x3f4   : > { %v3565_v9 = vor.u32 4788187, %v3564_v22  ;;  %v11905_v46 = vand.u32 31, %v3706_v56  ;;  %v3613_v36 = vshll.u32 %v16132_v7, %v3604_v28  ;;  %v3616_v35 = vshll.u32 %v16133_v27, %v3604_v28 }
 0x3f5   : > { %v11907_v50 = vsub.s32 %v3442_v57, %v3445_v32  ;;  %v3608_v30 = vshrl.u32 %v16131_v3, %v3605_v42  ;;  %v3611_v55 = vshrl.u32 %v16132_v7, %v3605_v42  ;;  %v3614_v2 = vshrl.u32 %v16133_v27, %v3605_v42 }
 0x3f6   : > { %v3617_v8 = vshrl.u32 %v16134_v25, %v3605_v42  ;;  %v3619_v23 = vshll.u32 %v16134_v25, %v3604_v28  ;;  %v3620_v57 = vshrl.u32 %v16135_v26, %v3605_v42  ;;  %v3568_v32 = vcvt.s32.f32 %v3561_v45 }
 0x3f7   : > { %v3448_v22 = vsub.s32 0, %v11907_v50  ;;  %v3609_v41 = vor.u32 %v3608_v30, %v3607_v49  ;;  %v3612_v47 = vor.u32 %v3611_v55, %v3610_v4  ;;  %v3606_v52 = vshrl.u32 %v16130_v6, %v3605_v42 }
 0x3f8   : > { %v3615_v58 = vor.u32 %v3614_v2, %v3613_v36  ;;  %v3618_v19 = vor.u32 %v3617_v8, %v3616_v35  ;;  %v3566_v61 = vand.u32 2147483647, %v3565_v9  ;;  %v3621_v38 = vor.u32 %v3620_v57, %v3619_v23 }
 0x3f9   : > { %v8166_v54 = vmin.u32 %v3448_v22, %v11907_v50  ;;  %vm3622_vm11 = vcmp.lt.s32.totalorder %v3603_v5, 1  ;;  %vm3623_vm12 = vcmp.lt.s32.totalorder %v3603_v5, 2  ;;  %vm3624_vm2 = vcmp.lt.s32.totalorder %v3603_v5, 3 }
 0x3fa   : > { %vm3625_vm3 = vcmp.lt.s32.totalorder %v3603_v5, 4  ;;  %v3630_v28 = vsel %vm3622_vm11, %v3609_v41, %v3612_v47  ;;  %v3626_v63 = vsel %vm3622_vm11, %v3606_v52, %v3609_v41  ;;  %v3634_v42 = vsel %vm3622_vm11, %v3612_v47, %v3615_v58 }
 0x3fb   : > { %v3450_v62 = vclz %v8166_v54  ;;  %v3627_v49 = vsel %vm3625_vm3, %v3615_v58, 2102212464  ;;  %v3631_v4 = vsel %vm3625_vm3, %v3618_v19, 920167782  ;;  %v3635_v55 = vsel %vm3625_vm3, %v3621_v38, 1326507024 }
 0x3fc   : > { %v3628_v30 = vsel %vm3624_vm2, %v3612_v47, %v3627_v49  ;;  %v3632_v45 = vsel %vm3624_vm2, %v3615_v58, %v3631_v4  ;;  %v11922_v36 = vmul.f32 %v3568_v32, %v3566_v61  ;;  %v3438_v9 = vadd.s32 %v11838_v16, %v11856_v18 }
 0x3fd   : > { %v8167_v2 = vadd.s32 4294967294, %v3450_v62  ;;  %v3633_v35 = vsel %vm3623_vm12, %v3630_v28, %v3632_v45  ;;  %v3629_v8 = vsel %vm3623_vm12, %v3626_v63, %v3628_v30  ;;  %v3636_v54 = vsel %vm3624_vm2, %v3618_v19, %v3635_v55 }
 0x3fe   : > { %v11930_v41 = vmul.u32.u64.low %v11896_v43, %v3633_v35  ;;  %v11931_v52 = vmul.u32.u64.high %v11896_v43, %v3633_v35, %v11930_v41  ;;  %v3637_v38 = vsel %vm3623_vm12, %v3634_v42, %v3636_v54  ;;  %v11935_v58 = vshrl.u32 %v3706_v56, 5 }
 0x3ff   : > { %vm8168_vm13 = vcmp.lt.s32.totalorder %v8167_v2, 0  ;;  %v11937_v61 = vshll.u32 %v3702_v34, 8  ;;  %v11940_v62 = vmul.u32.u64.low %v11896_v43, %v3637_v38  ;;  %v11941_v18 = vmul.u32.u64.high %v11896_v43, %v3637_v38, %v11940_v62 }
 0x400   : > { %v3453_v16 = vsel %vm8168_vm13, 0, %v8167_v2  ;;  %v3709_v63 = vsub.s32 32, %v11905_v46  ;;  %v3570_v47 = vxor.u32 2147483648, %v11922_v36  ;;  %v3645_v22 = vmul.u32 %v11896_v43, %v3629_v8 }
 0x401   : > { %v3454_v19 = vsub.s32 32, %v3453_v16  ;;  %v3458_v23 = vsub.s32 4294967266, %v3453_v16  ;;  %v3455_v5 = vshll.u32 %v11907_v50, %v3453_v16  ;;  %v3648_v56 = vadd.s32 1, %v11931_v52 }
 0x402   : > { %v3711_v34 = vshll.u32 %v16130_v6, %v11905_v46  ;;  %v3712_v57 = vshrl.u32 %v16131_v3, %v3709_v63  ;;  %v3714_v49 = vshll.u32 %v16131_v3, %v11905_v46  ;;  %v3715_v4 = vshrl.u32 %v16132_v7, %v3709_v63 }
 0x403   : > { %v3456_v32 = vshrl.u32 %v3438_v9, %v3454_v19  ;;  %v3459_v28 = vadd.s32 127, %v3458_v23  ;;  %vm3647_vm4 = vc.u32 %v11941_v18, %v11930_v41  ;;  %v3717_v50 = vshll.u32 %v16132_v7, %v11905_v46 }
 0x404   : > { %v3713_v43 = vor.u32 %v3712_v57, %v3711_v34  ;;  %v3718_v30 = vshrl.u32 %v16133_v27, %v3709_v63  ;;  %v3649_v55 = vsel %vm3647_vm4, %v3648_v56, %v11931_v52  ;;  %v3716_v9 = vor.u32 %v3715_v4, %v3714_v49 }
 0x405   : > { %v3457_v45 = vor.u32 %v3456_v32, %v3455_v5  ;;  %v3460_v42 = vshll.u32 %v3459_v28, 23  ;;  %v3650_v2 = vadd.s32 %v3649_v55, %v3645_v22  ;;  %v3720_v8 = vshll.u32 %v16133_v27, %v11905_v46 }
 0x406   : > { %v3719_v35 = vor.u32 %v3718_v30, %v3717_v50  ;;  %v3721_v54 = vshrl.u32 %v16134_v25, %v3709_v63  ;;  %v16254_v38 = vand.u32 2147483647, %v11255_v33  ;;  %v3710_v19 = vshrl.u32 %v16130_v6, %v3709_v63 }
 0x407   : > { %v3461_v62 = vor.u32 4788187, %v3460_v42  ;;  %v3723_v52 = vshll.u32 %v16134_v25, %v11905_v46  ;;  %v3724_v23 = vshrl.u32 %v16135_v26, %v3709_v63  ;;  %v16257_v22 = vand.u32 2147483647, %v11578_v17 }
 0x408   : > { %vm11965_vm11 = vcmp.le.f32.partialorder %v16254_v38, 0.7853982  ;;  %v3464_v56 = vcvt.s32.f32 %v3457_v45  ;;  %v3651_v34 = vadd.s32 536870912, %v3650_v2  ;;  %v3722_v57 = vor.u32 %v3721_v54, %v3720_v8 }
 0x409   : > { %vm11975_vm12 = vcmp.le.f32.partialorder %v16257_v22, 0.7853982  ;;  %vm3726_vm2 = vcmp.lt.s32.totalorder %v11935_v58, 1  ;;  %v3462_v32 = vand.u32 2147483647, %v3461_v62  ;;  %v3725_v28 = vor.u32 %v3724_v23, %v3723_v52 }
 0x40a   : > { %vm3728_vm3 = vcmp.lt.s32.totalorder %v11935_v58, 3  ;;  %vm3729_vm13 = vcmp.lt.s32.totalorder %v11935_v58, 4  ;;  %vm16005_vm4 = vcmp.lt.s32.totalorder %v11664_v48, 0  ;;  %v11983_v46 = vshrl.u32 %v3651_v34, 30 }
 0x40b   : > { %v3730_v63 = vsel %vm3726_vm2, %v3710_v19, %v3713_v43  ;;  %v3731_v49 = vsel %vm3729_vm13, %v3719_v35, 2102212464  ;;  %v3734_v4 = vsel %vm3726_vm2, %v3713_v43, %v3716_v9  ;;  %v3465_v50 = vmul.f32 %v3464_v56, %v3462_v32 }
 0x40c   : > { %v3732_v30 = vsel %vm3728_vm3, %v3716_v9, %v3731_v49  ;;  %v3735_v45 = vsel %vm3729_vm13, %v3722_v57, 920167782  ;;  %v3738_v42 = vsel %vm3726_vm2, %v3716_v9, %v3719_v35  ;;  %v3653_v55 = vshll.u32 %v11983_v46, 30 }
 0x40d   : > { %vm3727_vm6 = vcmp.lt.s32.totalorder %v11935_v58, 2  ;;  %v3736_v8 = vsel %vm3728_vm3, %v3719_v35, %v3735_v45  ;;  %v3739_v54 = vsel %vm3729_vm13, %v3725_v28, 1326507024  ;;  %v3571_v38 = vsel %vm3488_vm9, %v3570_v47, %v11922_v36 }
 0x40e   : > { %v3733_v62 = vsel %vm3727_vm6, %v3730_v63, %v3732_v30  ;;  %v3737_v43 = vsel %vm3727_vm6, %v3734_v4, %v3736_v8  ;;  %v3740_v19 = vsel %vm3728_vm3, %v3722_v57, %v3739_v54  ;;  %v11996_v52 = vsub.s32 %v3650_v2, %v3653_v55 }
 0x40f   : > { %v3741_v9 = vsel %vm3727_vm6, %v3738_v42, %v3740_v19  ;;  %v11999_v23 = vmul.u32.u64.low %v11937_v61, %v3737_v43  ;;  %v12000_v22 = vmul.u32.u64.high %v11937_v61, %v3737_v43, %v11999_v23  ;;  %v3466_v56 = vxor.u32 2147483648, %v3465_v50 }
 0x410   : > { %v12003_v35 = vmul.u32.u64.low %v11937_v61, %v3741_v9  ;;  %v12004_v34 = vmul.u32.u64.high %v11937_v61, %v3741_v9, %v12003_v35  ;;  %v3905_v32 = vand.u32 2139095040, %v11785_v59  ;;  %8763 = vsinq.f32 %v11845_v51 }
 0x411   : > { %v3367_v36 = vsel %vm11965_vm11, 0, %v11864_v0  ;;  %v16260_v58 = vand.u32 2147483647, %v11664_v48  ;;  %v3656_v2 = vsub.s32 0, %v11996_v52  ;;  %v3366_v57 = vsel %vm11965_vm11, %v11255_v33, %v11886_v21 }
 0x412   : > { %v3575_v51 = vsel %vm11975_vm12, 0, %v11891_v15  ;;  %v3906_v28 = vshrl.u32 %v3905_v32, 23  ;;  %v3801_v0 = vand.u32 2139095040, %v11852_v12  ;;  %v3574_v63 = vsel %vm11975_vm12, %v11578_v17, %v3571_v38 }
 0x413   : > { %vm12013_vm6 = vcmp.le.f32.partialorder %v16260_v58, 0.7853982  ;;  %v8174_v49 = vmin.u32 %v3656_v2, %v11996_v52  ;;  %v3749_v4 = vmul.u32 %v11937_v61, %v3733_v62  ;;  %v3752_v30 = vadd.s32 1, %v12000_v22 }
 0x414   : > { %v3467_v21 = vsel %vm16005_vm4, %v3466_v56, %v3465_v50  ;;  %vm3751_vm9 = vc.u32 %v12004_v34, %v11999_v23  ;;  %v8185_v16 = vadd.s32 4294967169, %v3906_v28  ;;  %v16263_v15 = vand.u32 2147483647, %v11785_v59 }
 0x415   : > { %8765 = vcosq.f32 %v3366_v57  ;;  %v3658_v42 = vclz %v8174_v49  ;;  %v3753_v5 = vsel %vm3751_vm9, %v3752_v30, %v12000_v22  ;;  %v3802_v55 = vshrl.u32 %v3801_v0, 23 }
 0x416   : > { %v3909_v45 = vand.u32 8388607, %v16263_v15  ;;  %8767 = vsinq.f32 %v3366_v57  ;;  %v12038_v8 = vadd.s32 3, %v3367_v36  ;;  %v3754_v61 = vadd.s32 %v3753_v5, %v3749_v4 }
 0x417   : > { %v3912_v54 = vadd.s32 1, %v8185_v16  ;;  %8769 = vcosq.f32 %v3574_v63  ;;  %v12040_v38 = vadd.s32 3, %v3575_v51  ;;  %v3470_v50 = vsel %vm12013_vm6, %v11664_v48, %v3467_v21 }
 0x418   : > { %v8175_v62 = vadd.s32 4294967294, %v3658_v42  ;;  %8771 = vsinq.f32 %v3574_v63  ;;  %v3755_v43 = vadd.s32 536870912, %v3754_v61  ;;  %v3910_v19 = vor.u32 8388608, %v3909_v45 }
 0x419   : > { %16264 = vst [vmem:[#allocation33_spill] sm:$0xff] %v12040_v38  ;;  %vm3913_vm11 = vcmp.gt.s32.totalorder %v3912_v54, 0  ;;  %v16003_v22 = vand.u32 2147483647, %v11852_v12  ;;  %v8181_v56 = vadd.s32 4294967169, %v3802_v55  ;;  %8773 = vcosq.f32 %v3470_v50 }
 0x41a   : > { %vm8176_vm12 = vcmp.lt.s32.totalorder %v8175_v62, 0  ;;  %v3914_v9 = vsel %vm3913_vm11, %v3912_v54, 0  ;;  %v12046_v32 = vshrl.u32 %v3755_v43, 30  ;;  %v12048_v58 = vpop.eup %8763  ;;  %8775 = vsinq.f32 %v3470_v50 }
 0x41b   : > { %v3661_v35 = vsel %vm8176_vm12, 0, %v8175_v62  ;;  %v3916_v36 = vand.u32 31, %v3914_v9  ;;  %v3646_v2 = vadd.s32 %v11930_v41, %v11941_v18  ;;  %v12053_v28 = vadd.s32 %v11999_v23, %v12004_v34 }
 0x41c   : > { %v3662_v57 = vsub.s32 32, %v3661_v35  ;;  %v3666_v51 = vsub.s32 4294967266, %v3661_v35  ;;  %v3757_v0 = vshll.u32 %v12046_v32, 30  ;;  %v12056_v49 = vshll.u32 %v3910_v19, 8 }
 0x41d   : > { %v3917_v63 = vsub.s32 32, %v3916_v36  ;;  %v12060_v21 = vand.u32 8388607, %v16003_v22  ;;  %v3808_v16 = vadd.s32 1, %v8181_v56  ;;  %v3663_v15 = vshll.u32 %v11996_v52, %v3661_v35 }
 0x41e   : > { %v3664_v4 = vshrl.u32 %v3646_v2, %v3662_v57  ;;  %v3667_v30 = vadd.s32 127, %v3666_v51  ;;  %v12063_v41 = vsub.s32 %v3754_v61, %v3757_v0  ;;  %v3915_v18 = vshrl.u32 %v3914_v9, 5 }
 0x41f   : > { %v3920_v23 = vshrl.u32 %v16131_v3, %v3917_v63  ;;  %v12066_v34 = vpop.eup %8765  ;;  %v3919_v42 = vshll.u32 %v16130_v6, %v3916_v36  ;;  %v3922_v5 = vshll.u32 %v16131_v3, %v3916_v36  ;;  %v3923_v55 = vshrl.u32 %v16132_v7, %v3917_v63 }
 0x420   : > { %16265 = vst [vmem:[#allocation34_spill] sm:$0xff] %v12066_v34  ;;  %v3668_v45 = vshll.u32 %v3667_v30, 23  ;;  %v12071_v54 = vpop.eup %8767  ;;  %v3665_v50 = vor.u32 %v3664_v4, %v3663_v15  ;;  %v3760_v62 = vsub.s32 0, %v12063_v41  ;;  %v3925_v52 = vshll.u32 %v16132_v7, %v3916_v36 }
 0x421   : > { %v3926_v61 = vshrl.u32 %v16133_v27, %v3917_v63  ;;  %v12076_v43 = vpop.eup %8769  ;;  %v3921_v9 = vor.u32 %v3920_v23, %v3919_v42  ;;  %v3924_v56 = vor.u32 %v3923_v55, %v3922_v5  ;;  %vm3809_vm2 = vcmp.gt.s32.totalorder %v3808_v16, 0 }
 0x422   : > { %16266 = vst [vmem:[#allocation35_spill] sm:$0xff] %v12076_v43  ;;  %v3669_v19 = vor.u32 4788187, %v3668_v45  ;;  %v12078_v35 = vpop.eup %8771  ;;  %v8178_v2 = vmin.u32 %v3760_v62, %v12063_v41  ;;  %v3928_v51 = vshll.u32 %v16133_v27, %v3916_v36  ;;  %v3929_v0 = vshrl.u32 %v16134_v25, %v3917_v63 }
 0x423   : > { %16267 = vst [vmem:[#allocation36_spill] sm:$0xff] %v12078_v35  ;;  %v3927_v57 = vor.u32 %v3926_v61, %v3925_v52  ;;  %v3918_v30 = vshrl.u32 %v16130_v6, %v3917_v63  ;;  %v3931_v15 = vshll.u32 %v16134_v25, %v3916_v36  ;;  %v3932_v22 = vshrl.u32 %v16135_v26, %v3917_v63  ;;  %v12086_v45 = vpop.eup %8773 }
 0x424   : > { %v3670_v4 = vand.u32 2147483647, %v3669_v19  ;;  %v3672_v23 = vcvt.s32.f32 %v3665_v50  ;;  %v3762_v42 = vclz %v8178_v2  ;;  %v3930_v5 = vor.u32 %v3929_v0, %v3928_v51  ;;  %v12088_v55 = vpop.eup %8775 }
 0x425   : > { %vm3937_vm3 = vcmp.lt.s32.totalorder %v3915_v18, 4  ;;  %v3933_v62 = vor.u32 %v3932_v22, %v3931_v15  ;;  %vm3934_vm13 = vcmp.lt.s32.totalorder %v3915_v18, 1  ;;  %vm3936_vm9 = vcmp.lt.s32.totalorder %v3915_v18, 3 }
 0x426   : > { %v3939_v52 = vsel %vm3937_vm3, %v3927_v57, 2102212464  ;;  %vm16011_vm11 = vcmp.lt.s32.totalorder %v11749_v37, 0  ;;  %v3673_v61 = vmul.f32 %v3672_v23, %v3670_v4  ;;  %v8179_v19 = vadd.s32 4294967294, %v3762_v42  ;;  %v16268_v23 = vld [vmem:[#allocation6_spill] sm:$0xff] }
 0x427   : > { %v3942_v36 = vsel %vm3934_vm13, %v3921_v9, %v3924_v56  ;;  %v3943_v63 = vsel %vm3937_vm3, %v3930_v5, 920167782  ;;  %vm3935_vm12 = vcmp.lt.s32.totalorder %v3915_v18, 2  ;;  %v3938_v17 = vsel %vm3934_vm13, %v3918_v30, %v3921_v9 }
 0x428   : > { %v3940_v50 = vsel %vm3936_vm9, %v3924_v56, %v3939_v52  ;;  %v3944_v2 = vsel %vm3936_vm9, %v3927_v57, %v3943_v63  ;;  %vm8180_vm4 = vcmp.lt.s32.totalorder %v8179_v19, 0  ;;  %v3946_v51 = vsel %vm3934_vm13, %v3924_v56, %v3927_v57 }
 0x429   : > { %v3945_v22 = vsel %vm3935_vm12, %v3942_v36, %v3944_v2  ;;  %v3947_v0 = vsel %vm3937_vm3, %v3933_v62, 1326507024  ;;  %v3765_v15 = vsel %vm8180_vm4, 0, %v8179_v19  ;;  %v12100_v4 = vadd.f32 %v11547_v20, %v11775_v13 }
 0x42a   : > { %v3948_v43 = vsel %vm3936_vm9, %v3930_v5, %v3947_v0  ;;  %v3674_v9 = vxor.u32 2147483648, %v3673_v61  ;;  %v3766_v30 = vsub.s32 32, %v3765_v15  ;;  %v3770_v52 = vsub.s32 4294967266, %v3765_v15 }
 0x42b   : > { %v3810_v63 = vsel %vm3809_vm2, %v3808_v16, 0  ;;  %v3941_v35 = vsel %vm3935_vm12, %v3938_v17, %v3940_v50  ;;  %v3949_v56 = vsel %vm3935_vm12, %v3946_v51, %v3948_v43  ;;  %v16269_v5 = vand.u32 2147483647, %v11749_v37 }
 0x42c   : > { %v12107_v57 = vmul.u32.u64.low %v12056_v49, %v3945_v22  ;;  %v12108_v62 = vmul.u32.u64.high %v12056_v49, %v3945_v22, %v12107_v57  ;;  %vm3696_vm3 = vcmp.lt.s32.totalorder %v11781_v60, 0  ;;  %v3767_v13 = vshll.u32 %v12063_v41, %v3765_v15 }
 0x42d   : > { %vm12113_vm4 = vcmp.le.f32.partialorder %v16269_v5, 0.7853982  ;;  %v3768_v16 = vshrl.u32 %v12053_v28, %v3766_v30  ;;  %v3771_v17 = vadd.s32 127, %v3770_v52  ;;  %v3806_v18 = vor.u32 8388608, %v12060_v21 }
 0x42e   : > { %v12122_v43 = vmul.u32.u64.low %v12056_v49, %v3949_v56  ;;  %v12123_v19 = vmul.u32.u64.high %v12056_v49, %v3949_v56, %v12122_v43  ;;  %v3812_v36 = vand.u32 31, %v3810_v63  ;;  %v3780_v51 = vsub.s32 4, %v12046_v32 }
 0x42f   : > { %v3769_v2 = vor.u32 %v3768_v16, %v3767_v13  ;;  %v3772_v22 = vshll.u32 %v3771_v17, 23  ;;  %v3957_v0 = vmul.u32 %v12056_v49, %v3941_v35  ;;  %v3675_v41 = vsel %vm16011_vm11, %v3674_v9, %v3673_v61 }
 0x430   : > { %v3960_v28 = vadd.s32 1, %v12108_v62  ;;  %v3811_v15 = vshrl.u32 %v3810_v63, 5  ;;  %v3813_v21 = vsub.s32 32, %v3812_v36  ;;  %v3815_v56 = vshll.u32 %v16130_v6, %v3812_v36 }
 0x431   : > { %v3773_v30 = vor.u32 4788187, %v3772_v22  ;;  %v3776_v52 = vcvt.s32.f32 %v3769_v2  ;;  %v3818_v5 = vshll.u32 %v16131_v3, %v3812_v36  ;;  %v16272_v13 = vand.u32 2147483647, %v11781_v60 }
 0x432   : > { %vm3959_vm13 = vc.u32 %v12123_v19, %v12107_v57  ;;  %v3816_v49 = vshrl.u32 %v16131_v3, %v3813_v21  ;;  %v3821_v35 = vshll.u32 %v16132_v7, %v3812_v36  ;;  %v3824_v61 = vshll.u32 %v16133_v27, %v3812_v36 }
 0x433   : > { %vm12135_vm2 = vcmp.le.f32.partialorder %v16272_v13, 0.7853982  ;;  %v3774_v9 = vand.u32 2147483647, %v3773_v30  ;;  %v3961_v63 = vsel %vm3959_vm13, %v3960_v28, %v12108_v62  ;;  %v3819_v17 = vshrl.u32 %v16132_v7, %v3813_v21 }
 0x434   : > { %v3822_v43 = vshrl.u32 %v16133_v27, %v3813_v21  ;;  %v3962_v2 = vadd.s32 %v3961_v63, %v3957_v0  ;;  %v3817_v22 = vor.u32 %v3816_v49, %v3815_v56  ;;  %v3825_v13 = vshrl.u32 %v16134_v25, %v3813_v21 }
 0x435   : > { %v3827_v50 = vshll.u32 %v16134_v25, %v3812_v36  ;;  %v3777_v42 = vmul.f32 %v3776_v52, %v3774_v9  ;;  %v3820_v38 = vor.u32 %v3819_v17, %v3818_v5  ;;  %v3828_v34 = vshrl.u32 %v16135_v26, %v3813_v21 }
 0x436   : > { %v3823_v33 = vor.u32 %v3822_v43, %v3821_v35  ;;  %v3678_v30 = vsel %vm12113_vm4, %v11749_v37, %v3675_v41  ;;  %v12156_v62 = vsel %vm3696_vm3, %v3780_v51, %v12046_v32  ;;  %v3963_v0 = vadd.s32 536870912, %v3962_v2 }
 0x437   : > { %v3826_v28 = vor.u32 %v3825_v13, %v3824_v61  ;;  %v3829_v56 = vor.u32 %v3828_v34, %v3827_v50  ;;  %vm3830_vm9 = vcmp.lt.s32.totalorder %v3811_v15, 1  ;;  %vm3833_vm12 = vcmp.lt.s32.totalorder %v3811_v15, 4 }
 0x438   : > { %v3846_v36 = vshll.u32 %v3806_v18, 8  ;;  %vm3904_vm13 = vcmp.lt.s32.totalorder %v11785_v59, 0  ;;  %v3964_v52 = vshrl.u32 %v3963_v0, 30  ;;  %vm3832_vm11 = vcmp.lt.s32.totalorder %v3811_v15, 3 }
 0x439   : > { %v3838_v5 = vsel %vm3830_vm9, %v3817_v22, %v3820_v38  ;;  %v3839_v49 = vsel %vm3833_vm12, %v3826_v28, 920167782  ;;  %v3778_v41 = vxor.u32 2147483648, %v3777_v42  ;;  %vm3831_vm8 = vcmp.lt.s32.totalorder %v3811_v15, 2 }
 0x43a   : > { %v3835_v35 = vsel %vm3833_vm12, %v3823_v33, 2102212464  ;;  %v3840_v32 = vsel %vm3832_vm11, %v3823_v33, %v3839_v49  ;;  %v3965_v51 = vshll.u32 %v3964_v52, 30  ;;  %v3814_v34 = vshrl.u32 %v16130_v6, %v3813_v21 }
 0x43b   : > { %v3841_v50 = vsel %vm3831_vm8, %v3838_v5, %v3840_v32  ;;  %v3842_v18 = vsel %vm3830_vm9, %v3820_v38, %v3823_v33  ;;  %v3843_v9 = vsel %vm3833_vm12, %v3829_v56, 1326507024  ;;  %v16275_v43 = vand.u32 2147483647, %v11785_v59 }
 0x43c   : > { %v12170_v63 = vmul.u32.u64.low %v3846_v36, %v3841_v50  ;;  %v12171_v17 = vmul.u32.u64.high %v3846_v36, %v3841_v50, %v12170_v63  ;;  %v12179_v21 = vsub.s32 %v3962_v2, %v3965_v51  ;;  %v3834_v0 = vsel %vm3830_vm9, %v3814_v34, %v3817_v22 }
 0x43d   : > { %vm12175_vm10 = vcmp.le.f32.partialorder %v16275_v43, 0.7853982  ;;  %v3836_v33 = vsel %vm3832_vm11, %v3820_v38, %v3835_v35  ;;  %v3844_v5 = vsel %vm3832_vm11, %v3826_v28, %v3843_v9  ;;  %8777 = vcosq.f32 %v3678_v30 }
 0x43e   : > { %v3779_v56 = vsel %vm3696_vm3, %v3778_v41, %v3777_v42  ;;  %v3988_v49 = vsub.s32 4, %v3964_v52  ;;  %v3845_v32 = vsel %vm3831_vm8, %v3842_v18, %v3844_v5  ;;  %8779 = vsinq.f32 %v3678_v30 }
 0x43f   : > { %v3968_v50 = vsub.s32 0, %v12179_v21  ;;  %v12188_v43 = vmul.u32.u64.low %v3846_v36, %v3845_v32  ;;  %v12189_v61 = vmul.u32.u64.high %v3846_v36, %v3845_v32, %v12188_v43  ;;  %v3837_v2 = vsel %vm3831_vm8, %v3834_v0, %v3836_v33 }
 0x440   : > { %v3856_v22 = vadd.s32 1, %v12171_v17  ;;  %v4009_v38 = vand.u32 2139095040, %v12100_v4  ;;  %v16278_v28 = vsub.s32 4, %v16268_v23  ;;  %v3782_v30 = vsel %vm12135_vm2, %v11781_v60, %v3779_v56 }
 0x441   : > { %v3958_v41 = vadd.s32 %v12107_v57, %v12123_v19  ;;  %v8186_v15 = vmin.u32 %v3968_v50, %v12179_v21  ;;  %v12209_v51 = vsel %vm3904_vm13, %v3988_v49, %v3964_v52  ;;  %v16279_v18 = vand.u32 2147483647, %v12100_v4 }
 0x442   : > { %v2637_v42 = vsel %vm2552_vm5, %v16278_v28, %v16268_v23  ;;  %v4010_v34 = vshrl.u32 %v4009_v38, 23  ;;  %v3853_v33 = vmul.u32 %v3846_v36, %v3837_v2  ;;  %vm3855_vm5 = vc.u32 %v12189_v61, %v12170_v63 }
 0x443   : > { %v2639_v35 = vsel %vm11368_vm1, 0, %v2637_v42  ;;  %v4013_v23 = vand.u32 8388607, %v16279_v18  ;;  %v3970_v0 = vclz %v8186_v15  ;;  %v3052_v57 = vsub.s32 4, %v11487_v14 }
 0x444   : > { %v2643_v9 = vadd.s32 3, %v2639_v35  ;;  %v3857_v19 = vsel %vm3855_vm5, %v3856_v22, %v12171_v17  ;;  %v8189_v5 = vadd.s32 4294967169, %v4010_v34  ;;  %v2647_v56 = vxor.u32 2147483648, %v11498_v29 }
 0x445   : > { %8781 = vcosq.f32 %v3782_v30  ;;  %v8187_v52 = vadd.s32 4294967294, %v3970_v0  ;;  %v3858_v49 = vadd.s32 %v3857_v19, %v3853_v33  ;;  %v2650_v32 = vxor.u32 2147483648, %v11490_v24 }
 0x446   : > { %v2644_v31 = vand.u32 3, %v2643_v9  ;;  %8783 = vsinq.f32 %v3782_v30  ;;  %v4014_v50 = vor.u32 8388608, %v4013_v23  ;;  %v4016_v43 = vadd.s32 1, %v8189_v5 }
 0x447   : > { %vm8188_vm1 = vcmp.lt.s32.totalorder %v8187_v52, 0  ;;  %v3859_v2 = vadd.s32 536870912, %v3858_v49  ;;  %v3053_v17 = vsel %vm2968_vm14, %v3052_v57, %v11487_v14  ;;  %v12224_v22 = vpop.eup %8777  ;;  %v12233_v18 = vadd.s32 %v12170_v63, %v12189_v61 }
 0x448   : > { %vm2646_vm8 = vcmp.eq.s32.totalorder %v2644_v31, 0  ;;  %v3973_v38 = vsel %vm8188_vm1, 0, %v8187_v52  ;;  %vm4017_vm11 = vcmp.gt.s32.totalorder %v4016_v43, 0  ;;  %vm2649_vm3 = vcmp.eq.s32.totalorder %v2644_v31, 2  ;;  %v12227_v42 = vpop.eup %8779 }
 0x449   : > { %v2648_v28 = vsel %vm2646_vm8, %v11490_v24, %v2647_v56  ;;  %v3974_v30 = vsub.s32 32, %v3973_v38  ;;  %v3978_v15 = vsub.s32 4294967266, %v3973_v38  ;;  %v12229_v35 = vshrl.u32 %v3859_v2, 30 }
 0x44a   : > { %v2651_v34 = vsel %vm2649_vm3, %v2650_v32, %v11498_v29  ;;  %v4018_v23 = vsel %vm4017_vm11, %v4016_v43, 0  ;;  %vm2645_vm14 = vcmp.lt.s32.totalorder %v2644_v31, 2  ;;  %v3055_v14 = vsel %vm11635_vm15, 0, %v3053_v17 }
 0x44b   : > { %v3975_v9 = vshll.u32 %v12179_v21, %v3973_v38  ;;  %v3976_v24 = vshrl.u32 %v3958_v41, %v3974_v30  ;;  %v3979_v0 = vadd.s32 127, %v3978_v15  ;;  %v3861_v33 = vshll.u32 %v12229_v35, 30 }
 0x44c   : > { %v4020_v57 = vand.u32 31, %v4018_v23  ;;  %v12239_v19 = vshll.u32 %v4014_v50, 8  ;;  %v12241_v5 = vsel %vm2645_vm14, %v2648_v28, %v2651_v34  ;;  %v3059_v31 = vadd.s32 3, %v3055_v14 }
 0x44d   : > { %v3977_v61 = vor.u32 %v3976_v24, %v3975_v9  ;;  %v3980_v63 = vshll.u32 %v3979_v0, 23  ;;  %v12244_v56 = vsub.s32 %v3858_v49, %v3861_v33  ;;  %v4019_v39 = vshrl.u32 %v4018_v23, 5 }
 0x44e   : > { %v4021_v52 = vsub.s32 32, %v4020_v57  ;;  %v4023_v21 = vshll.u32 %v16130_v6, %v4020_v57  ;;  %v4026_v41 = vshll.u32 %v16131_v3, %v4020_v57  ;;  %v4029_v17 = vshll.u32 %v16132_v7, %v4020_v57 }
 0x44f   : > { %v12248_v32 = vpop.eup %8781  ;;  %v3981_v43 = vor.u32 4788187, %v3980_v63  ;;  %v3984_v50 = vcvt.s32.f32 %v3977_v61  ;;  %v3864_v2 = vsub.s32 0, %v12244_v56  ;;  %v4032_v15 = vshll.u32 %v16133_v27, %v4020_v57 }
 0x450   : > { %v12252_v38 = vpop.eup %8783  ;;  %v4024_v49 = vshrl.u32 %v16131_v3, %v4021_v52  ;;  %v4027_v28 = vshrl.u32 %v16132_v7, %v4021_v52  ;;  %v4030_v30 = vshrl.u32 %v16133_v27, %v4021_v52  ;;  %v4033_v14 = vshrl.u32 %v16134_v25, %v4021_v52 }
 0x451   : > { %v3982_v34 = vand.u32 2147483647, %v3981_v43  ;;  %v8182_v23 = vmin.u32 %v3864_v2, %v12244_v56  ;;  %v4035_v9 = vshll.u32 %v16134_v25, %v4020_v57  ;;  %v4036_v61 = vshrl.u32 %v16135_v26, %v4021_v52  ;;  %v16280_v43 = vld [vmem:[#allocation5_spill] sm:$0xff] }
 0x452   : > { %v4025_v24 = vor.u32 %v4024_v49, %v4023_v21  ;;  %v4028_v0 = vor.u32 %v4027_v28, %v4026_v41  ;;  %v4031_v33 = vor.u32 %v4030_v30, %v4029_v17  ;;  %v4034_v36 = vor.u32 %v4033_v14, %v4032_v15 }
 0x453   : > { %v3866_v63 = vclz %v8182_v23  ;;  %v3060_v29 = vand.u32 3, %v3059_v31  ;;  %v3066_v7 = vxor.u32 2147483648, %v11758_v40  ;;  %v3985_v3 = vmul.f32 %v3984_v50, %v3982_v34 }
 0x454   : > { %v4037_v60 = vor.u32 %v4036_v61, %v4035_v9  ;;  %vm4038_vm15 = vcmp.lt.s32.totalorder %v4019_v39, 1  ;;  %v2844_v27 = vsub.s32 4, %v16280_v43  ;;  %vm4040_vm9 = vcmp.lt.s32.totalorder %v4019_v39, 3 }
 0x455   : > { %v8183_v2 = vadd.s32 4294967294, %v3866_v63  ;;  %vm4041_vm12 = vcmp.lt.s32.totalorder %v4019_v39, 4  ;;  %v4046_v57 = vsel %vm4038_vm15, %v4025_v24, %v4028_v0  ;;  %vm2642_vm5 = vweird.f32 %v10905_v44 }
 0x456   : > { %v4022_v21 = vshrl.u32 %v16130_v6, %v4021_v52  ;;  %v4043_v41 = vsel %vm4041_vm12, %v4031_v33, 2102212464  ;;  %v4047_v17 = vsel %vm4041_vm12, %v4034_v36, 920167782  ;;  %v4051_v49 = vsel %vm4041_vm12, %v4037_v60, 1326507024 }
 0x457   : > { %vm8184_vm1 = vcmp.lt.s32.totalorder %v8183_v2, 0  ;;  %vm4039_vm8 = vcmp.lt.s32.totalorder %v4019_v39, 2  ;;  %v4048_v31 = vsel %vm4040_vm9, %v4031_v33, %v4047_v17  ;;  %v4050_v50 = vsel %vm4038_vm15, %v4028_v0, %v4031_v33 }
 0x458   : > { %vm3058_vm11 = vweird.f32 %v10994_v1  ;;  %v3869_v28 = vsel %vm8184_vm1, 0, %v8183_v2  ;;  %v4042_v30 = vsel %vm4038_vm15, %v4022_v21, %v4025_v24  ;;  %v4049_v15 = vsel %vm4039_vm8, %v4046_v57, %v4048_v31 }
 0x459   : > { %v4052_v34 = vsel %vm4040_vm9, %v4034_v36, %v4051_v49  ;;  %v3986_v23 = vxor.u32 2147483648, %v3985_v3  ;;  %v3870_v52 = vsub.s32 32, %v3869_v28  ;;  %v3874_v14 = vsub.s32 4294967266, %v3869_v28 }
 0x45a   : > { %v4044_v60 = vsel %vm4040_vm9, %v4028_v0, %v4043_v41  ;;  %v3871_v9 = vshll.u32 %v12244_v56, %v3869_v28  ;;  %v4053_v61 = vsel %vm4039_vm8, %v4050_v50, %v4052_v34  ;;  %vm3061_vm3 = vcmp.lt.s32.totalorder %v3060_v29, 2 }
 0x45b   : > { %v12277_v33 = vmul.u32.u64.low %v12239_v19, %v4049_v15  ;;  %v12278_v63 = vmul.u32.u64.high %v12239_v19, %v4049_v15, %v12277_v33  ;;  %v3872_v24 = vshrl.u32 %v12233_v18, %v3870_v52  ;;  %v3875_v2 = vadd.s32 127, %v3874_v14  ;;  %v16287_v14 = vld [vmem:[#allocation22_spill] sm:$0xff] }
 0x45c   : > { %v12283_v57 = vmul.u32.u64.low %v12239_v19, %v4053_v61  ;;  %v12284_v36 = vmul.u32.u64.high %v12239_v19, %v4053_v61, %v12283_v57  ;;  %v4045_v21 = vsel %vm4039_vm8, %v4042_v30, %v4044_v60  ;;  %vm3062_vm14 = vcmp.eq.s32.totalorder %v3060_v29, 0  ;;  %v16288_v61 = vld [vmem:[#allocation20_spill] sm:$0xff] }
 0x45d   : > { %vm3065_vm15 = vcmp.eq.s32.totalorder %v3060_v29, 2  ;;  %v3873_v56 = vor.u32 %v3872_v24, %v3871_v9  ;;  %v3876_v0 = vshll.u32 %v3875_v2, 23  ;;  %v16281_v41 = vxor.u32 2147483648, %v11813_v53  ;;  %v16289_v24 = vld [vmem:[#allocation7_spill] sm:$0xff] }
 0x45e   : > { %v3067_v49 = vsel %vm3065_vm15, %v3066_v7, %v11813_v53  ;;  %vm3800_vm9 = vcmp.lt.s32.totalorder %v11852_v12, 0  ;;  %v4064_v18 = vadd.s32 1, %v12278_v63  ;;  %v2653_v39 = vsel %vm2642_vm5, nan, %v12241_v5 }
 0x45f   : > { %v3064_v17 = vsel %vm3062_vm14, %v11758_v40, %v16281_v41  ;;  %vm16282_vm12 = vcmp.lt.s32.totalorder %v11011_v10, 0  ;;  %v3987_v50 = vsel %vm3904_vm13, %v3986_v23, %v3985_v3  ;;  %v16283_v40 = vand.u32 2147483647, %v11852_v12  ;;  %v16286_v23 = vld [vmem:[#allocation24_spill] sm:$0xff] }
 0x460   : > { %v3068_v31 = vsel %vm3061_vm3, %v3064_v17, %v3067_v49  ;;  %v2845_v29 = vsel %vm16282_vm12, %v2844_v27, %v16280_v43  ;;  %v3877_v53 = vor.u32 4788187, %v3876_v0  ;;  %v4061_v28 = vmul.u32 %v12239_v19, %v4045_v21  ;;  %v16291_v21 = vld [vmem:[#allocation12_spill] sm:$0xff] }
 0x461   : > { %vm12303_vm1 = vcmp.le.f32.partialorder %v16283_v40, 0.7853982  ;;  %vm4063_vm5 = vc.u32 %v12284_v36, %v12277_v33  ;;  %v3880_v44 = vcvt.s32.f32 %v3873_v56  ;;  %v3069_v27 = vsel %vm3058_vm11, nan, %v3068_v31  ;;  %v16292_v0 = vld [vmem:[#allocation8_spill] sm:$0xff] }
 0x462   : > { %v4065_v5 = vsel %vm4063_vm5, %v4064_v18, %v12278_v63  ;;  %v2847_v3 = vsel %vm11421_vm0, 0, %v2845_v29  ;;  %v3878_v43 = vand.u32 2147483647, %v3877_v53  ;;  %v8355_v15 = vpack.c.bf16 %v3069_v27, %v2653_v39  ;;  %v16293_v18 = vld [vmem:[#allocation14_spill] sm:$0xff]  ;;  %v16301_v29 = vld [vmem:[#allocation17_spill] sm:$0xff] }
 0x463   : > { %v4066_v30 = vadd.s32 %v4065_v5, %v4061_v28  ;;  %v2851_v34 = vadd.s32 3, %v2847_v3  ;;  %v12318_v19 = vsel %vm12175_vm10, %v11785_v59, %v3987_v50  ;;  %vm2850_vm13 = vweird.f32 %v11011_v10  ;;  %v16295_v3 = vld [vmem:[#allocation32_spill] sm:$0xff] }
 0x464   : > { %v2855_v52 = vxor.u32 2147483648, %v16286_v23  ;;  %v3260_v60 = vsub.s32 4, %v16287_v14  ;;  %v3881_v1 = vmul.f32 %v3880_v44, %v3878_v43  ;;  %8356 = vmatprep.subr.bf16.mxu0 %v8355_v15  ;;  %v2858_v63 = vxor.u32 2147483648, %v16288_v61  ;;  %v16296_v15 = vld [vmem:[#allocation11_spill] sm:$0xff] }
 0x465   : > { %v4067_v9 = vadd.s32 536870912, %v4066_v30  ;;  %v2852_v11 = vand.u32 3, %v2851_v34  ;;  %vm16290_vm0 = vcmp.lt.s32.totalorder %v16289_v24, 0  ;;  %v3271_v57 = vxor.u32 2147483648, %v12048_v58 }
 0x466   : > { %v3261_v2 = vsel %vm16290_vm0, %v3260_v60, %v16287_v14  ;;  %v2540_v56 = vand.u32 3, %v16291_v21  ;;  %v2543_v41 = vxor.u32 2147483648, %v16292_v0  ;;  %v3882_v17 = vxor.u32 2147483648, %v3881_v1 }
 0x467   : > { %v12330_v49 = vshrl.u32 %v4067_v9, 30  ;;  %vm2854_vm8 = vcmp.eq.s32.totalorder %v2852_v11, 0  ;;  %vm3266_vm11 = vweird.f32 %v16289_v24  ;;  %v2546_v39 = vxor.u32 2147483648, %v16293_v18 }
 0x468   : > { %vm2853_vm3 = vcmp.lt.s32.totalorder %v2852_v11, 2  ;;  %v2856_v31 = vsel %vm2854_vm8, %v16288_v61, %v2855_v52  ;;  %vm2857_vm14 = vcmp.eq.s32.totalorder %v2852_v11, 2  ;;  %v3263_v50 = vsel %vm11807_vm7, 0, %v3261_v2  ;;  %v16297_v11 = vld [vmem:[#allocation23_spill] sm:$0xff] }
 0x469   : > { %v3883_v40 = vsel %vm3800_vm9, %v3882_v17, %v3881_v1  ;;  %v4069_v53 = vshll.u32 %v12330_v49, 30  ;;  %v2859_v28 = vsel %vm2857_vm14, %v2858_v63, %v16286_v23  ;;  %v3267_v44 = vadd.s32 3, %v3263_v50  ;;  %v16298_v2 = vld [vmem:[#allocation27_spill] sm:$0xff] }
 0x46a   : > { %v3886_v5 = vsel %vm12303_vm1, %v11852_v12, %v3883_v40  ;;  %v2860_v27 = vsel %vm2853_vm3, %v2856_v31, %v2859_v28  ;;  %v3274_v43 = vxor.u32 2147483648, %v16295_v3  ;;  %vm2538_vm15 = vweird.f32 %v16296_v15  ;;  %v16302_v40 = vld [vmem:[#allocation19_spill] sm:$0xff]  ;;  %v16303_v28 = vld [vmem:[#allocation9_spill] sm:$0xff] }
 0x46b   : > { %v12346_v34 = vsub.s32 %v4066_v30, %v4069_v53  ;;  %v3268_v52 = vand.u32 3, %v3267_v44  ;;  %vm2541_vm7 = vcmp.lt.s32.totalorder %v2540_v56, 2  ;;  %vm2542_vm12 = vcmp.eq.s32.totalorder %v2540_v56, 0 }
 0x46c   : > { %8785 = vcosq.f32 %v3886_v5  ;;  %v2861_v14 = vsel %vm2850_vm13, nan, %v2860_v27  ;;  %v2544_v23 = vsel %vm2542_vm12, %v16293_v18, %v2543_v41  ;;  %vm2545_vm5 = vcmp.eq.s32.totalorder %v2540_v56, 2  ;;  %v16299_v18 = vld [vmem:[#allocation13_spill] sm:$0xff] }
 0x46d   : > { %v4072_v60 = vsub.s32 0, %v12346_v34  ;;  %vm3270_vm0 = vcmp.eq.s32.totalorder %v3268_v52, 0  ;;  %vm3273_vm8 = vcmp.eq.s32.totalorder %v3268_v52, 2  ;;  %v2547_v1 = vsel %vm2545_vm5, %v2546_v39, %v16292_v0  ;;  %v16300_v39 = vld [vmem:[#allocation26_spill] sm:$0xff] }
 0x46e   : > { %vm3269_vm3 = vcmp.lt.s32.totalorder %v3268_v52, 2  ;;  %v3272_v30 = vsel %vm3270_vm0, %v16295_v3, %v3271_v57  ;;  %v3275_v9 = vsel %vm3273_vm8, %v3274_v43, %v12048_v58  ;;  %v2956_v61 = vand.u32 3, %v16297_v11  ;;  %v16304_v3 = vld [vmem:[#allocation25_spill] sm:$0xff] }
 0x46f   : > { %8787 = vsinq.f32 %v3886_v5  ;;  %v8190_v10 = vmin.u32 %v4072_v60, %v12346_v34  ;;  %v3276_v63 = vsel %vm3269_vm3, %v3272_v30, %v3275_v9  ;;  %v2959_v21 = vxor.u32 2147483648, %v16298_v2 }
 0x470   : > { %v3277_v41 = vsel %vm3266_vm11, nan, %v3276_v63  ;;  %v2548_v17 = vsel %vm2541_vm7, %v2544_v23, %v2547_v1  ;;  %vm2954_vm13 = vweird.f32 %v16299_v18  ;;  %vm2958_vm14 = vcmp.eq.s32.totalorder %v2956_v61, 0 }
 0x471   : > { %v4074_v0 = vclz %v8190_v10  ;;  %v8363_v57 = vpack.c.bf16 %v3277_v41, %v2861_v14  ;;  %v2960_v58 = vsel %vm2958_vm14, %v16300_v39, %v2959_v21  ;;  %v2962_v31 = vxor.u32 2147483648, %v16300_v39  ;;  %v16307_v41 = vld [vmem:[#allocation28_spill] sm:$0xff] }
 0x472   : > { %vm2961_vm12 = vcmp.eq.s32.totalorder %v2956_v61, 2  ;;  %v2748_v50 = vand.u32 3, %v16301_v29  ;;  %v2751_v53 = vxor.u32 2147483648, %v16302_v40  ;;  %v2754_v44 = vxor.u32 2147483648, %v16303_v28  ;;  %v16309_v39 = vld [vmem:[#allocation16_spill] sm:$0xff] }
 0x473   : > { %v8191_v24 = vadd.s32 4294967294, %v4074_v0  ;;  %8364 = vmatprep.subr.bf16.mxu1 %v8363_v57  ;;  %v2549_v56 = vsel %vm2538_vm15, nan, %v2548_v17  ;;  %vm2957_vm11 = vcmp.lt.s32.totalorder %v2956_v61, 2  ;;  %v2963_v5 = vsel %vm2961_vm12, %v2962_v31, %v16298_v2  ;;  %v16305_v61 = vld [vmem:[#allocation18_spill] sm:$0xff]  ;;  %v16306_v2 = vld [vmem:[#allocation29_spill] sm:$0xff] }
 0x474   : > { %v2964_v27 = vsel %vm2957_vm11, %v2960_v58, %v2963_v5  ;;  %vm2750_vm7 = vcmp.eq.s32.totalorder %v2748_v50, 0  ;;  %vm2753_vm5 = vcmp.eq.s32.totalorder %v2748_v50, 2  ;;  %v3164_v43 = vand.u32 3, %v16304_v3 }
 0x475   : > { %vm8192_vm0 = vcmp.lt.s32.totalorder %v8191_v24, 0  ;;  %v2965_v52 = vsel %vm2954_vm13, nan, %v2964_v27  ;;  %v2752_v14 = vsel %vm2750_vm7, %v16303_v28, %v2751_v53  ;;  %v2755_v23 = vsel %vm2753_vm5, %v2754_v44, %v16302_v40 }
 0x476   : > { %v12375_v60 = vpop.eup %8785  ;;  %v4062_v15 = vadd.s32 %v12277_v33, %v12284_v36  ;;  %v4077_v1 = vsel %vm8192_vm0, 0, %v8191_v24  ;;  %v8357_v30 = vpack.c.bf16 %v2965_v52, %v2549_v56  ;;  %vm2749_vm15 = vcmp.lt.s32.totalorder %v2748_v50, 2  ;;  %v16308_v33 = vld [vmem:[#allocation31_spill] sm:$0xff] }
 0x477   : > { %v4078_v9 = vsub.s32 32, %v4077_v1  ;;  %v4082_v11 = vsub.s32 4294967266, %v4077_v1  ;;  %vm2746_vm8 = vweird.f32 %v16305_v61  ;;  %v2756_v10 = vsel %vm2749_vm15, %v2752_v14, %v2755_v23 }
 0x478   : > { %v4079_v63 = vshll.u32 %v12346_v34, %v4077_v1  ;;  %8358 = vmatpush1.bf16.msra.mxu0 %v8357_v30  ;;  %vm3166_vm3 = vcmp.eq.s32.totalorder %v3164_v43, 0  ;;  %v3167_v21 = vxor.u32 2147483648, %v16306_v2  ;;  %v3170_v17 = vxor.u32 2147483648, %v16307_v41 }
 0x479   : > { %v8788_v18 = vpop.eup %8787  ;;  %v4080_v0 = vshrl.u32 %v4062_v15, %v4078_v9  ;;  %v4083_v57 = vadd.s32 127, %v4082_v11  ;;  %vm3169_vm13 = vcmp.eq.s32.totalorder %v3164_v43, 2  ;;  %v3468_v36 = vsub.s32 4, %v16308_v33 }
 0x47a   : > { %vm3162_vm14 = vweird.f32 %v16309_v39  ;;  %vm3165_vm12 = vcmp.lt.s32.totalorder %v3164_v43, 2  ;;  %v3168_v58 = vsel %vm3166_vm3, %v16307_v41, %v3167_v21  ;;  %v3171_v31 = vsel %vm3169_vm13, %v3170_v17, %v16306_v2 }
 0x47b   : > { %v4081_v34 = vor.u32 %v4080_v0, %v4079_v63  ;;  %v4084_v29 = vshll.u32 %v4083_v57, 23  ;;  %v3172_v50 = vsel %vm3165_vm12, %v3168_v58, %v3171_v31  ;;  %vm16310_vm11 = vcmp.lt.s32.totalorder %v11664_v48, 0 }
 0x47c   : > { %v3469_v40 = vsel %vm16310_vm11, %v3468_v36, %v16308_v33  ;;  %vm4008_vm7 = vcmp.lt.s32.totalorder %v12100_v4, 0  ;;  %v2757_v53 = vsel %vm2746_vm8, nan, %v2756_v10  ;;  %v3173_v28 = vsel %vm3162_vm14, nan, %v3172_v50 }
 0x47d   : > { %v3471_v44 = vsel %vm12013_vm6, 0, %v3469_v40  ;;  %v3884_v24 = vsub.s32 4, %v12229_v35  ;;  %8789 = vsinq.f32 %v12318_v19  ;;  %v16311_v56 = vand.u32 2147483647, %v12100_v4 }
 0x47e   : > { %v4085_v27 = vor.u32 4788187, %v4084_v29  ;;  %v8365_v3 = vpack.c.bf16 %v3173_v28, %v2757_v53  ;;  %v3475_v43 = vadd.s32 3, %v3471_v44  ;;  %vm3474_vm0 = vweird.f32 %v11664_v48  ;;  %v16317_v44 = vld [vmem:[#allocation34_spill] sm:$0xff] }
 0x47f   : > { %vm12399_vm5 = vcmp.le.f32.partialorder %v16311_v56, 0.7853982  ;;  %v3479_v52 = vxor.u32 2147483648, %v12088_v55  ;;  %v3482_v47 = vxor.u32 2147483648, %v12086_v45  ;;  %v3885_v14 = vsel %vm3800_vm9, %v3884_v24, %v12229_v35 }
 0x480   : > { %v3676_v23 = vsub.s32 4, %v11983_v46  ;;  %v4086_v15 = vand.u32 2147483647, %v4085_v27  ;;  %v4088_v1 = vcvt.s32.f32 %v4081_v34  ;;  %8366 = vmatpush1.bf16.msra.mxu1 %v8365_v3  ;;  %v3476_v30 = vand.u32 3, %v3475_v43 }
 0x481   : > { %v3887_v9 = vsel %vm12303_vm1, 0, %v3885_v14  ;;  %vm3890_vm6 = vweird.f32 %v11852_v12  ;;  %v3895_v61 = vxor.u32 2147483648, %v8788_v18  ;;  %vm16314_vm15 = vcmp.lt.s32.totalorder %v11749_v37, 0 }
 0x482   : > { %v3891_v11 = vadd.s32 3, %v3887_v9  ;;  %v3677_v10 = vsel %vm16314_vm15, %v3676_v23, %v11983_v46  ;;  %v4089_v63 = vmul.f32 %v4088_v1, %v4086_v15  ;;  %vm3478_vm8 = vcmp.eq.s32.totalorder %v3476_v30, 0  ;;  %v16320_v23 = vld [vmem:[#allocation36_spill] sm:$0xff] }
 0x483   : > { %vm3481_vm9 = vcmp.eq.s32.totalorder %v3476_v30, 2  ;;  %v3898_v35 = vxor.u32 2147483648, %v12375_v60  ;;  %v3480_v2 = vsel %vm3478_vm8, %v12086_v45, %v3479_v52  ;;  %v3679_v7 = vsel %vm12113_vm4, 0, %v3677_v10 }
 0x484   : > { %v3483_v21 = vsel %vm3481_vm9, %v3482_v47, %v12088_v55  ;;  %v3892_v41 = vand.u32 3, %v3891_v11  ;;  %v4090_v17 = vxor.u32 2147483648, %v4089_v63  ;;  %vm3477_vm1 = vcmp.lt.s32.totalorder %v3476_v30, 2  ;;  %v16319_v47 = vld [vmem:[#allocation33_spill] sm:$0xff]  ;;  %v16321_v30 = vld [vmem:[#allocation30_spill] sm:$0xff]  ;;  %v16322_v11 = vld [vmem:[#allocation35_spill] sm:$0xff] }
 0x485   : > { %v3683_v0 = vadd.s32 3, %v3679_v7  ;;  %v4092_v57 = vsub.s32 4, %v12330_v49  ;;  %v3484_v33 = vsel %vm3477_vm1, %v3480_v2, %v3483_v21  ;;  %v3687_v58 = vxor.u32 2147483648, %v12227_v42 }
 0x486   : > { %vm3893_vm3 = vcmp.lt.s32.totalorder %v3892_v41, 2  ;;  %vm3894_vm13 = vcmp.eq.s32.totalorder %v3892_v41, 0  ;;  %vm3897_vm14 = vcmp.eq.s32.totalorder %v3892_v41, 2  ;;  %v4091_v46 = vsel %vm4008_vm7, %v4090_v17, %v4089_v63 }
 0x487   : > { %v3896_v45 = vsel %vm3894_vm13, %v12375_v60, %v3895_v61  ;;  %v3899_v36 = vsel %vm3897_vm14, %v3898_v35, %v8788_v18  ;;  %v3684_v55 = vand.u32 3, %v3683_v0  ;;  %v4094_v20 = vsel %vm12399_vm5, %v12100_v4, %v4091_v46  ;;  %v12432_v34 = vpop.eup %8789 }
 0x488   : > { %v3900_v39 = vsel %vm3893_vm3, %v3896_v45, %v3899_v36  ;;  %v4093_v31 = vsel %vm4008_vm7, %v4092_v57, %v12330_v49  ;;  %8791 = vcosq.f32 %v4094_v20  ;;  %v3485_v29 = vsel %vm3474_vm0, nan, %v3484_v33  ;;  %v4110_v45 = vld [vmem:[%s15913_s5] sm:$0xff] }
 0x489   : > { %v3901_v60 = vsel %vm3890_vm6, nan, %v3900_v39  ;;  %v3690_v18 = vxor.u32 2147483648, %v12224_v22  ;;  %v16315_v50 = vsel %vm12135_vm2, 0, %v12156_v62  ;;  %v16316_v49 = vsel %vm12175_vm10, 0, %v12209_v51 }
 0x48a   : > { %v3787_v40 = vadd.s32 3, %v16315_v50  ;;  %v3995_v53 = vadd.s32 3, %v16316_v49  ;;  %8793 = vsinq.f32 %v4094_v20  ;;  %v8359_v28 = vpack.c.bf16 %v3901_v60, %v3485_v29  ;;  %v16324_v29 = vld [vmem:[#allocation21_spill] sm:$0xff] }
 0x48b   : > { %8795 = vcosq.f32 %v12318_v19  ;;  %vm3686_vm4 = vcmp.eq.s32.totalorder %v3684_v55, 0  ;;  %v4095_v48 = vsel %vm12399_vm5, 0, %v4093_v31  ;;  %v3372_v12 = vand.u32 3, %v12038_v8 }
 0x48c   : > { %8360 = vmatprep.subr.bf16.mxu0 %v8359_v28  ;;  %vm3689_vm12 = vcmp.eq.s32.totalorder %v3684_v55, 2  ;;  %v4099_v16 = vadd.s32 3, %v4095_v48  ;;  %v3375_v62 = vxor.u32 2147483648, %v12071_v54  ;;  %v3378_v13 = vxor.u32 2147483648, %v16317_v44 }
 0x48d   : > { %v3688_v51 = vsel %vm3686_vm4, %v12224_v22, %v3687_v58  ;;  %v3691_v24 = vsel %vm3689_vm12, %v3690_v18, %v12227_v42  ;;  %vm3374_vm10 = vcmp.eq.s32.totalorder %v3372_v12, 0  ;;  %vm3377_vm2 = vcmp.eq.s32.totalorder %v3372_v12, 2  ;;  %v16318_v22 = vld [vmem:[#allocation15_spill] sm:$0xff] }
 0x48e   : > { %vm3682_vm11 = vweird.f32 %v11749_v37  ;;  %vm3685_vm7 = vcmp.lt.s32.totalorder %v3684_v55, 2  ;;  %v3376_v19 = vsel %vm3374_vm10, %v16317_v44, %v3375_v62  ;;  %v3379_v8 = vsel %vm3377_vm2, %v3378_v13, %v12071_v54 }
 0x48f   : > { %v4100_v56 = vand.u32 3, %v4099_v16  ;;  %v3788_v5 = vand.u32 3, %v3787_v40  ;;  %v3791_v27 = vxor.u32 2147483648, %v12252_v38  ;;  %v3794_v3 = vxor.u32 2147483648, %v12248_v32 }
 0x490   : > { %v3692_v43 = vsel %vm3685_vm7, %v3688_v51, %v3691_v24  ;;  %vm4098_vm5 = vweird.f32 %v12100_v4  ;;  %vm3370_vm0 = vweird.f32 %v16318_v22  ;;  %vm3373_vm6 = vcmp.lt.s32.totalorder %v3372_v12, 2  ;;  %v4111_v4 = vld [vmem:[%s15913_s5 + $0x8] sm:$0xff] }
 0x491   : > { %v3380_v42 = vsel %vm3373_vm6, %v3376_v19, %v3379_v8  ;;  %vm3789_vm15 = vcmp.lt.s32.totalorder %v3788_v5, 2  ;;  %vm3790_vm8 = vcmp.eq.s32.totalorder %v3788_v5, 0  ;;  %vm3793_vm9 = vcmp.eq.s32.totalorder %v3788_v5, 2 }
 0x492   : > { %v3792_v52 = vsel %vm3790_vm8, %v12248_v32, %v3791_v27  ;;  %v3795_v54 = vsel %vm3793_vm9, %v3794_v3, %v12252_v38  ;;  %v3580_v14 = vand.u32 3, %v16319_v47  ;;  %v3583_v15 = vxor.u32 2147483648, %v16320_v23  ;;  %v8792_v1 = vpop.eup %8791 }
 0x493   : > { %vm4105_vm1 = vcmp.eq.s32.totalorder %v4100_v56, 2  ;;  %vm3786_vm3 = vweird.f32 %v16321_v30  ;;  %v3796_v9 = vsel %vm3789_vm15, %v3792_v52, %v3795_v54  ;;  %v3586_v61 = vxor.u32 2147483648, %v16322_v11 }
 0x494   : > { %v8794_v10 = vpop.eup %8793  ;;  %v4106_v63 = vxor.u32 2147483648, %v8792_v1  ;;  %v3381_v35 = vsel %vm3370_vm0, nan, %v3380_v42  ;;  %v3797_v2 = vsel %vm3786_vm3, nan, %v3796_v9  ;;  %v3996_v32 = vand.u32 3, %v3995_v53  ;;  %v12508_v53 = vpop.permute.xlu0 %4120 }
 0x495   : > { %v8796_v21 = vpop.eup %8795  ;;  %v4103_v38 = vxor.u32 2147483648, %v8794_v10  ;;  %v8361_v41 = vpack.c.bf16 %v3797_v2, %v3381_v35  ;;  %vm3582_vm13 = vcmp.eq.s32.totalorder %v3580_v14, 0  ;;  %vm3585_vm14 = vcmp.eq.s32.totalorder %v3580_v14, 2 }
 0x496   : > { %vm4102_vm4 = vcmp.eq.s32.totalorder %v4100_v56, 0  ;;  %v4107_v7 = vsel %vm4105_vm1, %v4106_v63, %v8794_v10  ;;  %v3584_v17 = vsel %vm3582_vm13, %v16322_v11, %v3583_v15  ;;  %v3587_v0 = vsel %vm3585_vm14, %v3586_v61, %v16320_v23 }
 0x497   : > { %v3693_v57 = vsel %vm3682_vm11, nan, %v3692_v43  ;;  %vm4101_vm12 = vcmp.lt.s32.totalorder %v4100_v56, 2  ;;  %v4104_v33 = vsel %vm4102_vm4, %v8792_v1, %v4103_v38  ;;  %8362 = vmatpush1.bf16.msra.mxu0 %v8361_v41  ;;  %v3999_v46 = vxor.u32 2147483648, %v12432_v34 }
 0x498   : > { %v4108_v36 = vsel %vm4101_vm12, %v4104_v33, %v4107_v7  ;;  %vm3581_vm10 = vcmp.lt.s32.totalorder %v3580_v14, 2  ;;  %vm3998_vm2 = vcmp.eq.s32.totalorder %v3996_v32, 0  ;;  %v4002_v55 = vxor.u32 2147483648, %v8796_v21 }
 0x499   : > { %v4109_v20 = vsel %vm4098_vm5, nan, %v4108_v36  ;;  %v3588_v39 = vsel %vm3581_vm10, %v3584_v17, %v3587_v0  ;;  %v4000_v58 = vsel %vm3998_vm2, %v8796_v21, %v3999_v46  ;;  %vm4001_vm7 = vcmp.eq.s32.totalorder %v3996_v32, 2 }
 0x49a   : > { %v8367_v37 = vpack.c.bf16 %v4109_v20, %v3693_v57  ;;  %vm3997_vm11 = vcmp.lt.s32.totalorder %v3996_v32, 2  ;;  %v4003_v31 = vsel %vm4001_vm7, %v4002_v55, %v12432_v34  ;;  %vm16323_vm0 = vcmask 261120   ;;  %v4113_v34 = vld [vmem:[%s15913_s5 + $0x18] sm:$0xff] }
 0x49b   : > { %8193 = vmatmul.mubr.msk.f32.vlgmr.msra.gmra.mrb[8].mxu0 %vm16323_vm0, %v4110_v45  ;;  %vm3578_vm6 = vweird.f32 %v16324_v29  ;;  %vm3994_vm15 = vweird.f32 %v11785_v59  ;;  %v4004_v60 = vsel %vm3997_vm11, %v4000_v58, %v4003_v31  ;;  %v16325_v18 = vmov 0.0   ;;  %vm16326_vm5 = vmmov %vm16323_vm0  ;;  %v4112_v59 = vld [vmem:[%s15913_s5 + $0x10] sm:$0xff] }
 0x49c   : > { %4220 = vmatprep.mubr.f32.mxu0 %v16325_v18  ;;  %8368 = vmatprep.subr.bf16.mxu1 %v8367_v37  ;;  %v3589_v50 = vsel %vm3578_vm6, nan, %v3588_v39  ;;  %v4005_v40 = vsel %vm3994_vm15, nan, %v4004_v60  ;;  %vm16327_vm8 = vmmov %vm16323_vm0  ;;  %v16335_v41 = vmov 2475754826   ;;  %v16336_v17 = vmov 2131351028  }
 0x49d   : > { %v8369_v49 = vpack.c.bf16 %v4005_v40, %v3589_v50  ;;  %vm16328_vm9 = vmmov %vm16323_vm0  ;;  %v16337_v57 = vmov 2102212464  }
 0x49e   : > { %vm16329_vm1 = vmmov %vm16323_vm0 }
 0x49f   : > { %8194 = vmatmul.mubr.msk.f32.gmra.mrb[10].mxu0 %vm16326_vm5, %v4111_v4  ;;  %8370 = vmatpush1.bf16.msra.mxu1 %v8369_v49  ;;  %vm16330_vm3 = vmmov %vm16323_vm0 }
 0x4a0   : > { %4226 = vmatprep.mubr.f32.mxu0 %v16325_v18  ;;  %vm16331_vm13 = vmmov %vm16323_vm0 }
 0x4a1   : > { %vm16332_vm14 = vmmov %vm16323_vm0 }
 0x4a2   : > { %8197 = vmatmul.mubr.msk.f32.vlgmr.msra.gmra.mrb[8].mxu1 %vm16327_vm8, %v4110_v45 }
 0x4a3   : > { %8195 = vmatmul.mubr.msk.f32.gmra.mrb[12].mxu0 %vm16328_vm9, %v4112_v59  ;;  %4309 = vmatprep.mubr.f32.mxu1 %v16325_v18 }
 0x4a4   : > { %4232 = vmatprep.mubr.f32.mxu0 %v16325_v18 }
 0x4a6   : > { %8198 = vmatmul.mubr.msk.f32.gmra.mrb[10].mxu1 %vm16329_vm1, %v4111_v4 }
 0x4a7   : > { %8196 = vmatmul.mubr.msk.f32.gmra.mrb[14].mxu0 %vm16330_vm3, %v4113_v34  ;;  %4315 = vmatprep.mubr.f32.mxu1 %v16325_v18 }
 0x4a8   : > { %6096 = vmatprep.mubr.f32.mxu0 %v16325_v18 }
 0x4aa   : > { %8199 = vmatmul.mubr.msk.f32.gmra.mrb[12].mxu1 %vm16331_vm13, %v4112_v59 }
 0x4ab   : > { %4321 = vmatprep.mubr.f32.mxu1 %v16325_v18 }
 0x4ae   : > { %8200 = vmatmul.mubr.msk.f32.gmra.mrb[14].mxu1 %vm16332_vm14, %v4113_v34 }
 0x4af   : > { %6185 = vmatprep.mubr.f32.mxu1 %v16325_v18 }
 0x56e   : > { %v4216_v28 = vpop.f32.mrb[8].mxu0 }
 0x56f   : > { %v12511_v48 = vadd.f32 %v4216_v28, %v12508_v53  ;;  %v4218_v12 = vpop.f32.mrb[9].mxu0 }
 0x570   : > { %v12514_v16 = vadd.f32 %v4218_v12, %v12508_v53 }
 0x571   : > { %16333 = vst [vmem:[#allocation6_spill] sm:$0xff] %v12511_v48  ;;  %v4328_v62 = vand.u32 2147483647, %v12511_v48  ;;  %v4331_v44 = vand.u32 2139095040, %v12511_v48 }
 0x572   : > { %v4435_v13 = vand.u32 2139095040, %v12514_v16  ;;  %v12519_v51 = vpop.f32.mrb[10].mxu0  ;;  %v4432_v56 = vand.u32 2147483647, %v12514_v16 }
 0x573   : > { %v4332_v24 = vshrl.u32 %v4331_v44, 23  ;;  %v12521_v19 = vpop.f32.mrb[11].mxu0  ;;  %v4335_v8 = vand.u32 8388607, %v4328_v62 }
 0x574   : > { %v4436_v5 = vshrl.u32 %v4435_v13, 23  ;;  %v4439_v47 = vand.u32 8388607, %v4432_v56 }
 0x575   : > { %v8201_v27 = vadd.s32 4294967169, %v4332_v24  ;;  %v4305_v3 = vpop.f32.mrb[8].mxu1  ;;  %v4336_v54 = vor.u32 8388608, %v4335_v8 }
 0x576   : > { %v8205_v43 = vadd.s32 4294967169, %v4436_v5  ;;  %v12527_v42 = vadd.f32 %v4305_v3, %v12508_v53  ;;  %v12529_v52 = vpop.f32.mrb[9].mxu1  ;;  %v4440_v63 = vor.u32 8388608, %v4439_v47  ;;  %v12554_v37 = vpop.f32.mrb[12].mxu0 }
 0x577   : > { %v4338_v22 = vadd.s32 1, %v8201_v27  ;;  %v12539_v10 = vshll.u32 %v4336_v54, 8 }
 0x578   : > { %16334 = vst [vmem:[#allocation5_spill] sm:$0xff] %v12527_v42  ;;  %v4442_v14 = vadd.s32 1, %v8205_v43  ;;  %v4536_v23 = vand.u32 2147483647, %v12527_v42  ;;  %v4539_v15 = vand.u32 2139095040, %v12527_v42 }
 0x579   : > { %vm4339_vm4 = vcmp.gt.s32.totalorder %v4338_v22, 0  ;;  %v12535_v30 = vpop.f32.mrb[10].mxu1 }
 0x57a   : > { %v4340_v1 = vsel %vm4339_vm4, %v4338_v22, 0  ;;  %vm4443_vm12 = vcmp.gt.s32.totalorder %v4442_v14, 0  ;;  %v12537_v11 = vpop.f32.mrb[11].mxu1  ;;  %v4540_v2 = vshrl.u32 %v4539_v15, 23  ;;  %v4543_v32 = vand.u32 8388607, %v4536_v23 }
 0x57b   : > { %v4342_v9 = vand.u32 31, %v4340_v1  ;;  %v4341_v61 = vshrl.u32 %v4340_v1, 5  ;;  %v4444_v21 = vsel %vm4443_vm12, %v4442_v14, 0  ;;  %v12565_v1 = vpop.permute.xlu1 %4125 }
 0x57c   : > { %v8209_v4 = vadd.s32 4294967169, %v4540_v2  ;;  %v4544_v27 = vor.u32 8388608, %v4543_v32  ;;  %v12569_v2 = vshll.u32 %v4440_v63, 8  ;;  %v12573_v32 = vadd.f32 %v12529_v52, %v12508_v53 }
 0x57d   : > { %v4343_v35 = vsub.s32 32, %v4342_v9  ;;  %v4345_v38 = vshll.u32 %v16130_v6, %v4342_v9  ;;  %v4348_v7 = vshll.u32 %v16335_v41, %v4342_v9  ;;  %v4351_v0 = vshll.u32 %v16336_v17, %v4342_v9 }
 0x57e   : > { %v4354_v33 = vshll.u32 %v16337_v57, %v4342_v9  ;;  %v4357_v55 = vshll.u32 %v16134_v25, %v4342_v9  ;;  %vm4360_vm10 = vcmp.lt.s32.totalorder %v4341_v61, 1  ;;  %vm4362_vm2 = vcmp.lt.s32.totalorder %v4341_v61, 3  ;;  %16338 = vst [vmem:[#allocation24_spill] sm:$0xff] %v12573_v32 }
 0x57f   : > { %v4346_v46 = vshrl.u32 %v16335_v41, %v4343_v35  ;;  %v4349_v45 = vshrl.u32 %v16336_v17, %v4343_v35  ;;  %v4352_v36 = vshrl.u32 %v16337_v57, %v4343_v35  ;;  %v4344_v20 = vshrl.u32 %v16130_v6, %v4343_v35 }
 0x580   : > { %v4355_v39 = vshrl.u32 %v16134_v25, %v4343_v35  ;;  %v4358_v58 = vshrl.u32 %v16135_v26, %v4343_v35  ;;  %vm4363_vm7 = vcmp.lt.s32.totalorder %v4341_v61, 4  ;;  %v4546_v24 = vadd.s32 1, %v8209_v4 }
 0x581   : > { %v4347_v31 = vor.u32 %v4346_v46, %v4345_v38  ;;  %v4350_v29 = vor.u32 %v4349_v45, %v4348_v7  ;;  %v4353_v60 = vor.u32 %v4352_v36, %v4351_v0  ;;  %vm4361_vm11 = vcmp.lt.s32.totalorder %v4341_v61, 2 }
 0x582   : > { %v4356_v50 = vor.u32 %v4355_v39, %v4354_v33  ;;  %v4359_v40 = vor.u32 %v4358_v58, %v4357_v55  ;;  %vm4547_vm0 = vcmp.gt.s32.totalorder %v4546_v24, 0  ;;  %v12567_v61 = vand.u32 31, %v4444_v21 }
 0x583   : > { %v4364_v49 = vsel %vm4360_vm10, %v4344_v20, %v4347_v31  ;;  %v4365_v59 = vsel %vm4363_vm7, %v4353_v60, 2102212464  ;;  %v4368_v34 = vsel %vm4360_vm10, %v4347_v31, %v4350_v29  ;;  %v4372_v28 = vsel %vm4360_vm10, %v4350_v29, %v4353_v60 }
 0x584   : > { %v4366_v12 = vsel %vm4362_vm2, %v4350_v29, %v4365_v59  ;;  %v4369_v44 = vsel %vm4363_vm7, %v4356_v50, 920167782  ;;  %v4373_v13 = vsel %vm4363_vm7, %v4359_v40, 1326507024  ;;  %v4548_v9 = vsel %vm4547_vm0, %v4546_v24, 0 }
 0x585   : > { %v4370_v8 = vsel %vm4362_vm2, %v4353_v60, %v4369_v44  ;;  %v4374_v5 = vsel %vm4362_vm2, %v4356_v50, %v4373_v13  ;;  %v4367_v3 = vsel %vm4361_vm11, %v4364_v49, %v4366_v12  ;;  %v4550_v35 = vand.u32 31, %v4548_v9 }
 0x586   : > { %v4371_v43 = vsel %vm4361_vm11, %v4368_v34, %v4370_v8  ;;  %v4375_v22 = vsel %vm4361_vm11, %v4372_v28, %v4374_v5  ;;  %v12577_v38 = vadd.f32 %v12519_v51, %v12565_v1  ;;  %v4383_v7 = vmul.u32 %v12539_v10, %v4367_v3  ;;  %v12602_v28 = vpop.f32.mrb[12].mxu1 }
 0x587   : > { %v12557_v54 = vmul.u32.u64.low %v12539_v10, %v4375_v22  ;;  %v12558_v47 = vmul.u32.u64.high %v12539_v10, %v4375_v22, %v12557_v54  ;;  %v12561_v14 = vmul.u32.u64.low %v12539_v10, %v4371_v43  ;;  %v12562_v15 = vmul.u32.u64.high %v12539_v10, %v4371_v43, %v12561_v14 }
 0x588   : > { %16339 = vst [vmem:[#allocation22_spill] sm:$0xff] %v12577_v38  ;;  %v4549_v0 = vshrl.u32 %v4548_v9, 5  ;;  %v12580_v33 = vshll.u32 %v4544_v27, 8  ;;  %v12582_v46 = vshrl.u32 %v4444_v21, 5  ;;  %v4551_v45 = vsub.s32 32, %v4550_v35 }
 0x589   : > { %vm4385_vm6 = vc.u32 %v12558_v47, %v12561_v14  ;;  %v4386_v63 = vadd.s32 1, %v12562_v15  ;;  %v12588_v53 = vsub.s32 32, %v12567_v61  ;;  %v4553_v52 = vshll.u32 %v16130_v6, %v4550_v35 }
 0x58a   : > { %v4556_v51 = vshll.u32 %v16335_v41, %v4550_v35  ;;  %v4559_v10 = vshll.u32 %v16336_v17, %v4550_v35  ;;  %v4562_v36 = vshll.u32 %v16337_v57, %v4550_v35  ;;  %v4552_v55 = vshrl.u32 %v16130_v6, %v4551_v45 }
 0x58b   : > { %v4387_v21 = vsel %vm4385_vm6, %v4386_v63, %v12562_v15  ;;  %v4554_v20 = vshrl.u32 %v16335_v41, %v4551_v45  ;;  %v4557_v39 = vshrl.u32 %v16336_v17, %v4551_v45  ;;  %v4560_v31 = vshrl.u32 %v16337_v57, %v4551_v45 }
 0x58c   : > { %v4388_v58 = vadd.s32 %v4387_v21, %v4383_v7  ;;  %v4563_v29 = vshrl.u32 %v16134_v25, %v4551_v45  ;;  %v4565_v60 = vshll.u32 %v16134_v25, %v4550_v35  ;;  %v4566_v40 = vshrl.u32 %v16135_v26, %v4551_v45 }
 0x58d   : > { %v4555_v4 = vor.u32 %v4554_v20, %v4553_v52  ;;  %v4558_v50 = vor.u32 %v4557_v39, %v4556_v51  ;;  %vm4568_vm15 = vcmp.lt.s32.totalorder %v4549_v0, 1  ;;  %v4561_v59 = vor.u32 %v4560_v31, %v4559_v10 }
 0x58e   : > { %v4389_v49 = vadd.s32 536870912, %v4388_v58  ;;  %v4564_v34 = vor.u32 %v4563_v29, %v4562_v36  ;;  %vm4569_vm5 = vcmp.lt.s32.totalorder %v4549_v0, 2  ;;  %v4567_v12 = vor.u32 %v4566_v40, %v4565_v60 }
 0x58f   : > { %vm4570_vm8 = vcmp.lt.s32.totalorder %v4549_v0, 3  ;;  %vm4571_vm9 = vcmp.lt.s32.totalorder %v4549_v0, 4  ;;  %v4572_v44 = vsel %vm4568_vm15, %v4552_v55, %v4555_v4  ;;  %v4576_v8 = vsel %vm4568_vm15, %v4555_v4, %v4558_v50 }
 0x590   : > { %v12605_v13 = vshrl.u32 %v4389_v49, 30  ;;  %v4573_v24 = vsel %vm4571_vm9, %v4561_v59, 2102212464  ;;  %v4577_v5 = vsel %vm4571_vm9, %v4564_v34, 920167782  ;;  %v4580_v43 = vsel %vm4568_vm15, %v4558_v50, %v4561_v59 }
 0x591   : > { %v4574_v27 = vsel %vm4570_vm8, %v4558_v50, %v4573_v24  ;;  %v4578_v3 = vsel %vm4570_vm8, %v4561_v59, %v4577_v5  ;;  %v4581_v22 = vsel %vm4571_vm9, %v4567_v12, 1326507024  ;;  %v16018_v9 = vand.u32 2147483647, %v12573_v32 }
 0x592   : > { %v4391_v54 = vshll.u32 %v12605_v13, 30  ;;  %v4579_v15 = vsel %vm4569_vm5, %v4576_v8, %v4578_v3  ;;  %v4643_v35 = vand.u32 2139095040, %v12573_v32  ;;  %v4582_v7 = vsel %vm4570_vm8, %v4564_v34, %v4581_v22 }
 0x593   : > { %v12614_v63 = vmul.u32.u64.low %v12580_v33, %v4579_v15  ;;  %v12615_v45 = vmul.u32.u64.high %v12580_v33, %v4579_v15, %v12614_v63  ;;  %vm4464_vm1 = vcmp.lt.s32.totalorder %v12582_v46, 1  ;;  %v4575_v51 = vsel %vm4569_vm5, %v4572_v44, %v4574_v27 }
 0x594   : > { %v12619_v52 = vsub.s32 %v4388_v58, %v4391_v54  ;;  %v4583_v10 = vsel %vm4569_vm5, %v4580_v43, %v4582_v7  ;;  %v4449_v36 = vshll.u32 %v16130_v6, %v12567_v61  ;;  %v4450_v20 = vshrl.u32 %v16335_v41, %v12588_v53 }
 0x595   : > { %v12626_v21 = vmul.u32.u64.low %v12580_v33, %v4583_v10  ;;  %v12627_v55 = vmul.u32.u64.high %v12580_v33, %v4583_v10, %v12626_v21  ;;  %v4452_v39 = vshll.u32 %v16335_v41, %v12567_v61  ;;  %v4453_v31 = vshrl.u32 %v16336_v17, %v12588_v53 }
 0x596   : > { %v4394_v58 = vsub.s32 0, %v12619_v52  ;;  %v4455_v0 = vshll.u32 %v16336_v17, %v12567_v61  ;;  %v4456_v29 = vshrl.u32 %v16337_v57, %v12588_v53  ;;  %v4591_v60 = vmul.u32 %v12580_v33, %v4575_v51 }
 0x597   : > { %v4594_v4 = vadd.s32 1, %v12615_v45  ;;  %v4458_v50 = vshll.u32 %v16337_v57, %v12567_v61  ;;  %v4459_v40 = vshrl.u32 %v16134_v25, %v12588_v53  ;;  %v4451_v59 = vor.u32 %v4450_v20, %v4449_v36 }
 0x598   : > { %v8202_v49 = vmin.u32 %v4394_v58, %v12619_v52  ;;  %v4454_v34 = vor.u32 %v4453_v31, %v4452_v39  ;;  %v4457_v12 = vor.u32 %v4456_v29, %v4455_v0  ;;  %vm4593_vm3 = vc.u32 %v12627_v55, %v12614_v63 }
 0x599   : > { %v4460_v44 = vor.u32 %v4459_v40, %v4458_v50  ;;  %v4461_v33 = vshll.u32 %v16134_v25, %v12567_v61  ;;  %v4462_v24 = vshrl.u32 %v16135_v26, %v12588_v53  ;;  %v4595_v5 = vsel %vm4593_vm3, %v4594_v4, %v12615_v45 }
 0x59a   : > { %v4396_v8 = vclz %v8202_v49  ;;  %vm4465_vm13 = vcmp.lt.s32.totalorder %v12582_v46, 2  ;;  %vm4466_vm14 = vcmp.lt.s32.totalorder %v12582_v46, 3  ;;  %v4384_v27 = vadd.s32 %v12561_v14, %v12558_v47 }
 0x59b   : > { %v4596_v3 = vadd.s32 %v4595_v5, %v4591_v60  ;;  %v4463_v43 = vor.u32 %v4462_v24, %v4461_v33  ;;  %vm4467_vm4 = vcmp.lt.s32.totalorder %v12582_v46, 4  ;;  %v4472_v61 = vsel %vm4464_vm1, %v4451_v59, %v4454_v34 }
 0x59c   : > { %v8203_v22 = vadd.s32 4294967294, %v4396_v8  ;;  %v4473_v54 = vsel %vm4467_vm4, %v4460_v44, 920167782  ;;  %v4476_v15 = vsel %vm4464_vm1, %v4454_v34, %v4457_v12  ;;  %v4448_v45 = vshrl.u32 %v16130_v6, %v12588_v53 }
 0x59d   : > { %v4597_v7 = vadd.s32 536870912, %v4596_v3  ;;  %v4474_v51 = vsel %vm4466_vm14, %v4457_v12, %v4473_v54  ;;  %v4477_v47 = vsel %vm4467_vm4, %v4463_v43, 1326507024  ;;  %v4469_v14 = vsel %vm4467_vm4, %v4457_v12, 2102212464 }
 0x59e   : > { %vm8204_vm12 = vcmp.lt.s32.totalorder %v8203_v22, 0  ;;  %v4478_v10 = vsel %vm4466_vm14, %v4460_v44, %v4477_v47  ;;  %v4644_v36 = vshrl.u32 %v4643_v35, 23  ;;  %v4475_v39 = vsel %vm4465_vm13, %v4472_v61, %v4474_v51 }
 0x59f   : > { %v4399_v21 = vsel %vm8204_vm12, 0, %v8203_v22  ;;  %v12669_v20 = vshrl.u32 %v4597_v7, 30  ;;  %v4479_v58 = vsel %vm4465_vm13, %v4476_v15, %v4478_v10  ;;  %v4468_v0 = vsel %vm4464_vm1, %v4448_v45, %v4451_v59  ;;  %v12704_v45 = vpop.f32.mrb[13].mxu0 }
 0x5a0   : > { %v4400_v53 = vsub.s32 32, %v4399_v21  ;;  %v4404_v31 = vsub.s32 4294967266, %v4399_v21  ;;  %v8213_v29 = vadd.s32 4294967169, %v4644_v36  ;;  %v4470_v35 = vsel %vm4466_vm14, %v4454_v34, %v4469_v14 }
 0x5a1   : > { %v4599_v60 = vshll.u32 %v12669_v20, 30  ;;  %v12681_v4 = vmul.u32.u64.low %v12569_v2, %v4479_v58  ;;  %v12682_v50 = vmul.u32.u64.high %v12569_v2, %v4479_v58, %v12681_v4  ;;  %v4747_v44 = vand.u32 2139095040, %v12577_v38 }
 0x5a2   : > { %v4405_v40 = vadd.s32 127, %v4404_v31  ;;  %v12685_v49 = vmul.u32.u64.low %v12569_v2, %v4475_v39  ;;  %v12686_v12 = vmul.u32.u64.high %v12569_v2, %v4475_v39, %v12685_v49  ;;  %v4402_v33 = vshrl.u32 %v4384_v27, %v4400_v53 }
 0x5a3   : > { %v12690_v59 = vsub.s32 %v4596_v3, %v4599_v60  ;;  %v4650_v24 = vadd.s32 1, %v8213_v29  ;;  %v4471_v34 = vsel %vm4465_vm13, %v4468_v0, %v4470_v35  ;;  %v4647_v5 = vand.u32 8388607, %v16018_v9 }
 0x5a4   : > { %v4406_v8 = vshll.u32 %v4405_v40, 23  ;;  %v4401_v43 = vshll.u32 %v12619_v52, %v4399_v21  ;;  %vm4489_vm10 = vc.u32 %v12682_v50, %v12685_v49  ;;  %v4490_v61 = vadd.s32 1, %v12686_v12 }
 0x5a5   : > { %v4602_v22 = vsub.s32 0, %v12690_v59  ;;  %vm4651_vm2 = vcmp.gt.s32.totalorder %v4650_v24, 0  ;;  %v4744_v27 = vand.u32 2147483647, %v12577_v38  ;;  %v4748_v3 = vshrl.u32 %v4747_v44, 23 }
 0x5a6   : > { %v4403_v54 = vor.u32 %v4402_v33, %v4401_v43  ;;  %v4487_v15 = vmul.u32 %v12569_v2, %v4471_v34  ;;  %v4652_v7 = vsel %vm4651_vm2, %v4650_v24, 0  ;;  %v4407_v52 = vor.u32 4788187, %v4406_v8 }
 0x5a7   : > { %v8210_v46 = vmin.u32 %v4602_v22, %v12690_v59  ;;  %v4491_v51 = vsel %vm4489_vm10, %v4490_v61, %v12686_v12  ;;  %v4648_v47 = vor.u32 8388608, %v4647_v5  ;;  %v4654_v14 = vand.u32 31, %v4652_v7 }
 0x5a8   : > { %v4492_v36 = vadd.s32 %v4491_v51, %v4487_v15  ;;  %v4592_v21 = vadd.s32 %v12614_v63, %v12627_v55  ;;  %v4410_v58 = vcvt.s32.f32 %v4403_v54  ;;  %v8217_v0 = vadd.s32 4294967169, %v4748_v3 }
 0x5a9   : > { %v4604_v10 = vclz %v8210_v46  ;;  %v4655_v39 = vsub.s32 32, %v4654_v14  ;;  %v4408_v29 = vand.u32 2147483647, %v4407_v52  ;;  %v12710_v60 = vshll.u32 %v4648_v47, 8 }
 0x5aa   : > { %v4493_v31 = vadd.s32 536870912, %v4492_v36  ;;  %v12714_v35 = vand.u32 8388607, %v4744_v27  ;;  %v4653_v12 = vshrl.u32 %v4652_v7, 5  ;;  %v4657_v44 = vshll.u32 %v16130_v6, %v4654_v14 }
 0x5ab   : > { %v8211_v53 = vadd.s32 4294967294, %v4604_v10  ;;  %v4658_v2 = vshrl.u32 %v16335_v41, %v4655_v39  ;;  %v4661_v40 = vshrl.u32 %v16336_v17, %v4655_v39  ;;  %v4664_v63 = vshrl.u32 %v16337_v57, %v4655_v39 }
 0x5ac   : > { %v12716_v4 = vshrl.u32 %v4493_v31, 30  ;;  %v4667_v33 = vshrl.u32 %v16134_v25, %v4655_v39  ;;  %v4660_v34 = vshll.u32 %v16335_v41, %v4654_v14  ;;  %v4663_v5 = vshll.u32 %v16336_v17, %v4654_v14 }
 0x5ad   : > { %vm8212_vm7 = vcmp.lt.s32.totalorder %v8211_v53, 0  ;;  %v4659_v22 = vor.u32 %v4658_v2, %v4657_v44  ;;  %v4666_v61 = vshll.u32 %v16337_v57, %v4654_v14  ;;  %v4754_v3 = vadd.s32 1, %v8217_v0 }
 0x5ae   : > { %v4607_v55 = vsel %vm8212_vm7, 0, %v8211_v53  ;;  %v4495_v43 = vshll.u32 %v12716_v4, 30  ;;  %v4662_v15 = vor.u32 %v4661_v40, %v4660_v34  ;;  %v4665_v7 = vor.u32 %v4664_v63, %v4663_v5 }
 0x5af   : > { %v4608_v24 = vsub.s32 32, %v4607_v55  ;;  %v4612_v8 = vsub.s32 4294967266, %v4607_v55  ;;  %v4668_v51 = vor.u32 %v4667_v33, %v4666_v61  ;;  %v4669_v47 = vshll.u32 %v16134_v25, %v4654_v14 }
 0x5b0   : > { %v12726_v52 = vsub.s32 %v4492_v36, %v4495_v43  ;;  %v4670_v10 = vshrl.u32 %v16135_v26, %v4655_v39  ;;  %v4411_v53 = vmul.f32 %v4410_v58, %v4408_v29  ;;  %v4609_v31 = vshll.u32 %v12690_v59, %v4607_v55 }
 0x5b1   : > { %v4610_v54 = vshrl.u32 %v4592_v21, %v4608_v24  ;;  %v4613_v46 = vadd.s32 127, %v4612_v8  ;;  %v4656_v2 = vshrl.u32 %v16130_v6, %v4655_v39  ;;  %vm4672_vm11 = vcmp.lt.s32.totalorder %v4653_v12, 1 }
 0x5b2   : > { %v4498_v44 = vsub.s32 0, %v12726_v52  ;;  %v4671_v0 = vor.u32 %v4670_v10, %v4669_v47  ;;  %vm4673_vm0 = vcmp.lt.s32.totalorder %v4653_v12, 2  ;;  %vm4674_vm6 = vcmp.lt.s32.totalorder %v4653_v12, 3 }
 0x5b3   : > { %v4614_v9 = vshll.u32 %v4613_v46, 23  ;;  %v4611_v21 = vor.u32 %v4610_v54, %v4609_v31  ;;  %vm4675_vm15 = vcmp.lt.s32.totalorder %v4653_v12, 4  ;;  %v4680_v36 = vsel %vm4672_vm11, %v4659_v22, %v4662_v15 }
 0x5b4   : > { %v8206_v40 = vmin.u32 %v4498_v44, %v12726_v52  ;;  %v4677_v14 = vsel %vm4675_vm15, %v4665_v7, 2102212464  ;;  %v4681_v63 = vsel %vm4675_vm15, %v4668_v51, 920167782  ;;  %v4684_v33 = vsel %vm4672_vm11, %v4662_v15, %v4665_v7 }
 0x5b5   : > { %v4615_v58 = vor.u32 4788187, %v4614_v9  ;;  %v4676_v29 = vsel %vm4672_vm11, %v4656_v2, %v4659_v22  ;;  %v4682_v59 = vsel %vm4674_vm6, %v4665_v7, %v4681_v63  ;;  %v4685_v55 = vsel %vm4675_vm15, %v4671_v0, 1326507024 }
 0x5b6   : > { %v4500_v24 = vclz %v8206_v40  ;;  %v4683_v39 = vsel %vm4673_vm0, %v4680_v36, %v4682_v59  ;;  %v4686_v8 = vsel %vm4674_vm6, %v4668_v51, %v4685_v55  ;;  %vm4755_vm5 = vcmp.gt.s32.totalorder %v4754_v3, 0 }
 0x5b7   : > { %v4678_v34 = vsel %vm4674_vm6, %v4662_v15, %v4677_v14  ;;  %v4687_v5 = vsel %vm4673_vm0, %v4684_v33, %v4686_v8  ;;  %v12737_v43 = vmul.u32.u64.low %v12710_v60, %v4683_v39  ;;  %v12738_v61 = vmul.u32.u64.high %v12710_v60, %v4683_v39, %v12737_v43  ;;  %v12746_v15 = vpop.f32.mrb[13].mxu1 }
 0x5b8   : > { %v8207_v54 = vadd.s32 4294967294, %v4500_v24  ;;  %v12742_v46 = vmul.u32.u64.low %v12710_v60, %v4687_v5  ;;  %v12743_v9 = vmul.u32.u64.high %v12710_v60, %v4687_v5, %v12742_v46  ;;  %v4756_v22 = vsel %vm4755_vm5, %v4754_v3, 0 }
 0x5b9   : > { %v4758_v7 = vand.u32 31, %v4756_v22  ;;  %v4412_v47 = vxor.u32 2147483648, %v4411_v53  ;;  %v4616_v10 = vand.u32 2147483647, %v4615_v58  ;;  %v4679_v51 = vsel %vm4673_vm0, %v4676_v29, %v4678_v34 }
 0x5ba   : > { %vm8208_vm8 = vcmp.lt.s32.totalorder %v8207_v54, 0  ;;  %v4698_v2 = vadd.s32 1, %v12738_v61  ;;  %v4752_v44 = vor.u32 8388608, %v12714_v35  ;;  %vm4330_vm9 = vcmp.lt.s32.totalorder %v12511_v48, 0 }
 0x5bb   : > { %v4503_v31 = vsel %vm8208_vm8, 0, %v8207_v54  ;;  %v4759_v0 = vsub.s32 32, %v4758_v7  ;;  %v4618_v36 = vcvt.s32.f32 %v4611_v21  ;;  %v12753_v3 = vadd.f32 %v12521_v19, %v12565_v1 }
 0x5bc   : > { %v4508_v40 = vsub.s32 4294967266, %v4503_v31  ;;  %v4414_v14 = vsub.s32 4, %v12605_v13  ;;  %v4488_v12 = vadd.s32 %v12685_v49, %v12682_v50  ;;  %v4695_v63 = vmul.u32 %v12710_v60, %v4679_v51 }
 0x5bd   : > { %vm4697_vm1 = vc.u32 %v12743_v9, %v12737_v43  ;;  %v12763_v35 = vsel %vm4330_vm9, %v4412_v47, %v4411_v53  ;;  %v12765_v21 = vmul.f32 %v4618_v36, %v4616_v10  ;;  %v4757_v29 = vshrl.u32 %v4756_v22, 5 }
 0x5be   : > { %v4509_v33 = vadd.s32 127, %v4508_v40  ;;  %v4699_v19 = vsel %vm4697_vm1, %v4698_v2, %v12738_v61  ;;  %v4762_v59 = vshrl.u32 %v16335_v41, %v4759_v0  ;;  %v12769_v55 = vshll.u32 %v4752_v44, 8 }
 0x5bf   : > { %v4700_v58 = vadd.s32 %v4699_v19, %v4695_v63  ;;  %v4504_v50 = vsub.s32 32, %v4503_v31  ;;  %v4761_v49 = vshll.u32 %v16130_v6, %v4758_v7  ;;  %v4764_v60 = vshll.u32 %v16335_v41, %v4758_v7 }
 0x5c0   : > { %v4765_v24 = vshrl.u32 %v16336_v17, %v4759_v0  ;;  %v4510_v53 = vshll.u32 %v4509_v33, 23  ;;  %v4767_v8 = vshll.u32 %v16336_v17, %v4758_v7  ;;  %v4768_v34 = vshrl.u32 %v16337_v57, %v4759_v0 }
 0x5c1   : > { %v4701_v39 = vadd.s32 536870912, %v4700_v58  ;;  %v4763_v5 = vor.u32 %v4762_v59, %v4761_v49  ;;  %v4770_v54 = vshll.u32 %v16337_v57, %v4758_v7  ;;  %v4771_v46 = vshrl.u32 %v16134_v25, %v4759_v0 }
 0x5c2   : > { %v4766_v61 = vor.u32 %v4765_v24, %v4764_v60  ;;  %v4769_v47 = vor.u32 %v4768_v34, %v4767_v8  ;;  %v4773_v10 = vshll.u32 %v16134_v25, %v4758_v7  ;;  %v4774_v51 = vshrl.u32 %v16135_v26, %v4759_v0 }
 0x5c3   : > { %v12778_v22 = vshrl.u32 %v4701_v39, 30  ;;  %v4505_v2 = vshll.u32 %v12726_v52, %v4503_v31  ;;  %v4760_v44 = vshrl.u32 %v16130_v6, %v4759_v0  ;;  %v4772_v36 = vor.u32 %v4771_v46, %v4770_v54 }
 0x5c4   : > { %v12786_v40 = vadd.f32 %v12535_v30, %v12565_v1  ;;  %vm12790_vm3 = vcmp.le.f32.partialorder %v4328_v62, 0.7853982  ;;  %v4775_v7 = vor.u32 %v4774_v51, %v4773_v10  ;;  %vm4776_vm13 = vcmp.lt.s32.totalorder %v4757_v29, 1 }
 0x5c5   : > { %16340 = vst [vmem:[#allocation20_spill] sm:$0xff] %v12778_v22  ;;  %v4703_v33 = vshll.u32 %v12778_v22, 30  ;;  %vm4779_vm14 = vcmp.lt.s32.totalorder %v4757_v29, 4  ;;  %v4506_v19 = vshrl.u32 %v4488_v12, %v4504_v50  ;;  %v4511_v52 = vor.u32 4788187, %v4510_v53 }
 0x5c6   : > { %16341 = vst [vmem:[#allocation7_spill] sm:$0xff] %v12786_v40  ;;  %v4781_v31 = vsel %vm4779_vm14, %v4769_v47, 2102212464  ;;  %v4784_v0 = vsel %vm4776_vm13, %v4763_v5, %v4766_v61  ;;  %vm4778_vm4 = vcmp.lt.s32.totalorder %v4757_v29, 3  ;;  %v4785_v30 = vsel %vm4779_vm14, %v4772_v36, 920167782 }
 0x5c7   : > { %v12795_v59 = vsub.s32 %v4700_v58, %v4703_v33  ;;  %v4788_v49 = vsel %vm4776_vm13, %v4766_v61, %v4769_v47  ;;  %vm4777_vm12 = vcmp.lt.s32.totalorder %v4757_v29, 2  ;;  %v4780_v60 = vsel %vm4776_vm13, %v4760_v44, %v4763_v5 }
 0x5c8   : > { %v4786_v62 = vsel %vm4778_vm4, %v4769_v47, %v4785_v30  ;;  %v4789_v24 = vsel %vm4779_vm14, %v4775_v7, 1326507024  ;;  %v4782_v8 = vsel %vm4778_vm4, %v4766_v61, %v4781_v31  ;;  %v4507_v46 = vor.u32 %v4506_v19, %v4505_v2 }
 0x5c9   : > { %v4706_v39 = vsub.s32 0, %v12795_v59  ;;  %v4787_v34 = vsel %vm4777_vm12, %v4784_v0, %v4786_v62  ;;  %v4790_v54 = vsel %vm4778_vm4, %v4772_v36, %v4789_v24  ;;  %v4620_v58 = vxor.u32 2147483648, %v12765_v21 }
 0x5ca   : > { %v4791_v10 = vsel %vm4777_vm12, %v4788_v49, %v4790_v54  ;;  %v12799_v12 = vmul.u32.u64.low %v12769_v55, %v4787_v34  ;;  %v12800_v50 = vmul.u32.u64.high %v12769_v55, %v4787_v34, %v12799_v12  ;;  %v4512_v47 = vand.u32 2147483647, %v4511_v52 }
 0x5cb   : > { %v8214_v53 = vmin.u32 %v4706_v39, %v12795_v59  ;;  %v12806_v29 = vmul.u32.u64.low %v12769_v55, %v4791_v10  ;;  %v12807_v5 = vmul.u32.u64.high %v12769_v55, %v4791_v10, %v12806_v29  ;;  %v4783_v51 = vsel %vm4777_vm12, %v4780_v60, %v4782_v8 }
 0x5cc   : > { %v4955_v61 = vand.u32 2139095040, %v12786_v40  ;;  %v16019_v2 = vand.u32 2147483647, %v12753_v3  ;;  %v4415_v44 = vsel %vm4330_vm9, %v4414_v14, %v12605_v13  ;;  %vm4538_vm10 = vcmp.lt.s32.totalorder %v12527_v42, 0 }
 0x5cd   : > { %v4622_v36 = vsub.s32 4, %v12669_v20  ;;  %v4708_v33 = vclz %v8214_v53  ;;  %v4416_v7 = vsel %vm12790_vm3, %v12511_v48, %v12763_v35  ;;  %v4514_v19 = vcvt.s32.f32 %v4507_v46  ;;  %v12852_v46 = vpop.f32.mrb[14].mxu0 }
 0x5ce   : > { %v4802_v52 = vadd.s32 1, %v12800_v50  ;;  %v4956_v31 = vshrl.u32 %v4955_v61, 23  ;;  %v4621_v0 = vsel %vm4538_vm10, %v4620_v58, %v12765_v21  ;;  %v4799_v13 = vmul.u32 %v12769_v55, %v4783_v51 }
 0x5cf   : > { %v8215_v30 = vadd.s32 4294967294, %v4708_v33  ;;  %vm4801_vm2 = vc.u32 %v12807_v5, %v12799_v12  ;;  %v4515_v14 = vmul.f32 %v4514_v19, %v4512_v47  ;;  %v16020_v60 = vand.u32 2147483647, %v12786_v40 }
 0x5d0   : > { %v4803_v49 = vsel %vm4801_vm2, %v4802_v52, %v12800_v50  ;;  %v8225_v35 = vadd.s32 4294967169, %v4956_v31  ;;  %v4851_v24 = vand.u32 2139095040, %v12753_v3  ;;  %v4417_v39 = vsel %vm12790_vm3, 0, %v4415_v44 }
 0x5d1   : > { %vm8216_vm7 = vcmp.lt.s32.totalorder %v8215_v30, 0  ;;  %v4804_v62 = vadd.s32 %v4803_v49, %v4799_v13  ;;  %vm12836_vm11 = vcmp.le.f32.partialorder %v4536_v23, 0.7853982  ;;  %8797 = vcosq.f32 %v4416_v7 }
 0x5d2   : > { %v12840_v55 = vsel %vm8216_vm7, 0, %v8215_v30  ;;  %v4962_v8 = vadd.s32 1, %v8225_v35  ;;  %v12845_v34 = vsel %vm4538_vm10, %v4622_v36, %v12669_v20  ;;  %v12850_v63 = vsel %vm12836_vm11, %v12527_v42, %v4621_v0 }
 0x5d3   : > { %v4805_v54 = vadd.s32 536870912, %v4804_v62  ;;  %v4516_v23 = vxor.u32 2147483648, %v4515_v14  ;;  %v4959_v10 = vand.u32 8388607, %v16020_v60  ;;  %v12858_v50 = vand.u32 8388607, %v16019_v2 }
 0x5d4   : > { %vm4963_vm0 = vcmp.gt.s32.totalorder %v4962_v8, 0  ;;  %v4716_v20 = vsub.s32 4294967266, %v12840_v55  ;;  %v4852_v29 = vshrl.u32 %v4851_v24, 23  ;;  %8799 = vsinq.f32 %v4416_v7 }
 0x5d5   : > { %v12861_v58 = vshrl.u32 %v4805_v54, 30  ;;  %v4964_v53 = vsel %vm4963_vm0, %v4962_v8, 0  ;;  %v12863_v47 = vadd.s32 3, %v4417_v39  ;;  %vm4434_vm6 = vcmp.lt.s32.totalorder %v12514_v16, 0 }
 0x5d6   : > { %v4966_v51 = vand.u32 31, %v4964_v53  ;;  %8801 = vcosq.f32 %v12850_v63  ;;  %v4696_v44 = vadd.s32 %v12737_v43, %v12743_v9  ;;  %v12875_v33 = vsel %vm4434_vm6, %v4516_v23, %v4515_v14 }
 0x5d7   : > { %16346 = vst [vmem:[#allocation12_spill] sm:$0xff] %v12863_v47  ;;  %v4807_v36 = vshll.u32 %v12861_v58, 30  ;;  %v4960_v7 = vor.u32 8388608, %v4959_v10  ;;  %v4712_v31 = vsub.s32 32, %v12840_v55  ;;  %v4717_v0 = vadd.s32 127, %v4716_v20 }
 0x5d8   : > { %v4967_v19 = vsub.s32 32, %v4966_v51  ;;  %v8221_v13 = vadd.s32 4294967169, %v4852_v29  ;;  %v4969_v49 = vshll.u32 %v16130_v6, %v4966_v51  ;;  %v4972_v9 = vshll.u32 %v16335_v41, %v4966_v51 }
 0x5d9   : > { %v12879_v30 = vsub.s32 %v4804_v62, %v4807_v36  ;;  %v4965_v24 = vshrl.u32 %v4964_v53, 5  ;;  %v4975_v39 = vshll.u32 %v16336_v17, %v4966_v51  ;;  %v4978_v62 = vshll.u32 %v16337_v57, %v4966_v51 }
 0x5da   : > { %v4970_v43 = vshrl.u32 %v16335_v41, %v4967_v19  ;;  %v4973_v35 = vshrl.u32 %v16336_v17, %v4967_v19  ;;  %v4976_v8 = vshrl.u32 %v16337_v57, %v4967_v19  ;;  %v4979_v10 = vshrl.u32 %v16134_v25, %v4967_v19 }
 0x5db   : > { %v4810_v14 = vsub.s32 0, %v12879_v30  ;;  %v12890_v20 = vpop.eup %8797  ;;  %v4718_v29 = vshll.u32 %v4717_v0, 23  ;;  %v12893_v2 = vshll.u32 %v4960_v7, 8  ;;  %v12897_v53 = vadd.f32 %v12537_v11, %v12565_v1 }
 0x5dc   : > { %v4971_v54 = vor.u32 %v4970_v43, %v4969_v49  ;;  %v4974_v23 = vor.u32 %v4973_v35, %v4972_v9  ;;  %16347 = vst [vmem:[#allocation8_spill] sm:$0xff] %v12890_v20  ;;  %v4977_v60 = vor.u32 %v4976_v8, %v4975_v39  ;;  %v4980_v52 = vor.u32 %v4979_v10, %v4978_v62 }
 0x5dd   : > { %v8218_v36 = vmin.u32 %v4810_v14, %v12879_v30  ;;  %v4981_v49 = vshll.u32 %v16134_v25, %v4966_v51  ;;  %v4982_v43 = vshrl.u32 %v16135_v26, %v4967_v19  ;;  %v4713_v9 = vshll.u32 %v12795_v59, %v12840_v55 }
 0x5de   : > { %vm4746_vm15 = vcmp.lt.s32.totalorder %v12577_v38, 0  ;;  %vm4984_vm5 = vcmp.lt.s32.totalorder %v4965_v24, 1  ;;  %v4858_v35 = vadd.s32 1, %v8221_v13  ;;  %v12904_v7 = vpop.eup %8799  ;;  %vm12908_vm8 = vcmp.le.f32.partialorder %v4432_v56, 0.7853982 }
 0x5df   : > { %v4812_v0 = vclz %v8218_v36  ;;  %16348 = vst [vmem:[#allocation14_spill] sm:$0xff] %v12904_v7  ;;  %v4714_v1 = vshrl.u32 %v4696_v44, %v4712_v31  ;;  %v4983_v51 = vor.u32 %v4982_v43, %v4981_v49  ;;  %vm4987_vm9 = vcmp.lt.s32.totalorder %v4965_v24, 4  ;;  %v12925_v36 = vpop.f32.mrb[14].mxu1 }
 0x5e0   : > { %v4992_v14 = vsel %vm4984_vm5, %v4971_v54, %v4974_v23  ;;  %v12913_v39 = vpop.eup %8801  ;;  %v4719_v59 = vor.u32 4788187, %v4718_v29  ;;  %vm4986_vm1 = vcmp.lt.s32.totalorder %v4965_v24, 3  ;;  %v4993_v8 = vsel %vm4987_vm9, %v4980_v52, 920167782  ;;  %v13086_v7 = vpop.f32.mrb[15].mxu1 }
 0x5e1   : > { %16351 = vst [vmem:[#allocation10_spill] sm:$0xff] %v12913_v39  ;;  %v8219_v55 = vadd.s32 4294967294, %v4812_v0  ;;  %vm12917_vm3 = vcmp.le.f32.partialorder %v4744_v27, 0.7853982  ;;  %vm4985_vm13 = vcmp.lt.s32.totalorder %v4965_v24, 2  ;;  %v4994_v44 = vsel %vm4986_vm1, %v4977_v60, %v4993_v8 }
 0x5e2   : > { %v4989_v56 = vsel %vm4987_vm9, %v4977_v60, 2102212464  ;;  %v4996_v31 = vsel %vm4984_vm5, %v4974_v23, %v4977_v60  ;;  %v4968_v62 = vshrl.u32 %v16130_v6, %v4967_v19  ;;  %v4995_v10 = vsel %vm4985_vm13, %v4992_v14, %v4994_v44 }
 0x5e3   : > { %vm8220_vm14 = vcmp.lt.s32.totalorder %v8219_v55, 0  ;;  %v4997_v29 = vsel %vm4987_vm9, %v4983_v51, 1326507024  ;;  %v4715_v49 = vor.u32 %v4714_v1, %v4713_v9  ;;  %v4830_v27 = vsub.s32 4, %v12861_v58 }
 0x5e4   : > { %v4998_v43 = vsel %vm4986_vm1, %v4980_v52, %v4997_v29  ;;  %vm4859_vm4 = vcmp.gt.s32.totalorder %v4858_v35, 0  ;;  %v12929_v0 = vsel %vm8220_vm14, 0, %v8219_v55  ;;  %v4988_v8 = vsel %vm4984_vm5, %v4968_v62, %v4971_v54 }
 0x5e5   : > { %v4990_v60 = vsel %vm4986_vm1, %v4974_v23, %v4989_v56  ;;  %v4999_v61 = vsel %vm4985_vm13, %v4996_v31, %v4998_v43  ;;  %v12939_v51 = vmul.u32.u64.low %v12893_v2, %v4995_v10  ;;  %v12940_v9 = vmul.u32.u64.high %v12893_v2, %v4995_v10, %v12939_v51 }
 0x5e6   : > { %v12935_v19 = vmul.u32.u64.low %v12893_v2, %v4999_v61  ;;  %v12936_v14 = vmul.u32.u64.high %v12893_v2, %v4999_v61, %v12935_v19  ;;  %8803 = vsinq.f32 %v12850_v63  ;;  %v16354_v52 = vsel %vm12836_vm11, 0, %v12845_v34 }
 0x5e7   : > { %v12948_v54 = vadd.s32 3, %v16354_v52  ;;  %v4720_v23 = vand.u32 2147483647, %v4719_v59  ;;  %v4860_v1 = vsel %vm4859_vm4, %v4858_v35, 0  ;;  %v4820_v55 = vsub.s32 4294967266, %v12929_v0 }
 0x5e8   : > { %v12954_v61 = vsel %vm4746_vm15, %v4830_v27, %v12861_v58  ;;  %v4991_v56 = vsel %vm4985_vm13, %v4988_v8, %v4990_v60  ;;  %v4862_v44 = vand.u32 31, %v4860_v1  ;;  %v12961_v21 = vsel %vm12908_vm8, %v12514_v16, %v12875_v33 }
 0x5e9   : > { %16355 = vst [vmem:[#allocation32_spill] sm:$0xff] %v12948_v54  ;;  %v4722_v34 = vcvt.s32.f32 %v4715_v49  ;;  %v4800_v63 = vadd.s32 %v12799_v12, %v12807_v5  ;;  %v16356_v35 = vor.u32 8388608, %v12858_v50  ;;  %vm5009_vm12 = vc.u32 %v12936_v14, %v12939_v51 }
 0x5ea   : > { %v5010_v58 = vadd.s32 1, %v12940_v9  ;;  %v4863_v24 = vsub.s32 32, %v4862_v44  ;;  %v4816_v33 = vsub.s32 32, %v12929_v0  ;;  %v4833_v12 = vsel %vm12917_vm3, 0, %v12954_v61 }
 0x5eb   : > { %v12967_v59 = vshll.u32 %v16356_v35, 8  ;;  %v12973_v62 = vmul.f32 %v4722_v34, %v4720_v23  ;;  %v5007_v5 = vmul.u32 %v12893_v2, %v4991_v56  ;;  %v4821_v50 = vadd.s32 127, %v4820_v55 }
 0x5ec   : > { %v5011_v10 = vsel %vm5009_vm12, %v5010_v58, %v12940_v9  ;;  %v4866_v29 = vshrl.u32 %v16335_v41, %v4863_v24  ;;  %v4869_v49 = vshrl.u32 %v16336_v17, %v4863_v24  ;;  %v4865_v43 = vshll.u32 %v16130_v6, %v4862_v44 }
 0x5ed   : > { %v5012_v27 = vadd.s32 %v5011_v10, %v5007_v5  ;;  %v4868_v8 = vshll.u32 %v16335_v41, %v4862_v44  ;;  %v4872_v60 = vshrl.u32 %v16337_v57, %v4863_v24  ;;  %v4861_v19 = vshrl.u32 %v4860_v1, 5  ;;  %v12994_v1 = vpop.permute.xlu0 %4130 }
 0x5ee   : > { %v4871_v52 = vshll.u32 %v16336_v17, %v4862_v44  ;;  %v4874_v23 = vshll.u32 %v16337_v57, %v4862_v44  ;;  %v4875_v2 = vshrl.u32 %v16134_v25, %v4863_v24  ;;  %v4867_v9 = vor.u32 %v4866_v29, %v4865_v43 }
 0x5ef   : > { %v5013_v55 = vadd.s32 536870912, %v5012_v27  ;;  %v4870_v61 = vor.u32 %v4869_v49, %v4868_v8  ;;  %v5059_v56 = vand.u32 2139095040, %v12897_v53  ;;  %v4877_v58 = vshll.u32 %v16134_v25, %v4862_v44 }
 0x5f0   : > { %v4873_v34 = vor.u32 %v4872_v60, %v4871_v52  ;;  %v4876_v35 = vor.u32 %v4875_v2, %v4874_v23  ;;  %v4878_v5 = vshrl.u32 %v16135_v26, %v4863_v24  ;;  %v12992_v10 = vpop.eup %8803  ;;  %v4724_v31 = vxor.u32 2147483648, %v12973_v62 }
 0x5f1   : > { %16357 = vst [vmem:[#allocation11_spill] sm:$0xff] %v12992_v10  ;;  %v4817_v18 = vshll.u32 %v12879_v30, %v12929_v0  ;;  %v4818_v42 = vshrl.u32 %v4800_v63, %v4816_v33  ;;  %v12999_v29 = vshrl.u32 %v5013_v55, 30  ;;  %vm16063_vm10 = vcmp.lt.s32.totalorder %v12573_v32, 0 }
 0x5f2   : > { %v4822_v49 = vshll.u32 %v4821_v50, 23  ;;  %v4879_v43 = vor.u32 %v4878_v5, %v4877_v58  ;;  %vm4880_vm2 = vcmp.lt.s32.totalorder %v4861_v19, 1  ;;  %v13004_v44 = vadd.f32 %v12554_v37, %v12994_v1 }
 0x5f3   : > { %v5015_v8 = vshll.u32 %v12999_v29, 30  ;;  %vm4883_vm7 = vcmp.lt.s32.totalorder %v4861_v19, 4  ;;  %v4888_v60 = vsel %vm4880_vm2, %v4867_v9, %v4870_v61  ;;  %v5060_v52 = vshrl.u32 %v5059_v56, 23 }
 0x5f4   : > { %16358 = vst [vmem:[#allocation23_spill] sm:$0xff] %v13004_v44  ;;  %v4864_v30 = vshrl.u32 %v16130_v6, %v4863_v24  ;;  %vm4882_vm11 = vcmp.lt.s32.totalorder %v4861_v19, 3  ;;  %v4885_v0 = vsel %vm4883_vm7, %v4873_v34, 2102212464  ;;  %v4889_v63 = vsel %vm4883_vm7, %v4876_v35, 920167782 }
 0x5f5   : > { %v13009_v33 = vsub.s32 %v5012_v27, %v5015_v8  ;;  %vm4881_vm0 = vcmp.lt.s32.totalorder %v4861_v19, 2  ;;  %v4890_v50 = vsel %vm4882_vm11, %v4873_v34, %v4889_v63  ;;  %v4892_v23 = vsel %vm4880_vm2, %v4870_v61, %v4873_v34 }
 0x5f6   : > { %v4819_v2 = vor.u32 %v4818_v42, %v4817_v18  ;;  %v4823_v37 = vor.u32 4788187, %v4822_v49  ;;  %v4891_v55 = vsel %vm4881_vm0, %v4888_v60, %v4890_v50  ;;  %v4893_v58 = vsel %vm4883_vm7, %v4879_v43, 1326507024  ;;  %v13027_v49 = vpop.f32.mrb[15].mxu0 }
 0x5f7   : > { %v5018_v5 = vsub.s32 0, %v13009_v33  ;;  %v4884_v56 = vsel %vm4880_vm2, %v4864_v30, %v4867_v9  ;;  %v4886_v39 = vsel %vm4882_vm11, %v4870_v61, %v4885_v0  ;;  %v4894_v24 = vsel %vm4882_vm11, %v4876_v35, %v4893_v58 }
 0x5f8   : > { %v4895_v10 = vsel %vm4881_vm0, %v4892_v23, %v4894_v24  ;;  %v13017_v27 = vmul.u32.u64.low %v12967_v59, %v4891_v55  ;;  %v13018_v8 = vmul.u32.u64.high %v12967_v59, %v4891_v55, %v13017_v27  ;;  %v8229_v63 = vadd.s32 4294967169, %v5060_v52 }
 0x5f9   : > { %8805 = vcosq.f32 %v12961_v21  ;;  %v8226_v18 = vmin.u32 %v5018_v5, %v13009_v33  ;;  %v13024_v42 = vmul.u32.u64.low %v12967_v59, %v4895_v10  ;;  %v13025_v34 = vmul.u32.u64.high %v12967_v59, %v4895_v10, %v13024_v42 }
 0x5fa   : > { %8807 = vsinq.f32 %v12961_v21  ;;  %v13030_v9 = vadd.s32 3, %v4833_v12  ;;  %v4887_v61 = vsel %vm4881_vm0, %v4884_v56, %v4886_v39  ;;  %v5066_v35 = vadd.s32 1, %v8229_v63 }
 0x5fb   : > { %v13036_v43 = vsel %vm16063_vm10, %v4724_v31, %v12973_v62  ;;  %v4824_v60 = vand.u32 2147483647, %v4823_v37  ;;  %v5020_v52 = vclz %v8226_v18  ;;  %v16360_v30 = vand.u32 2147483647, %v12897_v53 }
 0x5fc   : > { %16359 = vst [vmem:[#allocation27_spill] sm:$0xff] %v13030_v9  ;;  %v4826_v0 = vcvt.s32.f32 %v4819_v2  ;;  %v4906_v50 = vadd.s32 1, %v13018_v8  ;;  %vm5067_vm5 = vcmp.gt.s32.totalorder %v5066_v35, 0  ;;  %v5163_v21 = vand.u32 2139095040, %v13004_v44 }
 0x5fd   : > { %v5063_v10 = vand.u32 8388607, %v16360_v30  ;;  %v8227_v12 = vadd.s32 4294967294, %v5020_v52  ;;  %v4903_v39 = vmul.u32 %v12967_v59, %v4887_v61  ;;  %vm4905_vm9 = vc.u32 %v13025_v34, %v13017_v27 }
 0x5fe   : > { %v5068_v19 = vsel %vm5067_vm5, %v5066_v35, 0  ;;  %v5008_v31 = vadd.s32 %v12939_v51, %v12936_v14  ;;  %v4907_v62 = vsel %vm4905_vm9, %v4906_v50, %v13018_v8  ;;  %v13050_v2 = vadd.f32 %v12602_v28, %v12994_v1 }
 0x5ff   : > { %v5070_v23 = vand.u32 31, %v5068_v19  ;;  %v13052_v37 = vmul.f32 %v4826_v0, %v4824_v60  ;;  %vm8228_vm1 = vcmp.lt.s32.totalorder %v8227_v12, 0  ;;  %v4908_v55 = vadd.s32 %v4907_v62, %v4903_v39 }
 0x600   : > { %16361 = vst [vmem:[#allocation13_spill] sm:$0xff] %v13050_v2  ;;  %v5064_v58 = vor.u32 8388608, %v5063_v10  ;;  %v5023_v59 = vsel %vm8228_vm1, 0, %v8227_v12  ;;  %v5164_v24 = vshrl.u32 %v5163_v21, 23  ;;  %v5069_v51 = vshrl.u32 %v5068_v19, 5 }
 0x601   : > { %v5071_v5 = vsub.s32 32, %v5070_v23  ;;  %v5024_v63 = vsub.s32 32, %v5023_v59  ;;  %v5028_v18 = vsub.s32 4294967266, %v5023_v59  ;;  %v4909_v14 = vadd.s32 536870912, %v4908_v55 }
 0x602   : > { %v5073_v8 = vshll.u32 %v16130_v6, %v5070_v23  ;;  %v5076_v28 = vshll.u32 %v16335_v41, %v5070_v23  ;;  %v5079_v30 = vshll.u32 %v16336_v17, %v5070_v23  ;;  %v5082_v12 = vshll.u32 %v16337_v57, %v5070_v23 }
 0x603   : > { %v5074_v42 = vshrl.u32 %v16335_v41, %v5071_v5  ;;  %v5077_v61 = vshrl.u32 %v16336_v17, %v5071_v5  ;;  %v13059_v35 = vpop.eup %8805  ;;  %v5029_v60 = vadd.s32 127, %v5028_v18  ;;  %v13061_v52 = vshrl.u32 %v4909_v14, 30 }
 0x604   : > { %v5080_v10 = vshrl.u32 %v16337_v57, %v5071_v5  ;;  %v13065_v0 = vpop.eup %8807  ;;  %v5026_v50 = vshrl.u32 %v5008_v31, %v5024_v63  ;;  %v5083_v39 = vshrl.u32 %v16134_v25, %v5071_v5  ;;  %v5085_v14 = vshll.u32 %v16134_v25, %v5070_v23 }
 0x605   : > { %v5075_v21 = vor.u32 %v5074_v42, %v5073_v8  ;;  %v5030_v19 = vshll.u32 %v5029_v60, 23  ;;  %v4911_v62 = vshll.u32 %v13061_v52, 30  ;;  %v5078_v56 = vor.u32 %v5077_v61, %v5076_v28 }
 0x606   : > { %v5081_v54 = vor.u32 %v5080_v10, %v5079_v30  ;;  %v5084_v18 = vor.u32 %v5083_v39, %v5082_v12  ;;  %v5086_v9 = vshrl.u32 %v16135_v26, %v5071_v5  ;;  %v13072_v20 = vshll.u32 %v5064_v58, 8 }
 0x607   : > { %v16362_v48 = vand.u32 2147483647, %v12573_v32  ;;  %v16363_v31 = vmov 0  ;;  %v5025_v63 = vshll.u32 %v13009_v33, %v5023_v59  ;;  %v13081_v8 = vsub.s32 %v4908_v55, %v4911_v62 }
 0x608   : > { %v5072_v42 = vshrl.u32 %v16130_v6, %v5071_v5  ;;  %v8233_v28 = vadd.s32 4294967169, %v5164_v24  ;;  %v5031_v61 = vor.u32 4788187, %v5030_v19  ;;  %v5087_v60 = vor.u32 %v5086_v9, %v5085_v14 }
 0x609   : > { %vm13076_vm13 = vcmp.le.f32.partialorder %v16362_v48, 0.7853982  ;;  %vm5088_vm14 = vcmp.lt.s32.totalorder %v5069_v51, 1  ;;  %vm5091_vm4 = vcmp.lt.s32.totalorder %v5069_v51, 4  ;;  %v5027_v23 = vor.u32 %v5026_v50, %v5025_v63 }
 0x60a   : > { %v16364_v31 = vsel %vm13076_vm13, 4294967295, %v16363_v31  ;;  %v4914_v58 = vsub.s32 0, %v13081_v8  ;;  %v5093_v30 = vsel %vm5091_vm4, %v5081_v54, 2102212464  ;;  %v5096_v10 = vsel %vm5088_vm14, %v5075_v21, %v5078_v56 }
 0x60b   : > { %16365 = vst [vmem:[#allocation26_spill] sm:$0xff] %v16364_v31  ;;  %vm5090_vm12 = vcmp.lt.s32.totalorder %v5069_v51, 3  ;;  %v5097_v48 = vsel %vm5091_vm4, %v5084_v18, 920167782  ;;  %v5100_v12 = vsel %vm5088_vm14, %v5078_v56, %v5081_v54  ;;  %v5101_v39 = vsel %vm5091_vm4, %v5087_v60, 1326507024 }
 0x60c   : > { %v8222_v33 = vmin.u32 %v4914_v58, %v13081_v8  ;;  %vm5089_vm2 = vcmp.lt.s32.totalorder %v5069_v51, 2  ;;  %v5092_v55 = vsel %vm5088_vm14, %v5072_v42, %v5075_v21  ;;  %v5098_v59 = vsel %vm5090_vm12, %v5081_v54, %v5097_v48 }
 0x60d   : > { %v5032_v5 = vand.u32 2147483647, %v5031_v61  ;;  %v5094_v24 = vsel %vm5090_vm12, %v5078_v56, %v5093_v30  ;;  %v5099_v19 = vsel %vm5089_vm2, %v5096_v10, %v5098_v59  ;;  %v5102_v9 = vsel %vm5090_vm12, %v5084_v18, %v5101_v39 }
 0x60e   : > { %v5034_v62 = vcvt.s32.f32 %v5027_v23  ;;  %v4916_v14 = vclz %v8222_v33  ;;  %v5103_v50 = vsel %vm5089_vm2, %v5100_v12, %v5102_v9  ;;  %v5170_v63 = vadd.s32 1, %v8233_v28 }
 0x60f   : > { %v13089_v47 = vmul.u32.u64.low %v13072_v20, %v5103_v50  ;;  %v13090_v22 = vmul.u32.u64.high %v13072_v20, %v5103_v50, %v13089_v47  ;;  %v13093_v60 = vmul.u32.u64.low %v13072_v20, %v5099_v19  ;;  %v13094_v58 = vmul.u32.u64.high %v13072_v20, %v5099_v19, %v13093_v60 }
 0x610   : > { %v8223_v54 = vadd.s32 4294967294, %v4916_v14  ;;  %v5095_v51 = vsel %vm5089_vm2, %v5092_v55, %v5094_v24  ;;  %v16366_v56 = vand.u32 2147483647, %v13004_v44  ;;  %vm5171_vm7 = vcmp.gt.s32.totalorder %v5170_v63, 0 }
 0x611   : > { %v13103_v18 = vsel %vm13076_vm13, %v12573_v32, %v13036_v43  ;;  %v13106_v47 = vmul.f32 %v5034_v62, %v5032_v5  ;;  %v5172_v28 = vsel %vm5171_vm7, %v5170_v63, 0  ;;  %v4904_v10 = vadd.s32 %v13017_v27, %v13025_v34 }
 0x612   : > { %v5167_v21 = vand.u32 8388607, %v16366_v56  ;;  %vm8224_vm11 = vcmp.lt.s32.totalorder %v8223_v54, 0  ;;  %v5174_v23 = vand.u32 31, %v5172_v28  ;;  %v5111_v12 = vmul.u32 %v13072_v20, %v5095_v51 }
 0x613   : > { %v4919_v48 = vsel %vm8224_vm11, 0, %v8223_v54  ;;  %vm5113_vm0 = vc.u32 %v13090_v22, %v13093_v60  ;;  %v5114_v33 = vadd.s32 1, %v13094_v58  ;;  %v5036_v59 = vxor.u32 2147483648, %v13106_v47 }
 0x614   : > { %v4920_v43 = vsub.s32 32, %v4919_v48  ;;  %v4924_v39 = vsub.s32 4294967266, %v4919_v48  ;;  %v5168_v55 = vor.u32 8388608, %v5167_v21  ;;  %v5173_v5 = vshrl.u32 %v5172_v28, 5 }
 0x615   : > { %v5175_v24 = vsub.s32 32, %v5174_v23  ;;  %v5177_v19 = vshll.u32 %v16130_v6, %v5174_v23  ;;  %v5115_v27 = vsel %vm5113_vm0, %v5114_v33, %v13094_v58  ;;  %v5180_v34 = vshll.u32 %v16335_v41, %v5174_v23 }
 0x616   : > { %v4925_v9 = vadd.s32 127, %v4924_v39  ;;  %v5183_v20 = vshll.u32 %v16336_v17, %v5174_v23  ;;  %v4922_v62 = vshrl.u32 %v4904_v10, %v4920_v43  ;;  %v5116_v14 = vadd.s32 %v5115_v27, %v5111_v12 }
 0x617   : > { %v5178_v50 = vshrl.u32 %v16335_v41, %v5175_v24  ;;  %v5181_v63 = vshrl.u32 %v16336_v17, %v5175_v24  ;;  %v5184_v51 = vshrl.u32 %v16337_v57, %v5175_v24  ;;  %v5186_v56 = vshll.u32 %v16337_v57, %v5174_v23 }
 0x618   : > { %v4926_v54 = vshll.u32 %v4925_v9, 23  ;;  %v5187_v21 = vshrl.u32 %v16134_v25, %v5175_v24  ;;  %v5117_v28 = vadd.s32 536870912, %v5116_v14  ;;  %v13126_v33 = vshll.u32 %v5168_v55, 8 }
 0x619   : > { %v5179_v39 = vor.u32 %v5178_v50, %v5177_v19  ;;  %v5182_v58 = vor.u32 %v5181_v63, %v5180_v34  ;;  %v4921_v30 = vshll.u32 %v13081_v8, %v4919_v48  ;;  %v5185_v10 = vor.u32 %v5184_v51, %v5183_v20 }
 0x61a   : > { %v5188_v12 = vor.u32 %v5187_v21, %v5186_v56  ;;  %v5371_v43 = vand.u32 2139095040, %v13050_v2  ;;  %vm4954_vm5 = vcmp.lt.s32.totalorder %v12786_v40, 0  ;;  %v4927_v9 = vor.u32 4788187, %v4926_v54 }
 0x61b   : > { %v13131_v27 = vshrl.u32 %v5117_v28, 30  ;;  %v5189_v61 = vshll.u32 %v16134_v25, %v5174_v23  ;;  %v5190_v42 = vshrl.u32 %v16135_v26, %v5175_v24  ;;  %v4923_v31 = vor.u32 %v4922_v62, %v4921_v30 }
 0x61c   : > { %v5176_v19 = vshrl.u32 %v16130_v6, %v5175_v24  ;;  %vm5192_vm9 = vcmp.lt.s32.totalorder %v5173_v5, 1  ;;  %vm5195_vm1 = vcmp.lt.s32.totalorder %v5173_v5, 4  ;;  %v16368_v20 = vand.u32 2147483647, %v12786_v40 }
 0x61d   : > { %16367 = vst [vmem:[#allocation17_spill] sm:$0xff] %v13131_v27  ;;  %v5119_v8 = vshll.u32 %v13131_v27, 30  ;;  %v5191_v48 = vor.u32 %v5190_v42, %v5189_v61  ;;  %v5197_v55 = vsel %vm5195_vm1, %v5185_v10, 2102212464  ;;  %v5200_v34 = vsel %vm5192_vm9, %v5179_v39, %v5182_v58 }
 0x61e   : > { %vm13139_vm14 = vcmp.le.f32.partialorder %v16368_v20, 0.7853982  ;;  %vm5193_vm4 = vcmp.lt.s32.totalorder %v5173_v5, 2  ;;  %vm5194_vm12 = vcmp.lt.s32.totalorder %v5173_v5, 3  ;;  %v5201_v23 = vsel %vm5195_vm1, %v5188_v12, 920167782 }
 0x61f   : > { %v5204_v63 = vsel %vm5192_vm9, %v5182_v58, %v5185_v10  ;;  %v4928_v30 = vand.u32 2147483647, %v4927_v9  ;;  %v13143_v62 = vsub.s32 %v5116_v14, %v5119_v8  ;;  %v5202_v24 = vsel %vm5194_vm12, %v5185_v10, %v5201_v23 }
 0x620   : > { %v5205_v54 = vsel %vm5195_vm1, %v5191_v48, 1326507024  ;;  %v5196_v51 = vsel %vm5192_vm9, %v5176_v19, %v5179_v39  ;;  %v5198_v56 = vsel %vm5194_vm12, %v5182_v58, %v5197_v55  ;;  %v5203_v42 = vsel %vm5193_vm4, %v5200_v34, %v5202_v24 }
 0x621   : > { %v5206_v61 = vsel %vm5194_vm12, %v5188_v12, %v5205_v54  ;;  %v5122_v21 = vsub.s32 0, %v13143_v62  ;;  %v13149_v20 = vmul.u32.u64.low %v13126_v33, %v5203_v42  ;;  %v13150_v27 = vmul.u32.u64.high %v13126_v33, %v5203_v42, %v13149_v20 }
 0x622   : > { %v5207_v28 = vsel %vm5193_vm4, %v5204_v63, %v5206_v61  ;;  %v4930_v32 = vcvt.s32.f32 %v4923_v31  ;;  %v5372_v10 = vshrl.u32 %v5371_v43, 23  ;;  %8809 = vcosq.f32 %v13103_v18 }
 0x623   : > { %v13154_v14 = vmul.u32.u64.low %v13126_v33, %v5207_v28  ;;  %v13155_v9 = vmul.u32.u64.high %v13126_v33, %v5207_v28, %v13154_v14  ;;  %v16371_v39 = vxor.u32 2147483648, %v13052_v37  ;;  %v8230_v12 = vmin.u32 %v5122_v21, %v13143_v62 }
 0x624   : > { %v5199_v19 = vsel %vm5193_vm4, %v5196_v51, %v5198_v56  ;;  %v5037_v31 = vsel %vm4954_vm5, %v5036_v59, %v13106_v47  ;;  %v16372_v8 = vsub.s32 4, %v12999_v29  ;;  %vm4850_vm2 = vcmp.lt.s32.totalorder %v12753_v3, 0 }
 0x625   : > { %v4829_v58 = vsel %vm4746_vm15, %v16371_v39, %v13052_v37  ;;  %v4931_v48 = vmul.f32 %v4930_v32, %v4928_v30  ;;  %v8241_v55 = vadd.s32 4294967169, %v5372_v10  ;;  %v5124_v34 = vclz %v8230_v12 }
 0x626   : > { %v5039_v43 = vsel %vm4954_vm5, %v16372_v8, %v12999_v29  ;;  %v5218_v37 = vadd.s32 1, %v13150_v27  ;;  %v16373_v5 = vand.u32 2147483647, %v13050_v2  ;;  %v13179_v63 = vadd.f32 %v12704_v45, %v12994_v1 }
 0x627   : > { %8811 = vsinq.f32 %v13103_v18  ;;  %v5215_v47 = vmul.u32 %v13126_v33, %v5199_v19  ;;  %vm5217_vm15 = vc.u32 %v13155_v9, %v13149_v20  ;;  %v5378_v29 = vadd.s32 1, %v8241_v55 }
 0x628   : > { %v5375_v23 = vand.u32 8388607, %v16373_v5  ;;  %v4832_v32 = vsel %vm12917_vm3, %v12577_v38, %v4829_v58  ;;  %v5041_v59 = vsel %vm13139_vm14, 0, %v5039_v43  ;;  %v8231_v30 = vadd.s32 4294967294, %v5124_v34 }
 0x629   : > { %v5219_v24 = vsel %vm5217_vm15, %v5218_v37, %v13150_v27  ;;  %v13194_v45 = vsel %vm13139_vm14, %v12786_v40, %v5037_v31  ;;  %v4932_v18 = vxor.u32 2147483648, %v4931_v48  ;;  %vm5379_vm7 = vcmp.gt.s32.totalorder %v5378_v29, 0 }
 0x62a   : > { %v5220_v33 = vadd.s32 %v5219_v24, %v5215_v47  ;;  %vm8232_vm11 = vcmp.lt.s32.totalorder %v8231_v30, 0  ;;  %v5376_v54 = vor.u32 8388608, %v5375_v23  ;;  %v5380_v51 = vsel %vm5379_vm7, %v5378_v29, 0 }
 0x62b   : > { %v5267_v13 = vand.u32 2139095040, %v13179_v63  ;;  %8813 = vcosq.f32 %v4832_v32  ;;  %v5127_v56 = vsel %vm8232_vm11, 0, %v8231_v30  ;;  %v5382_v61 = vand.u32 31, %v5380_v51 }
 0x62c   : > { %v5221_v42 = vadd.s32 536870912, %v5220_v33  ;;  %8815 = vsinq.f32 %v4832_v32  ;;  %v13197_v21 = vadd.s32 3, %v5041_v59  ;;  %v5128_v27 = vsub.s32 32, %v5127_v56  ;;  %v13204_v39 = vpop.eup %8809 }
 0x62d   : > { %v5132_v28 = vsub.s32 4294967266, %v5127_v56  ;;  %8817 = vcosq.f32 %v13194_v45  ;;  %v5112_v50 = vadd.s32 %v13093_v60, %v13090_v22  ;;  %v5383_v10 = vsub.s32 32, %v5382_v61 }
 0x62e   : > { %16374 = vst [vmem:[#allocation19_spill] sm:$0xff] %v13197_v21  ;;  %v13202_v14 = vshrl.u32 %v5221_v42, 30  ;;  %v13208_v58 = vsel %vm4850_vm2, %v4932_v18, %v4931_v48  ;;  %v13210_v19 = vshll.u32 %v5376_v54, 8  ;;  %v5268_v31 = vshrl.u32 %v5267_v13, 23 }
 0x62f   : > { %v5133_v12 = vadd.s32 127, %v5132_v28  ;;  %v5385_v43 = vshll.u32 %v16130_v6, %v5382_v61  ;;  %v5386_v55 = vshrl.u32 %v16335_v41, %v5383_v10  ;;  %v5388_v22 = vshll.u32 %v16335_v41, %v5382_v61 }
 0x630   : > { %v5223_v8 = vshll.u32 %v13202_v14, 30  ;;  %v5130_v60 = vshrl.u32 %v5112_v50, %v5128_v27  ;;  %v5389_v37 = vshrl.u32 %v16336_v17, %v5383_v10  ;;  %v5392_v5 = vshrl.u32 %v16337_v57, %v5383_v10 }
 0x631   : > { %v5134_v34 = vshll.u32 %v5133_v12, 23  ;;  %v13218_v48 = vpop.eup %8811  ;;  %v5391_v47 = vshll.u32 %v16336_v17, %v5382_v61  ;;  %v5394_v29 = vshll.u32 %v16337_v57, %v5382_v61  ;;  %v5395_v32 = vshrl.u32 %v16134_v25, %v5383_v10 }
 0x632   : > { %v13220_v23 = vsub.s32 %v5220_v33, %v5223_v8  ;;  %v5129_v59 = vshll.u32 %v13143_v62, %v5127_v56  ;;  %v5381_v24 = vshrl.u32 %v5380_v51, 5  ;;  %v5387_v18 = vor.u32 %v5386_v55, %v5385_v43 }
 0x633   : > { %v5135_v30 = vor.u32 4788187, %v5134_v34  ;;  %vm5162_vm3 = vcmp.lt.s32.totalorder %v13004_v44, 0  ;;  %v5390_v13 = vor.u32 %v5389_v37, %v5388_v22  ;;  %v5393_v42 = vor.u32 %v5392_v5, %v5391_v47 }
 0x634   : > { %v5226_v54 = vsub.s32 0, %v13220_v23  ;;  %v5396_v27 = vor.u32 %v5395_v32, %v5394_v29  ;;  %v5131_v33 = vor.u32 %v5130_v60, %v5129_v59  ;;  %v5397_v28 = vshll.u32 %v16134_v25, %v5382_v61 }
 0x635   : > { %v5398_v50 = vshrl.u32 %v16135_v26, %v5383_v10  ;;  %v8237_v12 = vadd.s32 4294967169, %v5268_v31  ;;  %v13230_v8 = vpop.eup %8813  ;;  %v16376_v62 = vand.u32 2147483647, %v12753_v3  ;;  %v5136_v56 = vand.u32 2147483647, %v5135_v30 }
 0x636   : > { %16375 = vst [vmem:[#allocation9_spill] sm:$0xff] %v13230_v8  ;;  %v8234_v43 = vmin.u32 %v5226_v54, %v13220_v23  ;;  %v5246_v55 = vsub.s32 4, %v13202_v14  ;;  %v5384_v22 = vshrl.u32 %v16130_v6, %v5383_v10  ;;  %v13241_v60 = vpop.eup %8815  ;;  %vm5400_vm5 = vcmp.lt.s32.totalorder %v5381_v24, 1 }
 0x637   : > { %vm13234_vm0 = vcmp.le.f32.partialorder %v16376_v62, 0.7853982  ;;  %16379 = vst [vmem:[#allocation25_spill] sm:$0xff] %v13241_v60  ;;  %v5399_v61 = vor.u32 %v5398_v50, %v5397_v28  ;;  %vm5402_vm9 = vcmp.lt.s32.totalorder %v5381_v24, 3  ;;  %vm5403_vm1 = vcmp.lt.s32.totalorder %v5381_v24, 4  ;;  %v13243_v31 = vpop.eup %8817 }
 0x638   : > { %16380 = vst [vmem:[#allocation18_spill] sm:$0xff] %v13243_v31  ;;  %v5228_v34 = vclz %v8234_v43  ;;  %v5405_v37 = vsel %vm5403_vm1, %v5393_v42, 2102212464  ;;  %v5408_v5 = vsel %vm5400_vm5, %v5387_v18, %v5390_v13  ;;  %v5409_v47 = vsel %vm5403_vm1, %v5396_v27, 920167782 }
 0x639   : > { %v5138_v29 = vcvt.s32.f32 %v5131_v33  ;;  %vm5401_vm14 = vcmp.lt.s32.totalorder %v5381_v24, 2  ;;  %v5410_v32 = vsel %vm5402_vm9, %v5393_v42, %v5409_v47  ;;  %v5412_v59 = vsel %vm5400_vm5, %v5390_v13, %v5393_v42 }
 0x63a   : > { %v8235_v30 = vadd.s32 4294967294, %v5228_v34  ;;  %v5404_v54 = vsel %vm5400_vm5, %v5384_v22, %v5387_v18  ;;  %v5411_v10 = vsel %vm5401_vm14, %v5408_v5, %v5410_v32  ;;  %v5413_v62 = vsel %vm5403_vm1, %v5399_v61, 1326507024 }
 0x63b   : > { %vm16061_vm4 = vcmp.lt.s32.totalorder %v12897_v53, 0  ;;  %v5406_v28 = vsel %vm5402_vm9, %v5390_v13, %v5405_v37  ;;  %v5414_v50 = vsel %vm5402_vm9, %v5396_v27, %v5413_v62  ;;  %v5139_v33 = vmul.f32 %v5138_v29, %v5136_v56 }
 0x63c   : > { %v13251_v43 = vmul.u32.u64.low %v13210_v19, %v5411_v10  ;;  %v13252_v40 = vmul.u32.u64.high %v13210_v19, %v5411_v10, %v13251_v43  ;;  %vm8236_vm12 = vcmp.lt.s32.totalorder %v8235_v30, 0  ;;  %v5415_v42 = vsel %vm5401_vm14, %v5412_v59, %v5414_v50 }
 0x63d   : > { %v16038_v18 = vand.u32 2147483647, %v13179_v63  ;;  %v5231_v22 = vsel %vm8236_vm12, 0, %v8235_v30  ;;  %v5247_v61 = vsel %vm5162_vm3, %v5246_v55, %v13202_v14  ;;  %8819 = vsinq.f32 %v13194_v45 }
 0x63e   : > { %v13261_v13 = vmul.u32.u64.low %v13210_v19, %v5415_v42  ;;  %v13262_v34 = vmul.u32.u64.high %v13210_v19, %v5415_v42, %v13261_v13  ;;  %v16381_v27 = vand.u32 2147483647, %v13004_v44  ;;  %v5236_v37 = vsub.s32 4294967266, %v5231_v22 }
 0x63f   : > { %v5407_v5 = vsel %vm5401_vm14, %v5404_v54, %v5406_v28  ;;  %v4936_v14 = vsel %vm13234_vm0, %v12753_v3, %v13208_v58  ;;  %v5426_v55 = vadd.s32 1, %v13252_v40  ;;  %v5274_v47 = vadd.s32 1, %v8237_v12  ;;  %v13288_v58 = vpop.permute.xlu1 %4135 }
 0x640   : > { %vm13267_vm15 = vcmp.le.f32.partialorder %v16381_v27, 0.7853982  ;;  %v13279_v45 = vadd.f32 %v12746_v15, %v12994_v1  ;;  %v5140_v29 = vxor.u32 2147483648, %v5139_v33  ;;  %v5237_v32 = vadd.s32 127, %v5236_v37  ;;  %v16434_v1 = vld [vmem:[#allocation8_spill] sm:$0xff] }
 0x641   : > { %v5249_v59 = vsel %vm13267_vm15, 0, %v5247_v61  ;;  %v5271_v24 = vand.u32 8388607, %v16038_v18  ;;  %v5232_v30 = vsub.s32 32, %v5231_v22  ;;  %v5423_v54 = vmul.u32 %v13210_v19, %v5407_v5 }
 0x642   : > { %vm5425_vm7 = vc.u32 %v13262_v34, %v13251_v43  ;;  %vm5275_vm11 = vcmp.gt.s32.totalorder %v5274_v47, 0  ;;  %8821 = vcosq.f32 %v4936_v14  ;;  %v16384_v15 = vand.u32 2147483647, %v12897_v53 }
 0x643   : > { %v5238_v12 = vshll.u32 %v5237_v32, 23  ;;  %v5427_v10 = vsel %vm5425_vm7, %v5426_v55, %v13252_v40  ;;  %v5276_v62 = vsel %vm5275_vm11, %v5274_v47, 0  ;;  %v5216_v19 = vadd.s32 %v13149_v20, %v13155_v9 }
 0x644   : > { %vm13292_vm5 = vcmp.le.f32.partialorder %v16384_v15, 0.7853982  ;;  %v5428_v28 = vadd.s32 %v5427_v10, %v5423_v54  ;;  %v5278_v50 = vand.u32 31, %v5276_v62  ;;  %v13301_v42 = vadd.f32 %v12852_v46, %v13288_v58 }
 0x645   : > { %8823 = vsinq.f32 %v4936_v14  ;;  %v5141_v61 = vsel %vm16061_vm4, %v5140_v29, %v5139_v33  ;;  %v13305_v13 = vadd.s32 3, %v5249_v59  ;;  %v5234_v37 = vshrl.u32 %v5216_v19, %v5232_v30 }
 0x646   : > { %v5429_v40 = vadd.s32 536870912, %v5428_v28  ;;  %v5272_v5 = vor.u32 8388608, %v5271_v24  ;;  %v5279_v55 = vsub.s32 32, %v5278_v50  ;;  %v5233_v20 = vshll.u32 %v13220_v23, %v5231_v22 }
 0x647   : > { %16387 = vst [vmem:[#allocation29_spill] sm:$0xff] %v13305_v13  ;;  %v5239_v9 = vor.u32 4788187, %v5238_v12  ;;  %v5281_v47 = vshll.u32 %v16130_v6, %v5278_v50  ;;  %v5475_v46 = vand.u32 2139095040, %v13279_v45  ;;  %v5284_v33 = vshll.u32 %v16335_v41, %v5278_v50  ;;  %v13316_v59 = vpop.eup %8819 }
 0x648   : > { %v13311_v32 = vshrl.u32 %v5429_v40, 30  ;;  %v5282_v14 = vshrl.u32 %v16335_v41, %v5279_v55  ;;  %v5285_v29 = vshrl.u32 %v16336_v17, %v5279_v55  ;;  %16388 = vst [vmem:[#allocation28_spill] sm:$0xff] %v13316_v59  ;;  %v5288_v24 = vshrl.u32 %v16337_v57, %v5279_v55 }
 0x649   : > { %v5290_v30 = vshll.u32 %v16337_v57, %v5278_v50  ;;  %v5291_v23 = vshrl.u32 %v16134_v25, %v5279_v55  ;;  %v5294_v22 = vshrl.u32 %v16135_v26, %v5279_v55  ;;  %v5235_v54 = vor.u32 %v5234_v37, %v5233_v20 }
 0x64a   : > { %v5431_v15 = vshll.u32 %v13311_v32, 30  ;;  %v5277_v12 = vshrl.u32 %v5276_v62, 5  ;;  %v5287_v10 = vshll.u32 %v16336_v17, %v5278_v50  ;;  %v5283_v19 = vor.u32 %v5282_v14, %v5281_v47 }
 0x64b   : > { %v5286_v40 = vor.u32 %v5285_v29, %v5284_v33  ;;  %v5292_v18 = vor.u32 %v5291_v23, %v5290_v30  ;;  %v5293_v27 = vshll.u32 %v16134_v25, %v5278_v50  ;;  %v5144_v13 = vsel %vm13292_vm5, %v12897_v53, %v5141_v61 }
 0x64c   : > { %v13328_v31 = vsub.s32 %v5428_v28, %v5431_v15  ;;  %v5289_v59 = vor.u32 %v5288_v24, %v5287_v10  ;;  %v13330_v21 = vshll.u32 %v5272_v5, 8  ;;  %v13332_v37 = vpop.eup %8821  ;;  %v5240_v20 = vand.u32 2147483647, %v5239_v9 }
 0x64d   : > { %v5295_v62 = vor.u32 %v5294_v22, %v5293_v27  ;;  %v5476_v8 = vshrl.u32 %v5475_v46, 23  ;;  %v16389_v47 = vand.u32 2147483647, %v13279_v45  ;;  %v5242_v33 = vcvt.s32.f32 %v5235_v54 }
 0x64e   : > { %v5434_v50 = vsub.s32 0, %v13328_v31  ;;  %vm5296_vm9 = vcmp.lt.s32.totalorder %v5277_v12, 1  ;;  %vm5299_vm1 = vcmp.lt.s32.totalorder %v5277_v12, 4  ;;  %v5280_v28 = vshrl.u32 %v16130_v6, %v5279_v55 }
 0x64f   : > { %v5479_v14 = vand.u32 8388607, %v16389_v47  ;;  %v13337_v29 = vpop.eup %8823  ;;  %vm5298_vm14 = vcmp.lt.s32.totalorder %v5277_v12, 3  ;;  %v5304_v61 = vsel %vm5296_vm9, %v5283_v19, %v5286_v40  ;;  %v5305_v5 = vsel %vm5299_vm1, %v5292_v18, 920167782 }
 0x650   : > { %vm5370_vm12 = vcmp.lt.s32.totalorder %v13050_v2, 0  ;;  %v8242_v27 = vmin.u32 %v5434_v50, %v13328_v31  ;;  %vm5297_vm7 = vcmp.lt.s32.totalorder %v5277_v12, 2  ;;  %v5301_v9 = vsel %vm5299_vm1, %v5289_v59, 2102212464 }
 0x651   : > { %v5306_v46 = vsel %vm5298_vm14, %v5289_v59, %v5305_v5  ;;  %v5243_v24 = vmul.f32 %v5242_v33, %v5240_v20  ;;  %v5308_v23 = vsel %vm5296_vm9, %v5286_v40, %v5289_v59  ;;  %v5309_v22 = vsel %vm5299_vm1, %v5295_v62, 1326507024 }
 0x652   : > { %v5307_v30 = vsel %vm5297_vm7, %v5304_v61, %v5306_v46  ;;  %v5436_v54 = vclz %v8242_v27  ;;  %v5310_v55 = vsel %vm5298_vm14, %v5292_v18, %v5309_v22  ;;  %v5300_v47 = vsel %vm5296_vm9, %v5280_v28, %v5283_v19 }
 0x653   : > { %v13348_v15 = vmul.u32.u64.low %v13330_v21, %v5307_v30  ;;  %v13349_v10 = vmul.u32.u64.high %v13330_v21, %v5307_v30, %v13348_v15  ;;  %v5302_v50 = vsel %vm5298_vm14, %v5286_v40, %v5301_v9  ;;  %v5311_v5 = vsel %vm5297_vm7, %v5308_v23, %v5310_v55 }
 0x654   : > { %v8245_v20 = vadd.s32 4294967169, %v5476_v8  ;;  %8825 = vcosq.f32 %v5144_v13  ;;  %v8243_v33 = vadd.s32 4294967294, %v5436_v54  ;;  %v5454_v18 = vsub.s32 4, %v13311_v32 }
 0x655   : > { %v13356_v59 = vmul.u32.u64.low %v13330_v21, %v5311_v5  ;;  %v13357_v62 = vmul.u32.u64.high %v13330_v21, %v5311_v5, %v13356_v59  ;;  %8827 = vsinq.f32 %v5144_v13  ;;  %v5579_v27 = vand.u32 2139095040, %v13301_v42 }
 0x656   : > { %v5482_v61 = vadd.s32 1, %v8245_v20  ;;  %v5424_v19 = vadd.s32 %v13251_v43, %v13262_v34  ;;  %vm8244_vm11 = vcmp.lt.s32.totalorder %v8243_v33, 0  ;;  %v5303_v40 = vsel %vm5297_vm7, %v5300_v47, %v5302_v50 }
 0x657   : > { %v5322_v8 = vadd.s32 1, %v13349_v10  ;;  %v5244_v28 = vxor.u32 2147483648, %v5243_v24  ;;  %v5439_v9 = vsel %vm8244_vm11, 0, %v8243_v33  ;;  %v5480_v46 = vor.u32 8388608, %v5479_v14 }
 0x658   : > { %vm5483_vm9 = vcmp.gt.s32.totalorder %v5482_v61, 0  ;;  %v5440_v30 = vsub.s32 32, %v5439_v9  ;;  %v5444_v23 = vsub.s32 4294967266, %v5439_v9  ;;  %v16042_v13 = vand.u32 2147483647, %v13301_v42 }
 0x659   : > { %v5580_v22 = vshrl.u32 %v5579_v27, 23  ;;  %v13369_v54 = vsel %vm5370_vm12, %v5454_v18, %v13311_v32  ;;  %v5319_v43 = vmul.u32 %v13330_v21, %v5303_v40  ;;  %vm5321_vm1 = vc.u32 %v13357_v62, %v13348_v15 }
 0x65a   : > { %v5484_v34 = vsel %vm5483_vm9, %v5482_v61, 0  ;;  %v5442_v12 = vshrl.u32 %v5424_v19, %v5440_v30  ;;  %v5445_v55 = vadd.s32 127, %v5444_v23  ;;  %v5323_v14 = vsel %vm5321_vm1, %v5322_v8, %v13349_v10 }
 0x65b   : > { %v13375_v47 = vshrl.u32 %v5484_v34, 5  ;;  %v5245_v50 = vsel %vm5162_vm3, %v5244_v28, %v5243_v24  ;;  %v5441_v5 = vshll.u32 %v13328_v31, %v5439_v9  ;;  %v5324_v20 = vadd.s32 %v5323_v14, %v5319_v43 }
 0x65c   : > { %v5486_v32 = vand.u32 31, %v5484_v34  ;;  %v5446_v33 = vshll.u32 %v5445_v55, 23  ;;  %v13380_v59 = vshll.u32 %v5480_v46, 8  ;;  %v8249_v21 = vadd.s32 4294967169, %v5580_v22 }
 0x65d   : > { %v13384_v18 = vand.u32 8388607, %v16042_v13  ;;  %v5443_v61 = vor.u32 %v5442_v12, %v5441_v5  ;;  %v5325_v27 = vadd.s32 536870912, %v5324_v20  ;;  %vm5504_vm14 = vcmp.lt.s32.totalorder %v13375_v47, 1 }
 0x65e   : > { %v5487_v10 = vsub.s32 32, %v5486_v32  ;;  %v13387_v19 = vpop.eup %8825  ;;  %v5447_v24 = vor.u32 4788187, %v5446_v33  ;;  %v5489_v31 = vshll.u32 %v16130_v6, %v5486_v32  ;;  %v5492_v40 = vshll.u32 %v16335_v41, %v5486_v32 }
 0x65f   : > { %16390 = vst [vmem:[#allocation31_spill] sm:$0xff] %v13387_v19  ;;  %v5495_v8 = vshll.u32 %v16336_v17, %v5486_v32  ;;  %v13392_v28 = vpop.eup %8827  ;;  %v13394_v9 = vshrl.u32 %v5325_v27, 30  ;;  %v5498_v23 = vshll.u32 %v16337_v57, %v5486_v32  ;;  %v5501_v12 = vshll.u32 %v16134_v25, %v5486_v32 }
 0x660   : > { %16391 = vst [vmem:[#allocation16_spill] sm:$0xff] %v13392_v28  ;;  %v5490_v46 = vshrl.u32 %v16335_v41, %v5487_v10  ;;  %v5493_v30 = vshrl.u32 %v16336_v17, %v5487_v10  ;;  %v5448_v22 = vand.u32 2147483647, %v5447_v24  ;;  %v5496_v43 = vshrl.u32 %v16337_v57, %v5487_v10 }
 0x661   : > { %16392 = vst [vmem:[#allocation34_spill] sm:$0xff] %v13394_v9  ;;  %v5499_v34 = vshrl.u32 %v16134_v25, %v5487_v10  ;;  %v16393_v55 = vand.u32 2147483647, %v13050_v2  ;;  %v5327_v5 = vshll.u32 %v13394_v9, 30  ;;  %v5502_v13 = vshrl.u32 %v16135_v26, %v5487_v10 }
 0x662   : > { %v5491_v33 = vor.u32 %v5490_v46, %v5489_v31  ;;  %v5494_v27 = vor.u32 %v5493_v30, %v5492_v40  ;;  %v5450_v38 = vcvt.s32.f32 %v5443_v61  ;;  %v5497_v24 = vor.u32 %v5496_v43, %v5495_v8 }
 0x663   : > { %vm13404_vm3 = vcmp.le.f32.partialorder %v16393_v55, 0.7853982  ;;  %v5500_v60 = vor.u32 %v5499_v34, %v5498_v23  ;;  %vm5505_vm7 = vcmp.lt.s32.totalorder %v13375_v47, 2  ;;  %v13411_v19 = vsub.s32 %v5324_v20, %v5327_v5 }
 0x664   : > { %v5488_v32 = vshrl.u32 %v16130_v6, %v5487_v10  ;;  %v5503_v28 = vor.u32 %v5502_v13, %v5501_v12  ;;  %vm5507_vm11 = vcmp.lt.s32.totalorder %v13375_v47, 4  ;;  %vm5506_vm9 = vcmp.lt.s32.totalorder %v13375_v47, 3 }
 0x665   : > { %v5509_v55 = vsel %vm5507_vm11, %v5497_v24, 2102212464  ;;  %v5512_v31 = vsel %vm5504_vm14, %v5491_v33, %v5494_v27  ;;  %v5513_v40 = vsel %vm5507_vm11, %v5500_v60, 920167782  ;;  %v5451_v46 = vmul.f32 %v5450_v38, %v5448_v22 }
 0x666   : > { %v5330_v61 = vsub.s32 0, %v13411_v19  ;;  %v5514_v8 = vsel %vm5506_vm9, %v5497_v24, %v5513_v40  ;;  %v5516_v20 = vsel %vm5504_vm14, %v5494_v27, %v5497_v24  ;;  %v5517_v13 = vsel %vm5507_vm11, %v5503_v28, 1326507024 }
 0x667   : > { %v5515_v10 = vsel %vm5505_vm7, %v5512_v31, %v5514_v8  ;;  %v5586_v30 = vadd.s32 1, %v8249_v21  ;;  %v13425_v23 = vadd.f32 %v12925_v36, %v13288_v58  ;;  %v5508_v38 = vsel %vm5504_vm14, %v5488_v32, %v5491_v33 }
 0x668   : > { %v8238_v43 = vmin.u32 %v5330_v61, %v13411_v19  ;;  %v5510_v22 = vsel %vm5506_vm9, %v5494_v27, %v5509_v55  ;;  %v5518_v34 = vsel %vm5506_vm9, %v5500_v60, %v5517_v13  ;;  %v5584_v21 = vor.u32 8388608, %v13384_v18 }
 0x669   : > { %v5519_v12 = vsel %vm5505_vm7, %v5516_v20, %v5518_v34  ;;  %v13433_v5 = vmul.u32.u64.low %v13380_v59, %v5515_v10  ;;  %v13434_v24 = vmul.u32.u64.high %v13380_v59, %v5515_v10, %v13433_v5  ;;  %v5452_v28 = vxor.u32 2147483648, %v5451_v46 }
 0x66a   : > { %v5332_v36 = vclz %v8238_v43  ;;  %v13439_v31 = vmul.u32.u64.low %v13380_v59, %v5519_v12  ;;  %v13440_v40 = vmul.u32.u64.high %v13380_v59, %v5519_v12, %v13439_v31  ;;  %v13445_v60 = vsel %vm13267_vm15, %v13004_v44, %v5245_v50 }
 0x66b   : > { %v5511_v27 = vsel %vm5505_vm7, %v5508_v38, %v5510_v22  ;;  %vm5587_vm1 = vcmp.gt.s32.totalorder %v5586_v30, 0  ;;  %v5320_v18 = vadd.s32 %v13348_v15, %v13357_v62  ;;  %v13456_v61 = vadd.f32 %v13027_v49, %v13288_v58 }
 0x66c   : > { %v8239_v32 = vadd.s32 4294967294, %v5332_v36  ;;  %v5588_v55 = vsel %vm5587_vm1, %v5586_v30, 0  ;;  %v5530_v56 = vadd.s32 1, %v13434_v24  ;;  %v13459_v8 = vshll.u32 %v5584_v21, 8 }
 0x66d   : > { %v5590_v50 = vand.u32 31, %v5588_v55  ;;  %v16052_v20 = vand.u32 2147483647, %v13425_v23  ;;  %v13464_v47 = vsel %vm5370_vm12, %v5452_v28, %v5451_v46  ;;  %v5527_v15 = vmul.u32 %v13380_v59, %v5511_v27 }
 0x66e   : > { %vm8240_vm15 = vcmp.lt.s32.totalorder %v8239_v32, 0  ;;  %vm5529_vm14 = vc.u32 %v13440_v40, %v13433_v5  ;;  %v5787_v13 = vand.u32 2139095040, %v13425_v23  ;;  %v5589_v22 = vshrl.u32 %v5588_v55, 5 }
 0x66f   : > { %v5335_v62 = vsel %vm8240_vm15, 0, %v8239_v32  ;;  %v5531_v49 = vsel %vm5529_vm14, %v5530_v56, %v13434_v24  ;;  %v5591_v10 = vsub.s32 32, %v5590_v50  ;;  %v5593_v46 = vshll.u32 %v16130_v6, %v5590_v50 }
 0x670   : > { %v5336_v30 = vsub.s32 32, %v5335_v62  ;;  %v5340_v43 = vsub.s32 4294967266, %v5335_v62  ;;  %v5532_v38 = vadd.s32 %v5531_v49, %v5527_v15  ;;  %v5337_v34 = vshll.u32 %v13411_v19, %v5335_v62 }
 0x671   : > { %v5594_v12 = vshrl.u32 %v16335_v41, %v5591_v10  ;;  %v5597_v59 = vshrl.u32 %v16336_v17, %v5591_v10  ;;  %v5596_v24 = vshll.u32 %v16335_v41, %v5590_v50  ;;  %v5599_v27 = vshll.u32 %v16336_v17, %v5590_v50 }
 0x672   : > { %v5338_v21 = vshrl.u32 %v5320_v18, %v5336_v30  ;;  %v5341_v28 = vadd.s32 127, %v5340_v43  ;;  %v5533_v36 = vadd.s32 536870912, %v5532_v38  ;;  %v5600_v32 = vshrl.u32 %v16337_v57, %v5591_v10 }
 0x673   : > { %v5595_v31 = vor.u32 %v5594_v12, %v5593_v46  ;;  %v5602_v55 = vshll.u32 %v16337_v57, %v5590_v50  ;;  %v5603_v62 = vshrl.u32 %v16134_v25, %v5591_v10  ;;  %v5598_v49 = vor.u32 %v5597_v59, %v5596_v24 }
 0x674   : > { %v5339_v56 = vor.u32 %v5338_v21, %v5337_v34  ;;  %v5342_v19 = vshll.u32 %v5341_v28, 23  ;;  %v13479_v15 = vshrl.u32 %v5533_v36, 30  ;;  %v5601_v33 = vor.u32 %v5600_v32, %v5599_v27 }
 0x675   : > { %v5605_v18 = vshll.u32 %v16134_v25, %v5590_v50  ;;  %v5606_v30 = vshrl.u32 %v16135_v26, %v5591_v10  ;;  %v5604_v12 = vor.u32 %v5603_v62, %v5602_v55  ;;  %v5791_v44 = vand.u32 8388607, %v16052_v20 }
 0x676   : > { %16396 = vst [vmem:[#allocation15_spill] sm:$0xff] %v13479_v15  ;;  %v5343_v43 = vor.u32 4788187, %v5342_v19  ;;  %v5535_v46 = vshll.u32 %v13479_v15, 30  ;;  %v5592_v34 = vshrl.u32 %v16130_v6, %v5591_v10  ;;  %vm5608_vm12 = vcmp.lt.s32.totalorder %v5589_v22, 1 }
 0x677   : > { %v5607_v21 = vor.u32 %v5606_v30, %v5605_v18  ;;  %v5788_v28 = vshrl.u32 %v5787_v13, 23  ;;  %v5346_v9 = vcvt.s32.f32 %v5339_v56  ;;  %vm5611_vm7 = vcmp.lt.s32.totalorder %v5589_v22, 4 }
 0x678   : > { %v5344_v36 = vand.u32 2147483647, %v5343_v43  ;;  %v13488_v59 = vsub.s32 %v5532_v38, %v5535_v46  ;;  %vm5610_vm11 = vcmp.lt.s32.totalorder %v5589_v22, 3  ;;  %v5613_v50 = vsel %vm5611_vm7, %v5601_v33, 2102212464 }
 0x679   : > { %v5616_v24 = vsel %vm5608_vm12, %v5595_v31, %v5598_v49  ;;  %v5617_v27 = vsel %vm5611_vm7, %v5604_v12, 920167782  ;;  %vm5609_vm9 = vcmp.lt.s32.totalorder %v5589_v22, 2  ;;  %v5620_v19 = vsel %vm5608_vm12, %v5598_v49, %v5601_v33 }
 0x67a   : > { %v5538_v32 = vsub.s32 0, %v13488_v59  ;;  %v5618_v55 = vsel %vm5610_vm11, %v5601_v33, %v5617_v27  ;;  %vm16058_vm1 = vcmp.lt.s32.totalorder %v13179_v63, 0  ;;  %v5612_v10 = vsel %vm5608_vm12, %v5592_v34, %v5595_v31 }
 0x67b   : > { %v5619_v13 = vsel %vm5609_vm9, %v5616_v24, %v5618_v55  ;;  %v5621_v62 = vsel %vm5611_vm7, %v5607_v21, 1326507024  ;;  %v8257_v56 = vadd.s32 4294967169, %v5788_v28  ;;  %v5347_v38 = vmul.f32 %v5346_v9, %v5344_v36 }
 0x67c   : > { %v8246_v18 = vmin.u32 %v5538_v32, %v13488_v59  ;;  %v5614_v30 = vsel %vm5610_vm11, %v5598_v49, %v5613_v50  ;;  %v5622_v43 = vsel %vm5610_vm11, %v5604_v12, %v5621_v62  ;;  %v13507_v31 = vsel %vm13404_vm3, %v13050_v2, %v13464_v47 }
 0x67d   : > { %v5623_v46 = vsel %vm5609_vm9, %v5620_v19, %v5622_v43  ;;  %v13499_v20 = vmul.u32.u64.low %v13459_v8, %v5619_v13  ;;  %v13500_v27 = vmul.u32.u64.high %v13459_v8, %v5619_v13, %v13499_v20  ;;  %v5794_v33 = vadd.s32 1, %v8257_v56  ;;  %v16452_v19 = vld [vmem:[#allocation15_spill] sm:$0xff] }
 0x67e   : > { %v5540_v9 = vclz %v8246_v18  ;;  %v13510_v34 = vmul.u32.u64.low %v13459_v8, %v5623_v46  ;;  %v13511_v49 = vmul.u32.u64.high %v13459_v8, %v5623_v46, %v13510_v34  ;;  %8829 = vcosq.f32 %v13445_v60 }
 0x67f   : > { %v5615_v12 = vsel %vm5609_vm9, %v5612_v10, %v5614_v30  ;;  %v5792_v21 = vor.u32 8388608, %v5791_v44  ;;  %vm5795_vm15 = vcmp.gt.s32.totalorder %v5794_v33, 0  ;;  %8831 = vsinq.f32 %v13445_v60 }
 0x680   : > { %v5348_v28 = vxor.u32 2147483648, %v5347_v38  ;;  %v8247_v36 = vadd.s32 4294967294, %v5540_v9  ;;  %v5796_v50 = vsel %vm5795_vm15, %v5794_v33, 0  ;;  %8833 = vcosq.f32 %v13507_v31 }
 0x681   : > { %v5634_v47 = vadd.s32 1, %v13500_v27  ;;  %v5798_v24 = vand.u32 31, %v5796_v50  ;;  %v16397_v55 = vand.u32 2147483647, %v13179_v63  ;;  %v5528_v44 = vadd.s32 %v13433_v5, %v13440_v40 }
 0x682   : > { %vm8248_vm12 = vcmp.lt.s32.totalorder %v8247_v36, 0  ;;  %v5631_v60 = vmul.u32 %v13459_v8, %v5615_v12  ;;  %vm5633_vm7 = vc.u32 %v13511_v49, %v13499_v20  ;;  %v13531_v62 = vshll.u32 %v5792_v21, 8 }
 0x683   : > { %vm13521_vm14 = vcmp.le.f32.partialorder %v16397_v55, 0.7853982  ;;  %v5543_v22 = vsel %vm8248_vm12, 0, %v8247_v36  ;;  %v5635_v10 = vsel %vm5633_vm7, %v5634_v47, %v13500_v27  ;;  %v5799_v13 = vsub.s32 32, %v5798_v24 }
 0x684   : > { %v5349_v56 = vsel %vm16058_vm1, %v5348_v28, %v5347_v38  ;;  %v5544_v18 = vsub.s32 32, %v5543_v22  ;;  %v5548_v30 = vsub.s32 4294967266, %v5543_v22  ;;  %v5636_v43 = vadd.s32 %v5635_v10, %v5631_v60 }
 0x685   : > { %v5545_v5 = vshll.u32 %v13488_v59, %v5543_v22  ;;  %v13536_v40 = vshrl.u32 %v5796_v50, 5  ;;  %v5802_v8 = vshrl.u32 %v16335_v41, %v5799_v13  ;;  %v5683_v46 = vand.u32 2139095040, %v13456_v61 }
 0x686   : > { %v5546_v33 = vshrl.u32 %v5528_v44, %v5544_v18  ;;  %v5549_v9 = vadd.s32 127, %v5548_v30  ;;  %v5637_v27 = vadd.s32 536870912, %v5636_v43  ;;  %v5805_v34 = vshrl.u32 %v16336_v17, %v5799_v13 }
 0x687   : > { %v5801_v12 = vshll.u32 %v16130_v6, %v5798_v24  ;;  %v5804_v38 = vshll.u32 %v16335_v41, %v5798_v24  ;;  %v5807_v21 = vshll.u32 %v16336_v17, %v5798_v24  ;;  %v5808_v28 = vshrl.u32 %v16337_v57, %v5799_v13 }
 0x688   : > { %v5547_v59 = vor.u32 %v5546_v33, %v5545_v5  ;;  %v5550_v36 = vshll.u32 %v5549_v9, 23  ;;  %v13545_v50 = vshrl.u32 %v5637_v27, 30  ;;  %v5811_v47 = vshrl.u32 %v16134_v25, %v5799_v13  ;;  %v13548_v55 = vpop.eup %8829 }
 0x689   : > { %16400 = vst [vmem:[#allocation33_spill] sm:$0xff] %v13548_v55  ;;  %vm16060_vm11 = vcmp.lt.s32.totalorder %v13279_v45, 0  ;;  %v5803_v44 = vor.u32 %v5802_v8, %v5801_v12  ;;  %v5810_v60 = vshll.u32 %v16337_v57, %v5798_v24  ;;  %v5813_v22 = vshll.u32 %v16134_v25, %v5798_v24  ;;  %v13554_v18 = vpop.eup %8831 }
 0x68a   : > { %v5814_v10 = vshrl.u32 %v16135_v26, %v5799_v13  ;;  %16401 = vst [vmem:[#allocation36_spill] sm:$0xff] %v13554_v18  ;;  %v5551_v30 = vor.u32 4788187, %v5550_v36  ;;  %v5639_v5 = vshll.u32 %v13545_v50, 30  ;;  %v5806_v33 = vor.u32 %v5805_v34, %v5804_v38  ;;  %v13557_v27 = vpop.eup %8833 }
 0x68b   : > { %v5809_v9 = vor.u32 %v5808_v28, %v5807_v21  ;;  %16402 = vst [vmem:[#allocation30_spill] sm:$0xff] %v13557_v27  ;;  %v5352_v32 = vsel %vm13521_vm14, %v13179_v63, %v5349_v56  ;;  %v5812_v8 = vor.u32 %v5811_v47, %v5810_v60  ;;  %v5684_v2 = vshrl.u32 %v5683_v46, 23 }
 0x68c   : > { %v5815_v12 = vor.u32 %v5814_v10, %v5813_v22  ;;  %v16403_v24 = vand.u32 2147483647, %v13279_v45  ;;  %v16404_v55 = vmov 0  ;;  %v5552_v36 = vand.u32 2147483647, %v5551_v30 }
 0x68d   : > { %v5554_v18 = vcvt.s32.f32 %v5547_v59  ;;  %v13568_v15 = vsub.s32 %v5636_v43, %v5639_v5  ;;  %v5800_v34 = vshrl.u32 %v16130_v6, %v5799_v13  ;;  %vm5816_vm15 = vcmp.lt.s32.totalorder %v13536_v40, 1 }
 0x68e   : > { %vm13564_vm9 = vcmp.le.f32.partialorder %v16403_v24, 0.7853982  ;;  %vm5817_vm12 = vcmp.lt.s32.totalorder %v13536_v40, 2  ;;  %vm5818_vm7 = vcmp.lt.s32.totalorder %v13536_v40, 3  ;;  %vm5819_vm1 = vcmp.lt.s32.totalorder %v13536_v40, 4 }
 0x68f   : > { %v16405_v55 = vsel %vm13564_vm9, 4294967295, %v16404_v55  ;;  %v5555_v56 = vmul.f32 %v5554_v18, %v5552_v36  ;;  %v5642_v46 = vsub.s32 0, %v13568_v15  ;;  %v5821_v38 = vsel %vm5819_vm1, %v5809_v9, 2102212464 }
 0x690   : > { %16406 = vst [vmem:[#allocation35_spill] sm:$0xff] %v16405_v55  ;;  %v5824_v21 = vsel %vm5816_vm15, %v5803_v44, %v5806_v33  ;;  %v5820_v28 = vsel %vm5816_vm15, %v5800_v34, %v5803_v44  ;;  %v5825_v47 = vsel %vm5819_vm1, %v5812_v8, 920167782  ;;  %v5828_v59 = vsel %vm5816_vm15, %v5806_v33, %v5809_v9 }
 0x691   : > { %v5829_v43 = vsel %vm5819_vm1, %v5815_v12, 1326507024  ;;  %v5556_v60 = vxor.u32 2147483648, %v5555_v56  ;;  %v8250_v13 = vmin.u32 %v5642_v46, %v13568_v15  ;;  %v5826_v22 = vsel %vm5818_vm7, %v5809_v9, %v5825_v47 }
 0x692   : > { %v5830_v10 = vsel %vm5818_vm7, %v5812_v8, %v5829_v43  ;;  %v5822_v30 = vsel %vm5818_vm7, %v5806_v33, %v5821_v38  ;;  %v5827_v5 = vsel %vm5817_vm12, %v5824_v21, %v5826_v22  ;;  %v8253_v24 = vadd.s32 4294967169, %v5684_v2 }
 0x693   : > { %v5831_v18 = vsel %vm5817_vm12, %v5828_v59, %v5830_v10  ;;  %v5557_v36 = vsel %vm16060_vm11, %v5556_v60, %v5555_v56  ;;  %v5644_v44 = vclz %v8250_v13  ;;  %8835 = vsinq.f32 %v13507_v31 }
 0x694   : > { %v13584_v34 = vmul.u32.u64.low %v13531_v62, %v5831_v18  ;;  %v13585_v12 = vmul.u32.u64.high %v13531_v62, %v5831_v18, %v13584_v34  ;;  %v16407_v33 = vsel %vm13404_vm3, 0, %v13369_v54  ;;  %8837 = vcosq.f32 %v5352_v32 }
 0x695   : > { %v13592_v9 = vadd.s32 3, %v16407_v33  ;;  %v13595_v8 = vmul.u32.u64.low %v13531_v62, %v5827_v5  ;;  %v13596_v46 = vmul.u32.u64.high %v13531_v62, %v5827_v5, %v13595_v8  ;;  %v8251_v2 = vadd.s32 4294967294, %v5644_v44 }
 0x696   : > { %v5662_v56 = vsub.s32 4, %v13545_v50  ;;  %v5690_v38 = vadd.s32 1, %v8253_v24  ;;  %8839 = vsinq.f32 %v5352_v32  ;;  %v13603_v31 = vsel %vm13564_vm9, %v13279_v45, %v5557_v36 }
 0x697   : > { %16408 = vst [vmem:[#allocation21_spill] sm:$0xff] %v13592_v9  ;;  %vm5578_vm3 = vcmp.lt.s32.totalorder %v13301_v42, 0  ;;  %v5823_v54 = vsel %vm5817_vm12, %v5820_v28, %v5822_v30  ;;  %vm8252_vm1 = vcmp.lt.s32.totalorder %v8251_v2, 0  ;;  %vm5841_vm15 = vc.u32 %v13585_v12, %v13595_v8 }
 0x698   : > { %v16409_v14 = vand.u32 2147483647, %v13456_v61  ;;  %vm5691_vm7 = vcmp.gt.s32.totalorder %v5690_v38, 0  ;;  %v5632_v32 = vadd.s32 %v13499_v20, %v13511_v49  ;;  %v5647_v47 = vsel %vm8252_vm1, 0, %v8251_v2 }
 0x699   : > { %v5842_v59 = vadd.s32 1, %v13596_v46  ;;  %v5692_v43 = vsel %vm5691_vm7, %v5690_v38, 0  ;;  %v5648_v60 = vsub.s32 32, %v5647_v47  ;;  %v5652_v13 = vsub.s32 4294967266, %v5647_v47 }
 0x69a   : > { %v5687_v21 = vand.u32 8388607, %v16409_v14  ;;  %v13618_v40 = vsel %vm5578_vm3, %v5662_v56, %v13545_v50  ;;  %v5839_v28 = vmul.u32 %v13531_v62, %v5823_v54  ;;  %8841 = vcosq.f32 %v13603_v31 }
 0x69b   : > { %v5843_v22 = vsel %vm5841_vm15, %v5842_v59, %v13596_v46  ;;  %v5694_v10 = vand.u32 31, %v5692_v43  ;;  %v13625_v20 = vadd.f32 %v13086_v7, %v13288_v58  ;;  %v5650_v49 = vshrl.u32 %v5632_v32, %v5648_v60 }
 0x69c   : > { %v5653_v30 = vadd.s32 127, %v5652_v13  ;;  %v5844_v5 = vadd.s32 %v5843_v22, %v5839_v28  ;;  %v5688_v18 = vor.u32 8388608, %v5687_v21  ;;  %v5649_v24 = vshll.u32 %v13568_v15, %v5647_v47  ;;  %v16459_v13 = vld [vmem:[#allocation33_spill] sm:$0xff] }
 0x69d   : > { %v5693_v36 = vshrl.u32 %v5692_v43, 5  ;;  %v5695_v50 = vsub.s32 32, %v5694_v10  ;;  %v5697_v33 = vshll.u32 %v16130_v6, %v5694_v10  ;;  %v5703_v46 = vshll.u32 %v16336_v17, %v5694_v10  ;;  %v13631_v2 = vpop.eup %8835 }
 0x69e   : > { %v5654_v62 = vshll.u32 %v5653_v30, 23  ;;  %v5845_v34 = vadd.s32 536870912, %v5844_v5  ;;  %16410 = vst [vmem:[#allocation37_spill] sm:$0xff] %v13631_v2  ;;  %v5651_v7 = vor.u32 %v5650_v49, %v5649_v24  ;;  %v13636_v15 = vpop.eup %8837  ;;  %vm5786_vm12 = vcmp.lt.s32.totalorder %v13425_v23, 0 }
 0x69f   : > { %v5698_v58 = vshrl.u32 %v16335_v41, %v5695_v50  ;;  %v5701_v56 = vshrl.u32 %v16336_v17, %v5695_v50  ;;  %v5704_v38 = vshrl.u32 %v16337_v57, %v5695_v50  ;;  %v5700_v21 = vshll.u32 %v16335_v41, %v5694_v10 }
 0x6a0   : > { %v5655_v54 = vor.u32 4788187, %v5654_v62  ;;  %v5846_v14 = vshrl.u32 %v5845_v34, 30  ;;  %v5707_v32 = vshrl.u32 %v16134_v25, %v5695_v50  ;;  %v13641_v47 = vpop.eup %8839  ;;  %v5706_v43 = vshll.u32 %v16337_v57, %v5694_v10 }
 0x6a1   : > { %v5705_v59 = vor.u32 %v5704_v38, %v5703_v46  ;;  %v13644_v60 = vshll.u32 %v5688_v18, 8  ;;  %v16411_v28 = vand.u32 2147483647, %v13301_v42  ;;  %v5699_v24 = vor.u32 %v5698_v58, %v5697_v33 }
 0x6a2   : > { %v5656_v49 = vand.u32 2147483647, %v5655_v54  ;;  %v5847_v30 = vshll.u32 %v5846_v14, 30  ;;  %v5702_v62 = vor.u32 %v5701_v56, %v5700_v21  ;;  %v5658_v34 = vcvt.s32.f32 %v5651_v7 }
 0x6a3   : > { %vm13649_vm1 = vcmp.le.f32.partialorder %v16411_v28, 0.7853982  ;;  %v5708_v44 = vor.u32 %v5707_v32, %v5706_v43  ;;  %v5709_v46 = vshll.u32 %v16134_v25, %v5694_v10  ;;  %v5710_v38 = vshrl.u32 %v16135_v26, %v5695_v50 }
 0x6a4   : > { %v16414_v18 = vand.u32 2147483647, %v13425_v23  ;;  %v13661_v28 = vsub.s32 %v5844_v5, %v5847_v30  ;;  %v5696_v27 = vshrl.u32 %v16130_v6, %v5695_v50  ;;  %vm5712_vm7 = vcmp.lt.s32.totalorder %v5693_v36, 1  ;;  %v13664_v33 = vpop.eup %8841 }
 0x6a5   : > { %vm5715_vm11 = vcmp.lt.s32.totalorder %v5693_v36, 4  ;;  %16417 = vst [vmem:[#allocation38_spill] sm:$0xff] %v13664_v33  ;;  %v5659_v7 = vmul.f32 %v5658_v34, %v5656_v49  ;;  %v5870_v58 = vsub.s32 4, %v5846_v14  ;;  %v5711_v56 = vor.u32 %v5710_v38, %v5709_v46 }
 0x6a6   : > { %vm13657_vm15 = vcmp.le.f32.partialorder %v16414_v18, 0.7853982  ;;  %v5717_v10 = vsel %vm5715_vm11, %v5705_v59, 2102212464  ;;  %v5850_v54 = vsub.s32 0, %v13661_v28  ;;  %vm5714_vm4 = vcmp.lt.s32.totalorder %v5693_v36, 3 }
 0x6a7   : > { %v5716_v21 = vsel %vm5712_vm7, %v5696_v27, %v5699_v24  ;;  %v5720_v32 = vsel %vm5712_vm7, %v5699_v24, %v5702_v62  ;;  %v5718_v43 = vsel %vm5714_vm4, %v5702_v62, %v5717_v10  ;;  %v5721_v18 = vsel %vm5715_vm11, %v5708_v44, 920167782 }
 0x6a8   : > { %v5724_v2 = vsel %vm5712_vm7, %v5702_v62, %v5705_v59  ;;  %v5725_v5 = vsel %vm5715_vm11, %v5711_v56, 1326507024  ;;  %v8258_v30 = vmin.u32 %v5850_v54, %v13661_v28  ;;  %vm5713_vm10 = vcmp.lt.s32.totalorder %v5693_v36, 2 }
 0x6a9   : > { %v5722_v50 = vsel %vm5714_vm4, %v5705_v59, %v5721_v18  ;;  %v5726_v9 = vsel %vm5714_vm4, %v5708_v44, %v5725_v5  ;;  %v5660_v55 = vxor.u32 2147483648, %v5659_v7  ;;  %v13670_v49 = vsel %vm5786_vm12, %v5870_v58, %v5846_v14 }
 0x6aa   : > { %v5723_v34 = vsel %vm5713_vm10, %v5720_v32, %v5722_v50  ;;  %v5727_v46 = vsel %vm5713_vm10, %v5724_v2, %v5726_v9  ;;  %v5852_v38 = vclz %v8258_v30  ;;  %v5719_v33 = vsel %vm5713_vm10, %v5716_v21, %v5718_v43 }
 0x6ab   : > { %v13673_v27 = vmul.u32.u64.low %v13644_v60, %v5727_v46  ;;  %v13674_v24 = vmul.u32.u64.high %v13644_v60, %v5727_v46, %v13673_v27  ;;  %8843 = vsinq.f32 %v13603_v31  ;;  %v5665_v36 = vsel %vm13649_vm1, 0, %v13618_v40 }
 0x6ac   : > { %v13681_v44 = vmul.u32.u64.low %v13644_v60, %v5723_v34  ;;  %v13682_v59 = vmul.u32.u64.high %v13644_v60, %v5723_v34, %v13681_v44  ;;  %v5840_v14 = vadd.s32 %v13595_v8, %v13585_v12  ;;  %v8259_v9 = vadd.s32 4294967294, %v5852_v38 }
 0x6ad   : > { %v5891_v2 = vand.u32 2139095040, %v13625_v20  ;;  %v16418_v62 = vsub.s32 4, %v12716_v4  ;;  %v5661_v58 = vsel %vm5578_vm3, %v5660_v55, %v5659_v7  ;;  %v5735_v10 = vmul.u32 %v13644_v60, %v5719_v33 }
 0x6ae   : > { %vm8260_vm10 = vcmp.lt.s32.totalorder %v8259_v9, 0  ;;  %vm5737_vm4 = vc.u32 %v13674_v24, %v13681_v44  ;;  %v16419_v54 = vand.u32 2147483647, %v13625_v20  ;;  %v5738_v32 = vadd.s32 1, %v13682_v59 }
 0x6af   : > { %v4519_v31 = vsel %vm4434_vm6, %v16418_v62, %v12716_v4  ;;  %v5892_v8 = vshrl.u32 %v5891_v2, 23  ;;  %v5855_v4 = vsel %vm8260_vm10, 0, %v8259_v9  ;;  %v4934_v7 = vsub.s32 4, %v13061_v52 }
 0x6b0   : > { %v4521_v12 = vsel %vm12908_vm8, 0, %v4519_v31  ;;  %v5895_v21 = vand.u32 8388607, %v16419_v54  ;;  %v5856_v43 = vsub.s32 32, %v5855_v4  ;;  %v5860_v18 = vsub.s32 4294967266, %v5855_v4 }
 0x6b1   : > { %v4525_v55 = vadd.s32 3, %v4521_v12  ;;  %v8261_v5 = vadd.s32 4294967169, %v5892_v8  ;;  %v4529_v60 = vxor.u32 2147483648, %v13065_v0  ;;  %v5857_v11 = vshll.u32 %v13661_v28, %v5855_v4 }
 0x6b2   : > { %v5739_v33 = vsel %vm5737_vm4, %v5738_v32, %v13682_v59  ;;  %v4532_v50 = vxor.u32 2147483648, %v13059_v35  ;;  %v5858_v34 = vshrl.u32 %v5840_v14, %v5856_v43  ;;  %v5861_v46 = vadd.s32 127, %v5860_v18 }
 0x6b3   : > { %v4526_v30 = vand.u32 3, %v4525_v55  ;;  %v5740_v38 = vadd.s32 %v5739_v33, %v5735_v10  ;;  %v5898_v27 = vadd.s32 1, %v8261_v5  ;;  %v5896_v9 = vor.u32 8388608, %v5895_v21 }
 0x6b4   : > { %v4935_v2 = vsel %vm4850_vm2, %v4934_v7, %v13061_v52  ;;  %v5859_v62 = vor.u32 %v5858_v34, %v5857_v11  ;;  %v5862_v31 = vshll.u32 %v5861_v46, 23  ;;  %v13717_v59 = vsel %vm13649_vm1, %v13301_v42, %v5661_v58 }
 0x6b5   : > { %vm4528_vm6 = vcmp.eq.s32.totalorder %v4526_v30, 0  ;;  %vm4531_vm8 = vcmp.eq.s32.totalorder %v4526_v30, 2  ;;  %v5741_v12 = vadd.s32 536870912, %v5740_v38  ;;  %vm5899_vm11 = vcmp.gt.s32.totalorder %v5898_v27, 0  ;;  %v13712_v28 = vpop.eup %8843 }
 0x6b6   : > { %v5900_v14 = vsel %vm5899_vm11, %v5898_v27, 0  ;;  %v4530_v10 = vsel %vm4528_vm6, %v13059_v35, %v4529_v60  ;;  %v4533_v8 = vsel %vm4531_vm8, %v4532_v50, %v13065_v0  ;;  %v5863_v54 = vor.u32 4788187, %v5862_v31 }
 0x6b7   : > { %v13722_v21 = vadd.s32 %v13681_v44, %v13674_v24  ;;  %v13724_v52 = vshrl.u32 %v5741_v12, 30  ;;  %v4937_v4 = vsel %vm13234_vm0, 0, %v4935_v2  ;;  %v5866_v32 = vcvt.s32.f32 %v5859_v62 }
 0x6b8   : > { %v5902_v55 = vand.u32 31, %v5900_v14  ;;  %v13728_v7 = vshll.u32 %v5896_v9, 8  ;;  %vm4527_vm2 = vcmp.lt.s32.totalorder %v4526_v30, 2  ;;  %v5864_v58 = vand.u32 2147483647, %v5863_v54 }
 0x6b9   : > { %v5743_v43 = vshll.u32 %v13724_v52, 30  ;;  %v5901_v35 = vshrl.u32 %v5900_v14, 5  ;;  %v13731_v18 = vsel %vm4527_vm2, %v4530_v10, %v4533_v8  ;;  %v4941_v44 = vadd.s32 3, %v4937_v4 }
 0x6ba   : > { %v5903_v0 = vsub.s32 32, %v5902_v55  ;;  %v5905_v24 = vshll.u32 %v16130_v6, %v5902_v55  ;;  %v4945_v5 = vxor.u32 2147483648, %v13337_v29  ;;  %v5867_v60 = vmul.f32 %v5866_v32, %v5864_v58 }
 0x6bb   : > { %v13735_v51 = vsub.s32 %v5740_v38, %v5743_v43  ;;  %v5908_v11 = vshll.u32 %v16335_v41, %v5902_v55  ;;  %v5911_v33 = vshll.u32 %v16336_v17, %v5902_v55  ;;  %v5914_v46 = vshll.u32 %v16337_v57, %v5902_v55 }
 0x6bc   : > { %v5906_v30 = vshrl.u32 %v16335_v41, %v5903_v0  ;;  %v5909_v50 = vshrl.u32 %v16336_v17, %v5903_v0  ;;  %v5912_v34 = vshrl.u32 %v16337_v57, %v5903_v0  ;;  %v5915_v9 = vshrl.u32 %v16134_v25, %v5903_v0 }
 0x6bd   : > { %v5746_v27 = vsub.s32 0, %v13735_v51  ;;  %v5917_v2 = vshll.u32 %v16134_v25, %v5902_v55  ;;  %v5918_v38 = vshrl.u32 %v16135_v26, %v5903_v0  ;;  %v5904_v62 = vshrl.u32 %v16130_v6, %v5903_v0 }
 0x6be   : > { %v5907_v31 = vor.u32 %v5906_v30, %v5905_v24  ;;  %v5910_v12 = vor.u32 %v5909_v50, %v5908_v11  ;;  %v5913_v14 = vor.u32 %v5912_v34, %v5911_v33  ;;  %v5916_v8 = vor.u32 %v5915_v9, %v5914_v46 }
 0x6bf   : > { %v8254_v10 = vmin.u32 %v5746_v27, %v13735_v51  ;;  %v5919_v54 = vor.u32 %v5918_v38, %v5917_v2  ;;  %vm5920_vm0 = vcmp.lt.s32.totalorder %v5901_v35, 1  ;;  %v5868_v4 = vxor.u32 2147483648, %v5867_v60 }
 0x6c0   : > { %vm5923_vm3 = vcmp.lt.s32.totalorder %v5901_v35, 4  ;;  %v5924_v32 = vsel %vm5920_vm0, %v5904_v62, %v5907_v31  ;;  %v5928_v58 = vsel %vm5920_vm0, %v5907_v31, %v5910_v12  ;;  %vm5922_vm7 = vcmp.lt.s32.totalorder %v5901_v35, 3 }
 0x6c1   : > { %v5748_v43 = vclz %v8254_v10  ;;  %v5925_v55 = vsel %vm5923_vm3, %v5913_v14, 2102212464  ;;  %v5929_v56 = vsel %vm5923_vm3, %v5916_v8, 920167782  ;;  %vm4524_vm10 = vweird.f32 %v12514_v16 }
 0x6c2   : > { %vm5921_vm4 = vcmp.lt.s32.totalorder %v5901_v35, 2  ;;  %v5926_v0 = vsel %vm5922_vm7, %v5910_v12, %v5925_v55  ;;  %v5930_v24 = vsel %vm5922_vm7, %v5913_v14, %v5929_v56  ;;  %v5932_v11 = vsel %vm5920_vm0, %v5910_v12, %v5913_v14 }
 0x6c3   : > { %vm4940_vm6 = vweird.f32 %v12753_v3  ;;  %v8255_v33 = vadd.s32 4294967294, %v5748_v43  ;;  %v5927_v30 = vsel %vm5921_vm4, %v5924_v32, %v5926_v0  ;;  %v5931_v50 = vsel %vm5921_vm4, %v5928_v58, %v5930_v24  ;;  %v16421_v0 = vld [vmem:[#allocation24_spill] sm:$0xff] }
 0x6c4   : > { %v5933_v34 = vsel %vm5923_vm3, %v5919_v54, 1326507024  ;;  %v5869_v46 = vsel %vm5786_vm12, %v5868_v4, %v5867_v60  ;;  %v13757_v9 = vmul.u32.u64.low %v13728_v7, %v5931_v50  ;;  %v13758_v2 = vmul.u32.u64.high %v13728_v7, %v5931_v50, %v13757_v9  ;;  %v16420_v4 = vld [vmem:[#allocation20_spill] sm:$0xff] }
 0x6c5   : > { %v5934_v27 = vsel %vm5922_vm7, %v5916_v8, %v5933_v34  ;;  %vm8256_vm8 = vcmp.lt.s32.totalorder %v8255_v33, 0  ;;  %v5943_v56 = vmul.u32 %v13728_v7, %v5927_v30  ;;  %v4942_v62 = vand.u32 3, %v4941_v44 }
 0x6c6   : > { %v5935_v38 = vsel %vm5921_vm4, %v5932_v11, %v5934_v27  ;;  %v5751_v31 = vsel %vm8256_vm8, 0, %v8255_v33  ;;  %v4948_v35 = vxor.u32 2147483648, %v13332_v37  ;;  %v5946_v54 = vadd.s32 1, %v13758_v2 }
 0x6c7   : > { %v13762_v12 = vmul.u32.u64.low %v13728_v7, %v5935_v38  ;;  %v13763_v14 = vmul.u32.u64.high %v13728_v7, %v5935_v38, %v13762_v12  ;;  %v5752_v10 = vsub.s32 32, %v5751_v31  ;;  %v5753_v60 = vshll.u32 %v13735_v51, %v5751_v31 }
 0x6c8   : > { %v5756_v8 = vsub.s32 4294967266, %v5751_v31  ;;  %vm4943_vm12 = vcmp.lt.s32.totalorder %v4942_v62, 2  ;;  %vm4944_vm11 = vcmp.eq.s32.totalorder %v4942_v62, 0  ;;  %vm4947_vm2 = vcmp.eq.s32.totalorder %v4942_v62, 2 }
 0x6c9   : > { %v4726_v32 = vsub.s32 4, %v16420_v4  ;;  %v5754_v44 = vshrl.u32 %v13722_v21, %v5752_v10  ;;  %v4946_v43 = vsel %vm4944_vm11, %v13332_v37, %v4945_v5  ;;  %v4949_v7 = vsel %vm4947_vm2, %v4948_v35, %v13337_v29 }
 0x6ca   : > { %v5757_v58 = vadd.s32 127, %v5756_v8  ;;  %vm5945_vm0 = vc.u32 %v13763_v14, %v13757_v9  ;;  %v4535_v51 = vsel %vm4524_vm10, nan, %v13731_v18  ;;  %v4950_v55 = vsel %vm4943_vm12, %v4946_v43, %v4949_v7  ;;  %v16429_v8 = vld [vmem:[#allocation12_spill] sm:$0xff] }
 0x6cb   : > { %vm16422_vm3 = vcmp.lt.s32.totalorder %v16421_v0, 0  ;;  %v5755_v11 = vor.u32 %v5754_v44, %v5753_v60  ;;  %v5947_v21 = vsel %vm5945_vm0, %v5946_v54, %v13758_v2  ;;  %v4951_v37 = vsel %vm4940_vm6, nan, %v4950_v55  ;;  %v16430_v55 = vld [vmem:[#allocation16_spill] sm:$0xff] }
 0x6cc   : > { %v4727_v24 = vsel %vm16422_vm3, %v4726_v32, %v16420_v4  ;;  %v5758_v33 = vshll.u32 %v5757_v58, 23  ;;  %8845 = vcosq.f32 %v13717_v59  ;;  %vm5682_vm7 = vcmp.lt.s32.totalorder %v13456_v61, 0 }
 0x6cd   : > { %v5948_v29 = vadd.s32 %v5947_v21, %v5943_v56  ;;  %v8371_v5 = vpack.c.bf16 %v4951_v37, %v4535_v51  ;;  %v4729_v18 = vsel %vm13076_vm13, 0, %v4727_v24  ;;  %8847 = vsinq.f32 %v13717_v59  ;;  %v16427_v59 = vld [vmem:[#allocation17_spill] sm:$0xff]  ;;  %v16432_v21 = vld [vmem:[#allocation14_spill] sm:$0xff] }
 0x6ce   : > { %v13790_v30 = vsel %vm13657_vm15, %v13425_v23, %v5869_v46  ;;  %v5759_v50 = vor.u32 4788187, %v5758_v33  ;;  %v4733_v34 = vadd.s32 3, %v4729_v18  ;;  %v16424_v3 = vand.u32 2147483647, %v13456_v61 }
 0x6cf   : > { %v5949_v2 = vadd.s32 536870912, %v5948_v29  ;;  %8372 = vmatprep.subr.bf16.mxu0 %v8371_v5  ;;  %v4737_v38 = vxor.u32 2147483648, %v13218_v48  ;;  %v4740_v56 = vxor.u32 2147483648, %v13204_v39  ;;  %v5142_v62 = vsub.s32 4, %v16427_v59  ;;  %v16433_v5 = vld [vmem:[#allocation6_spill] sm:$0xff] }
 0x6d0   : > { %vm13794_vm10 = vcmp.le.f32.partialorder %v16424_v3, 0.7853982  ;;  %v5760_v31 = vand.u32 2147483647, %v5759_v50  ;;  %v5762_v12 = vcvt.s32.f32 %v5755_v11  ;;  %v13802_v46 = vadd.s32 %v13757_v9, %v13763_v14  ;;  %v16431_v11 = vld [vmem:[#allocation31_spill] sm:$0xff] }
 0x6d1   : > { %v4734_v35 = vand.u32 3, %v4733_v34  ;;  %v13804_v10 = vshrl.u32 %v5949_v2, 30  ;;  %vm4732_vm13 = vweird.f32 %v16421_v0  ;;  %vm16428_vm4 = vcmp.lt.s32.totalorder %v12897_v53, 0 }
 0x6d2   : > { %v5143_v60 = vsel %vm16428_vm4, %v5142_v62, %v16427_v59  ;;  %v4422_v54 = vand.u32 3, %v16429_v8  ;;  %v5763_v4 = vmul.f32 %v5762_v12, %v5760_v31  ;;  %vm5148_vm11 = vweird.f32 %v12897_v53  ;;  %v16435_v31 = vld [vmem:[#allocation27_spill] sm:$0xff]  ;;  %v16439_v53 = vld [vmem:[#allocation32_spill] sm:$0xff] }
 0x6d3   : > { %vm4735_vm6 = vcmp.lt.s32.totalorder %v4734_v35, 2  ;;  %vm4736_vm8 = vcmp.eq.s32.totalorder %v4734_v35, 0  ;;  %vm4739_vm12 = vcmp.eq.s32.totalorder %v4734_v35, 2  ;;  %v5951_v32 = vshll.u32 %v13804_v10, 30  ;;  %v16436_v35 = vld [vmem:[#allocation25_spill] sm:$0xff] }
 0x6d4   : > { %v4738_v9 = vsel %vm4736_vm8, %v13204_v39, %v4737_v38  ;;  %v4741_v14 = vsel %vm4739_vm12, %v4740_v56, %v13218_v48  ;;  %v5145_v44 = vsel %vm13292_vm5, 0, %v5143_v60  ;;  %v5764_v58 = vxor.u32 2147483648, %v5763_v4 }
 0x6d5   : > { %v4742_v43 = vsel %vm4735_vm6, %v4738_v9, %v4741_v14  ;;  %v5149_v7 = vadd.s32 3, %v5145_v44  ;;  %v13817_v51 = vsub.s32 %v5948_v29, %v5951_v32  ;;  %v5153_v24 = vxor.u32 2147483648, %v16430_v55  ;;  %v16437_v32 = vld [vmem:[#allocation22_spill] sm:$0xff]  ;;  %v16438_v9 = vld [vmem:[#allocation9_spill] sm:$0xff] }
 0x6d6   : > { %v5156_v33 = vxor.u32 2147483648, %v16431_v11  ;;  %v4425_v37 = vxor.u32 2147483648, %v16432_v21  ;;  %v5765_v39 = vsel %vm5682_vm7, %v5764_v58, %v5763_v4  ;;  %vm4420_vm2 = vweird.f32 %v16433_v5  ;;  %v13826_v18 = vpop.eup %8845 }
 0x6d7   : > { %v5150_v48 = vand.u32 3, %v5149_v7  ;;  %vm4423_vm5 = vcmp.lt.s32.totalorder %v4422_v54, 2  ;;  %v4428_v16 = vxor.u32 2147483648, %v16434_v1  ;;  %v5954_v29 = vsub.s32 0, %v13817_v51  ;;  %v13831_v34 = vpop.eup %8847 }
 0x6d8   : > { %v4743_v50 = vsel %vm4732_vm13, nan, %v4742_v43  ;;  %vm4424_vm0 = vcmp.eq.s32.totalorder %v4422_v54, 0  ;;  %vm4427_vm3 = vcmp.eq.s32.totalorder %v4422_v54, 2  ;;  %v5768_v3 = vsel %vm13794_vm10, %v13456_v61, %v5765_v39 }
 0x6d9   : > { %vm5152_vm4 = vcmp.eq.s32.totalorder %v5150_v48, 0  ;;  %vm5155_vm6 = vcmp.eq.s32.totalorder %v5150_v48, 2  ;;  %v4426_v2 = vsel %vm4424_vm0, %v16434_v1, %v4425_v37  ;;  %v8262_v38 = vmin.u32 %v5954_v29, %v13817_v51  ;;  %v16441_v37 = vld [vmem:[#allocation10_spill] sm:$0xff]  ;;  %v16443_v29 = vld [vmem:[#allocation19_spill] sm:$0xff] }
 0x6da   : > { %vm5151_vm8 = vcmp.lt.s32.totalorder %v5150_v48, 2  ;;  %v5154_v56 = vsel %vm5152_vm4, %v16431_v11, %v5153_v24  ;;  %v5157_v0 = vsel %vm5155_vm6, %v5156_v33, %v16430_v55  ;;  %v4429_v62 = vsel %vm4427_vm3, %v4428_v16, %v16432_v21  ;;  %v16440_v11 = vld [vmem:[#allocation11_spill] sm:$0xff]  ;;  %v16442_v16 = vld [vmem:[#allocation5_spill] sm:$0xff] }
 0x6db   : > { %v5158_v59 = vsel %vm5151_vm8, %v5154_v56, %v5157_v0  ;;  %v4838_v12 = vand.u32 3, %v16435_v31  ;;  %v4841_v60 = vxor.u32 2147483648, %v16436_v35  ;;  %v5956_v8 = vclz %v8262_v38  ;;  %v16444_v31 = vld [vmem:[#allocation28_spill] sm:$0xff] }
 0x6dc   : > { %v5159_v4 = vsel %vm5148_vm11, nan, %v5158_v59  ;;  %vm4836_vm13 = vweird.f32 %v16437_v32  ;;  %v4844_v14 = vxor.u32 2147483648, %v16438_v9  ;;  %8849 = vcosq.f32 %v5768_v3 }
 0x6dd   : > { %v8379_v44 = vpack.c.bf16 %v5159_v4, %v4743_v50  ;;  %v4430_v58 = vsel %vm4423_vm5, %v4426_v2, %v4429_v62  ;;  %vm4840_vm12 = vcmp.eq.s32.totalorder %v4838_v12, 0  ;;  %8851 = vsinq.f32 %v5768_v3  ;;  %v16446_v4 = vld [vmem:[#allocation34_spill] sm:$0xff] }
 0x6de   : > { %v8263_v43 = vadd.s32 4294967294, %v5956_v8  ;;  %v4842_v7 = vsel %vm4840_vm12, %v16438_v9, %v4841_v60  ;;  %vm4843_vm0 = vcmp.eq.s32.totalorder %v4838_v12, 2  ;;  %vm4839_vm3 = vcmp.lt.s32.totalorder %v4838_v12, 2  ;;  %v16445_v60 = vld [vmem:[#allocation18_spill] sm:$0xff] }
 0x6df   : > { %8380 = vmatprep.subr.bf16.mxu1 %v8379_v44  ;;  %v4845_v55 = vsel %vm4843_vm0, %v4844_v14, %v16436_v35  ;;  %v4630_v24 = vand.u32 3, %v16439_v53  ;;  %v4633_v33 = vxor.u32 2147483648, %v16440_v11  ;;  %v4431_v21 = vsel %vm4420_vm2, nan, %v4430_v58 }
 0x6e0   : > { %vm8264_vm11 = vcmp.lt.s32.totalorder %v8263_v43, 0  ;;  %v4846_v54 = vsel %vm4839_vm3, %v4842_v7, %v4845_v55  ;;  %v4636_v39 = vxor.u32 2147483648, %v16441_v37  ;;  %vm4628_vm5 = vweird.f32 %v16442_v16 }
 0x6e1   : > { %v5959_v48 = vsel %vm8264_vm11, 0, %v8263_v43  ;;  %v4847_v1 = vsel %vm4836_vm13, nan, %v4846_v54  ;;  %v5046_v50 = vand.u32 3, %v16443_v29  ;;  %vm4632_vm4 = vcmp.eq.s32.totalorder %v4630_v24, 0 }
 0x6e2   : > { %v5960_v3 = vsub.s32 32, %v5959_v48  ;;  %v5964_v2 = vsub.s32 4294967266, %v5959_v48  ;;  %v8373_v38 = vpack.c.bf16 %v4847_v1, %v4431_v21  ;;  %v5961_v56 = vshll.u32 %v13817_v51, %v5959_v48 }
 0x6e3   : > { %vm4631_vm6 = vcmp.lt.s32.totalorder %v4630_v24, 2  ;;  %v4634_v5 = vsel %vm4632_vm4, %v16441_v37, %v4633_v33  ;;  %vm4635_vm2 = vcmp.eq.s32.totalorder %v4630_v24, 2  ;;  %v5049_v12 = vxor.u32 2147483648, %v16444_v31 }
 0x6e4   : > { %v5962_v0 = vshrl.u32 %v13802_v46, %v5960_v3  ;;  %v5965_v59 = vadd.s32 127, %v5964_v2  ;;  %8374 = vmatpush1.bf16.msra.mxu0 %v8373_v38  ;;  %v4637_v62 = vsel %vm4635_vm2, %v4636_v39, %v16440_v11  ;;  %vm5048_vm8 = vcmp.eq.s32.totalorder %v5046_v50, 0  ;;  %v16447_v46 = vld [vmem:[#allocation7_spill] sm:$0xff] }
 0x6e5   : > { %v4638_v35 = vsel %vm4631_vm6, %v4634_v5, %v4637_v62  ;;  %v5052_v8 = vxor.u32 2147483648, %v16445_v60  ;;  %v5350_v32 = vsub.s32 4, %v16446_v4  ;;  %v5050_v14 = vsel %vm5048_vm8, %v16445_v60, %v5049_v12 }
 0x6e6   : > { %v5963_v9 = vor.u32 %v5962_v0, %v5961_v56  ;;  %v5966_v51 = vshll.u32 %v5965_v59, 23  ;;  %vm5051_vm13 = vcmp.eq.s32.totalorder %v5046_v50, 2  ;;  %v8850_v44 = vpop.eup %8849  ;;  %vm5890_vm12 = vcmp.lt.s32.totalorder %v13625_v20, 0 }
 0x6e7   : > { %vm5044_vm0 = vweird.f32 %v16447_v46  ;;  %vm5047_vm3 = vcmp.lt.s32.totalorder %v5046_v50, 2  ;;  %v5053_v58 = vsel %vm5051_vm13, %v5052_v8, %v16444_v31  ;;  %vm16448_vm11 = vcmp.lt.s32.totalorder %v13179_v63, 0  ;;  %v8852_v7 = vpop.eup %8851 }
 0x6e8   : > { %v5351_v43 = vsel %vm16448_vm11, %v5350_v32, %v16446_v4  ;;  %v16449_v55 = vand.u32 2147483647, %v13625_v20  ;;  %v5967_v24 = vor.u32 4788187, %v5966_v51  ;;  %v4639_v11 = vsel %vm4628_vm5, nan, %v4638_v35 }
 0x6e9   : > { %v5054_v33 = vsel %vm5047_vm3, %v5050_v14, %v5053_v58  ;;  %v5353_v21 = vsel %vm13521_vm14, 0, %v5351_v43  ;;  %v5361_v39 = vxor.u32 2147483648, %v13641_v47  ;;  %v5766_v48 = vsub.s32 4, %v13724_v52 }
 0x6ea   : > { %vm13875_vm4 = vcmp.le.f32.partialorder %v16449_v55, 0.7853982  ;;  %v5055_v54 = vsel %vm5044_vm0, nan, %v5054_v33  ;;  %v5357_v37 = vadd.s32 3, %v5353_v21  ;;  %v5968_v1 = vand.u32 2147483647, %v5967_v24 }
 0x6eb   : > { %v5970_v29 = vcvt.s32.f32 %v5963_v9  ;;  %v8381_v50 = vpack.c.bf16 %v5055_v54, %v4639_v11  ;;  %v5364_v3 = vxor.u32 2147483648, %v13636_v15  ;;  %vm5356_vm6 = vweird.f32 %v13179_v63  ;;  %v16455_v55 = vld [vmem:[#allocation38_spill] sm:$0xff] }
 0x6ec   : > { %v5358_v2 = vand.u32 3, %v5357_v37  ;;  %v5767_v16 = vsel %vm5682_vm7, %v5766_v48, %v13724_v52  ;;  %v5558_v38 = vsub.s32 4, %v16452_v19  ;;  %vm5772_vm14 = vweird.f32 %v13456_v61 }
 0x6ed   : > { %v5971_v56 = vmul.f32 %v5970_v29, %v5968_v1  ;;  %8382 = vmatpush1.bf16.msra.mxu1 %v8381_v50  ;;  %v5769_v5 = vsel %vm13794_vm10, 0, %v5767_v16  ;;  %v5777_v0 = vxor.u32 2147483648, %v8852_v7  ;;  %v5780_v62 = vxor.u32 2147483648, %v8850_v44 }
 0x6ee   : > { %vm5360_vm5 = vcmp.eq.s32.totalorder %v5358_v2, 0  ;;  %vm5363_vm2 = vcmp.eq.s32.totalorder %v5358_v2, 2  ;;  %v5773_v59 = vadd.s32 3, %v5769_v5  ;;  %vm16453_vm7 = vcmp.lt.s32.totalorder %v13279_v45, 0 }
 0x6ef   : > { %v5972_v31 = vxor.u32 2147483648, %v5971_v56  ;;  %v5362_v12 = vsel %vm5360_vm5, %v13636_v15, %v5361_v39  ;;  %v5365_v35 = vsel %vm5363_vm2, %v5364_v3, %v13641_v47  ;;  %v5559_v52 = vsel %vm16453_vm7, %v5558_v38, %v16452_v19  ;;  %v16460_v3 = vld [vmem:[#allocation23_spill] sm:$0xff] }
 0x6f0   : > { %vm5359_vm8 = vcmp.lt.s32.totalorder %v5358_v2, 2  ;;  %v5774_v60 = vand.u32 3, %v5773_v59  ;;  %v5561_v8 = vsel %vm13564_vm9, 0, %v5559_v52  ;;  %v5569_v4 = vxor.u32 2147483648, %v13712_v28 }
 0x6f1   : > { %v5973_v32 = vsel %vm5890_vm12, %v5972_v31, %v5971_v56  ;;  %v5366_v9 = vsel %vm5359_vm8, %v5362_v12, %v5365_v35  ;;  %v5565_v51 = vadd.s32 3, %v5561_v8  ;;  %v5974_v15 = vsub.s32 4, %v13804_v10  ;;  %v16461_v56 = vld [vmem:[#allocation21_spill] sm:$0xff]  ;;  %v16463_v12 = vld [vmem:[#allocation30_spill] sm:$0xff] }
 0x6f2   : > { %v5976_v47 = vsel %vm13875_vm4, %v13625_v20, %v5973_v32  ;;  %vm5775_vm10 = vcmp.lt.s32.totalorder %v5774_v60, 2  ;;  %vm5776_vm13 = vcmp.eq.s32.totalorder %v5774_v60, 0  ;;  %vm5779_vm0 = vcmp.eq.s32.totalorder %v5774_v60, 2 }
 0x6f3   : > { %8853 = vcosq.f32 %v5976_v47  ;;  %v5778_v14 = vsel %vm5776_vm13, %v8850_v44, %v5777_v0  ;;  %v5781_v46 = vsel %vm5779_vm0, %v5780_v62, %v8852_v7  ;;  %v5566_v58 = vand.u32 3, %v5565_v51  ;;  %v16462_v62 = vld [vmem:[#allocation37_spill] sm:$0xff] }
 0x6f4   : > { %8855 = vsinq.f32 %v5976_v47  ;;  %v5782_v43 = vsel %vm5775_vm10, %v5778_v14, %v5781_v46  ;;  %v5572_v24 = vxor.u32 2147483648, %v16455_v55  ;;  %v5975_v11 = vsel %vm5890_vm12, %v5974_v15, %v13804_v10 }
 0x6f5   : > { %v5669_v33 = vadd.s32 3, %v5665_v36  ;;  %8857 = vsinq.f32 %v13790_v30  ;;  %v5367_v44 = vsel %vm5356_vm6, nan, %v5366_v9  ;;  %v5783_v7 = vsel %vm5772_vm14, nan, %v5782_v43  ;;  %v16457_v36 = vld [vmem:[#allocation29_spill] sm:$0xff] }
 0x6f6   : > { %8859 = vcosq.f32 %v13790_v30  ;;  %v16456_v21 = vsel %vm13657_vm15, 0, %v13670_v49  ;;  %v8375_v54 = vpack.c.bf16 %v5783_v7, %v5367_v44  ;;  %v5977_v40 = vsel %vm13875_vm4, 0, %v5975_v11  ;;  %v16458_v30 = vld [vmem:[#allocation36_spill] sm:$0xff] }
 0x6f7   : > { %v5877_v10 = vadd.s32 3, %v16456_v21  ;;  %vm5568_vm9 = vcmp.eq.s32.totalorder %v5566_v58, 0  ;;  %vm5571_vm1 = vcmp.eq.s32.totalorder %v5566_v58, 2  ;;  %v5981_v22 = vadd.s32 3, %v5977_v40  ;;  %v5993_v40 = vld [vmem:[%s15915_s7 + $0x8] sm:$0xff] }
 0x6f8   : > { %v5254_v63 = vand.u32 3, %v16457_v36  ;;  %8376 = vmatprep.subr.bf16.mxu0 %v8375_v54  ;;  %v5570_v61 = vsel %vm5568_vm9, %v16455_v55, %v5569_v4  ;;  %v5573_v37 = vsel %vm5571_vm1, %v5572_v24, %v13712_v28  ;;  %v5257_v39 = vxor.u32 2147483648, %v16458_v30  ;;  %v5995_v36 = vld [vmem:[%s15915_s7 + $0x18] sm:$0xff] }
 0x6f9   : > { %v5260_v48 = vxor.u32 2147483648, %v16459_v13  ;;  %vm5567_vm15 = vcmp.lt.s32.totalorder %v5566_v58, 2  ;;  %v5982_v49 = vand.u32 3, %v5981_v22  ;;  %vm5564_vm11 = vweird.f32 %v13279_v45  ;;  %v16464_v45 = vld [vmem:[#allocation13_spill] sm:$0xff] }
 0x6fa   : > { %vm5256_vm12 = vcmp.eq.s32.totalorder %v5254_v63, 0  ;;  %vm5259_vm3 = vcmp.eq.s32.totalorder %v5254_v63, 2  ;;  %vm5980_vm4 = vweird.f32 %v13625_v20  ;;  %v5670_v29 = vand.u32 3, %v5669_v33  ;;  %v5992_v33 = vld [vmem:[%s15915_s7] sm:$0xff] }
 0x6fb   : > { %v5258_v53 = vsel %vm5256_vm12, %v16459_v13, %v5257_v39  ;;  %v5261_v1 = vsel %vm5259_vm3, %v5260_v48, %v16458_v30  ;;  %v5673_v50 = vxor.u32 2147483648, %v13831_v34  ;;  %v5574_v28 = vsel %vm5567_vm15, %v5570_v61, %v5573_v37 }
 0x6fc   : > { %vm5252_vm6 = vweird.f32 %v16460_v3  ;;  %vm5255_vm14 = vcmp.lt.s32.totalorder %v5254_v63, 2  ;;  %vm5668_vm5 = vweird.f32 %v13301_v42  ;;  %vm5983_vm2 = vcmp.lt.s32.totalorder %v5982_v49, 2  ;;  %v13987_v63 = vpop.permute.xlu0 %6002 }
 0x6fd   : > { %vm5984_vm7 = vcmp.eq.s32.totalorder %v5982_v49, 0  ;;  %vm5987_vm8 = vcmp.eq.s32.totalorder %v5982_v49, 2  ;;  %vm5672_vm10 = vcmp.eq.s32.totalorder %v5670_v29, 0  ;;  %v8854_v2 = vpop.eup %8853  ;;  %v5262_v16 = vsel %vm5255_vm14, %v5258_v53, %v5261_v1 }
 0x6fe   : > { %v5674_v19 = vsel %vm5672_vm10, %v13826_v18, %v5673_v50  ;;  %v5676_v38 = vxor.u32 2147483648, %v13826_v18  ;;  %v5462_v5 = vand.u32 3, %v16461_v56  ;;  %v8856_v0 = vpop.eup %8855  ;;  %v5988_v59 = vxor.u32 2147483648, %v8854_v2 }
 0x6ff   : > { %vm5675_vm13 = vcmp.eq.s32.totalorder %v5670_v29, 2  ;;  %v5465_v31 = vxor.u32 2147483648, %v16462_v62  ;;  %v5468_v35 = vxor.u32 2147483648, %v16463_v12  ;;  %v8858_v52 = vpop.eup %8857  ;;  %v5985_v60 = vxor.u32 2147483648, %v8856_v0 }
 0x700   : > { %vm5671_vm0 = vcmp.lt.s32.totalorder %v5670_v29, 2  ;;  %v5677_v27 = vsel %vm5675_vm13, %v5676_v38, %v13831_v34  ;;  %vm5464_vm9 = vcmp.eq.s32.totalorder %v5462_v5, 0  ;;  %v8860_v8 = vpop.eup %8859  ;;  %v5989_v4 = vsel %vm5987_vm8, %v5988_v59, %v8856_v0 }
 0x701   : > { %v5263_v18 = vsel %vm5252_vm6, nan, %v5262_v16  ;;  %v5678_v32 = vsel %vm5671_vm0, %v5674_v19, %v5677_v27  ;;  %v5466_v9 = vsel %vm5464_vm9, %v16463_v12, %v5465_v31  ;;  %v5986_v51 = vsel %vm5984_vm7, %v8854_v2, %v5985_v60 }
 0x702   : > { %v5679_v15 = vsel %vm5668_vm5, nan, %v5678_v32  ;;  %vm5467_vm1 = vcmp.eq.s32.totalorder %v5462_v5, 2  ;;  %v5878_v47 = vand.u32 3, %v5877_v10  ;;  %v5990_v14 = vsel %vm5983_vm2, %v5986_v51, %v5989_v4 }
 0x703   : > { %v8377_v34 = vpack.c.bf16 %v5679_v15, %v5263_v18  ;;  %v5469_v46 = vsel %vm5467_vm1, %v5468_v35, %v16462_v62  ;;  %v5881_v58 = vxor.u32 2147483648, %v8858_v52  ;;  %v5575_v43 = vsel %vm5564_vm11, nan, %v5574_v28 }
 0x704   : > { %v5991_v55 = vsel %vm5980_vm4, nan, %v5990_v14  ;;  %vm5880_vm15 = vcmp.eq.s32.totalorder %v5878_v47, 0  ;;  %vm5463_vm12 = vcmp.lt.s32.totalorder %v5462_v5, 2  ;;  %v5884_v11 = vxor.u32 2147483648, %v8860_v8 }
 0x705   : > { %v8383_v24 = vpack.c.bf16 %v5991_v55, %v5575_v43  ;;  %8378 = vmatpush1.bf16.msra.mxu0 %v8377_v34  ;;  %v5882_v42 = vsel %vm5880_vm15, %v8860_v8, %v5881_v58  ;;  %v5470_v44 = vsel %vm5463_vm12, %v5466_v9, %v5469_v46  ;;  %vm5883_vm3 = vcmp.eq.s32.totalorder %v5878_v47, 2 }
 0x706   : > { %vm5879_vm6 = vcmp.lt.s32.totalorder %v5878_v47, 2  ;;  %v5885_v7 = vsel %vm5883_vm3, %v5884_v11, %v8858_v52  ;;  %vm5460_vm11 = vweird.f32 %v16464_v45  ;;  %vm5876_vm14 = vweird.f32 %v13425_v23  ;;  %v5994_v23 = vld [vmem:[%s15915_s7 + $0x10] sm:$0xff] }
 0x707   : > { %8384 = vmatprep.subr.bf16.mxu1 %v8383_v24  ;;  %v5886_v20 = vsel %vm5879_vm6, %v5882_v42, %v5885_v7  ;;  %vm16465_vm4 = vcmask 261120   ;;  %v5471_v21 = vsel %vm5460_vm11, nan, %v5470_v44  ;;  %v16466_v54 = vmov 0.0  }
 0x708   : > { %8265 = vmatmul.mubr.msk.f32.vlgmr.msra.gmra.mrb[16].mxu0 %vm16465_vm4, %v5992_v33  ;;  %v5887_v10 = vsel %vm5876_vm14, nan, %v5886_v20  ;;  %vm16467_vm5 = vmmov %vm16465_vm4 }
 0x709   : > { %6102 = vmatprep.mubr.f32.mxu0 %v16466_v54  ;;  %v8385_v22 = vpack.c.bf16 %v5887_v10, %v5471_v21  ;;  %vm16468_vm2 = vmmov %vm16465_vm4 }
 0x70a   : > { %vm16469_vm7 = vmmov %vm16468_vm2 }
 0x70b   : > { %8386 = vmatpush1.bf16.msra.mxu1 %v8385_v22  ;;  %vm16470_vm8 = vmmov %vm16468_vm2 }
 0x70c   : > { %8266 = vmatmul.mubr.msk.f32.gmra.mrb[18].mxu0 %vm16467_vm5, %v5993_v40  ;;  %vm16471_vm10 = vmmov %vm16468_vm2 }
 0x70d   : > { %6108 = vmatprep.mubr.f32.mxu0 %v16466_v54  ;;  %vm16472_vm13 = vmmov %vm16468_vm2 }
 0x70e   : > { %8269 = vmatmul.mubr.msk.f32.vlgmr.msra.gmra.mrb[16].mxu1 %vm16468_vm2, %v5992_v33  ;;  %vm16473_vm0 = vmmov %vm16468_vm2 }
 0x70f   : > { %6191 = vmatprep.mubr.f32.mxu1 %v16466_v54 }
 0x710   : > { %8267 = vmatmul.mubr.msk.f32.gmra.mrb[20].mxu0 %vm16469_vm7, %v5994_v23 }
 0x711   : > { %6114 = vmatprep.mubr.f32.mxu0 %v16466_v54 }
 0x712   : > { %8270 = vmatmul.mubr.msk.f32.gmra.mrb[18].mxu1 %vm16470_vm8, %v5993_v40 }
 0x713   : > { %6197 = vmatprep.mubr.f32.mxu1 %v16466_v54 }
 0x714   : > { %8268 = vmatmul.mubr.msk.f32.gmra.mrb[22].mxu0 %vm16471_vm10, %v5995_v36 }
 0x716   : > { %8271 = vmatmul.mubr.msk.f32.gmra.mrb[20].mxu1 %vm16472_vm13, %v5994_v23 }
 0x717   : > { %6203 = vmatprep.mubr.f32.mxu1 %v16466_v54 }
 0x71a   : > { %8272 = vmatmul.mubr.msk.f32.gmra.mrb[22].mxu1 %vm16473_vm0, %v5995_v36 }
 0x7db   : > { %v6098_v61 = vpop.f32.mrb[16].mxu0 }
 0x7dc   : > { %v13990_v37 = vadd.f32 %v6098_v61, %v13987_v63  ;;  %v6100_v30 = vpop.f32.mrb[17].mxu0 }
 0x7de   : > { %v6213_v39 = vand.u32 2139095040, %v13990_v37  ;;  %v6210_v29 = vand.u32 2147483647, %v13990_v37  ;;  %vm6212_vm10 = vcmp.lt.s32.totalorder %v13990_v37, 0 }
 0x7df   : > { %v13993_v13 = vpop.f32.mrb[18].mxu0 }
 0x7e0   : > { %v6214_v48 = vshrl.u32 %v6213_v39, 23  ;;  %v13995_v49 = vpop.f32.mrb[19].mxu0  ;;  %v6217_v19 = vand.u32 8388607, %v6210_v29  ;;  %v14028_v39 = vadd.f32 %v6100_v30, %v13987_v63  ;;  %vm14102_vm13 = vcmp.le.f32.partialorder %v6210_v29, 0.7853982 }
 0x7e1   : > { %v6187_v1 = vpop.f32.mrb[16].mxu1 }
 0x7e2   : > { %v8273_v53 = vadd.s32 4294967169, %v6214_v48  ;;  %v13999_v50 = vadd.f32 %v6187_v1, %v13987_v63  ;;  %v14001_v28 = vpop.f32.mrb[17].mxu1  ;;  %v6218_v62 = vor.u32 8388608, %v6217_v19  ;;  %v6317_v19 = vand.u32 2139095040, %v14028_v39 }
 0x7e4   : > { %v6220_v3 = vadd.s32 1, %v8273_v53  ;;  %v6421_v2 = vand.u32 2139095040, %v13999_v50  ;;  %v6258_v24 = vshll.u32 %v6218_v62, 8 }
 0x7e5   : > { %v14004_v16 = vpop.f32.mrb[18].mxu1 }
 0x7e6   : > { %vm6221_vm9 = vcmp.gt.s32.totalorder %v6220_v3, 0  ;;  %v14008_v5 = vpop.f32.mrb[19].mxu1  ;;  %v6422_v59 = vshrl.u32 %v6421_v2, 23 }
 0x7e7   : > { %v6222_v38 = vsel %vm6221_vm9, %v6220_v3, 0 }
 0x7e8   : > { %v6224_v56 = vand.u32 31, %v6222_v38  ;;  %v6223_v31 = vshrl.u32 %v6222_v38, 5  ;;  %v8281_v14 = vadd.s32 4294967169, %v6422_v59  ;;  %v6318_v59 = vshrl.u32 %v6317_v19, 23 }
 0x7ea   : > { %v6225_v0 = vsub.s32 32, %v6224_v56  ;;  %v6227_v12 = vshll.u32 %v16130_v6, %v6224_v56  ;;  %v6230_v35 = vshll.u32 %v16335_v41, %v6224_v56  ;;  %v6233_v27 = vshll.u32 %v16336_v17, %v6224_v56 }
 0x7eb   : > { %v6236_v4 = vshll.u32 %v16337_v57, %v6224_v56  ;;  %v6239_v32 = vshll.u32 %v16134_v25, %v6224_v56  ;;  %vm6242_vm1 = vcmp.lt.s32.totalorder %v6223_v31, 1  ;;  %vm6245_vm15 = vcmp.lt.s32.totalorder %v6223_v31, 4 }
 0x7ec   : > { %v6228_v52 = vshrl.u32 %v16335_v41, %v6225_v0  ;;  %v6231_v60 = vshrl.u32 %v16336_v17, %v6225_v0  ;;  %v6234_v8 = vshrl.u32 %v16337_v57, %v6225_v0  ;;  %v6237_v18 = vshrl.u32 %v16134_v25, %v6225_v0 }
 0x7ed   : > { %v6240_v9 = vshrl.u32 %v16135_v26, %v6225_v0  ;;  %v6226_v42 = vshrl.u32 %v16130_v6, %v6225_v0  ;;  %vm6244_vm12 = vcmp.lt.s32.totalorder %v6223_v31, 3  ;;  %vm6243_vm3 = vcmp.lt.s32.totalorder %v6223_v31, 2  ;;  %v14039_v31 = vpop.f32.mrb[20].mxu0 }
 0x7ee   : > { %v6229_v51 = vor.u32 %v6228_v52, %v6227_v12  ;;  %v6232_v15 = vor.u32 %v6231_v60, %v6230_v35  ;;  %v6235_v47 = vor.u32 %v6234_v8, %v6233_v27  ;;  %v6238_v34 = vor.u32 %v6237_v18, %v6236_v4  ;;  %16474 = vst [vmem:[#allocation20_spill] sm:$0xff] %v14039_v31 }
 0x7ef   : > { %v6241_v46 = vor.u32 %v6240_v9, %v6239_v32  ;;  %v6428_v45 = vadd.s32 1, %v8281_v14  ;;  %v8277_v35 = vadd.s32 4294967169, %v6318_v59  ;;  %v16069_v27 = vand.u32 2147483647, %v13999_v50 }
 0x7f0   : > { %v6247_v58 = vsel %vm6245_vm15, %v6235_v47, 2102212464  ;;  %v6250_v43 = vsel %vm6242_vm1, %v6229_v51, %v6232_v15  ;;  %v6254_v55 = vsel %vm6242_vm1, %v6232_v15, %v6235_v47  ;;  %v6251_v11 = vsel %vm6245_vm15, %v6238_v34, 920167782 }
 0x7f1   : > { %v6255_v33 = vsel %vm6245_vm15, %v6241_v46, 1326507024  ;;  %v6252_v44 = vsel %vm6244_vm12, %v6235_v47, %v6251_v11  ;;  %v6246_v20 = vsel %vm6242_vm1, %v6226_v42, %v6229_v51  ;;  %v6248_v21 = vsel %vm6244_vm12, %v6232_v15, %v6247_v58 }
 0x7f2   : > { %v6256_v7 = vsel %vm6244_vm12, %v6238_v34, %v6255_v33  ;;  %v6253_v10 = vsel %vm6243_vm3, %v6250_v43, %v6252_v44  ;;  %v6249_v61 = vsel %vm6243_vm3, %v6246_v20, %v6248_v21  ;;  %vm6429_vm6 = vcmp.gt.s32.totalorder %v6428_v45, 0 }
 0x7f3   : > { %v6257_v54 = vsel %vm6243_vm3, %v6254_v55, %v6256_v7  ;;  %v14024_v23 = vmul.u32.u64.low %v6258_v24, %v6253_v10  ;;  %v14025_v36 = vmul.u32.u64.high %v6258_v24, %v6253_v10, %v14024_v23  ;;  %v6265_v53 = vmul.u32 %v6258_v24, %v6249_v61 }
 0x7f4   : > { %v14021_v40 = vmul.u32.u64.low %v6258_v24, %v6257_v54  ;;  %v14022_v22 = vmul.u32.u64.high %v6258_v24, %v6257_v54, %v14021_v40  ;;  %v6430_v3 = vsel %vm6429_vm6, %v6428_v45, 0  ;;  %v6324_v9 = vadd.s32 1, %v8277_v35 }
 0x7f5   : > { %v6268_v48 = vadd.s32 1, %v14025_v36  ;;  %v6432_v56 = vand.u32 31, %v6430_v3  ;;  %v14046_v18 = vshrl.u32 %v6430_v3, 5  ;;  %v6425_v11 = vand.u32 8388607, %v16069_v27 }
 0x7f6   : > { %vm6267_vm11 = vc.u32 %v14022_v22, %v14024_v23  ;;  %vm6325_vm14 = vcmp.gt.s32.totalorder %v6324_v9, 0  ;;  %v6266_v54 = vadd.s32 %v14024_v23, %v14022_v22 }
 0x7f7   : > { %v6269_v1 = vsel %vm6267_vm11, %v6268_v48, %v14025_v36  ;;  %v14037_v30 = vsub.s32 32, %v6432_v56  ;;  %v6444_v32 = vshll.u32 %v16337_v57, %v6432_v56  ;;  %v6447_v14 = vshll.u32 %v16134_v25, %v6432_v56 }
 0x7f8   : > { %v6270_v2 = vadd.s32 %v6269_v1, %v6265_v53  ;;  %v6435_v58 = vshll.u32 %v16130_v6, %v6432_v56  ;;  %v6438_v43 = vshll.u32 %v16335_v41, %v6432_v56  ;;  %v6441_v55 = vshll.u32 %v16336_v17, %v6432_v56 }
 0x7f9   : > { %v6445_v60 = vshrl.u32 %v16134_v25, %v14037_v30  ;;  %v6448_v8 = vshrl.u32 %v16135_v26, %v14037_v30  ;;  %v6436_v51 = vshrl.u32 %v16335_v41, %v14037_v30  ;;  %v6439_v15 = vshrl.u32 %v16336_v17, %v14037_v30 }
 0x7fa   : > { %v6271_v38 = vadd.s32 536870912, %v6270_v2  ;;  %v6442_v47 = vshrl.u32 %v16337_v57, %v14037_v30  ;;  %vm6453_vm4 = vcmp.lt.s32.totalorder %v14046_v18, 4  ;;  %vm6450_vm2 = vcmp.lt.s32.totalorder %v14046_v18, 1 }
 0x7fb   : > { %v6446_v46 = vor.u32 %v6445_v60, %v6444_v32  ;;  %v6449_v24 = vor.u32 %v6448_v8, %v6447_v14  ;;  %v6437_v33 = vor.u32 %v6436_v51, %v6435_v58  ;;  %v6440_v44 = vor.u32 %v6439_v15, %v6438_v43  ;;  %v14091_v15 = vpop.f32.mrb[20].mxu1 }
 0x7fc   : > { %v14034_v0 = vshrl.u32 %v6271_v38, 30  ;;  %v6443_v7 = vor.u32 %v6442_v47, %v6441_v55  ;;  %v6326_v10 = vsel %vm6325_vm14, %v6324_v9, 0  ;;  %vm6452_vm7 = vcmp.lt.s32.totalorder %v14046_v18, 3  ;;  %16475 = vst [vmem:[#allocation24_spill] sm:$0xff] %v14091_v15 }
 0x7fd   : > { %v6459_v45 = vsel %vm6453_vm4, %v6446_v46, 920167782  ;;  %v6463_v21 = vsel %vm6453_vm4, %v6449_v24, 1326507024  ;;  %v6426_v61 = vor.u32 8388608, %v6425_v11  ;;  %v6458_v48 = vsel %vm6450_vm2, %v6437_v33, %v6440_v44 }
 0x7fe   : > { %v6273_v62 = vshll.u32 %v14034_v0, 30  ;;  %v6460_v53 = vsel %vm6452_vm7, %v6443_v7, %v6459_v45  ;;  %v6462_v1 = vsel %vm6450_vm2, %v6440_v44, %v6443_v7  ;;  %v6464_v22 = vsel %vm6452_vm7, %v6446_v46, %v6463_v21 }
 0x7ff   : > { %vm6451_vm8 = vcmp.lt.s32.totalorder %v14046_v18, 2  ;;  %v6328_v23 = vand.u32 31, %v6326_v10  ;;  %v6466_v35 = vshll.u32 %v6426_v61, 8  ;;  %v6296_v47 = vsub.s32 4, %v14034_v0 }
 0x800   : > { %v6274_v12 = vsub.s32 %v6270_v2, %v6273_v62  ;;  %v6461_v59 = vsel %vm6451_vm8, %v6458_v48, %v6460_v53  ;;  %v6465_v62 = vsel %vm6451_vm8, %v6462_v1, %v6464_v22  ;;  %v6455_v46 = vsel %vm6453_vm4, %v6443_v7, 2102212464 }
 0x801   : > { %v14086_v8 = vsub.s32 32, %v6328_v23  ;;  %v14088_v9 = vmul.u32.u64.low %v6466_v35, %v6465_v62  ;;  %v14089_v51 = vmul.u32.u64.high %v6466_v35, %v6465_v62, %v14088_v9  ;;  %v16068_v58 = vand.u32 2147483647, %v14028_v39 }
 0x802   : > { %v6276_v52 = vsub.s32 0, %v6274_v12  ;;  %v14106_v55 = vshrl.u32 %v6326_v10, 5  ;;  %v6331_v7 = vshll.u32 %v16130_v6, %v6328_v23  ;;  %v6297_v45 = vsel %vm6212_vm10, %v6296_v47, %v14034_v0 }
 0x803   : > { %v6341_v24 = vshrl.u32 %v16134_v25, %v14086_v8  ;;  %v6344_v29 = vshrl.u32 %v16135_v26, %v14086_v8  ;;  %v6335_v21 = vshrl.u32 %v16336_v17, %v14086_v8  ;;  %v6338_v10 = vshrl.u32 %v16337_v57, %v14086_v8 }
 0x804   : > { %v8274_v4 = vmin.u32 %v6276_v52, %v6274_v12  ;;  %v6337_v61 = vshll.u32 %v16336_v17, %v6328_v23  ;;  %v6299_v53 = vsel %vm14102_vm13, 0, %v6297_v45  ;;  %vm6349_vm9 = vcmp.lt.s32.totalorder %v14106_v55, 4 }
 0x805   : > { %vm6346_vm1 = vcmp.lt.s32.totalorder %v14106_v55, 1  ;;  %vm6348_vm15 = vcmp.lt.s32.totalorder %v14106_v55, 3  ;;  %vm6347_vm12 = vcmp.lt.s32.totalorder %v14106_v55, 2  ;;  %vm6302_vm14 = vweird.f32 %v13990_v37 }
 0x806   : > { %v6278_v34 = vclz %v8274_v4  ;;  %v6339_v22 = vor.u32 %v6338_v10, %v6337_v61 }
 0x808   : > { %v8275_v42 = vadd.s32 4294967294, %v6278_v34  ;;  %v6434_v34 = vshrl.u32 %v16130_v6, %v14037_v30 }
 0x80a   : > { %vm8276_vm5 = vcmp.lt.s32.totalorder %v8275_v42, 0  ;;  %v6454_v11 = vsel %vm6450_vm2, %v6434_v34, %v6437_v33 }
 0x80b   : > { %v6281_v20 = vsel %vm8276_vm5, 0, %v8275_v42  ;;  %v14112_v42 = vadd.f32 %v14001_v28, %v13987_v63  ;;  %v6332_v63 = vshrl.u32 %v16335_v41, %v14086_v8  ;;  %v6340_v28 = vshll.u32 %v16337_v57, %v6328_v23 }
 0x80c   : > { %v6282_v40 = vsub.s32 32, %v6281_v20  ;;  %v6286_v36 = vsub.s32 4294967266, %v6281_v20  ;;  %v6283_v3 = vshll.u32 %v6274_v12, %v6281_v20  ;;  %v6456_v20 = vsel %vm6452_vm7, %v6440_v44, %v6455_v46 }
 0x80d   : > { %v14082_v60 = vmul.u32.u64.low %v6466_v35, %v6461_v59  ;;  %v14083_v12 = vmul.u32.u64.high %v6466_v35, %v6461_v59, %v14082_v60  ;;  %16478 = vst [vmem:[#allocation26_spill] sm:$0xff] %v14112_v42  ;;  %v6457_v1 = vsel %vm6451_vm8, %v6454_v11, %v6456_v20  ;;  %v6303_v59 = vadd.s32 3, %v6299_v53 }
 0x80e   : > { %v6284_v2 = vshrl.u32 %v6266_v54, %v6282_v40  ;;  %v6287_v19 = vadd.s32 127, %v6286_v36  ;;  %v6343_v54 = vshll.u32 %v16134_v25, %v6328_v23  ;;  %v6334_v40 = vshll.u32 %v16335_v41, %v6328_v23 }
 0x80f   : > { %v6476_v44 = vadd.s32 1, %v14083_v12  ;;  %v6342_v36 = vor.u32 %v6341_v24, %v6340_v28  ;;  %vm6475_vm0 = vc.u32 %v14089_v51, %v14082_v60  ;;  %v6473_v62 = vmul.u32 %v6466_v35, %v6457_v1 }
 0x810   : > { %v6285_v38 = vor.u32 %v6284_v2, %v6283_v3  ;;  %v6288_v56 = vshll.u32 %v6287_v19, 23  ;;  %v6345_v48 = vor.u32 %v6344_v29, %v6343_v54  ;;  %v6321_v3 = vand.u32 8388607, %v16068_v58 }
 0x811   : > { %v6333_v2 = vor.u32 %v6332_v63, %v6331_v7  ;;  %v6336_v19 = vor.u32 %v6335_v21, %v6334_v40  ;;  %v6355_v23 = vsel %vm6349_vm9, %v6342_v36, 920167782  ;;  %v6304_v46 = vand.u32 3, %v6303_v59 }
 0x812   : > { %v6289_v52 = vor.u32 4788187, %v6288_v56  ;;  %v6292_v32 = vcvt.s32.f32 %v6285_v38  ;;  %v6477_v38 = vsel %vm6475_vm0, %v6476_v44, %v14083_v12  ;;  %v6525_v56 = vand.u32 2139095040, %v14112_v42 }
 0x813   : > { %v6359_v18 = vsel %vm6349_vm9, %v6345_v48, 1326507024  ;;  %v6354_v12 = vsel %vm6346_vm1, %v6333_v2, %v6336_v19  ;;  %v6356_v9 = vsel %vm6348_vm15, %v6339_v22, %v6355_v23  ;;  %v6358_v35 = vsel %vm6346_vm1, %v6336_v19, %v6339_v22 }
 0x814   : > { %v6290_v4 = vand.u32 2147483647, %v6289_v52  ;;  %v14157_v52 = vpop.permute.xlu1 %6007  ;;  %v6360_v47 = vsel %vm6348_vm15, %v6342_v36, %v6359_v18  ;;  %v6357_v43 = vsel %vm6347_vm12, %v6354_v12, %v6356_v9  ;;  %vm6309_vm3 = vcmp.eq.s32.totalorder %v6304_v46, 2 }
 0x815   : > { %v14169_v34 = vadd.f32 %v13993_v13, %v14157_v52  ;;  %v6361_v11 = vsel %vm6347_vm12, %v6358_v35, %v6360_v47  ;;  %vm6306_vm6 = vcmp.eq.s32.totalorder %v6304_v46, 0  ;;  %vm6305_vm11 = vcmp.lt.s32.totalorder %v6304_v46, 2 }
 0x816   : > { %v6293_v14 = vmul.f32 %v6292_v32, %v6290_v4  ;;  %v6478_v4 = vadd.s32 %v6477_v38, %v6473_v62  ;;  %v6322_v32 = vor.u32 8388608, %v6321_v3  ;;  %v6351_v48 = vsel %vm6349_vm9, %v6339_v22, 2102212464  ;;  %v14194_v38 = vpop.f32.mrb[21].mxu0 }
 0x817   : > { %16479 = vst [vmem:[#allocation17_spill] sm:$0xff] %v14169_v34  ;;  %v6629_v63 = vand.u32 2139095040, %v14169_v34  ;;  %v6330_v53 = vshrl.u32 %v16130_v6, %v14086_v8  ;;  %16481 = vst [vmem:[#allocation16_spill] sm:$0xff] %v14194_v38  ;;  %v16066_v35 = vand.u32 2147483647, %v14112_v42 }
 0x818   : > { %v6294_v30 = vxor.u32 2147483648, %v6293_v14  ;;  %v6362_v7 = vshll.u32 %v6322_v32, 8 }
 0x819   : > { %v6630_v1 = vshrl.u32 %v6629_v63, 23  ;;  %v6350_v23 = vsel %vm6346_vm1, %v6330_v53, %v6333_v2  ;;  %v6529_v55 = vand.u32 8388607, %v16066_v35 }
 0x81a   : > { %v6295_v33 = vsel %vm6212_vm10, %v6294_v30, %v6293_v14  ;;  %v6526_v14 = vshrl.u32 %v6525_v56, 23  ;;  %v6479_v30 = vadd.s32 536870912, %v6478_v4 }
 0x81b   : > { %v6298_v0 = vsel %vm14102_vm13, %v13990_v37, %v6295_v33  ;;  %v14177_v13 = vmul.u32.u64.low %v6362_v7, %v6357_v43  ;;  %v14178_v33 = vmul.u32.u64.high %v6362_v7, %v6357_v43, %v14177_v13  ;;  %v6352_v37 = vsel %vm6348_vm15, %v6336_v19, %v6351_v48 }
 0x81c   : > { %8861 = vcosq.f32 %v6298_v0  ;;  %v8285_v20 = vadd.s32 4294967169, %v6526_v14  ;;  %v14181_v10 = vmul.u32.u64.low %v6362_v7, %v6361_v11  ;;  %v14182_v54 = vmul.u32.u64.high %v6362_v7, %v6361_v11, %v14181_v10 }
 0x81d   : > { %8863 = vsinq.f32 %v6298_v0  ;;  %v14184_v44 = vshrl.u32 %v6479_v30, 30  ;;  %v6372_v56 = vadd.s32 1, %v14178_v33  ;;  %v8289_v22 = vadd.s32 4294967169, %v6630_v1 }
 0x81e   : > { %v6532_v36 = vadd.s32 1, %v8285_v20  ;;  %vm6371_vm5 = vc.u32 %v14182_v54, %v14177_v13  ;;  %v6353_v8 = vsel %vm6347_vm12, %v6350_v23, %v6352_v37  ;;  %v16067_v30 = vand.u32 2147483647, %v14169_v34 }
 0x81f   : > { %v6481_v3 = vshll.u32 %v14184_v44, 30  ;;  %v6373_v18 = vsel %vm6371_vm5, %v6372_v56, %v14178_v33  ;;  %v6369_v32 = vmul.u32 %v6362_v7, %v6353_v8  ;;  %v6636_v12 = vadd.s32 1, %v8289_v22 }
 0x820   : > { %vm6533_vm4 = vcmp.gt.s32.totalorder %v6532_v36, 0  ;;  %v14231_v33 = vadd.f32 %v14004_v16, %v14157_v52  ;;  %v6633_v1 = vand.u32 8388607, %v16067_v30 }
 0x821   : > { %v14203_v59 = vsub.s32 %v6478_v4, %v6481_v3  ;;  %v6534_v62 = vsel %vm6533_vm4, %v6532_v36, 0  ;;  %v6374_v9 = vadd.s32 %v6373_v18, %v6369_v32  ;;  %vm6637_vm2 = vcmp.gt.s32.totalorder %v6636_v12, 0 }
 0x822   : > { %v6536_v2 = vand.u32 31, %v6534_v62  ;;  %v6638_v46 = vsel %vm6637_vm2, %v6636_v12, 0  ;;  %v14223_v20 = vshrl.u32 %v6534_v62, 5  ;;  %v6837_v8 = vand.u32 2139095040, %v14231_v33 }
 0x823   : > { %v6484_v19 = vsub.s32 0, %v14203_v59  ;;  %v6375_v14 = vadd.s32 536870912, %v6374_v9  ;;  %v14256_v32 = vadd.f32 %v13995_v49, %v14157_v52  ;;  %v6634_v12 = vor.u32 8388608, %v6633_v1 }
 0x824   : > { %v14210_v47 = vsub.s32 32, %v6536_v2  ;;  %v6539_v10 = vshll.u32 %v16130_v6, %v6536_v2  ;;  %v6542_v48 = vshll.u32 %v16335_v41, %v6536_v2  ;;  %v6545_v53 = vshll.u32 %v16336_v17, %v6536_v2 }
 0x825   : > { %v8282_v4 = vmin.u32 %v6484_v19, %v14203_v59  ;;  %v14218_v11 = vshrl.u32 %v6375_v14, 30  ;;  %v6551_v16 = vshll.u32 %v16134_v25, %v6536_v2  ;;  %vm6557_vm7 = vcmp.lt.s32.totalorder %v14223_v20, 4 }
 0x826   : > { %v8862_v24 = vpop.eup %8861  ;;  %v6549_v43 = vshrl.u32 %v16134_v25, %v14210_v47  ;;  %v6540_v7 = vshrl.u32 %v16335_v41, %v14210_v47  ;;  %v6543_v63 = vshrl.u32 %v16336_v17, %v14210_v47  ;;  %v6838_v19 = vshrl.u32 %v6837_v8, 23 }
 0x827   : > { %v8864_v29 = vpop.eup %8863  ;;  %v6310_v45 = vxor.u32 2147483648, %v8862_v24  ;;  %v6377_v3 = vshll.u32 %v14218_v11, 30  ;;  %vm6554_vm10 = vcmp.lt.s32.totalorder %v14223_v20, 1  ;;  %vm6556_vm13 = vcmp.lt.s32.totalorder %v14223_v20, 3 }
 0x828   : > { %v6307_v28 = vxor.u32 2147483648, %v8864_v29  ;;  %v14241_v23 = vor.u32 %v6540_v7, %v6539_v10  ;;  %v14246_v56 = vor.u32 %v6543_v63, %v6542_v48  ;;  %vm6555_vm0 = vcmp.lt.s32.totalorder %v14223_v20, 2 }
 0x829   : > { %v6311_v21 = vsel %vm6309_vm3, %v6310_v45, %v8864_v29  ;;  %v6548_v29 = vshll.u32 %v16337_v57, %v6536_v2  ;;  %v6640_v45 = vand.u32 31, %v6638_v46  ;;  %v14262_v14 = vsub.s32 %v6374_v9, %v6377_v3 }
 0x82a   : > { %v6308_v0 = vsel %vm6306_vm6, %v8862_v24, %v6307_v28  ;;  %v6486_v24 = vclz %v8282_v4  ;;  %v6546_v28 = vshrl.u32 %v16337_v57, %v14210_v47  ;;  %v14260_v4 = vpop.f32.mrb[21].mxu1  ;;  %v6562_v49 = vsel %vm6554_vm10, %v14241_v23, %v14246_v56 }
 0x82b   : > { %v6312_v40 = vsel %vm6305_vm11, %v6308_v0, %v6311_v21  ;;  %v6530_v21 = vor.u32 8388608, %v6529_v55  ;;  %v6550_v0 = vor.u32 %v6549_v43, %v6548_v29  ;;  %v14244_v37 = vsub.s32 32, %v6640_v45  ;;  %16482 = vst [vmem:[#allocation31_spill] sm:$0xff] %v14260_v4 }
 0x82c   : > { %v14187_v61 = vsel %vm6302_vm14, nan, %v6312_v40  ;;  %v6552_v40 = vshrl.u32 %v16135_v26, %v14210_v47  ;;  %v8283_v36 = vadd.s32 4294967294, %v6486_v24  ;;  %v14248_v22 = vor.u32 %v6546_v28, %v6545_v53 }
 0x82d   : > { %16480 = vst [vmem:[#allocation12_spill] sm:$0xff] %v14187_v61  ;;  %v6563_v18 = vsel %vm6557_vm7, %v6550_v0, 920167782  ;;  %v14258_v2 = vshll.u32 %v6530_v21, 8  ;;  %v6653_v55 = vshrl.u32 %v16134_v25, %v14244_v37  ;;  %v8297_v9 = vadd.s32 4294967169, %v6838_v19 }
 0x82e   : > { %v6553_v62 = vor.u32 %v6552_v40, %v6551_v16  ;;  %vm8284_vm8 = vcmp.lt.s32.totalorder %v8283_v36, 0  ;;  %v6564_v43 = vsel %vm6556_vm13, %v14248_v22, %v6563_v18  ;;  %v6644_v7 = vshrl.u32 %v16335_v41, %v14244_v37 }
 0x82f   : > { %v6652_v29 = vshll.u32 %v16337_v57, %v6640_v45  ;;  %v6656_v63 = vshrl.u32 %v16135_v26, %v14244_v37  ;;  %v14283_v28 = vshrl.u32 %v6638_v46, 5  ;;  %v6647_v21 = vshrl.u32 %v16336_v17, %v14244_v37 }
 0x830   : > { %v6567_v24 = vsel %vm6557_vm7, %v6553_v62, 1326507024  ;;  %v6650_v10 = vshrl.u32 %v16337_v57, %v14244_v37  ;;  %v6844_v40 = vadd.s32 1, %v8297_v9  ;;  %v6566_v48 = vsel %vm6554_vm10, %v14246_v56, %v14248_v22 }
 0x831   : > { %v6643_v53 = vshll.u32 %v16130_v6, %v6640_v45  ;;  %v6654_v1 = vor.u32 %v6653_v55, %v6652_v29  ;;  %v6655_v3 = vshll.u32 %v16134_v25, %v6640_v45  ;;  %v6568_v46 = vsel %vm6556_vm13, %v6550_v0, %v6567_v24 }
 0x832   : > { %v6646_v16 = vshll.u32 %v16335_v41, %v6640_v45  ;;  %v6649_v8 = vshll.u32 %v16336_v17, %v6640_v45  ;;  %vm6845_vm9 = vcmp.gt.s32.totalorder %v6844_v40, 0  ;;  %v6565_v62 = vsel %vm6555_vm0, %v6562_v49, %v6564_v43 }
 0x833   : > { %v14301_v18 = vor.u32 %v6644_v7, %v6643_v53  ;;  %v6657_v19 = vor.u32 %v6656_v63, %v6655_v3  ;;  %v6846_v9 = vsel %vm6845_vm9, %v6844_v40, 0  ;;  %vm6661_vm1 = vcmp.lt.s32.totalorder %v14283_v28, 4 }
 0x834   : > { %v14303_v35 = vor.u32 %v6647_v21, %v6646_v16  ;;  %v6651_v55 = vor.u32 %v6650_v10, %v6649_v8  ;;  %v6848_v29 = vand.u32 31, %v6846_v9  ;;  %v6380_v0 = vsub.s32 0, %v14262_v14 }
 0x835   : > { %v6569_v24 = vsel %vm6555_vm0, %v6566_v48, %v6568_v46  ;;  %v6667_v45 = vsel %vm6661_vm1, %v6654_v1, 920167782  ;;  %v14311_v30 = vshll.u32 %v6634_v12, 8  ;;  %v14314_v49 = vsel %vm8284_vm8, 0, %v8283_v36 }
 0x836   : > { %v14317_v43 = vmul.u32.u64.low %v14258_v2, %v6565_v62  ;;  %v14318_v7 = vmul.u32.u64.high %v14258_v2, %v6565_v62, %v14317_v43  ;;  %v14321_v63 = vsub.s32 32, %v6848_v29  ;;  %v6538_v21 = vshrl.u32 %v16130_v6, %v14210_v47 }
 0x837   : > { %vm6658_vm15 = vcmp.lt.s32.totalorder %v14283_v28, 1  ;;  %vm6660_vm12 = vcmp.lt.s32.totalorder %v14283_v28, 3  ;;  %v6671_v12 = vsel %vm6661_vm1, %v6657_v19, 1326507024  ;;  %v8278_v47 = vmin.u32 %v6380_v0, %v14262_v14 }
 0x838   : > { %v14330_v36 = vmul.u32.u64.low %v14258_v2, %v6569_v24  ;;  %v14331_v10 = vmul.u32.u64.high %v14258_v2, %v6569_v24, %v14330_v36  ;;  %v6666_v40 = vsel %vm6658_vm15, %v14301_v18, %v14303_v35  ;;  %v6668_v48 = vsel %vm6660_vm12, %v6651_v55, %v6667_v45 }
 0x839   : > { %vm6659_vm3 = vcmp.lt.s32.totalorder %v14283_v28, 2  ;;  %v6670_v53 = vsel %vm6658_vm15, %v14303_v35, %v6651_v55  ;;  %v16076_v3 = vand.u32 2147483647, %v14231_v33  ;;  %v6672_v46 = vsel %vm6660_vm12, %v6654_v1, %v6671_v12 }
 0x83a   : > { %v6852_v16 = vshrl.u32 %v16335_v41, %v14321_v63  ;;  %v6855_v8 = vshrl.u32 %v16336_v17, %v14321_v63  ;;  %v6858_v62 = vshrl.u32 %v16337_v57, %v14321_v63  ;;  %v6669_v19 = vsel %vm6659_vm3, %v6666_v40, %v6668_v48 }
 0x83b   : > { %v14355_v0 = vshrl.u32 %v6846_v9, 5  ;;  %v6860_v24 = vshll.u32 %v16337_v57, %v6848_v29  ;;  %v6861_v45 = vshrl.u32 %v16134_v25, %v14321_v63  ;;  %v6851_v1 = vshll.u32 %v16130_v6, %v6848_v29 }
 0x83c   : > { %v6854_v12 = vshll.u32 %v16335_v41, %v6848_v29  ;;  %v6857_v36 = vshll.u32 %v16336_v17, %v6848_v29  ;;  %v6864_v58 = vshrl.u32 %v16135_v26, %v14321_v63  ;;  %v6382_v27 = vclz %v8278_v47 }
 0x83d   : > { %v6673_v40 = vsel %vm6659_vm3, %v6670_v53, %v6672_v46  ;;  %v6862_v9 = vor.u32 %v6861_v45, %v6860_v24  ;;  %v6863_v48 = vshll.u32 %v16134_v25, %v6848_v29  ;;  %v6841_v4 = vand.u32 8388607, %v16076_v3 }
 0x83e   : > { %v6853_v38 = vor.u32 %v6852_v16, %v6851_v1  ;;  %v6856_v34 = vor.u32 %v6855_v8, %v6854_v12  ;;  %v6859_v15 = vor.u32 %v6858_v62, %v6857_v36  ;;  %v6733_v47 = vand.u32 2139095040, %v14256_v32 }
 0x83f   : > { %v14371_v61 = vmul.u32.u64.low %v14311_v30, %v6669_v19  ;;  %v14372_v42 = vmul.u32.u64.high %v14311_v30, %v6669_v19, %v14371_v61  ;;  %v6865_v31 = vor.u32 %v6864_v58, %v6863_v48  ;;  %v6559_v53 = vsel %vm6557_vm7, %v14248_v22, 2102212464 }
 0x840   : > { %v14380_v29 = vmul.u32.u64.low %v14311_v30, %v6673_v40  ;;  %v14381_v46 = vmul.u32.u64.high %v14311_v30, %v6673_v40, %v14380_v29  ;;  %vm6869_vm6 = vcmp.lt.s32.totalorder %v14355_v0, 4  ;;  %v8279_v16 = vadd.s32 4294967294, %v6382_v27 }
 0x841   : > { %vm6866_vm11 = vcmp.lt.s32.totalorder %v14355_v0, 1  ;;  %vm6868_vm14 = vcmp.lt.s32.totalorder %v14355_v0, 3  ;;  %v6875_v58 = vsel %vm6869_vm6, %v6862_v9, 920167782  ;;  %v6558_v8 = vsel %vm6554_vm10, %v6538_v21, %v14241_v23  ;;  %v14430_v29 = vpop.f32.mrb[22].mxu0 }
 0x842   : > { %v6842_v62 = vor.u32 8388608, %v6841_v4  ;;  %v6874_v22 = vsel %vm6866_vm11, %v6853_v38, %v6856_v34  ;;  %v6876_v19 = vsel %vm6868_vm14, %v6859_v15, %v6875_v58  ;;  %v6560_v27 = vsel %vm6556_vm13, %v14246_v56, %v6559_v53  ;;  %16483 = vst [vmem:[#allocation14_spill] sm:$0xff] %v14430_v29 }
 0x843   : > { %v6878_v24 = vsel %vm6866_vm11, %v6856_v34, %v6859_v15  ;;  %v6879_v45 = vsel %vm6869_vm6, %v6865_v31, 1326507024  ;;  %v6734_v1 = vshrl.u32 %v6733_v47, 23  ;;  %v6663_v23 = vsel %vm6661_vm1, %v6651_v55, 2102212464 }
 0x844   : > { %vm6867_vm4 = vcmp.lt.s32.totalorder %v14355_v0, 2  ;;  %v6880_v4 = vsel %vm6868_vm14, %v6862_v9, %v6879_v45  ;;  %v6494_v21 = vsub.s32 4294967266, %v14314_v49  ;;  %v6642_v56 = vshrl.u32 %v16130_v6, %v14244_v37 }
 0x845   : > { %v6877_v12 = vsel %vm6867_vm4, %v6874_v22, %v6876_v19  ;;  %vm8280_vm5 = vcmp.lt.s32.totalorder %v8279_v16, 0  ;;  %v6561_v31 = vsel %vm6555_vm0, %v6558_v8, %v6560_v27  ;;  %v6881_v55 = vsel %vm6867_vm4, %v6878_v24, %v6880_v4 }
 0x846   : > { %v6882_v36 = vshll.u32 %v6842_v62, 8  ;;  %v6580_v40 = vadd.s32 1, %v14318_v7  ;;  %v6662_v9 = vsel %vm6658_vm15, %v6642_v56, %v14301_v18  ;;  %v6664_v37 = vsel %vm6660_vm12, %v14303_v35, %v6663_v23 }
 0x847   : > { %v8293_v48 = vadd.s32 4294967169, %v6734_v1  ;;  %vm6579_vm2 = vc.u32 %v14331_v10, %v14317_v43  ;;  %v6684_v20 = vadd.s32 1, %v14372_v42  ;;  %vm6683_vm7 = vc.u32 %v14381_v46, %v14371_v61 }
 0x848   : > { %v14426_v47 = vmul.u32.u64.low %v6882_v36, %v6877_v12  ;;  %v14427_v53 = vmul.u32.u64.high %v6882_v36, %v6877_v12, %v14426_v47  ;;  %v14434_v18 = vmul.u32.u64.low %v6882_v36, %v6881_v55  ;;  %v14435_v58 = vmul.u32.u64.high %v6882_v36, %v6881_v55, %v14434_v18 }
 0x849   : > { %v6740_v8 = vadd.s32 1, %v8293_v48  ;;  %v6490_v35 = vsub.s32 32, %v14314_v49  ;;  %v6495_v62 = vadd.s32 127, %v6494_v21  ;;  %v6665_v22 = vsel %vm6659_vm3, %v6662_v9, %v6664_v37 }
 0x84a   : > { %v6871_v19 = vsel %vm6869_vm6, %v6859_v15, 2102212464  ;;  %v14443_v27 = vsel %vm8280_vm5, 0, %v8279_v16  ;;  %v6581_v24 = vsel %vm6579_vm2, %v6580_v40, %v14318_v7  ;;  %v6850_v45 = vshrl.u32 %v16130_v6, %v14321_v63 }
 0x84b   : > { %vm6741_vm8 = vcmp.gt.s32.totalorder %v6740_v8, 0  ;;  %v6474_v1 = vadd.s32 %v14082_v60, %v14089_v51  ;;  %v6577_v23 = vmul.u32 %v14258_v2, %v6561_v31  ;;  %v6685_v28 = vsel %vm6683_vm7, %v6684_v20, %v14372_v42 }
 0x84c   : > { %v6742_v4 = vsel %vm6741_vm8, %v6740_v8, 0  ;;  %v6681_v21 = vmul.u32 %v14311_v30, %v6665_v22  ;;  %v6870_v15 = vsel %vm6866_vm11, %v6850_v45, %v6853_v38  ;;  %v6872_v7 = vsel %vm6868_vm14, %v6856_v34, %v6871_v19 }
 0x84d   : > { %v6744_v16 = vand.u32 31, %v6742_v4  ;;  %v6492_v56 = vshrl.u32 %v6474_v1, %v6490_v35  ;;  %v6496_v63 = vshll.u32 %v6495_v62, 23  ;;  %v6390_v12 = vsub.s32 4294967266, %v14443_v27 }
 0x84e   : > { %v14458_v55 = vadd.s32 %v6581_v24, %v6577_v23  ;;  %v14460_v60 = vadd.s32 %v6685_v28, %v6681_v21  ;;  %v6491_v42 = vshll.u32 %v14203_v59, %v14314_v49  ;;  %v6873_v38 = vsel %vm6867_vm4, %v6870_v15, %v6872_v7 }
 0x84f   : > { %v14462_v51 = vsub.s32 32, %v6744_v16  ;;  %v6892_v30 = vadd.s32 1, %v14427_v53  ;;  %vm6891_vm10 = vc.u32 %v14435_v58, %v14426_v47  ;;  %v14473_v34 = vadd.f32 %v14008_v5, %v14157_v52 }
 0x850   : > { %v6493_v2 = vor.u32 %v6492_v56, %v6491_v42  ;;  %v6497_v31 = vor.u32 4788187, %v6496_v63  ;;  %v6391_v40 = vadd.s32 127, %v6390_v12  ;;  %v6583_v9 = vadd.s32 536870912, %v14458_v55 }
 0x851   : > { %16484 = vst [vmem:[#allocation6_spill] sm:$0xff] %v14473_v34  ;;  %v6687_v37 = vadd.s32 536870912, %v14460_v60  ;;  %v6889_v59 = vmul.u32 %v6882_v36, %v6873_v38  ;;  %v16075_v49 = vand.u32 2147483647, %v14256_v32  ;;  %v6748_v0 = vshrl.u32 %v16335_v41, %v14462_v51 }
 0x852   : > { %v6893_v48 = vsel %vm6891_vm10, %v6892_v30, %v14427_v53  ;;  %v14481_v20 = vshrl.u32 %v6742_v4, 5  ;;  %v6751_v5 = vshrl.u32 %v16336_v17, %v14462_v51  ;;  %v6754_v52 = vshrl.u32 %v16337_v57, %v14462_v51 }
 0x853   : > { %v6747_v18 = vshll.u32 %v16130_v6, %v6744_v16  ;;  %v6756_v8 = vshll.u32 %v16337_v57, %v6744_v16  ;;  %v6757_v36 = vshrl.u32 %v16134_v25, %v14462_v51  ;;  %v6941_v35 = vand.u32 2139095040, %v14473_v34 }
 0x854   : > { %v6750_v62 = vshll.u32 %v16335_v41, %v6744_v16  ;;  %v6753_v53 = vshll.u32 %v16336_v17, %v6744_v16  ;;  %v6759_v22 = vshll.u32 %v16134_v25, %v6744_v16  ;;  %v6760_v19 = vshrl.u32 %v16135_v26, %v14462_v51 }
 0x855   : > { %v6894_v24 = vadd.s32 %v6893_v48, %v6889_v59  ;;  %v6737_v45 = vand.u32 8388607, %v16075_v49  ;;  %v14499_v1 = vor.u32 %v6748_v0, %v6747_v18  ;;  %v6758_v23 = vor.u32 %v6757_v36, %v6756_v8 }
 0x856   : > { %v14501_v28 = vor.u32 %v6751_v5, %v6750_v62  ;;  %v6755_v4 = vor.u32 %v6754_v52, %v6753_v53  ;;  %v6761_v21 = vor.u32 %v6760_v19, %v6759_v22  ;;  %vm6765_vm13 = vcmp.lt.s32.totalorder %v14481_v20, 4  ;;  %v14539_v22 = vpop.f32.mrb[22].mxu1 }
 0x857   : > { %v6498_v15 = vand.u32 2147483647, %v6497_v31  ;;  %v6370_v7 = vadd.s32 %v14177_v13, %v14182_v54  ;;  %v6386_v16 = vsub.s32 32, %v14443_v27  ;;  %v6771_v56 = vsel %vm6765_vm13, %v6758_v23, 920167782  ;;  %16485 = vst [vmem:[#allocation8_spill] sm:$0xff] %v14539_v22 }
 0x858   : > { %v6500_v63 = vcvt.s32.f32 %v6493_v2  ;;  %v14509_v12 = vshrl.u32 %v6583_v9, 30  ;;  %v14511_v42 = vshrl.u32 %v6687_v37, 30  ;;  %v6942_v38 = vshrl.u32 %v6941_v35, 23 }
 0x859   : > { %v6895_v30 = vadd.s32 536870912, %v6894_v24  ;;  %vm6762_vm0 = vcmp.lt.s32.totalorder %v14481_v20, 1  ;;  %vm6764_vm9 = vcmp.lt.s32.totalorder %v14481_v20, 3  ;;  %v6775_v31 = vsel %vm6765_vm13, %v6761_v21, 1326507024 }
 0x85a   : > { %v6392_v13 = vshll.u32 %v6391_v40, 23  ;;  %v6738_v54 = vor.u32 8388608, %v6737_v45  ;;  %v6770_v2 = vsel %vm6762_vm0, %v14499_v1, %v14501_v28  ;;  %v6772_v9 = vsel %vm6764_vm9, %v6755_v4, %v6771_v56 }
 0x85b   : > { %v6501_v37 = vmul.f32 %v6500_v63, %v6498_v15  ;;  %v6388_v59 = vshrl.u32 %v6370_v7, %v6386_v16  ;;  %v6774_v0 = vsel %vm6762_vm0, %v14501_v28, %v6755_v4  ;;  %v6776_v48 = vsel %vm6764_vm9, %v6758_v23, %v6775_v31 }
 0x85c   : > { %v6585_v40 = vshll.u32 %v14509_v12, 30  ;;  %v6689_v5 = vshll.u32 %v14511_v42, 30  ;;  %vm6763_vm1 = vcmp.lt.s32.totalorder %v14481_v20, 2  ;;  %v8301_v52 = vadd.s32 4294967169, %v6942_v38 }
 0x85d   : > { %v6387_v18 = vshll.u32 %v14262_v14, %v14443_v27  ;;  %v14533_v8 = vshrl.u32 %v6895_v30, 30  ;;  %v6773_v36 = vsel %vm6763_vm1, %v6770_v2, %v6772_v9  ;;  %v6393_v35 = vor.u32 4788187, %v6392_v13 }
 0x85e   : > { %v6777_v62 = vsel %vm6763_vm1, %v6774_v0, %v6776_v48  ;;  %v6778_v53 = vshll.u32 %v6738_v54, 8  ;;  %v6502_v19 = vxor.u32 2147483648, %v6501_v37  ;;  %v6504_v45 = vsub.s32 4, %v14184_v44 }
 0x85f   : > { %v6389_v23 = vor.u32 %v6388_v59, %v6387_v18  ;;  %v6948_v21 = vadd.s32 1, %v8301_v52  ;;  %v14543_v15 = vsub.s32 %v14458_v55, %v6585_v40  ;;  %v14546_v14 = vsub.s32 %v14460_v60, %v6689_v5 }
 0x860   : > { %v14548_v27 = vmul.u32.u64.low %v6778_v53, %v6773_v36  ;;  %v14549_v7 = vmul.u32.u64.high %v6778_v53, %v6773_v36, %v14548_v27  ;;  %v6897_v16 = vshll.u32 %v14533_v8, 30  ;;  %vm6420_vm12 = vcmp.lt.s32.totalorder %v13999_v50, 0 }
 0x861   : > { %v14553_v56 = vmul.u32.u64.low %v6778_v53, %v6777_v62  ;;  %v14554_v63 = vmul.u32.u64.high %v6778_v53, %v6777_v62, %v14553_v56  ;;  %vm6949_vm15 = vcmp.gt.s32.totalorder %v6948_v21, 0  ;;  %v6394_v38 = vand.u32 2147483647, %v6393_v35 }
 0x862   : > { %v6505_v30 = vsel %vm6420_vm12, %v6504_v45, %v14184_v44  ;;  %v6950_v55 = vsel %vm6949_vm15, %v6948_v21, 0  ;;  %v6503_v31 = vsel %vm6420_vm12, %v6502_v19, %v6501_v37  ;;  %v6396_v13 = vcvt.s32.f32 %v6389_v23 }
 0x863   : > { %v6588_v60 = vsub.s32 0, %v14543_v15  ;;  %v6767_v54 = vsel %vm6765_vm13, %v6755_v4, 2102212464  ;;  %v6692_v2 = vsub.s32 0, %v14546_v14  ;;  %v14562_v9 = vsub.s32 %v6894_v24, %v6897_v16  ;;  %v16492_v16 = vld [vmem:[#allocation20_spill] sm:$0xff] }
 0x864   : > { %v6746_v59 = vshrl.u32 %v16130_v6, %v14462_v51  ;;  %v6952_v0 = vand.u32 31, %v6950_v55  ;;  %v6397_v48 = vmul.f32 %v6396_v13, %v6394_v38  ;;  %v16486_v40 = vand.u32 2147483647, %v13999_v50 }
 0x865   : > { %v6400_v37 = vsub.s32 4, %v14218_v11  ;;  %v6768_v24 = vsel %vm6764_vm9, %v14501_v28, %v6767_v54  ;;  %v8286_v52 = vmin.u32 %v6588_v60, %v14543_v15  ;;  %v6788_v18 = vadd.s32 1, %v14549_v7  ;;  %v14592_v28 = vpop.permute.xlu0 %6012 }
 0x866   : > { %vm14568_vm3 = vcmp.le.f32.partialorder %v16486_v40, 0.7853982  ;;  %v6766_v4 = vsel %vm6762_vm0, %v6746_v59, %v14499_v1  ;;  %v8290_v36 = vmin.u32 %v6692_v2, %v14546_v14  ;;  %v6900_v35 = vsub.s32 0, %v14562_v9 }
 0x867   : > { %v6506_v51 = vsel %vm14568_vm3, %v13999_v50, %v6503_v31  ;;  %v6507_v5 = vsel %vm14568_vm3, 0, %v6505_v30  ;;  %vm6787_vm6 = vc.u32 %v14554_v63, %v14548_v27  ;;  %v14590_v1 = vsub.s32 32, %v6952_v0 }
 0x868   : > { %vm6316_vm11 = vcmp.lt.s32.totalorder %v14028_v39, 0  ;;  %v6398_v62 = vxor.u32 2147483648, %v6397_v48  ;;  %v6769_v19 = vsel %vm6763_vm1, %v6766_v4, %v6768_v24  ;;  %8865 = vcosq.f32 %v6506_v51 }
 0x869   : > { %v16489_v45 = vand.u32 2147483647, %v14028_v39  ;;  %v6401_v21 = vsel %vm6316_vm11, %v6400_v37, %v14218_v11  ;;  %v14606_v56 = vadd.f32 %v16492_v16, %v14592_v28  ;;  %8867 = vsinq.f32 %v6506_v51 }
 0x86a   : > { %v6511_v38 = vadd.s32 3, %v6507_v5  ;;  %v6590_v30 = vclz %v8286_v52  ;;  %v6789_v31 = vsel %vm6787_vm6, %v6788_v18, %v14549_v7  ;;  %v6694_v20 = vclz %v8290_v36 }
 0x86b   : > { %vm14599_vm14 = vcmp.le.f32.partialorder %v16489_v45, 0.7853982  ;;  %16493 = vst [vmem:[#allocation27_spill] sm:$0xff] %v14606_v56  ;;  %v8298_v13 = vmin.u32 %v6900_v35, %v14562_v9  ;;  %v6785_v60 = vmul.u32 %v6778_v53, %v6769_v19  ;;  %v6965_v54 = vshrl.u32 %v16134_v25, %v14590_v1 }
 0x86c   : > { %v6399_v2 = vsel %vm6316_vm11, %v6398_v62, %v6397_v48  ;;  %v6403_v11 = vsel %vm14599_vm14, 0, %v6401_v21  ;;  %v16074_v59 = vand.u32 2147483647, %v14473_v34  ;;  %v6968_v40 = vshrl.u32 %v16135_v26, %v14590_v1 }
 0x86d   : > { %v14617_v44 = vadd.s32 %v6789_v31, %v6785_v60  ;;  %v14619_v37 = vshrl.u32 %v6950_v55, 5  ;;  %v6964_v7 = vshll.u32 %v16337_v57, %v6952_v0  ;;  %v7045_v53 = vand.u32 2139095040, %v14606_v56 }
 0x86e   : > { %v6956_v4 = vshrl.u32 %v16335_v41, %v14590_v1  ;;  %v6959_v48 = vshrl.u32 %v16336_v17, %v14590_v1  ;;  %v6962_v24 = vshrl.u32 %v16337_v57, %v14590_v1  ;;  %v6967_v51 = vshll.u32 %v16134_v25, %v6952_v0 }
 0x86f   : > { %v8287_v5 = vadd.s32 4294967294, %v6590_v30  ;;  %v8291_v52 = vadd.s32 4294967294, %v6694_v20  ;;  %v6902_v18 = vclz %v8298_v13  ;;  %v6966_v55 = vor.u32 %v6965_v54, %v6964_v7 }
 0x870   : > { %v6955_v36 = vshll.u32 %v16130_v6, %v6952_v0  ;;  %v6958_v35 = vshll.u32 %v16335_v41, %v6952_v0  ;;  %v6961_v62 = vshll.u32 %v16336_v17, %v6952_v0  ;;  %v6969_v19 = vor.u32 %v6968_v40, %v6967_v51 }
 0x871   : > { %v6791_v45 = vadd.s32 536870912, %v14617_v44  ;;  %v6945_v21 = vand.u32 8388607, %v16074_v59  ;;  %v7046_v16 = vshrl.u32 %v7045_v53, 23  ;;  %vm6973_vm4 = vcmp.lt.s32.totalorder %v14619_v37, 4 }
 0x872   : > { %v14636_v31 = vor.u32 %v6956_v4, %v6955_v36  ;;  %v14638_v60 = vor.u32 %v6959_v48, %v6958_v35  ;;  %v6963_v30 = vor.u32 %v6962_v24, %v6961_v62  ;;  %v8866_v20 = vpop.eup %8865  ;;  %v6512_v13 = vand.u32 3, %v6511_v38 }
 0x873   : > { %v6402_v0 = vsel %vm14599_vm14, %v14028_v39, %v6399_v2  ;;  %v6407_v54 = vadd.s32 3, %v6403_v11  ;;  %v6979_v40 = vsel %vm6973_vm4, %v6966_v55, 920167782  ;;  %v8868_v7 = vpop.eup %8867  ;;  %vm8288_vm5 = vcmp.lt.s32.totalorder %v8287_v5, 0 }
 0x874   : > { %vm8292_vm2 = vcmp.lt.s32.totalorder %v8291_v52, 0  ;;  %v8299_v53 = vadd.s32 4294967294, %v6902_v18  ;;  %v6983_v4 = vsel %vm6973_vm4, %v6969_v19, 1326507024  ;;  %v14648_v48 = vshrl.u32 %v6791_v45, 30 }
 0x875   : > { %vm6970_vm7 = vcmp.lt.s32.totalorder %v14619_v37, 1  ;;  %vm6972_vm8 = vcmp.lt.s32.totalorder %v14619_v37, 3  ;;  %v8305_v38 = vadd.s32 4294967169, %v7046_v16  ;;  %v6518_v23 = vxor.u32 2147483648, %v8866_v20 }
 0x876   : > { %v6946_v2 = vor.u32 8388608, %v6945_v21  ;;  %v6978_v11 = vsel %vm6970_vm7, %v14636_v31, %v14638_v60  ;;  %v6980_v24 = vsel %vm6972_vm8, %v6963_v30, %v6979_v40  ;;  %8869 = vcosq.f32 %v6402_v0 }
 0x877   : > { %v14658_v51 = vsel %vm8288_vm5, 0, %v8287_v5  ;;  %v6982_v18 = vsel %vm6970_vm7, %v14638_v60, %v6963_v30  ;;  %v6984_v36 = vsel %vm6972_vm8, %v6966_v55, %v6983_v4  ;;  %v6515_v35 = vxor.u32 2147483648, %v8868_v7 }
 0x878   : > { %vm6517_vm10 = vcmp.eq.s32.totalorder %v6512_v13, 2  ;;  %v14666_v62 = vsel %vm8292_vm2, 0, %v8291_v52  ;;  %vm6971_vm13 = vcmp.lt.s32.totalorder %v14619_v37, 2  ;;  %vm6510_vm0 = vweird.f32 %v13999_v50 }
 0x879   : > { %vm8300_vm9 = vcmp.lt.s32.totalorder %v8299_v53, 0  ;;  %v6793_v5 = vshll.u32 %v14648_v48, 30  ;;  %v6981_v19 = vsel %vm6971_vm13, %v6978_v11, %v6980_v24  ;;  %v7052_v45 = vadd.s32 1, %v8305_v38 }
 0x87a   : > { %8871 = vsinq.f32 %v6402_v0  ;;  %v6598_v21 = vsub.s32 4294967266, %v14658_v51  ;;  %v6985_v55 = vsel %vm6971_vm13, %v6982_v18, %v6984_v36  ;;  %v14676_v16 = vshll.u32 %v6946_v2, 8 }
 0x87b   : > { %vm6514_vm1 = vcmp.eq.s32.totalorder %v6512_v13, 0  ;;  %v6519_v52 = vsel %vm6517_vm10, %v6518_v23, %v8868_v7  ;;  %v14678_v40 = vand.u32 3, %v6407_v54  ;;  %v6702_v4 = vsub.s32 4294967266, %v14666_v62  ;;  %v14695_v54 = vpop.permute.xlu0 %7880  ;;  %v16495_v7 = vld [vmem:[#allocation26_spill] sm:$0xff]  ;;  %v16496_v23 = vld [vmem:[#allocation12_spill] sm:$0xff] }
 0x87c   : > { %v6516_v59 = vsel %vm6514_vm1, %v8866_v20, %v6515_v35  ;;  %v14681_v49 = vsel %vm8300_vm9, 0, %v8299_v53  ;;  %v14684_v11 = vmul.u32.u64.low %v14676_v16, %v6981_v19  ;;  %v14685_v38 = vmul.u32.u64.high %v14676_v16, %v6981_v19, %v14684_v11  ;;  %16494 = vst [vmem:[#allocation25_spill] sm:$0xff] %v14695_v54 }
 0x87d   : > { %v14689_v0 = vsub.s32 %v14617_v44, %v6793_v5  ;;  %v14692_v2 = vmul.u32.u64.low %v14676_v16, %v6985_v55  ;;  %v14693_v24 = vmul.u32.u64.high %v14676_v16, %v6985_v55, %v14692_v2  ;;  %vm7053_vm15 = vcmp.gt.s32.totalorder %v7052_v45, 0  ;;  %v14706_v5 = vpop.f32.mrb[23].mxu0 }
 0x87e   : > { %vm6513_vm12 = vcmp.lt.s32.totalorder %v6512_v13, 2  ;;  %vm6524_vm3 = vcmp.lt.s32.totalorder %v16495_v7, 0  ;;  %v6599_v20 = vadd.s32 127, %v6598_v21  ;;  %v6698_v53 = vsub.s32 32, %v14666_v62  ;;  %16498 = vst [vmem:[#allocation9_spill] sm:$0xff] %v14706_v5 }
 0x87f   : > { %v14701_v18 = vmul.f32 %v14695_v54, %v16496_v23  ;;  %v6520_v36 = vsel %vm6513_vm12, %v6516_v59, %v6519_v52  ;;  %vm6413_vm6 = vcmp.eq.s32.totalorder %v14678_v40, 2  ;;  %v6578_v44 = vadd.s32 %v14317_v43, %v14331_v10  ;;  %v16499_v10 = vld [vmem:[#allocation24_spill] sm:$0xff] }
 0x880   : > { %v6703_v35 = vadd.s32 127, %v6702_v4  ;;  %v6682_v13 = vadd.s32 %v14371_v61, %v14381_v46  ;;  %v6910_v19 = vsub.s32 4294967266, %v14681_v49  ;;  %v6975_v21 = vsel %vm6973_vm4, %v6963_v30, 2102212464  ;;  %v14714_v2 = vpop.eup %8869 }
 0x881   : > { %16497 = vst [vmem:[#allocation22_spill] sm:$0xff] %v14701_v18  ;;  %v7054_v55 = vsel %vm7053_vm15, %v7052_v45, 0  ;;  %v6594_v59 = vsub.s32 32, %v14658_v51  ;;  %v6796_v52 = vsub.s32 0, %v14689_v0  ;;  %v6954_v43 = vshrl.u32 %v16130_v6, %v14590_v1 }
 0x882   : > { %v14722_v4 = vadd.f32 %v16499_v10, %v14592_v28  ;;  %v14726_v61 = vsel %vm6510_vm0, nan, %v6520_v36  ;;  %v6600_v46 = vshll.u32 %v6599_v20, 23  ;;  %v6608_v30 = vsub.s32 4, %v14509_v12 }
 0x883   : > { %v6700_v45 = vshrl.u32 %v6682_v13, %v6698_v53  ;;  %v6704_v23 = vshll.u32 %v6703_v35, 23  ;;  %v6974_v3 = vsel %vm6970_vm7, %v6954_v43, %v14636_v31  ;;  %v6976_v1 = vsel %vm6972_vm8, %v14638_v60, %v6975_v21 }
 0x884   : > { %16500 = vst [vmem:[#allocation32_spill] sm:$0xff] %v14722_v4  ;;  %v7056_v5 = vand.u32 31, %v7054_v55  ;;  %v14735_v10 = vpop.eup %8871  ;;  %v6414_v50 = vxor.u32 2147483648, %v14714_v2  ;;  %v6699_v20 = vshll.u32 %v14546_v14, %v14666_v62  ;;  %v6911_v36 = vadd.s32 127, %v6910_v19 }
 0x885   : > { %v6996_v53 = vadd.s32 1, %v14685_v38  ;;  %v6596_v35 = vshrl.u32 %v6578_v44, %v6594_v59  ;;  %v8294_v13 = vmin.u32 %v6796_v52, %v14689_v0  ;;  %vm6995_vm11 = vc.u32 %v14693_v24, %v14684_v11 }
 0x886   : > { %v7253_v31 = vand.u32 2139095040, %v14722_v4  ;;  %v14745_v60 = vor.u32 4788187, %v6600_v46  ;;  %v14750_v21 = vsel %vm6524_vm3, %v6608_v30, %v14509_v12  ;;  %v6701_v43 = vor.u32 %v6700_v45, %v6699_v20 }
 0x887   : > { %v6977_v14 = vsel %vm6971_vm13, %v6974_v3, %v6976_v1  ;;  %v6595_v44 = vshll.u32 %v14543_v15, %v14658_v51  ;;  %v6705_v19 = vor.u32 4788187, %v6704_v23  ;;  %v14757_v59 = vsub.s32 32, %v7056_v5 }
 0x888   : > { %v14762_v52 = vsel %vm6413_vm6, %v6414_v50, %v14735_v10  ;;  %v6906_v12 = vsub.s32 32, %v14681_v49  ;;  %v6912_v46 = vshll.u32 %v6911_v36, 23  ;;  %v6997_v30 = vsel %vm6995_vm11, %v6996_v53, %v14685_v38  ;;  %v16501_v50 = vld [vmem:[#allocation17_spill] sm:$0xff] }
 0x889   : > { %v6597_v37 = vor.u32 %v6596_v35, %v6595_v44  ;;  %v6798_v3 = vclz %v8294_v13  ;;  %v6993_v45 = vmul.u32 %v14676_v16, %v6977_v14  ;;  %v7254_v1 = vshrl.u32 %v7253_v31, 23 }
 0x88a   : > { %v6602_v15 = vand.u32 2147483647, %v14745_v60  ;;  %v6708_v51 = vcvt.s32.f32 %v6701_v43  ;;  %v6712_v23 = vsub.s32 4, %v14511_v42  ;;  %v6890_v20 = vadd.s32 %v14426_v47, %v14435_v58 }
 0x88b   : > { %vm6628_vm14 = vcmp.lt.s32.totalorder %v16501_v50, 0  ;;  %v6706_v62 = vand.u32 2147483647, %v6705_v19  ;;  %v14772_v22 = vadd.s32 %v6997_v30, %v6993_v45  ;;  %v7069_v38 = vshrl.u32 %v16134_v25, %v14757_v59 }
 0x88c   : > { %v8313_v36 = vadd.s32 4294967169, %v7254_v1  ;;  %v6907_v16 = vshll.u32 %v14562_v9, %v14681_v49  ;;  %v6908_v53 = vshrl.u32 %v6890_v20, %v6906_v12  ;;  %v6913_v35 = vor.u32 4788187, %v6912_v46 }
 0x88d   : > { %v8295_v31 = vadd.s32 4294967294, %v6798_v3  ;;  %v7060_v47 = vshrl.u32 %v16335_v41, %v14757_v59  ;;  %v7068_v58 = vshll.u32 %v16337_v57, %v7056_v5  ;;  %v7072_v60 = vshrl.u32 %v16135_v26, %v14757_v59 }
 0x88e   : > { %vm6410_vm4 = vcmp.eq.s32.totalorder %v14678_v40, 0  ;;  %v16502_v43 = vand.u32 2147483647, %v16501_v50  ;;  %v14791_v49 = vshrl.u32 %v7054_v55, 5  ;;  %v7063_v9 = vshrl.u32 %v16336_v17, %v14757_v59 }
 0x88f   : > { %v7066_v44 = vshrl.u32 %v16337_v57, %v14757_v59  ;;  %v7260_v19 = vadd.s32 1, %v8313_v36  ;;  %v6999_v12 = vadd.s32 536870912, %v14772_v22  ;;  %v7059_v46 = vshll.u32 %v16130_v6, %v7056_v5  ;;  %v14808_v36 = vpop.f32.mrb[23].mxu1 }
 0x890   : > { %vm14787_vm5 = vcmp.le.f32.partialorder %v16502_v43, 0.7853982  ;;  %v7070_v30 = vor.u32 %v7069_v38, %v7068_v58  ;;  %v7071_v3 = vshll.u32 %v16134_v25, %v7056_v5  ;;  %v16505_v45 = vand.u32 2147483647, %v16495_v7  ;;  %16508 = vst [vmem:[#allocation11_spill] sm:$0xff] %v14808_v36 }
 0x891   : > { %v6709_v55 = vmul.f32 %v6708_v51, %v6706_v62  ;;  %v6909_v20 = vor.u32 %v6908_v53, %v6907_v16  ;;  %v7062_v43 = vshll.u32 %v16335_v41, %v7056_v5  ;;  %v7065_v13 = vshll.u32 %v16336_v17, %v7056_v5 }
 0x892   : > { %vm14802_vm2 = vcmp.le.f32.partialorder %v16505_v45, 0.7853982  ;;  %v6604_v18 = vcvt.s32.f32 %v6597_v37  ;;  %v16509_v34 = vand.u32 2147483647, %v14606_v56  ;;  %v14812_v58 = vor.u32 %v7060_v47, %v7059_v46 }
 0x893   : > { %v7073_v29 = vor.u32 %v7072_v60, %v7071_v3  ;;  %vm6409_vm7 = vcmp.lt.s32.totalorder %v14678_v40, 2  ;;  %v14815_v45 = vor.u32 %v7063_v9, %v7062_v43  ;;  %v7067_v54 = vor.u32 %v7066_v44, %v7065_v13 }
 0x894   : > { %v7049_v38 = vand.u32 8388607, %v16509_v34  ;;  %vm7077_vm8 = vcmp.lt.s32.totalorder %v14791_v49, 4  ;;  %vm7261_vm10 = vcmp.gt.s32.totalorder %v7260_v19, 0  ;;  %v6914_v62 = vand.u32 2147483647, %v6913_v35 }
 0x895   : > { %vm8296_vm13 = vcmp.lt.s32.totalorder %v8295_v31, 0  ;;  %v14818_v5 = vshrl.u32 %v6999_v12, 30  ;;  %v7083_v37 = vsel %vm7077_vm8, %v7070_v30, 920167782  ;;  %v6605_v51 = vmul.f32 %v6604_v18, %v6602_v15 }
 0x896   : > { %v6710_v34 = vxor.u32 2147483648, %v6709_v55  ;;  %v6713_v16 = vsel %vm6628_vm14, %v6712_v23, %v14511_v42  ;;  %v6916_v53 = vcvt.s32.f32 %v6909_v20  ;;  %vm6836_vm0 = vcmp.lt.s32.totalorder %v14231_v33, 0 }
 0x897   : > { %vm7074_vm9 = vcmp.lt.s32.totalorder %v14791_v49, 1  ;;  %vm7076_vm1 = vcmp.lt.s32.totalorder %v14791_v49, 3  ;;  %v7087_v35 = vsel %vm7077_vm8, %v7073_v29, 1326507024  ;;  %v7262_v13 = vsel %vm7261_vm10, %v7260_v19, 0 }
 0x898   : > { %v14830_v47 = vsel %vm8296_vm13, 0, %v8295_v31  ;;  %v7050_v60 = vor.u32 8388608, %v7049_v38  ;;  %v7082_v18 = vsel %vm7074_vm9, %v14812_v58, %v14815_v45  ;;  %v7084_v42 = vsel %vm7076_vm1, %v7067_v54, %v7083_v37 }
 0x899   : > { %v16510_v15 = vxor.u32 2147483648, %v14735_v10  ;;  %v6715_v29 = vsel %vm14787_vm5, 0, %v6713_v16  ;;  %v6917_v31 = vmul.f32 %v6916_v53, %v6914_v62  ;;  %v7001_v9 = vshll.u32 %v14818_v5, 30 }
 0x89a   : > { %vm7075_vm15 = vcmp.lt.s32.totalorder %v14791_v49, 2  ;;  %v7086_v44 = vsel %vm7074_vm9, %v14815_v45, %v7067_v54  ;;  %v7088_v19 = vsel %vm7076_vm1, %v7070_v30, %v7087_v35  ;;  %v7264_v10 = vand.u32 31, %v7262_v13  ;;  %v16511_v30 = vld [vmem:[#allocation16_spill] sm:$0xff] }
 0x89b   : > { %v6412_v23 = vsel %vm6410_vm4, %v14714_v2, %v16510_v15  ;;  %v6606_v12 = vxor.u32 2147483648, %v6605_v51  ;;  %v6806_v46 = vsub.s32 4294967266, %v14830_v47  ;;  %v7085_v3 = vsel %vm7075_vm15, %v7082_v18, %v7084_v42 }
 0x89c   : > { %v6711_v20 = vsel %vm6628_vm14, %v6710_v34, %v6709_v55  ;;  %v6920_v43 = vsub.s32 4, %v14533_v8  ;;  %v14861_v38 = vshll.u32 %v7050_v60, 8  ;;  %v14865_v62 = vadd.f32 %v16511_v30, %v14592_v28 }
 0x89d   : > { %v14870_v37 = vsel %vm6409_vm7, %v6412_v23, %v14762_v52  ;;  %v14872_v16 = vadd.s32 3, %v6715_v29  ;;  %v6918_v53 = vxor.u32 2147483648, %v6917_v31  ;;  %v7089_v35 = vsel %vm7075_vm15, %v7086_v44, %v7088_v19 }
 0x89e   : > { %16512 = vst [vmem:[#allocation10_spill] sm:$0xff] %v14865_v62  ;;  %v14877_v55 = vsub.s32 %v14772_v22, %v7001_v9  ;;  %v14880_v34 = vmul.u32.u64.low %v14861_v38, %v7085_v3  ;;  %v14881_v60 = vmul.u32.u64.high %v14861_v38, %v7085_v3, %v14880_v34  ;;  %v14884_v18 = vsub.s32 32, %v7264_v10 }
 0x89f   : > { %v14888_v40 = vsel %vm6524_vm3, %v6606_v12, %v6605_v51  ;;  %v14893_v52 = vsel %vm14787_vm5, %v16501_v50, %v6711_v20  ;;  %v6802_v42 = vsub.s32 32, %v14830_v47  ;;  %v6807_v22 = vadd.s32 127, %v6806_v46 }
 0x8a0   : > { %v14899_v15 = vsel %vm6836_vm0, %v6920_v43, %v14533_v8  ;;  %v14902_v23 = vmul.u32.u64.low %v14861_v38, %v7089_v35  ;;  %v14903_v29 = vmul.u32.u64.high %v14861_v38, %v7089_v35, %v14902_v23  ;;  %v7149_v51 = vand.u32 2139095040, %v14865_v62 }
 0x8a1   : > { %v16513_v9 = vand.u32 2147483647, %v14231_v33  ;;  %v6919_v44 = vsel %vm6836_vm0, %v6918_v53, %v6917_v31  ;;  %v6786_v19 = vadd.s32 %v14548_v27, %v14554_v63  ;;  %v7058_v8 = vshrl.u32 %v16130_v6, %v14757_v59 }
 0x8a2   : > { %v7079_v12 = vsel %vm7077_vm8, %v7067_v54, 2102212464  ;;  %v6803_v46 = vshll.u32 %v14689_v0, %v14830_v47  ;;  %v7004_v3 = vsub.s32 0, %v14877_v55  ;;  %v16082_v20 = vand.u32 2147483647, %v14722_v4 }
 0x8a3   : > { %vm14908_vm12 = vcmp.le.f32.partialorder %v16513_v9, 0.7853982  ;;  %v7277_v43 = vshrl.u32 %v16134_v25, %v14884_v18  ;;  %v6804_v31 = vshrl.u32 %v6786_v19, %v6802_v42  ;;  %v6808_v30 = vshll.u32 %v6807_v22, 23 }
 0x8a4   : > { %v7078_v27 = vsel %vm7074_vm9, %v7058_v8, %v14812_v58  ;;  %v7280_v63 = vshrl.u32 %v16135_v26, %v14884_v18  ;;  %v7080_v0 = vsel %vm7076_vm1, %v14815_v45, %v7079_v12  ;;  %v14934_v54 = vshrl.u32 %v7262_v13, 5 }
 0x8a5   : > { %v7276_v59 = vshll.u32 %v16337_v57, %v7264_v10  ;;  %v7150_v47 = vshrl.u32 %v7149_v51, 23  ;;  %v7268_v53 = vshrl.u32 %v16335_v41, %v14884_v18  ;;  %v7271_v35 = vshrl.u32 %v16336_v17, %v14884_v18 }
 0x8a6   : > { %v7274_v58 = vshrl.u32 %v16337_v57, %v14884_v18  ;;  %v7279_v42 = vshll.u32 %v16134_v25, %v7264_v10  ;;  %v8302_v22 = vmin.u32 %v7004_v3, %v14877_v55  ;;  %v7100_v45 = vadd.s32 1, %v14881_v60 }
 0x8a7   : > { %v7278_v13 = vor.u32 %v7277_v43, %v7276_v59  ;;  %v8309_v23 = vadd.s32 4294967169, %v7150_v47  ;;  %v7267_v9 = vshll.u32 %v16130_v6, %v7264_v10  ;;  %v7270_v51 = vshll.u32 %v16335_v41, %v7264_v10 }
 0x8a8   : > { %v7273_v19 = vshll.u32 %v16336_v17, %v7264_v10  ;;  %v7281_v8 = vor.u32 %v7280_v63, %v7279_v42  ;;  %v7081_v12 = vsel %vm7075_vm15, %v7078_v27, %v7080_v0  ;;  %vm7099_vm3 = vc.u32 %v14903_v29, %v14880_v34 }
 0x8a9   : > { %v7257_v3 = vand.u32 8388607, %v16082_v20  ;;  %v7156_v2 = vadd.s32 1, %v8309_v23  ;;  %v14955_v36 = vor.u32 %v7268_v53, %v7267_v9  ;;  %v14957_v43 = vor.u32 %v7271_v35, %v7270_v51 }
 0x8aa   : > { %v7275_v59 = vor.u32 %v7274_v58, %v7273_v19  ;;  %vm7285_vm6 = vcmp.lt.s32.totalorder %v14934_v54, 4  ;;  %v6922_v10 = vsel %vm14908_vm12, %v14231_v33, %v6919_v44  ;;  %v6923_v49 = vsel %vm14908_vm12, 0, %v14899_v15 }
 0x8ab   : > { %v7291_v27 = vsel %vm7285_vm6, %v7278_v13, 920167782  ;;  %vm7157_vm11 = vcmp.gt.s32.totalorder %v7156_v2, 0  ;;  %v6805_v63 = vor.u32 %v6804_v31, %v6803_v46  ;;  %v6809_v0 = vor.u32 4788187, %v6808_v30 }
 0x8ac   : > { %v7101_v47 = vsel %vm7099_vm3, %v7100_v45, %v14881_v60  ;;  %v7295_v53 = vsel %vm7285_vm6, %v7281_v8, 1326507024  ;;  %v7097_v35 = vmul.u32 %v14861_v38, %v7081_v12  ;;  %vm7282_vm14 = vcmp.lt.s32.totalorder %v14934_v54, 1 }
 0x8ad   : > { %vm7284_vm4 = vcmp.lt.s32.totalorder %v14934_v54, 3  ;;  %v7158_v44 = vsel %vm7157_vm11, %v7156_v2, 0  ;;  %v7006_v14 = vclz %v8302_v22  ;;  %v7258_v15 = vor.u32 8388608, %v7257_v3 }
 0x8ae   : > { %v7290_v46 = vsel %vm7282_vm14, %v14955_v36, %v14957_v43  ;;  %v7292_v60 = vsel %vm7284_vm4, %v7275_v59, %v7291_v27  ;;  %v14980_v31 = vadd.s32 %v7101_v47, %v7097_v35  ;;  %v7294_v38 = vsel %vm7282_vm14, %v14957_v43, %v7275_v59 }
 0x8af   : > { %v7296_v30 = vsel %vm7284_vm4, %v7278_v13, %v7295_v53  ;;  %v7160_v2 = vand.u32 31, %v7158_v44  ;;  %v14991_v58 = vsel %vm14802_vm2, %v16495_v7, %v14888_v40  ;;  %8873 = vcosq.f32 %v14893_v52 }
 0x8b0   : > { %v14995_v42 = vand.u32 3, %v14872_v16  ;;  %vm7283_vm5 = vcmp.lt.s32.totalorder %v14934_v54, 2  ;;  %8875 = vsinq.f32 %v14893_v52  ;;  %v16081_v45 = vand.u32 2147483647, %v14865_v62 }
 0x8b1   : > { %v7293_v22 = vsel %vm7283_vm5, %v7290_v46, %v7292_v60  ;;  %v15002_v13 = vsub.s32 32, %v7160_v2  ;;  %8877 = vcosq.f32 %v6922_v10  ;;  %v15004_v23 = vadd.s32 3, %v6923_v49 }
 0x8b2   : > { %v7297_v40 = vsel %vm7283_vm5, %v7294_v38, %v7296_v30  ;;  %v15008_v9 = vshll.u32 %v7258_v15, 8  ;;  %v6810_v16 = vand.u32 2147483647, %v6809_v0  ;;  %v6812_v51 = vcvt.s32.f32 %v6805_v63 }
 0x8b3   : > { %v15010_v19 = vadd.s32 4294967294, %v7006_v14  ;;  %v7103_v52 = vadd.s32 536870912, %v14980_v31  ;;  %v7164_v3 = vshrl.u32 %v16335_v41, %v15002_v13  ;;  %v7167_v49 = vshrl.u32 %v16336_v17, %v15002_v13 }
 0x8b4   : > { %v15014_v8 = vmul.u32.u64.low %v15008_v9, %v7293_v22  ;;  %v15015_v12 = vmul.u32.u64.high %v15008_v9, %v7293_v22, %v15014_v8  ;;  %v15023_v27 = vmul.u32.u64.low %v15008_v9, %v7297_v40  ;;  %v15024_v47 = vmul.u32.u64.high %v15008_v9, %v7297_v40, %v15023_v27 }
 0x8b5   : > { %v7153_v63 = vand.u32 8388607, %v16081_v45  ;;  %v7170_v0 = vshrl.u32 %v16337_v57, %v15002_v13  ;;  %v7163_v53 = vshll.u32 %v16130_v6, %v7160_v2  ;;  %v7166_v35 = vshll.u32 %v16335_v41, %v7160_v2 }
 0x8b6   : > { %v7172_v14 = vshll.u32 %v16337_v57, %v7160_v2  ;;  %v7173_v15 = vshrl.u32 %v16134_v25, %v15002_v13  ;;  %v15035_v46 = vshrl.u32 %v7103_v52, 30  ;;  %v15037_v60 = vshrl.u32 %v7158_v44, 5 }
 0x8b7   : > { %v7169_v38 = vshll.u32 %v16336_v17, %v7160_v2  ;;  %v7176_v30 = vshrl.u32 %v16135_v26, %v15002_v13  ;;  %v15042_v22 = vor.u32 %v7164_v3, %v7163_v53  ;;  %v15044_v40 = vor.u32 %v7167_v49, %v7166_v35  ;;  %v16516_v3 = vld [vmem:[#allocation31_spill] sm:$0xff] }
 0x8b8   : > { %v7174_v27 = vor.u32 %v7173_v15, %v7172_v14  ;;  %v7175_v45 = vshll.u32 %v16134_v25, %v7160_v2  ;;  %8879 = vsinq.f32 %v6922_v10  ;;  %v7287_v20 = vsel %vm7285_vm6, %v7275_v59, 2102212464 }
 0x8b9   : > { %v7154_v52 = vor.u32 8388608, %v7153_v63  ;;  %v7171_v7 = vor.u32 %v7170_v0, %v7169_v38  ;;  %v15049_v44 = vpop.eup %8873  ;;  %v6813_v62 = vmul.f32 %v6812_v51, %v6810_v16  ;;  %v7266_v4 = vshrl.u32 %v16130_v6, %v14884_v18 }
 0x8ba   : > { %v7177_v56 = vor.u32 %v7176_v30, %v7175_v45  ;;  %v15055_v49 = vadd.f32 %v16516_v3, %v14592_v28  ;;  %v8876_v53 = vpop.eup %8875  ;;  %vm8304_vm7 = vcmp.lt.s32.totalorder %v15010_v19, 0  ;;  %v7105_v10 = vshll.u32 %v15035_v46, 30 }
 0x8bb   : > { %vm7178_vm8 = vcmp.lt.s32.totalorder %v15037_v60, 1  ;;  %vm7181_vm10 = vcmp.lt.s32.totalorder %v15037_v60, 4  ;;  %v15061_v59 = vpop.eup %8877  ;;  %vm6732_vm13 = vcmp.lt.s32.totalorder %v14256_v32, 0  ;;  %v7286_v18 = vsel %vm7282_vm14, %v7266_v4, %v14955_v36 }
 0x8bc   : > { %16517 = vst [vmem:[#allocation5_spill] sm:$0xff] %v15055_v49  ;;  %v7288_v28 = vsel %vm7284_vm4, %v14957_v43, %v7287_v20  ;;  %v7186_v2 = vsel %vm7178_vm8, %v15042_v22, %v15044_v40  ;;  %v7187_v45 = vsel %vm7181_vm10, %v7174_v27, 920167782  ;;  %v7308_v16 = vadd.s32 1, %v15015_v12 }
 0x8bd   : > { %vm7180_vm0 = vcmp.lt.s32.totalorder %v15037_v60, 3  ;;  %v7190_v4 = vsel %vm7178_vm8, %v15044_v40, %v7171_v7  ;;  %v15081_v36 = vshll.u32 %v7154_v52, 8  ;;  %vm6722_vm9 = vcmp.eq.s32.totalorder %v14995_v42, 0 }
 0x8be   : > { %vm7179_vm1 = vcmp.lt.s32.totalorder %v15037_v60, 2  ;;  %v7188_v20 = vsel %vm7180_vm0, %v7171_v7, %v7187_v45  ;;  %v7191_v43 = vsel %vm7181_vm10, %v7177_v56, 1326507024  ;;  %v7357_v51 = vand.u32 2139095040, %v15055_v49 }
 0x8bf   : > { %v16518_v63 = vand.u32 2147483647, %v14256_v32  ;;  %v7289_v35 = vsel %vm7283_vm5, %v7286_v18, %v7288_v28  ;;  %vm7307_vm12 = vc.u32 %v15024_v47, %v15014_v8  ;;  %v7189_v14 = vsel %vm7179_vm1, %v7186_v2, %v7188_v20 }
 0x8c0   : > { %v7192_v56 = vsel %vm7180_vm0, %v7174_v27, %v7191_v43  ;;  %v15107_v38 = vmul.u32.u64.low %v15081_v36, %v7189_v14  ;;  %v15108_v30 = vmul.u32.u64.high %v15081_v36, %v7189_v14, %v15107_v38  ;;  %v7358_v52 = vshrl.u32 %v7357_v51, 23 }
 0x8c1   : > { %vm15092_vm15 = vcmp.le.f32.partialorder %v16518_v63, 0.7853982  ;;  %v7193_v15 = vsel %vm7179_vm1, %v7190_v4, %v7192_v56  ;;  %8881 = vcosq.f32 %v14991_v58  ;;  %v6814_v54 = vxor.u32 2147483648, %v6813_v62 }
 0x8c2   : > { %v15113_v3 = vmul.u32.u64.low %v15081_v36, %v7193_v15  ;;  %v15114_v18 = vmul.u32.u64.high %v15081_v36, %v7193_v15, %v15113_v3  ;;  %vm6721_vm3 = vcmp.lt.s32.totalorder %v14995_v42, 2  ;;  %v6928_v27 = vand.u32 3, %v15004_v23  ;;  %v8880_v4 = vpop.eup %8879 }
 0x8c3   : > { %v15121_v28 = vsel %vm8304_vm7, 0, %v15010_v19  ;;  %v7309_v2 = vsel %vm7307_vm12, %v7308_v16, %v15015_v12  ;;  %v8317_v45 = vadd.s32 4294967169, %v7358_v52  ;;  %v6723_v20 = vxor.u32 2147483648, %v8876_v53 }
 0x8c4   : > { %v6726_v43 = vxor.u32 2147483648, %v15049_v44  ;;  %v7305_v51 = vmul.u32 %v15008_v9, %v7289_v35  ;;  %v7183_v63 = vsel %vm7181_vm10, %v7171_v7, 2102212464  ;;  %8883 = vsinq.f32 %v14991_v58 }
 0x8c5   : > { %vm6725_vm6 = vcmp.eq.s32.totalorder %v14995_v42, 2  ;;  %v15131_v23 = vsub.s32 %v14980_v31, %v7105_v10  ;;  %v7162_v19 = vshrl.u32 %v16130_v6, %v15002_v13  ;;  %v6934_v12 = vxor.u32 2147483648, %v15061_v59 }
 0x8c6   : > { %v6815_v16 = vsel %vm6732_vm13, %v6814_v54, %v6813_v62  ;;  %v7014_v9 = vsub.s32 4294967266, %v15121_v28  ;;  %v15139_v35 = vadd.s32 %v7309_v2, %v7305_v51  ;;  %vm6406_vm11 = vweird.f32 %v14028_v39  ;;  %v15166_v2 = vpop.permute.xlu1 %6017 }
 0x8c7   : > { %vm6718_vm14 = vweird.f32 %v16501_v50  ;;  %v6931_v7 = vxor.u32 2147483648, %v8880_v4  ;;  %v7182_v31 = vsel %vm7178_vm8, %v7162_v19, %v15042_v22  ;;  %v7184_v58 = vsel %vm7180_vm0, %v15044_v40, %v7183_v63 }
 0x8c8   : > { %v7364_v13 = vadd.s32 1, %v8317_v45  ;;  %v6724_v62 = vsel %vm6722_vm9, %v15049_v44, %v6723_v20  ;;  %v6727_v10 = vsel %vm6725_vm6, %v6726_v43, %v8876_v53  ;;  %vm6930_vm4 = vcmp.eq.s32.totalorder %v6928_v27, 0 }
 0x8c9   : > { %v7204_v14 = vadd.s32 1, %v15108_v30  ;;  %v6816_v56 = vsub.s32 4, %v14648_v48  ;;  %v6818_v15 = vsel %vm15092_vm15, %v14256_v32, %v6815_v16  ;;  %v7108_v22 = vsub.s32 0, %v15131_v23 }
 0x8ca   : > { %vm7203_vm5 = vc.u32 %v15114_v18, %v15107_v38  ;;  %vm6933_vm7 = vcmp.eq.s32.totalorder %v6928_v27, 2  ;;  %v7015_v40 = vadd.s32 127, %v7014_v9  ;;  %v7311_v52 = vadd.s32 536870912, %v15139_v35 }
 0x8cb   : > { %v7185_v44 = vsel %vm7179_vm1, %v7182_v31, %v7184_v58  ;;  %vm6929_vm8 = vcmp.lt.s32.totalorder %v6928_v27, 2  ;;  %v6932_v53 = vsel %vm6930_vm4, %v15061_v59, %v6931_v7  ;;  %v6935_v54 = vsel %vm6933_vm7, %v6934_v12, %v8880_v4  ;;  %v15164_v3 = vpop.eup %8881 }
 0x8cc   : > { %vm7365_vm10 = vcmp.gt.s32.totalorder %v7364_v13, 0  ;;  %16521 = vst [vmem:[#allocation19_spill] sm:$0xff] %v15164_v3  ;;  %v6728_v45 = vsel %vm6721_vm3, %v6724_v62, %v6727_v10  ;;  %8885 = vcosq.f32 %v6818_v15  ;;  %v7010_v20 = vsub.s32 32, %v15121_v28  ;;  %v16527_v10 = vld [vmem:[#allocation14_spill] sm:$0xff] }
 0x8cd   : > { %v7205_v43 = vsel %vm7203_vm5, %v7204_v14, %v15108_v30  ;;  %v6817_v60 = vsel %vm6732_vm13, %v6816_v56, %v14648_v48  ;;  %v6994_v59 = vadd.s32 %v14684_v11, %v14693_v24  ;;  %v8306_v27 = vmin.u32 %v7108_v22, %v15131_v23  ;;  %v16523_v30 = vld [vmem:[#allocation25_spill] sm:$0xff] }
 0x8ce   : > { %v7201_v4 = vmul.u32 %v15081_v36, %v7185_v44  ;;  %v6936_v51 = vsel %vm6929_vm8, %v6932_v53, %v6935_v54  ;;  %v7016_v63 = vshll.u32 %v7015_v40, 23  ;;  %v15179_v42 = vshrl.u32 %v7311_v52, 30  ;;  %v15181_v12 = vpop.eup %8883 }
 0x8cf   : > { %v7366_v19 = vsel %vm7365_vm10, %v7364_v13, 0  ;;  %16522 = vst [vmem:[#allocation28_spill] sm:$0xff] %v15181_v12  ;;  %v7900_v16 = vmul.f32 %v16523_v30, %v14726_v61  ;;  %v16524_v48 = vsel %vm14802_vm2, 0, %v14750_v21  ;;  %vm6926_vm13 = vweird.f32 %v14231_v33  ;;  %v15200_v13 = vpop.permute.xlu1 %7885 }
 0x8d0   : > { %v6615_v9 = vadd.s32 3, %v16524_v48  ;;  %v15190_v11 = vadd.s32 %v7205_v43, %v7201_v4  ;;  %v6417_v24 = vsel %vm6406_vm11, nan, %v14870_v37  ;;  %v6729_v36 = vsel %vm6718_vm14, nan, %v6728_v45  ;;  %16525 = vst [vmem:[#allocation18_spill] sm:$0xff] %v15200_v13 }
 0x8d1   : > { %v6819_v7 = vsel %vm15092_vm15, 0, %v6817_v60  ;;  %v7012_v61 = vshrl.u32 %v6994_v59, %v7010_v20  ;;  %v6937_v31 = vsel %vm6926_vm13, nan, %v6936_v51  ;;  %v7024_v1 = vsub.s32 4, %v14818_v5  ;;  %v16534_v59 = vld [vmem:[#allocation22_spill] sm:$0xff] }
 0x8d2   : > { %v7110_v21 = vclz %v8306_v27  ;;  %v7368_v58 = vand.u32 31, %v7366_v19  ;;  %8887 = vsinq.f32 %v6818_v15  ;;  %v7011_v33 = vshll.u32 %v14877_v55, %v15121_v28  ;;  %v16529_v15 = vld [vmem:[#allocation6_spill] sm:$0xff] }
 0x8d3   : > { %v7017_v39 = vor.u32 4788187, %v7016_v63  ;;  %v7313_v37 = vshll.u32 %v15179_v42, 30  ;;  %v15205_v50 = vand.u32 3, %v6615_v9  ;;  %v7902_v0 = vmul.f32 %v15200_v13, %v6729_v36 }
 0x8d4   : > { %v7207_v62 = vadd.s32 536870912, %v15190_v11  ;;  %v15211_v14 = vadd.f32 %v16527_v10, %v15166_v2  ;;  %v7904_v56 = vmul.f32 %v15200_v13, %v6937_v31  ;;  %v6823_v22 = vadd.s32 3, %v6819_v7 }
 0x8d5   : > { %16526 = vst [vmem:[#allocation34_spill] sm:$0xff] %v15205_v50  ;;  %vm6940_vm2 = vcmp.lt.s32.totalorder %v16529_v15, 0  ;;  %v7013_v40 = vor.u32 %v7012_v61, %v7011_v33  ;;  %v15216_v55 = vmul.f32 %v16523_v30, %v6417_v24  ;;  %v8307_v52 = vadd.s32 4294967294, %v7110_v21 }
 0x8d6   : > { %16528 = vst [vmem:[#allocation7_spill] sm:$0xff] %v15211_v14  ;;  %v15221_v28 = vsel %vm6940_vm2, %v7024_v1, %v14818_v5  ;;  %v15223_v44 = vsub.s32 32, %v7368_v58  ;;  %v15225_v53 = vpop.eup %8885  ;;  %v16531_v45 = vand.u32 2147483647, %v16529_v15  ;;  %v7018_v43 = vand.u32 2147483647, %v7017_v39 }
 0x8d7   : > { %16530 = vst [vmem:[#allocation15_spill] sm:$0xff] %v15216_v55  ;;  %v15235_v60 = vsub.s32 %v15139_v35, %v7313_v37  ;;  %v15239_v27 = vadd.f32 %v7902_v0, %v16534_v59  ;;  %v15241_v4 = vshrl.u32 %v7207_v62, 30  ;;  %v7461_v51 = vand.u32 2139095040, %v15211_v14 }
 0x8d8   : > { %vm15230_vm0 = vcmp.le.f32.partialorder %v16531_v45, 0.7853982  ;;  %v15244_v63 = vadd.f32 %v7904_v56, %v7900_v16  ;;  %v15246_v48 = vand.u32 3, %v6823_v22  ;;  %v7020_v9 = vcvt.s32.f32 %v7013_v40 }
 0x8d9   : > { %16535 = vst [vmem:[#allocation35_spill] sm:$0xff] %v15239_v27  ;;  %16536 = vst [vmem:[#allocation38_spill] sm:$0xff] %v15241_v4  ;;  %v6830_v35 = vxor.u32 2147483648, %v15225_v53  ;;  %v7098_v36 = vadd.s32 %v14880_v34, %v14903_v29  ;;  %vm8308_vm9 = vcmp.lt.s32.totalorder %v8307_v52, 0  ;;  %v7381_v7 = vshrl.u32 %v16134_v25, %v15223_v44 }
 0x8da   : > { %16537 = vst [vmem:[#allocation29_spill] sm:$0xff] %v15244_v63  ;;  %v7021_v61 = vmul.f32 %v7020_v9, %v7018_v43  ;;  %v7316_v16 = vsub.s32 0, %v15235_v60  ;;  %v16090_v31 = vand.u32 2147483647, %v15055_v49  ;;  %v7380_v1 = vshll.u32 %v16337_v57, %v7368_v58 }
 0x8db   : > { %v7209_v21 = vshll.u32 %v15241_v4, 30  ;;  %v7372_v33 = vshrl.u32 %v16335_v41, %v15223_v44  ;;  %v7384_v39 = vshrl.u32 %v16135_v26, %v15223_v44  ;;  %v7462_v34 = vshrl.u32 %v7461_v51, 23 }
 0x8dc   : > { %v8888_v29 = vpop.eup %8887  ;;  %vm6826_vm1 = vcmp.eq.s32.totalorder %v15246_v48, 0  ;;  %vm6829_vm15 = vcmp.eq.s32.totalorder %v15246_v48, 2  ;;  %v15266_v37 = vsel %vm8308_vm9, 0, %v8307_v52  ;;  %v15268_v0 = vshrl.u32 %v7366_v19, 5 }
 0x8dd   : > { %v7375_v62 = vshrl.u32 %v16336_v17, %v15223_v44  ;;  %v7378_v10 = vshrl.u32 %v16337_v57, %v15223_v44  ;;  %v7371_v56 = vshll.u32 %v16130_v6, %v7368_v58  ;;  %v7382_v22 = vor.u32 %v7381_v7, %v7380_v1 }
 0x8de   : > { %v7383_v40 = vshll.u32 %v16134_v25, %v7368_v58  ;;  %v8321_v45 = vadd.s32 4294967169, %v7462_v34  ;;  %v8314_v43 = vmin.u32 %v7316_v16, %v15235_v60  ;;  %v7361_v52 = vand.u32 8388607, %v16090_v31 }
 0x8df   : > { %v7374_v19 = vshll.u32 %v16335_v41, %v7368_v58  ;;  %v7377_v59 = vshll.u32 %v16336_v17, %v7368_v58  ;;  %v6827_v51 = vxor.u32 2147483648, %v8888_v29  ;;  %v15282_v9 = vsub.s32 %v15190_v11, %v7209_v21 }
 0x8e0   : > { %v7373_v54 = vor.u32 %v7372_v33, %v7371_v56  ;;  %v7385_v5 = vor.u32 %v7384_v39, %v7383_v40  ;;  %vm7389_vm12 = vcmp.lt.s32.totalorder %v15268_v0, 4  ;;  %v7468_v1 = vadd.s32 1, %v8321_v45 }
 0x8e1   : > { %v7376_v24 = vor.u32 %v7375_v62, %v7374_v19  ;;  %v7379_v7 = vor.u32 %v7378_v10, %v7377_v59  ;;  %v7022_v34 = vxor.u32 2147483648, %v7021_v61  ;;  %v7114_v16 = vsub.s32 32, %v15266_v37 }
 0x8e2   : > { %v7118_v31 = vsub.s32 4294967266, %v15266_v37  ;;  %v7395_v30 = vsel %vm7389_vm12, %v7382_v22, 920167782  ;;  %v7318_v58 = vclz %v8314_v43  ;;  %v7362_v3 = vor.u32 8388608, %v7361_v52 }
 0x8e3   : > { %v16094_v11 = vand.u32 2147483647, %v15211_v14  ;;  %vm7469_vm3 = vcmp.gt.s32.totalorder %v7468_v1, 0  ;;  %vm7386_vm6 = vcmp.lt.s32.totalorder %v15268_v0, 1  ;;  %vm7388_vm11 = vcmp.lt.s32.totalorder %v15268_v0, 3 }
 0x8e4   : > { %v7399_v21 = vsel %vm7389_vm12, %v7385_v5, 1326507024  ;;  %v7470_v33 = vsel %vm7469_vm3, %v7468_v1, 0  ;;  %v7212_v39 = vsub.s32 0, %v15282_v9  ;;  %v7394_v62 = vsel %vm7386_vm6, %v7373_v54, %v7376_v24 }
 0x8e5   : > { %v7396_v10 = vsel %vm7388_vm11, %v7379_v7, %v7395_v30  ;;  %v7472_v56 = vand.u32 31, %v7470_v33  ;;  %v15302_v40 = vsel %vm6826_vm1, %v15225_v53, %v6827_v51  ;;  %v15306_v45 = vsel %vm6829_vm15, %v6830_v35, %v8888_v29 }
 0x8e6   : > { %v15310_v5 = vsel %vm6940_vm2, %v7022_v34, %v7021_v61  ;;  %v15312_v43 = vshrl.u32 %v7098_v36, %v7114_v16  ;;  %vm7387_vm14 = vcmp.lt.s32.totalorder %v15268_v0, 2  ;;  %v7398_v30 = vsel %vm7386_vm6, %v7376_v24, %v7379_v7 }
 0x8e7   : > { %v7400_v52 = vsel %vm7388_vm11, %v7382_v22, %v7399_v21  ;;  %v7473_v53 = vsub.s32 32, %v7472_v56  ;;  %v15319_v19 = vadd.s32 127, %v7118_v31  ;;  %v15321_v59 = vadd.s32 4294967294, %v7318_v58 }
 0x8e8   : > { %v7397_v35 = vsel %vm7387_vm14, %v7394_v62, %v7396_v10  ;;  %v15325_v61 = vshll.u32 %v7362_v3, 8  ;;  %v8310_v36 = vmin.u32 %v7212_v39, %v15282_v9  ;;  %v7370_v29 = vshrl.u32 %v16130_v6, %v15223_v44 }
 0x8e9   : > { %v7465_v51 = vand.u32 8388607, %v16094_v11  ;;  %v7476_v22 = vshrl.u32 %v16335_v41, %v7473_v53  ;;  %v7401_v31 = vsel %vm7387_vm14, %v7398_v30, %v7400_v52  ;;  %v7479_v1 = vshrl.u32 %v16336_v17, %v7473_v53  ;;  %v16538_v30 = vld [vmem:[#allocation8_spill] sm:$0xff] }
 0x8ea   : > { %v7482_v34 = vshrl.u32 %v16337_v57, %v7473_v53  ;;  %v7485_v3 = vshrl.u32 %v16134_v25, %v7473_v53  ;;  %v15339_v16 = vmul.u32.u64.low %v15325_v61, %v7397_v35  ;;  %v15340_v58 = vmul.u32.u64.high %v15325_v61, %v7397_v35, %v15339_v16 }
 0x8eb   : > { %v7475_v44 = vshll.u32 %v16130_v6, %v7472_v56  ;;  %v7478_v21 = vshll.u32 %v16335_v41, %v7472_v56  ;;  %v7471_v39 = vshrl.u32 %v7470_v33, 5  ;;  %v7481_v62 = vshll.u32 %v16336_v17, %v7472_v56 }
 0x8ec   : > { %v7484_v10 = vshll.u32 %v16337_v57, %v7472_v56  ;;  %v15349_v52 = vadd.f32 %v16538_v30, %v15166_v2  ;;  %v7391_v11 = vsel %vm7389_vm12, %v7379_v7, 2102212464  ;;  %v7466_v12 = vor.u32 8388608, %v7465_v51 }
 0x8ed   : > { %v7477_v35 = vor.u32 %v7476_v22, %v7475_v44  ;;  %v7480_v63 = vor.u32 %v7479_v1, %v7478_v21  ;;  %v7483_v27 = vor.u32 %v7482_v34, %v7481_v62  ;;  %v7487_v50 = vshll.u32 %v16134_v25, %v7472_v56 }
 0x8ee   : > { %v7486_v55 = vor.u32 %v7485_v3, %v7484_v10  ;;  %v7488_v33 = vshrl.u32 %v16135_v26, %v7473_v53  ;;  %vm6825_vm4 = vcmp.lt.s32.totalorder %v15246_v48, 2  ;;  %v7214_v49 = vclz %v8310_v36 }
 0x8ef   : > { %v7390_v14 = vsel %vm7386_vm6, %v7370_v29, %v7373_v54  ;;  %v15359_v30 = vmul.u32.u64.low %v15325_v61, %v7401_v31  ;;  %v15360_v4 = vmul.u32.u64.high %v15325_v61, %v7401_v31, %v15359_v30  ;;  %v7392_v7 = vsel %vm7388_vm11, %v7376_v24, %v7391_v11 }
 0x8f0   : > { %v7489_v51 = vor.u32 %v7488_v33, %v7487_v50  ;;  %vm7490_vm5 = vcmp.lt.s32.totalorder %v7471_v39, 1  ;;  %v7669_v22 = vand.u32 2139095040, %v15349_v52  ;;  %vm7492_vm7 = vcmp.lt.s32.totalorder %v7471_v39, 3 }
 0x8f1   : > { %vm7493_vm8 = vcmp.lt.s32.totalorder %v7471_v39, 4  ;;  %v7498_v56 = vsel %vm7490_vm5, %v7477_v35, %v7480_v63  ;;  %v7506_v1 = vshll.u32 %v7466_v12, 8  ;;  %v7502_v54 = vsel %vm7490_vm5, %v7480_v63, %v7483_v27 }
 0x8f2   : > { %v7495_v36 = vsel %vm7493_vm8, %v7483_v27, 2102212464  ;;  %v7499_v34 = vsel %vm7493_vm8, %v7486_v55, 920167782  ;;  %v7503_v29 = vsel %vm7493_vm8, %v7489_v51, 1326507024  ;;  %v7474_v31 = vshrl.u32 %v16130_v6, %v7473_v53 }
 0x8f3   : > { %vm7491_vm10 = vcmp.lt.s32.totalorder %v7471_v39, 2  ;;  %v7500_v3 = vsel %vm7492_vm7, %v7483_v27, %v7499_v34  ;;  %v7504_v50 = vsel %vm7492_vm7, %v7486_v55, %v7503_v29  ;;  %v8311_v24 = vadd.s32 4294967294, %v7214_v49 }
 0x8f4   : > { %v7501_v11 = vsel %vm7491_vm10, %v7498_v56, %v7500_v3  ;;  %v7505_v44 = vsel %vm7491_vm10, %v7502_v54, %v7504_v50  ;;  %v7670_v21 = vshrl.u32 %v7669_v22, 23  ;;  %v7494_v12 = vsel %vm7490_vm5, %v7474_v31, %v7477_v35 }
 0x8f5   : > { %v7496_v62 = vsel %vm7492_vm7, %v7480_v63, %v7495_v36  ;;  %v15374_v10 = vmul.u32.u64.low %v7506_v1, %v7505_v44  ;;  %v15375_v33 = vmul.u32.u64.high %v7506_v1, %v7505_v44, %v15374_v10  ;;  %v7412_v53 = vadd.s32 1, %v15340_v58 }
 0x8f6   : > { %v15378_v30 = vmul.u32.u64.low %v7506_v1, %v7501_v11  ;;  %v15379_v51 = vmul.u32.u64.high %v7506_v1, %v7501_v11, %v15378_v30  ;;  %v8329_v55 = vadd.s32 4294967169, %v7670_v21  ;;  %v16539_v49 = vsel %vm15230_vm0, 0, %v15221_v28 }
 0x8f7   : > { %v15386_v27 = vadd.s32 3, %v16539_v49  ;;  %v7115_v35 = vshll.u32 %v15131_v23, %v15266_v37  ;;  %v7120_v63 = vshll.u32 %v15319_v19, 23  ;;  %vm7411_vm13 = vc.u32 %v15360_v4, %v15339_v16 }
 0x8f8   : > { %v15397_v22 = vsel %vm6825_vm4, %v15302_v40, %v15306_v45  ;;  %v7393_v56 = vsel %vm7387_vm14, %v7390_v14, %v7392_v7  ;;  %v7497_v28 = vsel %vm7491_vm10, %v7494_v12, %v7496_v62  ;;  %v7676_v36 = vadd.s32 1, %v8329_v55 }
 0x8f9   : > { %v7026_v23 = vsel %vm15230_vm0, %v16529_v15, %v15310_v5  ;;  %v7117_v37 = vor.u32 %v15312_v43, %v7115_v35  ;;  %vm8316_vm2 = vcmp.lt.s32.totalorder %v15321_v59, 0  ;;  %vm8312_vm9 = vcmp.lt.s32.totalorder %v8311_v24, 0 }
 0x8fa   : > { %v7413_v48 = vsel %vm7411_vm13, %v7412_v53, %v15340_v58  ;;  %vm7515_vm1 = vc.u32 %v15375_v33, %v15378_v30  ;;  %v7516_v14 = vadd.s32 1, %v15379_v51  ;;  %vm7677_vm15 = vcmp.gt.s32.totalorder %v7676_v36, 0 }
 0x8fb   : > { %v7121_v0 = vor.u32 4788187, %v7120_v63  ;;  %v7409_v40 = vmul.u32 %v15325_v61, %v7393_v56  ;;  %v7513_v45 = vmul.u32 %v7506_v1, %v7497_v28  ;;  %v7678_v19 = vsel %vm7677_vm15, %v7676_v36, 0 }
 0x8fc   : > { %v15415_v5 = vsel %vm8316_vm2, 0, %v15321_v59  ;;  %v7517_v43 = vsel %vm7515_vm1, %v7516_v14, %v15379_v51  ;;  %v7680_v39 = vand.u32 31, %v7678_v19  ;;  %8889 = vcosq.f32 %v7026_v23 }
 0x8fd   : > { %v15418_v58 = vsel %vm8312_vm9, 0, %v8311_v24  ;;  %v15420_v7 = vadd.s32 %v7413_v48, %v7409_v40  ;;  %v7518_v34 = vadd.s32 %v7517_v43, %v7513_v45  ;;  %8891 = vsinq.f32 %v7026_v23  ;;  %v16540_v40 = vld [vmem:[#allocation27_spill] sm:$0xff] }
 0x8fe   : > { %v7306_v61 = vadd.s32 %v15014_v8, %v15024_v47  ;;  %v16104_v1 = vand.u32 2147483647, %v15349_v52  ;;  %v7681_v54 = vsub.s32 32, %v7680_v39  ;;  %v7122_v29 = vand.u32 2147483647, %v7121_v0 }
 0x8ff   : > { %v7124_v31 = vcvt.s32.f32 %v7117_v37  ;;  %v7322_v59 = vsub.s32 32, %v15415_v5  ;;  %v7519_v3 = vadd.s32 536870912, %v7518_v34  ;;  %v7326_v50 = vsub.s32 4294967266, %v15415_v5 }
 0x900   : > { %v7222_v24 = vsub.s32 4294967266, %v15418_v58  ;;  %v7684_v11 = vshrl.u32 %v16335_v41, %v7681_v54  ;;  %v7687_v44 = vshrl.u32 %v16336_v17, %v7681_v54  ;;  %v7415_v21 = vadd.s32 536870912, %v15420_v7 }
 0x901   : > { %v15431_v12 = vshrl.u32 %v7519_v3, 30  ;;  %v7683_v8 = vshll.u32 %v16130_v6, %v7680_v39  ;;  %v7690_v47 = vshrl.u32 %v16337_v57, %v7681_v54  ;;  %v7673_v62 = vand.u32 8388607, %v16104_v1 }
 0x902   : > { %v7686_v10 = vshll.u32 %v16335_v41, %v7680_v39  ;;  %v7692_v53 = vshll.u32 %v16337_v57, %v7680_v39  ;;  %v7693_v51 = vshrl.u32 %v16134_v25, %v7681_v54  ;;  %v7679_v49 = vshrl.u32 %v7678_v19, 5 }
 0x903   : > { %v7521_v55 = vshll.u32 %v15431_v12, 30  ;;  %v7685_v35 = vor.u32 %v7684_v11, %v7683_v8  ;;  %v7689_v63 = vshll.u32 %v16336_v17, %v7680_v39  ;;  %v7695_v36 = vshll.u32 %v16134_v25, %v7680_v39  ;;  %v16542_v39 = vld [vmem:[#allocation32_spill] sm:$0xff]  ;;  %v16545_v8 = vld [vmem:[#allocation9_spill] sm:$0xff] }
 0x904   : > { %v7688_v56 = vor.u32 %v7687_v44, %v7686_v10  ;;  %v7694_v28 = vor.u32 %v7693_v51, %v7692_v53  ;;  %v7696_v23 = vshrl.u32 %v16135_v26, %v7681_v54  ;;  %v15444_v37 = vmul.f32 %v7124_v31, %v7122_v29 }
 0x905   : > { %v7336_v48 = vsub.s32 4, %v15179_v42  ;;  %v15447_v14 = vsub.s32 %v7518_v34, %v7521_v55  ;;  %v7691_v0 = vor.u32 %v7690_v47, %v7689_v63  ;;  %vm7044_vm0 = vcmp.lt.s32.totalorder %v16540_v40, 0 }
 0x906   : > { %v7324_v45 = vshrl.u32 %v7306_v61, %v7322_v59  ;;  %v7327_v19 = vadd.s32 127, %v7326_v50  ;;  %v7202_v43 = vadd.s32 %v15107_v38, %v15114_v18  ;;  %v7697_v3 = vor.u32 %v7696_v23, %v7695_v36  ;;  %v15452_v11 = vpop.eup %8889 }
 0x907   : > { %16541 = vst [vmem:[#allocation36_spill] sm:$0xff] %v15452_v11  ;;  %vm7252_vm12 = vcmp.lt.s32.totalorder %v16542_v39, 0  ;;  %v7223_v44 = vadd.s32 127, %v7222_v24  ;;  %v15455_v29 = vshrl.u32 %v7415_v21, 30  ;;  %vm7698_vm3 = vcmp.lt.s32.totalorder %v7679_v49, 1  ;;  %v15457_v34 = vpop.eup %8891 }
 0x908   : > { %vm7701_vm6 = vcmp.lt.s32.totalorder %v7679_v49, 4  ;;  %16544 = vst [vmem:[#allocation23_spill] sm:$0xff] %v15457_v34  ;;  %v7674_v31 = vor.u32 8388608, %v7673_v62  ;;  %vm7700_vm11 = vcmp.lt.s32.totalorder %v7679_v49, 3  ;;  %v7706_v61 = vsel %vm7698_vm3, %v7685_v35, %v7688_v56 }
 0x909   : > { %16543 = vst [vmem:[#allocation33_spill] sm:$0xff] %v15455_v29  ;;  %v7707_v59 = vsel %vm7701_vm6, %v7694_v28, 920167782  ;;  %v7524_v50 = vsub.s32 0, %v15447_v14  ;;  %v7682_v38 = vshrl.u32 %v16130_v6, %v7681_v54  ;;  %v15465_v24 = vadd.f32 %v16545_v8, %v15166_v2 }
 0x90a   : > { %v7708_v18 = vsel %vm7700_vm11, %v7691_v0, %v7707_v59  ;;  %vm6822_vm14 = vweird.f32 %v14256_v32  ;;  %v16546_v21 = vand.u32 2147483647, %v16540_v40  ;;  %vm7699_vm5 = vcmp.lt.s32.totalorder %v7679_v49, 2 }
 0x90b   : > { %v7703_v62 = vsel %vm7701_vm6, %v7691_v0, 2102212464  ;;  %v7710_v10 = vsel %vm7698_vm3, %v7688_v56, %v7691_v0  ;;  %v7711_v53 = vsel %vm7701_vm6, %v7697_v3, 1326507024  ;;  %v7328_v54 = vshll.u32 %v7327_v19, 23 }
 0x90c   : > { %vm15470_vm4 = vcmp.le.f32.partialorder %v16546_v21, 0.7853982  ;;  %v7218_v51 = vsub.s32 32, %v15418_v58  ;;  %v7224_v55 = vshll.u32 %v7223_v44, 23  ;;  %v7709_v63 = vsel %vm7699_vm5, %v7706_v61, %v7708_v18 }
 0x90d   : > { %v16549_v36 = vand.u32 2147483647, %v16542_v39  ;;  %v7417_v59 = vshll.u32 %v15455_v29, 30  ;;  %v7702_v8 = vsel %vm7698_vm3, %v7682_v38, %v7685_v35  ;;  %v7712_v21 = vsel %vm7700_vm11, %v7694_v28, %v7711_v53 }
 0x90e   : > { %v7714_v0 = vshll.u32 %v7674_v31, 8  ;;  %v8322_v19 = vmin.u32 %v7524_v50, %v15447_v14  ;;  %v7704_v3 = vsel %vm7700_vm11, %v7688_v56, %v7703_v62  ;;  %v7713_v44 = vsel %vm7699_vm5, %v7710_v10, %v7712_v21 }
 0x90f   : > { %vm15479_vm7 = vcmp.le.f32.partialorder %v16549_v36, 0.7853982  ;;  %v7565_v61 = vand.u32 2139095040, %v15465_v24  ;;  %v7126_v35 = vxor.u32 2147483648, %v15444_v37  ;;  %v16552_v28 = vsub.s32 4, %v15035_v46 }
 0x910   : > { %v15490_v18 = vmul.u32.u64.low %v7714_v0, %v7713_v44  ;;  %v15491_v36 = vmul.u32.u64.high %v7714_v0, %v7713_v44, %v15490_v18  ;;  %v15493_v1 = vmul.u32.u64.low %v7714_v0, %v7709_v63  ;;  %v15494_v20 = vmul.u32.u64.high %v7714_v0, %v7709_v63, %v15493_v1 }
 0x911   : > { %v7129_v31 = vsel %vm7044_vm0, %v16552_v28, %v15035_v46  ;;  %v7220_v56 = vshrl.u32 %v7202_v43, %v7218_v51  ;;  %v7566_v50 = vshrl.u32 %v7565_v61, 23  ;;  %v7323_v38 = vshll.u32 %v15235_v60, %v15415_v5 }
 0x912   : > { %v7329_v62 = vor.u32 4788187, %v7328_v54  ;;  %v7337_v10 = vsel %vm7252_vm12, %v7336_v48, %v15179_v42  ;;  %v7705_v53 = vsel %vm7699_vm5, %v7702_v8, %v7704_v3  ;;  %v7219_v63 = vshll.u32 %v15282_v9, %v15418_v58 }
 0x913   : > { %v7225_v21 = vor.u32 4788187, %v7224_v55  ;;  %v15512_v44 = vsub.s32 %v15420_v7, %v7417_v59  ;;  %v8325_v46 = vadd.s32 4294967169, %v7566_v50  ;;  %v7325_v43 = vor.u32 %v7324_v45, %v7323_v38 }
 0x914   : > { %v7526_v51 = vclz %v8322_v19  ;;  %vm7723_vm8 = vc.u32 %v15491_v36, %v15493_v1  ;;  %v7724_v60 = vadd.s32 1, %v15494_v20  ;;  %v6833_v42 = vsel %vm6822_vm14, nan, %v15397_v22 }
 0x915   : > { %v7131_v5 = vsel %vm15470_vm4, 0, %v7129_v31  ;;  %v7221_v9 = vor.u32 %v7220_v56, %v7219_v63  ;;  %v7721_v58 = vmul.u32 %v7714_v0, %v7705_v53  ;;  %v7127_v7 = vsel %vm7044_vm0, %v7126_v35, %v15444_v37 }
 0x916   : > { %v7330_v49 = vand.u32 2147483647, %v7329_v62  ;;  %v7725_v48 = vsel %vm7723_vm8, %v7724_v60, %v15494_v20  ;;  %v7572_v45 = vadd.s32 1, %v8325_v46  ;;  %v7339_v54 = vsel %vm15479_vm7, 0, %v7337_v10 }
 0x917   : > { %v7226_v55 = vand.u32 2147483647, %v7225_v21  ;;  %v7420_v32 = vsub.s32 0, %v15512_v44  ;;  %v7726_v22 = vadd.s32 %v7725_v48, %v7721_v58  ;;  %v7135_v59 = vadd.s32 3, %v7131_v5 }
 0x918   : > { %v7332_v8 = vcvt.s32.f32 %v7325_v43  ;;  %v8323_v19 = vadd.s32 4294967294, %v7526_v51  ;;  %vm7573_vm10 = vcmp.gt.s32.totalorder %v7572_v45, 0  ;;  %v15530_v0 = vmul.f32 %v15200_v13, %v6833_v42  ;;  %v16555_v43 = vld [vmem:[#allocation38_spill] sm:$0xff] }
 0x919   : > { %v15533_v37 = vand.u32 3, %v15386_v27  ;;  %v7228_v3 = vcvt.s32.f32 %v7221_v9  ;;  %v7727_v20 = vadd.s32 536870912, %v7726_v22  ;;  %v7130_v61 = vsel %vm15470_vm4, %v16540_v40, %v7127_v7 }
 0x91a   : > { %16553 = vst [vmem:[#allocation21_spill] sm:$0xff] %v15530_v0  ;;  %v15538_v18 = vmul.f32 %v7332_v8, %v7330_v49  ;;  %v7343_v35 = vadd.s32 3, %v7339_v54  ;;  %v7574_v28 = vsel %vm7573_vm10, %v7572_v45, 0  ;;  %v8318_v56 = vmin.u32 %v7420_v32, %v15512_v44 }
 0x91b   : > { %16554 = vst [vmem:[#allocation37_spill] sm:$0xff] %v15533_v37  ;;  %v15540_v31 = vmul.f32 %v7228_v3, %v7226_v55  ;;  %v15543_v50 = vshrl.u32 %v7727_v20, 30  ;;  %v7576_v38 = vand.u32 31, %v7574_v28  ;;  %v15546_v62 = vand.u32 3, %v7135_v59 }
 0x91c   : > { %vm8324_vm13 = vcmp.lt.s32.totalorder %v8323_v19, 0  ;;  %v16105_v10 = vand.u32 2147483647, %v15465_v24  ;;  %8893 = vcosq.f32 %v7130_v61  ;;  %v15552_v46 = vand.u32 3, %v7343_v35 }
 0x91d   : > { %v7729_v53 = vshll.u32 %v15543_v50, 30  ;;  %v7577_v63 = vsub.s32 32, %v7576_v38  ;;  %8895 = vsinq.f32 %v7130_v61  ;;  %v7422_v42 = vclz %v8318_v56 }
 0x91e   : > { %v15556_v5 = vsel %vm8324_vm13, 0, %v8323_v19  ;;  %v7569_v58 = vand.u32 8388607, %v16105_v10  ;;  %v7579_v54 = vshll.u32 %v16130_v6, %v7576_v38  ;;  %v7582_v55 = vshll.u32 %v16335_v41, %v7576_v38  ;;  %v16556_v19 = vld [vmem:[#allocation11_spill] sm:$0xff] }
 0x91f   : > { %v15558_v9 = vsub.s32 %v7726_v22, %v7729_v53  ;;  %v7580_v7 = vshrl.u32 %v16335_v41, %v7577_v63  ;;  %v7583_v49 = vshrl.u32 %v16336_v17, %v7577_v63  ;;  %v7586_v48 = vshrl.u32 %v16337_v57, %v7577_v63 }
 0x920   : > { %v7589_v32 = vshrl.u32 %v16134_v25, %v7577_v63  ;;  %v7575_v59 = vshrl.u32 %v7574_v28, 5  ;;  %v7585_v22 = vshll.u32 %v16336_v17, %v7576_v38  ;;  %v7588_v8 = vshll.u32 %v16337_v57, %v7576_v38  ;;  %v16557_v28 = vld [vmem:[#allocation10_spill] sm:$0xff] }
 0x921   : > { %v7732_v45 = vsub.s32 0, %v15558_v9  ;;  %v15573_v3 = vadd.f32 %v16556_v19, %v15166_v2  ;;  %v8319_v20 = vadd.s32 4294967294, %v7422_v42  ;;  %v7581_v35 = vor.u32 %v7580_v7, %v7579_v54 }
 0x922   : > { %v7584_v56 = vor.u32 %v7583_v49, %v7582_v55  ;;  %v7587_v53 = vor.u32 %v7586_v48, %v7585_v22  ;;  %v7590_v27 = vor.u32 %v7589_v32, %v7588_v8  ;;  %v7591_v47 = vshll.u32 %v16134_v25, %v7576_v38 }
 0x923   : > { %v8330_v61 = vmin.u32 %v7732_v45, %v15558_v9  ;;  %v7592_v10 = vshrl.u32 %v16135_v26, %v7577_v63  ;;  %vm7148_vm2 = vcmp.lt.s32.totalorder %v16557_v28, 0  ;;  %v7530_v60 = vsub.s32 32, %v15556_v5 }
 0x924   : > { %v7534_v21 = vsub.s32 4294967266, %v15556_v5  ;;  %v7570_v2 = vor.u32 8388608, %v7569_v58  ;;  %v7578_v42 = vshrl.u32 %v16130_v6, %v7577_v63  ;;  %vm7594_vm9 = vcmp.lt.s32.totalorder %v7575_v59, 1 }
 0x925   : > { %v7734_v51 = vclz %v8330_v61  ;;  %v7593_v19 = vor.u32 %v7592_v10, %v7591_v47  ;;  %v7773_v7 = vand.u32 2139095040, %v15573_v3  ;;  %vm7596_vm1 = vcmp.lt.s32.totalorder %v7575_v59, 3 }
 0x926   : > { %v15583_v49 = vpop.eup %8893  ;;  %vm7597_vm15 = vcmp.lt.s32.totalorder %v7575_v59, 4  ;;  %v7602_v38 = vsel %vm7594_vm9, %v7581_v35, %v7584_v56  ;;  %v16558_v54 = vand.u32 2147483647, %v16557_v28  ;;  %v7606_v47 = vsel %vm7594_vm9, %v7584_v56, %v7587_v53 }
 0x927   : > { %v8331_v48 = vadd.s32 4294967294, %v7734_v51  ;;  %v15586_v45 = vpop.eup %8895  ;;  %v7599_v63 = vsel %vm7597_vm15, %v7587_v53, 2102212464  ;;  %v7603_v10 = vsel %vm7597_vm15, %v7590_v27, 920167782  ;;  %vm7595_vm6 = vcmp.lt.s32.totalorder %v7575_v59, 2 }
 0x928   : > { %vm15590_vm0 = vcmp.le.f32.partialorder %v16558_v54, 0.7853982  ;;  %v7607_v58 = vsel %vm7597_vm15, %v7593_v19, 1326507024  ;;  %v7604_v51 = vsel %vm7596_vm1, %v7587_v53, %v7603_v10  ;;  %v7535_v22 = vadd.s32 127, %v7534_v21 }
 0x929   : > { %vm8332_vm3 = vcmp.lt.s32.totalorder %v8331_v48, 0  ;;  %v7608_v32 = vsel %vm7596_vm1, %v7590_v27, %v7607_v58  ;;  %v7605_v8 = vsel %vm7595_vm6, %v7602_v38, %v7604_v51  ;;  %v7610_v54 = vshll.u32 %v7570_v2, 8 }
 0x92a   : > { %v7609_v61 = vsel %vm7595_vm6, %v7606_v47, %v7608_v32  ;;  %v7737_v13 = vsel %vm8332_vm3, 0, %v8331_v48  ;;  %v7598_v15 = vsel %vm7594_vm9, %v7578_v42, %v7581_v35  ;;  %v7600_v11 = vsel %vm7596_vm1, %v7584_v56, %v7599_v63 }
 0x92b   : > { %v7774_v34 = vshrl.u32 %v7773_v7, 23  ;;  %v15601_v0 = vmul.u32.u64.low %v7610_v54, %v7609_v61  ;;  %v15602_v19 = vmul.u32.u64.high %v7610_v54, %v7609_v61, %v15601_v0  ;;  %v7139_v27 = vxor.u32 2147483648, %v15586_v45 }
 0x92c   : > { %v15604_v37 = vmul.u32.u64.low %v7610_v54, %v7605_v8  ;;  %v15605_v29 = vmul.u32.u64.high %v7610_v54, %v7605_v8, %v15604_v37  ;;  %v7142_v21 = vxor.u32 2147483648, %v15583_v49  ;;  %vm8320_vm11 = vcmp.lt.s32.totalorder %v8319_v20, 0 }
 0x92d   : > { %v8333_v53 = vadd.s32 4294967169, %v7774_v34  ;;  %v16561_v2 = vsub.s32 4, %v16555_v43  ;;  %v7514_v0 = vadd.s32 %v15378_v30, %v15375_v33  ;;  %v7536_v56 = vshll.u32 %v7535_v22, 23 }
 0x92e   : > { %v7601_v42 = vsel %vm7595_vm6, %v7598_v15, %v7600_v11  ;;  %v16562_v7 = vxor.u32 2147483648, %v15538_v18  ;;  %v16563_v34 = vxor.u32 2147483648, %v15540_v31  ;;  %v15630_v10 = vsel %vm8320_vm11, 0, %v8319_v20 }
 0x92f   : > { %v15615_v35 = vsel %vm7148_vm2, %v16561_v2, %v16555_v43  ;;  %v7742_v43 = vsub.s32 4294967266, %v7737_v13  ;;  %v7780_v63 = vadd.s32 1, %v8333_v53  ;;  %v7532_v33 = vshrl.u32 %v7514_v0, %v7530_v60 }
 0x930   : > { %v7335_v48 = vsel %vm7252_vm12, %v16562_v7, %v15538_v18  ;;  %v7231_v38 = vsel %vm7148_vm2, %v16563_v34, %v15540_v31  ;;  %vm7619_vm14 = vc.u32 %v15602_v19, %v15604_v37  ;;  %v7620_v15 = vadd.s32 1, %v15605_v29 }
 0x931   : > { %v7235_v30 = vsel %vm15590_vm0, 0, %v15615_v35  ;;  %v7531_v11 = vshll.u32 %v15447_v14, %v15556_v5  ;;  %v7617_v18 = vmul.u32 %v7610_v54, %v7601_v42  ;;  %vm7781_vm12 = vcmp.gt.s32.totalorder %v7780_v63, 0 }
 0x932   : > { %v7537_v31 = vor.u32 4788187, %v7536_v56  ;;  %v7738_v59 = vsub.s32 32, %v7737_v13  ;;  %v7621_v20 = vsel %vm7619_vm14, %v7620_v15, %v15605_v29  ;;  %v7782_v47 = vsel %vm7781_vm12, %v7780_v63, 0 }
 0x933   : > { %v7234_v60 = vsel %vm15590_vm0, %v16557_v28, %v7231_v38  ;;  %v7426_v58 = vsub.s32 32, %v15630_v10  ;;  %v7743_v51 = vadd.s32 127, %v7742_v43  ;;  %v7622_v32 = vadd.s32 %v7621_v20, %v7617_v18 }
 0x934   : > { %v15648_v22 = vsel %vm15479_vm7, %v16542_v39, %v7335_v48  ;;  %v7533_v14 = vor.u32 %v7532_v33, %v7531_v11  ;;  %v7722_v5 = vadd.s32 %v15493_v1, %v15491_v36  ;;  %v7784_v8 = vand.u32 31, %v7782_v47 }
 0x935   : > { %v7410_v29 = vadd.s32 %v15339_v16, %v15360_v4  ;;  %v7430_v61 = vsub.s32 4294967266, %v15630_v10  ;;  %v7623_v54 = vadd.s32 536870912, %v7622_v32  ;;  %v7770_v53 = vand.u32 2147483647, %v15573_v3 }
 0x936   : > { %8897 = vcosq.f32 %v7234_v60  ;;  %v7538_v2 = vand.u32 2147483647, %v7537_v31  ;;  %v7740_v0 = vshrl.u32 %v7722_v5, %v7738_v59  ;;  %v7785_v56 = vsub.s32 32, %v7784_v8 }
 0x937   : > { %8899 = vsinq.f32 %v7234_v60  ;;  %v15656_v23 = vshrl.u32 %v7410_v29, %v7426_v58  ;;  %v7744_v42 = vshll.u32 %v7743_v51, 23  ;;  %v15658_v7 = vshrl.u32 %v7623_v54, 30  ;;  %v16564_v54 = vld [vmem:[#allocation7_spill] sm:$0xff] }
 0x938   : > { %v7540_v1 = vcvt.s32.f32 %v7533_v14  ;;  %v7739_v36 = vshll.u32 %v15558_v9, %v7737_v13  ;;  %v7788_v4 = vshrl.u32 %v16335_v41, %v7785_v56  ;;  %v7791_v16 = vshrl.u32 %v16336_v17, %v7785_v56 }
 0x939   : > { %v7431_v48 = vadd.s32 127, %v7430_v61  ;;  %v7625_v34 = vshll.u32 %v15658_v7, 30  ;;  %v7777_v38 = vand.u32 8388607, %v7770_v53  ;;  %v7794_v43 = vshrl.u32 %v16337_v57, %v7785_v56 }
 0x93a   : > { %v15667_v63 = vmul.f32 %v7540_v1, %v7538_v2  ;;  %v7741_v33 = vor.u32 %v7740_v0, %v7739_v36  ;;  %v7787_v15 = vshll.u32 %v16130_v6, %v7784_v8  ;;  %v7790_v11 = vshll.u32 %v16335_v41, %v7784_v8 }
 0x93b   : > { %v7745_v13 = vor.u32 4788187, %v7744_v42  ;;  %v15671_v9 = vsub.s32 %v7622_v32, %v7625_v34  ;;  %v7783_v18 = vshrl.u32 %v7782_v47, 5  ;;  %v7793_v31 = vshll.u32 %v16336_v17, %v7784_v8 }
 0x93c   : > { %v7789_v59 = vor.u32 %v7788_v4, %v7787_v15  ;;  %v7792_v20 = vor.u32 %v7791_v16, %v7790_v11  ;;  %v7796_v60 = vshll.u32 %v16337_v57, %v7784_v8  ;;  %v7797_v58 = vshrl.u32 %v16134_v25, %v7785_v56 }
 0x93d   : > { %v7628_v51 = vsub.s32 0, %v15671_v9  ;;  %v7795_v14 = vor.u32 %v7794_v43, %v7793_v31  ;;  %v7799_v5 = vshll.u32 %v16134_v25, %v7784_v8  ;;  %v7800_v29 = vshrl.u32 %v16135_v26, %v7785_v56 }
 0x93e   : > { %v7432_v41 = vshll.u32 %v7431_v48, 23  ;;  %v7542_v32 = vxor.u32 2147483648, %v15667_v63  ;;  %v7778_v61 = vor.u32 8388608, %v7777_v38  ;;  %v7798_v47 = vor.u32 %v7797_v58, %v7796_v60 }
 0x93f   : > { %vm7460_vm4 = vcmp.lt.s32.totalorder %v16564_v54, 0  ;;  %v8326_v17 = vmin.u32 %v7628_v51, %v15671_v9  ;;  %v7801_v2 = vor.u32 %v7800_v29, %v7799_v5  ;;  %vm7802_vm5 = vcmp.lt.s32.totalorder %v7783_v18, 1 }
 0x940   : > { %vm7805_vm7 = vcmp.lt.s32.totalorder %v7783_v18, 4  ;;  %v15682_v57 = vpop.eup %8897  ;;  %v7746_v0 = vand.u32 2147483647, %v7745_v13  ;;  %v7748_v42 = vcvt.s32.f32 %v7741_v33  ;;  %v7810_v25 = vsel %vm7802_vm5, %v7789_v59, %v7792_v20 }
 0x941   : > { %v7811_v26 = vsel %vm7805_vm7, %v7798_v47, 920167782  ;;  %v15686_v8 = vpop.eup %8899  ;;  %v7630_v1 = vclz %v8326_v17  ;;  %v7786_v36 = vshrl.u32 %v16130_v6, %v7785_v56  ;;  %vm7804_vm8 = vcmp.lt.s32.totalorder %v7783_v18, 3 }
 0x942   : > { %v7807_v4 = vsel %vm7805_vm7, %v7795_v14, 2102212464  ;;  %vm7803_vm10 = vcmp.lt.s32.totalorder %v7783_v18, 2  ;;  %v7812_v16 = vsel %vm7804_vm8, %v7795_v14, %v7811_v26  ;;  %v7814_v48 = vsel %vm7802_vm5, %v7792_v20, %v7795_v14 }
 0x943   : > { %v7818_v34 = vshll.u32 %v7778_v61, 8  ;;  %v8327_v38 = vadd.s32 4294967294, %v7630_v1  ;;  %v7806_v43 = vsel %vm7802_vm5, %v7786_v36, %v7789_v59  ;;  %v7813_v33 = vsel %vm7803_vm10, %v7810_v25, %v7812_v16  ;;  %v16568_v16 = vld [vmem:[#allocation5_spill] sm:$0xff] }
 0x944   : > { %v7815_v15 = vsel %vm7805_vm7, %v7801_v2, 1326507024  ;;  %v7808_v11 = vsel %vm7804_vm8, %v7792_v20, %v7807_v4  ;;  %vm7141_vm13 = vcmp.eq.s32.totalorder %v15546_v62, 2  ;;  %v7427_v6 = vshll.u32 %v15512_v44, %v15630_v10 }
 0x945   : > { %v7816_v13 = vsel %vm7804_vm8, %v7798_v47, %v7815_v15  ;;  %v15694_v31 = vmul.u32.u64.low %v7818_v34, %v7813_v33  ;;  %v15695_v60 = vmul.u32.u64.high %v7818_v34, %v7813_v33, %v15694_v31  ;;  %v7749_v56 = vmul.f32 %v7748_v42, %v7746_v0 }
 0x946   : > { %vm8328_vm2 = vcmp.lt.s32.totalorder %v8327_v38, 0  ;;  %v7817_v58 = vsel %vm7803_vm10, %v7814_v48, %v7816_v13  ;;  %v7433_v59 = vor.u32 4788187, %v7432_v41  ;;  %vm7138_vm9 = vcmp.eq.s32.totalorder %v15546_v62, 0 }
 0x947   : > { %v7633_v51 = vsel %vm8328_vm2, 0, %v8327_v38  ;;  %v15702_v14 = vmul.u32.u64.low %v7818_v34, %v7817_v58  ;;  %v15703_v5 = vmul.u32.u64.high %v7818_v34, %v7817_v58, %v15702_v14  ;;  %v7618_v20 = vadd.s32 %v15604_v37, %v15602_v19 }
 0x948   : > { %v7634_v29 = vsub.s32 32, %v7633_v51  ;;  %v7638_v61 = vsub.s32 4294967266, %v7633_v51  ;;  %v7809_v47 = vsel %vm7803_vm10, %v7806_v43, %v7808_v11  ;;  %8901 = vcosq.f32 %v15648_v22 }
 0x949   : > { %v7429_v44 = vor.u32 %v15656_v23, %v7427_v6  ;;  %v7543_v10 = vsel %vm7460_vm4, %v7542_v32, %v15667_v63  ;;  %v7828_v41 = vadd.s32 1, %v15695_v60  ;;  %v7750_v17 = vxor.u32 2147483648, %v7749_v56 }
 0x94a   : > { %v7635_v2 = vshll.u32 %v15671_v9, %v7633_v51  ;;  %v7636_v0 = vshrl.u32 %v7618_v20, %v7634_v29  ;;  %v7639_v42 = vadd.s32 127, %v7638_v61  ;;  %v7239_v37 = vadd.s32 3, %v7235_v30 }
 0x94b   : > { %v16565_v19 = vand.u32 2147483647, %v16564_v54  ;;  %v7825_v18 = vmul.u32 %v7818_v34, %v7809_v47  ;;  %vm7827_vm15 = vc.u32 %v15703_v5, %v15694_v31  ;;  %v7434_v63 = vand.u32 2147483647, %v7433_v59 }
 0x94c   : > { %v7637_v32 = vor.u32 %v7636_v0, %v7635_v2  ;;  %v7640_v9 = vshll.u32 %v7639_v42, 23  ;;  %v7829_v25 = vsel %vm7827_vm15, %v7828_v41, %v15695_v60  ;;  %8903 = vsinq.f32 %v15648_v22 }
 0x94d   : > { %vm15722_vm1 = vcmp.le.f32.partialorder %v16565_v19, 0.7853982  ;;  %vm7668_vm0 = vcmp.lt.s32.totalorder %v15349_v52, 0  ;;  %v7830_v35 = vadd.s32 %v7829_v25, %v7825_v18  ;;  %v7436_v30 = vcvt.s32.f32 %v7429_v44 }
 0x94e   : > { %v7546_v55 = vsel %vm15722_vm1, %v16564_v54, %v7543_v10  ;;  %v7544_v26 = vsub.s32 4, %v15431_v12  ;;  %v7751_v1 = vsel %vm7668_vm0, %v7750_v17, %v7749_v56  ;;  %v7641_v36 = vor.u32 4788187, %v7640_v9 }
 0x94f   : > { %v7143_v22 = vsel %vm7141_vm13, %v7142_v21, %v15586_v45  ;;  %v7240_v4 = vand.u32 3, %v7239_v37  ;;  %vm7356_vm3 = vcmp.lt.s32.totalorder %v16568_v16, 0  ;;  %v16569_v48 = vand.u32 2147483647, %v15349_v52 }
 0x950   : > { %v7831_v38 = vadd.s32 536870912, %v7830_v35  ;;  %v7437_v43 = vmul.f32 %v7436_v30, %v7434_v63  ;;  %8905 = vcosq.f32 %v7546_v55  ;;  %v7642_v33 = vand.u32 2147483647, %v7641_v36 }
 0x951   : > { %vm15745_vm6 = vcmp.le.f32.partialorder %v16569_v48, 0.7853982  ;;  %v7644_v15 = vcvt.s32.f32 %v7637_v32  ;;  %vm7137_vm11 = vcmp.lt.s32.totalorder %v15546_v62, 2  ;;  %v7140_v21 = vsel %vm7138_vm9, %v15583_v49, %v7139_v27 }
 0x952   : > { %8907 = vsinq.f32 %v7546_v55  ;;  %v7754_v11 = vsel %vm15745_vm6, %v15349_v52, %v7751_v1  ;;  %v15758_v13 = vshrl.u32 %v7831_v38, 30  ;;  %v7545_v60 = vsel %vm7460_vm4, %v7544_v26, %v15431_v12  ;;  %v8902_v58 = vpop.eup %8901  ;;  %v16578_v55 = vld [vmem:[#allocation33_spill] sm:$0xff] }
 0x953   : > { %v7752_v6 = vsub.s32 4, %v15543_v50  ;;  %v7645_v56 = vmul.f32 %v7644_v15, %v7642_v33  ;;  %v7648_v45 = vsub.s32 4, %v15658_v7  ;;  %vm7242_vm14 = vcmp.eq.s32.totalorder %v7240_v4, 0 }
 0x954   : > { %vm7245_vm12 = vcmp.eq.s32.totalorder %v7240_v4, 2  ;;  %v7246_v49 = vxor.u32 2147483648, %v15682_v57  ;;  %v7833_v27 = vshll.u32 %v15758_v13, 30  ;;  %vm7134_vm5 = vweird.f32 %v16540_v40 }
 0x955   : > { %v7243_v59 = vxor.u32 2147483648, %v15686_v8  ;;  %v7438_v51 = vxor.u32 2147483648, %v7437_v43  ;;  %8909 = vcosq.f32 %v7754_v11  ;;  %v7646_v14 = vxor.u32 2147483648, %v7645_v56 }
 0x956   : > { %v7547_v12 = vsel %vm15722_vm1, 0, %v7545_v60  ;;  %8911 = vsinq.f32 %v7754_v11  ;;  %vm7564_vm4 = vcmp.lt.s32.totalorder %v15465_v24, 0  ;;  %v15772_v20 = vsub.s32 %v7830_v35, %v7833_v27  ;;  %v8904_v41 = vpop.eup %8903 }
 0x957   : > { %vm7238_vm7 = vweird.f32 %v16557_v28  ;;  %v7753_v29 = vsel %vm7668_vm0, %v7752_v6, %v15543_v50  ;;  %v16572_v61 = vand.u32 2147483647, %v15465_v24  ;;  %v7647_v44 = vsel %vm7564_vm4, %v7646_v14, %v7645_v56 }
 0x958   : > { %v7649_v10 = vsel %vm7564_vm4, %v7648_v45, %v15658_v7  ;;  %v7350_v17 = vxor.u32 2147483648, %v8902_v58  ;;  %v7247_v2 = vsel %vm7245_vm12, %v7246_v49, %v15686_v8  ;;  %v7836_v50 = vsub.s32 0, %v15772_v20 }
 0x959   : > { %vm15780_vm8 = vcmp.le.f32.partialorder %v16572_v61, 0.7853982  ;;  %v7244_v42 = vsel %vm7242_vm14, %v15682_v57, %v7243_v59  ;;  %v7439_v37 = vsel %vm7356_vm3, %v7438_v51, %v7437_v43  ;;  %v7551_v19 = vadd.s32 3, %v7547_v12 }
 0x95a   : > { %v7650_v0 = vsel %vm15780_vm8, %v15465_v24, %v7647_v44  ;;  %v7755_v7 = vsel %vm15745_vm6, 0, %v7753_v29  ;;  %v7651_v8 = vsel %vm15780_vm8, 0, %v7649_v10  ;;  %v8334_v23 = vmin.u32 %v7836_v50, %v15772_v20  ;;  %v8906_v18 = vpop.eup %8905  ;;  %v16579_v10 = vld [vmem:[#allocation37_spill] sm:$0xff] }
 0x95b   : > { %8913 = vcosq.f32 %v7650_v0  ;;  %v7144_v63 = vsel %vm7137_vm11, %v7140_v21, %v7143_v22  ;;  %v7347_v32 = vxor.u32 2147483648, %v8904_v41  ;;  %vm7349_vm10 = vcmp.eq.s32.totalorder %v15552_v46, 2 }
 0x95c   : > { %8915 = vsinq.f32 %v7650_v0  ;;  %v16575_v57 = vand.u32 2147483647, %v16568_v16  ;;  %v8908_v25 = vpop.eup %8907  ;;  %vm7241_vm2 = vcmp.lt.s32.totalorder %v7240_v4, 2  ;;  %v7440_v35 = vsub.s32 4, %v16578_v55 }
 0x95d   : > { %v7838_v26 = vclz %v8334_v23  ;;  %v7248_v62 = vsel %vm7241_vm2, %v7244_v42, %v7247_v2  ;;  %v7552_v1 = vand.u32 3, %v7551_v19  ;;  %v7759_v36 = vadd.s32 3, %v7755_v7 }
 0x95e   : > { %vm15805_vm13 = vcmp.le.f32.partialorder %v16575_v57, 0.7853982  ;;  %v7655_v22 = vadd.s32 3, %v7651_v8  ;;  %v15815_v48 = vsel %vm7134_vm5, nan, %v7144_v63  ;;  %vm7346_vm9 = vcmp.eq.s32.totalorder %v15552_v46, 0 }
 0x95f   : > { %v7442_v30 = vsel %vm15805_vm13, %v16568_v16, %v7439_v37  ;;  %v7351_v34 = vsel %vm7349_vm10, %v7350_v17, %v8904_v41  ;;  %v8335_v38 = vadd.s32 4294967294, %v7838_v26  ;;  %v8910_v4 = vpop.eup %8909  ;;  %v7348_v43 = vsel %vm7346_vm9, %v8902_v58, %v7347_v32 }
 0x960   : > { %8917 = vcosq.f32 %v7442_v30  ;;  %v7555_v33 = vxor.u32 2147483648, %v8908_v25  ;;  %v7558_v15 = vxor.u32 2147483648, %v8906_v18  ;;  %v8912_v21 = vpop.eup %8911  ;;  %vm7345_vm1 = vcmp.lt.s32.totalorder %v15552_v46, 2 }
 0x961   : > { %v7249_v11 = vsel %vm7238_vm7, nan, %v7248_v62  ;;  %v7441_v40 = vsel %vm7356_vm3, %v7440_v35, %v16578_v55  ;;  %8919 = vsinq.f32 %v7442_v30  ;;  %vm8336_vm15 = vcmp.lt.s32.totalorder %v8335_v38, 0  ;;  %v16580_v55 = vld [vmem:[#allocation34_spill] sm:$0xff] }
 0x962   : > { %vm7550_vm0 = vweird.f32 %v16564_v54  ;;  %vm7554_vm6 = vcmp.eq.s32.totalorder %v7552_v1, 0  ;;  %v7760_v60 = vand.u32 3, %v7759_v36  ;;  %v7656_v6 = vand.u32 3, %v7655_v22  ;;  %v16582_v36 = vld [vmem:[#allocation21_spill] sm:$0xff] }
 0x963   : > { %v7841_v56 = vsel %vm8336_vm15, 0, %v8335_v38  ;;  %vm7557_vm11 = vcmp.eq.s32.totalorder %v7552_v1, 2  ;;  %v7826_v45 = vadd.s32 %v15694_v31, %v15703_v5  ;;  %v7556_v27 = vsel %vm7554_vm6, %v8906_v18, %v7555_v33  ;;  %v15835_v18 = vpop.permute.xlu0 %7890 }
 0x964   : > { %v7842_v58 = vsub.s32 32, %v7841_v56  ;;  %v7846_v49 = vsub.s32 4294967266, %v7841_v56  ;;  %v7559_v59 = vsel %vm7557_vm11, %v7558_v15, %v8908_v25  ;;  %v7763_v51 = vxor.u32 2147483648, %v8912_v21 }
 0x965   : > { %v8914_v28 = vpop.eup %8913  ;;  %v7766_v14 = vxor.u32 2147483648, %v8910_v4  ;;  %v7843_v61 = vshll.u32 %v15772_v20, %v7841_v56  ;;  %vm7034_vm3 = vcmp.eq.s32.totalorder %v16579_v10, 0  ;;  %vm7037_vm14 = vcmp.eq.s32.totalorder %v16579_v10, 2 }
 0x966   : > { %v8916_v12 = vpop.eup %8915  ;;  %v7662_v29 = vxor.u32 2147483648, %v8914_v28  ;;  %v7844_v47 = vshrl.u32 %v7826_v45, %v7842_v58  ;;  %v7847_v44 = vadd.s32 127, %v7846_v49  ;;  %vm7553_vm12 = vcmp.lt.s32.totalorder %v7552_v1, 2  ;;  %v16581_v1 = vld [vmem:[#allocation15_spill] sm:$0xff] }
 0x967   : > { %vm7762_vm5 = vcmp.eq.s32.totalorder %v7760_v60, 0  ;;  %v7659_v31 = vxor.u32 2147483648, %v8916_v12  ;;  %vm7661_vm4 = vcmp.eq.s32.totalorder %v7656_v6, 2  ;;  %vm7658_vm7 = vcmp.eq.s32.totalorder %v7656_v6, 0 }
 0x968   : > { %v7663_v5 = vsel %vm7661_vm4, %v7662_v29, %v8916_v12  ;;  %v7845_v41 = vor.u32 %v7844_v47, %v7843_v61  ;;  %v7848_v17 = vshll.u32 %v7847_v44, 23  ;;  %v7560_v2 = vsel %vm7553_vm12, %v7556_v27, %v7559_v59  ;;  %v16591_v61 = vld [vmem:[#allocation28_spill] sm:$0xff]  ;;  %v16593_v44 = vld [vmem:[#allocation19_spill] sm:$0xff] }
 0x969   : > { %vm7765_vm8 = vcmp.eq.s32.totalorder %v7760_v60, 2  ;;  %vm7657_vm10 = vcmp.lt.s32.totalorder %v7656_v6, 2  ;;  %v7660_v0 = vsel %vm7658_vm7, %v8914_v28, %v7659_v31  ;;  %v7764_v50 = vsel %vm7762_vm5, %v8910_v4, %v7763_v51  ;;  %v16585_v4 = vld [vmem:[#allocation36_spill] sm:$0xff] }
 0x96a   : > { %v7767_v20 = vsel %vm7765_vm8, %v7766_v14, %v8912_v21  ;;  %v7664_v42 = vsel %vm7657_vm10, %v7660_v0, %v7663_v5  ;;  %v7849_v37 = vor.u32 4788187, %v7848_v17  ;;  %v8918_v19 = vpop.eup %8917  ;;  %v7352_v7 = vsel %vm7345_vm1, %v7348_v43, %v7351_v34 }
 0x96b   : > { %v7443_v8 = vsel %vm15805_vm13, 0, %v7441_v40  ;;  %vm7761_vm2 = vcmp.lt.s32.totalorder %v7760_v60, 2  ;;  %vm7654_vm9 = vweird.f32 %v15465_v24  ;;  %v8920_v23 = vpop.eup %8919  ;;  %v7561_v63 = vsel %vm7550_vm0, nan, %v7560_v2  ;;  %v15844_v24 = vpop.permute.xlu1 %7895  ;;  %v16587_v40 = vld [vmem:[#allocation35_spill] sm:$0xff] }
 0x96c   : > { %v7665_v32 = vsel %vm7654_vm9, nan, %v7664_v42  ;;  %v7850_v57 = vand.u32 2147483647, %v7849_v37  ;;  %v7852_v25 = vcvt.s32.f32 %v7845_v41  ;;  %vm6618_vm15 = vcmp.eq.s32.totalorder %v16580_v55, 0  ;;  %v16595_v37 = vld [vmem:[#allocation6_spill] sm:$0xff] }
 0x96d   : > { %v7906_v46 = vmul.f32 %v15835_v18, %v15815_v48  ;;  %vm7342_vm1 = vweird.f32 %v16542_v39  ;;  %v7907_v9 = vmul.f32 %v15835_v18, %v7249_v11  ;;  %v7768_v35 = vsel %vm7761_vm2, %v7764_v50, %v7767_v20  ;;  %v16583_v39 = vld [vmem:[#allocation23_spill] sm:$0xff] }
 0x96e   : > { %v7353_v30 = vsel %vm7342_vm1, nan, %v7352_v7  ;;  %v7447_v26 = vadd.s32 3, %v7443_v8  ;;  %v7853_v62 = vmul.f32 %v7852_v25, %v7850_v57  ;;  %v7856_v54 = vsub.s32 4, %v15758_v13 }
 0x96f   : > { %v7923_v22 = vadd.f32 %v16582_v36, %v16581_v1  ;;  %v7910_v34 = vmul.f32 %v15844_v24, %v7561_v63  ;;  %vm7758_vm13 = vweird.f32 %v15349_v52  ;;  %v7911_v48 = vmul.f32 %v15844_v24, %v7665_v32 }
 0x970   : > { %v16584_v38 = vxor.u32 2147483648, %v16583_v39  ;;  %v16586_v33 = vxor.u32 2147483648, %v16585_v4  ;;  %v7769_v21 = vsel %vm7758_vm13, nan, %v7768_v35  ;;  %v7854_v11 = vxor.u32 2147483648, %v7853_v62 }
 0x971   : > { %v7915_v60 = vadd.f32 %v16587_v40, %v7906_v46  ;;  %v7908_v52 = vmul.f32 %v15835_v18, %v7353_v30  ;;  %v7924_v6 = vadd.f32 %v7923_v22, %v7907_v9  ;;  %vm7772_vm0 = vcmp.lt.s32.totalorder %v15573_v3, 0  ;;  %v16596_v46 = vld [vmem:[#allocation26_spill] sm:$0xff]  ;;  %v16598_v22 = vld [vmem:[#allocation25_spill] sm:$0xff] }
 0x972   : > { %v7036_v43 = vsel %vm7034_vm3, %v16585_v4, %v16584_v38  ;;  %v7039_v15 = vsel %vm7037_vm14, %v16586_v33, %v16583_v39  ;;  %v7448_v56 = vand.u32 3, %v7447_v26  ;;  %vm15867_vm6 = vcmp.le.f32.partialorder %v7770_v53, 0.7853982  ;;  %v16590_v53 = vld [vmem:[#allocation29_spill] sm:$0xff] }
 0x973   : > { %v7855_v58 = vsel %vm7772_vm0, %v7854_v11, %v7853_v62  ;;  %v7857_v49 = vsel %vm7772_vm0, %v7856_v54, %v15758_v13  ;;  %v7916_v28 = vadd.f32 %v7915_v60, %v7910_v34  ;;  %v7912_v27 = vmul.f32 %v15844_v24, %v7769_v21 }
 0x974   : > { %v7925_v59 = vadd.f32 %v7924_v6, %v7911_v48  ;;  %v7858_v51 = vsel %vm15867_vm6, %v15573_v3, %v7855_v58  ;;  %vm6621_vm11 = vcmp.eq.s32.totalorder %v16580_v55, 2  ;;  %v7451_v14 = vxor.u32 2147483648, %v8920_v23  ;;  %v7954_v58 = vpop.permute.xlu0 %7953 }
 0x975   : > { %v7454_v12 = vxor.u32 2147483648, %v8918_v19  ;;  %8921 = vcosq.f32 %v7858_v51  ;;  %vm7033_vm3 = vcmp.lt.s32.totalorder %v16579_v10, 2  ;;  %v7933_v29 = vadd.f32 %v16590_v53, %v7908_v52 }
 0x976   : > { %v7859_v13 = vsel %vm15867_vm6, 0, %v7857_v49  ;;  %8923 = vsinq.f32 %v7858_v51  ;;  %v16592_v47 = vxor.u32 2147483648, %v16591_v61  ;;  %v16594_v5 = vxor.u32 2147483648, %v16593_v44 }
 0x977   : > { %v7040_v17 = vsel %vm7033_vm3, %v7036_v43, %v7039_v15  ;;  %vm7450_vm14 = vcmp.eq.s32.totalorder %v7448_v56, 0  ;;  %vm7453_vm12 = vcmp.eq.s32.totalorder %v7448_v56, 2  ;;  %v7917_v10 = vrot.slane %v7916_v28, 4 }
 0x978   : > { %v6620_v31 = vsel %vm6618_vm15, %v16593_v44, %v16592_v47  ;;  %v6623_v41 = vsel %vm6621_vm11, %v16594_v5, %v16591_v61  ;;  %v7934_v2 = vadd.f32 %v7933_v29, %v7912_v27  ;;  %v7926_v0 = vrot.slane %v7925_v59, 4 }
 0x979   : > { %v7452_v50 = vsel %vm7450_vm14, %v8918_v19, %v7451_v14  ;;  %v7455_v20 = vsel %vm7453_vm12, %v7454_v12, %v8920_v23  ;;  %v7863_v42 = vadd.s32 3, %v7859_v13  ;;  %vm6617_vm5 = vcmp.lt.s32.totalorder %v16580_v55, 2  ;;  %v16597_v23 = vld [vmem:[#allocation18_spill] sm:$0xff]  ;;  %v16599_v14 = vld [vmem:[#allocation4_spill] sm:$0xff] }
 0x97a   : > { %vm7030_vm4 = vweird.f32 %v16595_v37  ;;  %v6624_v7 = vsel %vm6617_vm5, %v6620_v31, %v6623_v41  ;;  %vm7449_vm7 = vcmp.lt.s32.totalorder %v7448_v56, 2  ;;  %v7918_v32 = vadd.f32 %v7917_v10, %v7916_v28  ;;  %v16600_v41 = vld [vmem:[#allocation3_spill] sm:$0xff] }
 0x97b   : > { %v7041_v8 = vsel %vm7030_vm4, nan, %v7040_v17  ;;  %v7456_v63 = vsel %vm7449_vm7, %v7452_v50, %v7455_v20  ;;  %v7935_v57 = vrot.slane %v7934_v2, 4  ;;  %v7927_v25 = vadd.f32 %v7926_v0, %v7925_v59 }
 0x97c   : > { %vm6614_vm8 = vweird.f32 %v16596_v46  ;;  %v7864_v9 = vand.u32 3, %v7863_v42  ;;  %vm7446_vm10 = vweird.f32 %v16568_v16  ;;  %v7905_v30 = vmul.f32 %v16597_v23, %v7041_v8 }
 0x97d   : > { %v6625_v35 = vsel %vm6614_vm8, nan, %v6624_v7  ;;  %v7457_v26 = vsel %vm7446_vm10, nan, %v7456_v63  ;;  %v7919_v62 = vrot.slane %v7918_v32, 2  ;;  %v7936_v54 = vadd.f32 %v7935_v57, %v7934_v2 }
 0x97e   : > { %v7928_v1 = vrot.slane %v7927_v25, 2  ;;  %v7901_v34 = vmul.f32 %v16598_v22, %v6625_v35  ;;  %vm7869_vm2 = vcmp.eq.s32.totalorder %v7864_v9, 2  ;;  %v7909_v39 = vmul.f32 %v15835_v18, %v7457_v26 }
 0x97f   : > { %v8922_v19 = vpop.eup %8921  ;;  %vm7866_vm9 = vcmp.eq.s32.totalorder %v7864_v9, 0  ;;  %vm7862_vm15 = vweird.f32 %v15573_v3  ;;  %vm7865_vm1 = vcmp.lt.s32.totalorder %v7864_v9, 2  ;;  %v7920_v43 = vadd.f32 %v7919_v62, %v7918_v32 }
 0x980   : > { %v8924_v55 = vpop.eup %8923  ;;  %v7870_v36 = vxor.u32 2147483648, %v8922_v19  ;;  %v7941_v4 = vadd.f32 %v7905_v30, %v7901_v34  ;;  %v7937_v33 = vrot.slane %v7936_v54, 2  ;;  %v7929_v15 = vadd.f32 %v7928_v1, %v7927_v25 }
 0x981   : > { %v7867_v48 = vxor.u32 2147483648, %v8924_v55  ;;  %v7921_v52 = vrot.slane %v7920_v43, 1  ;;  %v8942_v49 = vmov 1966171168   ;;  %v7959_v12 = vrot.slane %v7954_v58, %v16599_v14 }
 0x982   : > { %v7871_v38 = vsel %vm7869_vm2, %v7870_v36, %v8924_v55  ;;  %v7942_v40 = vadd.f32 %v7941_v4, %v7909_v39  ;;  %v7938_v6 = vadd.f32 %v7937_v33, %v7936_v54  ;;  %v7930_v56 = vrot.slane %v7929_v15, 1 }
 0x983   : > { %v7868_v16 = vsel %vm7866_vm9, %v8922_v19, %v7867_v48  ;;  %v7971_v28 = vunpack.c.l.s4 %v8942_v49  ;;  %v7922_v27 = vadd.f32 %v7921_v52, %v7920_v43  ;;  %v16601_v37 = vlaneseq }
 0x984   : > { %v7872_v21 = vsel %vm7865_vm1, %v7868_v16, %v7871_v38  ;;  %v7939_v3 = vrot.slane %v7938_v6, 1  ;;  %v7931_v59 = vadd.f32 %v7930_v56, %v7929_v15 }
 0x985   : > { %v7873_v11 = vsel %vm7862_vm15, nan, %v7872_v21  ;;  %v7972_v29 = vunpack.c.0.s8 %v7971_v28  ;;  %v7960_v13 = vadd.f32 %v7959_v12, %v7922_v27  ;;  %vm7995_vm13 = vcmp.lt.s32.totalorder %v16601_v37, 512 }
 0x986   : > { %v7913_v60 = vmul.f32 %v15844_v24, %v7873_v11  ;;  %v7940_v61 = vadd.f32 %v7939_v3, %v7938_v6  ;;  %v7961_v24 = vadd.f32 %v7959_v12, %v7931_v59 }
 0x987   : > { %v7975_v17 = vsub.s32 %v7972_v29, %v16600_v41 }
 0x988   : > { %v7943_v45 = vadd.f32 %v7942_v40, %v7913_v60  ;;  %v7962_v31 = vadd.f32 %v7959_v12, %v7940_v61  ;;  %v7968_v5 = vcombine.low %v7960_v13, %v7961_v24 }
 0x98a   : > { %v7944_v18 = vrot.slane %v7943_v45, 4  ;;  %v7976_v0 = vrot.slane %v7968_v5, %v7975_v17 }
 0x98c   : > { %v7945_v51 = vadd.f32 %v7944_v18, %v7943_v45 }
 0x98e   : > { %v7946_v53 = vrot.slane %v7945_v51, 2 }
 0x990   : > { %v7947_v47 = vadd.f32 %v7946_v53, %v7945_v51 }
 0x992   : > { %v7948_v44 = vrot.slane %v7947_v47, 1 }
 0x994   : > { %v7949_v10 = vadd.f32 %v7948_v44, %v7947_v47 }
 0x996   : > { %v7963_v2 = vadd.f32 %v7959_v12, %v7949_v10 }
 0x998   : > { %v7969_v50 = vcombine.low %v7962_v31, %v7963_v2 }
 0x99a   : > { %v7983_v20 = vrot.slane %v7969_v50, %v7975_v17 }
 0x99c   : > { %v7984_v42 = vcombine.low %v7976_v0, %v7983_v20 }
 0x99e   : > { %v7991_v7 = vrot.slane %v7984_v42, %v7975_v17 }
 0x9a0   : > { %7997 = vst.msk [vmem:[%s388_s26] sm:$0xf] %vm7995_vm13, %v7991_v7 }
 0x9a1 PF: > { %s23_s19 = sadd.s32 1, %s8931_s19  }
 0x9a2   : > { %p20_p4 = scmp.ge.s32.totalorder %s23_s19, 6  }
 0x9a4   :  { %22 = sbr.rel (!%p20_p4) target bundleno = 3 (0x3), region = 95 }

</bundles_post_ra>
